<compile_context>
chip_gen: v7x
topology: tpu7x:2x2x1
jax: 0.10.0
libtpu: 0.0.40
codegen_flags: <defaults>
</compile_context>

<pallas_src>
import numpy as np
import jax
import jax.numpy as jnp
from jax import lax
from jax.experimental import pallas as pl
from jax.experimental.pallas import tpu as pltpu


# ----------------------------------------------------------------------------
# Pre-defined filter bank construction (pure numpy, same math as PFNet.py)
# ----------------------------------------------------------------------------
def saddle(x, y, phi, sigma, uneven=True):
    a = np.arctan2(y, x)
    phi = np.deg2rad(phi)
    a = np.abs(phi - a)
    r = np.sqrt(x ** 2 + y ** 2)
    c = np.cos(a) * r
    if uneven:
        out = 1 - np.exp(-0.5 * (c / sigma) ** 2)
        out[a > 0.5 * np.pi] = -out[a > 0.5 * np.pi]
    else:
        out = 2.0 * np.exp(-0.5 * (c / sigma) ** 2)
    return out


def get_parameterized_filter(k, mode, phi=0.0):
    border = 0.5 * (k - 1.0)
    x = np.linspace(-border, border, k)
    y = np.linspace(-border, border, k)
    xx, yy = np.meshgrid(x, y)
    if mode == "even":
        data = saddle(xx, yy, phi, sigma=0.15 * k, uneven=False)
        data = data - data.mean()
    elif mode == "uneven":
        data = saddle(xx, yy, phi, sigma=0.3 * k, uneven=True)
        data = data - data.mean()
    else:
        raise ValueError(mode)
    data = data / np.abs(data).sum()
    return data


def build_filter_bank(k, filter_mode, n_angles):
    """Returns (n_kernels, k, k) float32 — matches PredefinedConvnxn ordering."""
    w = []
    if filter_mode in ("uneven", "all"):
        w += [get_parameterized_filter(k, "uneven", phi)
              for phi in np.linspace(0, 180, n_angles, endpoint=False)]
    if filter_mode in ("even", "all"):
        w += [get_parameterized_filter(k, "even", phi)
              for phi in np.linspace(0, 180, n_angles, endpoint=False)]
    w = [sign * item for item in w for sign in [-1, 1]]        # rows alternate (-w, +w)
    return np.stack(w, axis=0).astype(np.float32)


def fold_bn(gamma, beta, running_mean=0.0, running_var=1.0, eps=1e-5):
    scale = gamma / jnp.sqrt(running_var + eps)
    shift = beta - running_mean * scale
    return scale, shift


# ----------------------------------------------------------------------------
# Weight-table preparation (BN folded, +/- pair structure exploited)
# ----------------------------------------------------------------------------
def _prep_pfm_tables(bank, f, n_in, gamma1, beta1, mean1, var1,
                     w1x1, gamma2, beta2, mean2, var2):
    """Returns (paired, taps, a1, shift1, w11, shift2).

    taps  : (cmid // (2 if paired else 1), k*k) UNSCALED depthwise taps (one row per pair
            when paired; the +w filter of the (-w,+w) pair).
    a1    : (cmid,) BN1 scale with the per-mid-channel filter sign folded in.
    w11   : (cout, cmid) 1x1 conv weights with BN2 scale folded in.
    """
    bank = np.asarray(bank, np.float32)
    nk, k, _ = bank.shape
    cmid = n_in * f
    assert cmid % nk == 0 and w1x1.shape[1] == cmid
    s1, sh1 = fold_bn(gamma1, beta1, mean1, var1)
    s2, sh2 = fold_bn(gamma2, beta2, mean2, var2)

    # +/- pair sharing requires the bank's alternating-sign row ordering and even f
    # (so both mid channels of a pair read the same source plane).
    paired = (f % 2 == 0 and nk % 2 == 0
              and np.allclose(bank[0::2], -bank[1::2], rtol=0.0, atol=0.0))
    if paired:
        taps = np.stack([bank[(2 * q + 1) % nk].reshape(-1) for q in range(cmid // 2)])
        sign = np.where(np.arange(cmid) % 2 == 0, -1.0, 1.0).astype(np.float32)
    else:
        # TODO(synk): non-paired fallback (e.g. Random filter mode or odd f) — no sharing.
        taps = np.stack([bank[m % nk].reshape(-1) for m in range(cmid)])
        sign = np.ones((cmid,), np.float32)

    a1 = jnp.asarray(sign) * s1
    w11 = jnp.asarray(w1x1, jnp.float32) * s2[:, None]
    return (paired, jnp.asarray(taps, jnp.float32), a1,
            jnp.asarray(sh1, jnp.float32), w11, jnp.asarray(sh2, jnp.float32))


# ----------------------------------------------------------------------------
# Fused DoublePredefinedFilterModule kernel (one grid step == NB lane-packed images)
# ----------------------------------------------------------------------------
def make_double_pfm_kernel(cin, cout, f, k, H, W, NB, paired1, paired2):
    pad = k // 2
    wp = W + 4 * pad                 # per-image packed input stride (halo + pad)
    he = H + 2 * pad                 # padded-h1 rows
    LW = NB * wp                     # packed lane width of the input slab
    CW1 = LW - 2 * pad               # PFM1 / padded-h1 lane width
    CW2 = LW - 4 * pad               # PFM2 / output lane width

    def _pfm(src_ref, row_off, out_w, n_in, paired,
             taps_ref, a1_ref, b1_ref, w11_ref, b2_ref):
        """One PFM on (H, out_w) lane-packed planes; returns `cout` output planes."""
        mpr = 2 if paired else 1
        y = [None] * cout
        for c in range(n_in):
            # k overlapping row blocks per input plane; dx windows are generated lazily
            # inside the tap loop (bounds live ranges).
            rows = [src_ref[c, row_off + dy: row_off + dy + H, :] for dy in range(k)]
            for g in range(f // mpr):
                m0 = c * f + g * mpr
                trow = m0 // mpr
                raw = None                                   # shared unscaled 9-tap sum
                for dy in range(k):
                    rb = rows[dy]
                    for dx in range(k):
                        term = rb[:, dx:dx + out_w] * taps_ref[trow, dy * k + dx]
                        raw = term if raw is None else raw + term
                for s in range(mpr):
                    m = m0 + s
                    # signed BN1 scale + shift + ReLU (sign of the +/- pair folded into a1)
                    hm = jnp.maximum(raw * a1_ref[m] + b1_ref[m], 0.0)
                    for o in range(cout):                    # folded 1x1 conv (VPU FMAs)
                        t = hm * w11_ref[o, m]
                        y[o] = t if y[o] is None else y[o] + t
        return [y[o] + b2_ref[o] for o in range(cout)]

    def kernel(x_ref, mask_ref,                               # (cin,hp,LW) VMEM, (H,CW1) VMEM
               taps1, a1a, b1a, w11a, b2a,                    # PFM1 tables (SMEM)
               taps2, a1b, b1b, w11b, b2b,                    # PFM2 tables (SMEM)
               out_ref,                                       # (cout,H,CW2) VMEM
               h1p_ref):                                      # (cout,he,CW1) VMEM scratch
        # Zero the p-row ring of padded-h1 once (column ring handled by mask_ref).
        zrow = jnp.zeros((pad, CW1), jnp.float32)
        for o in range(cout):
            h1p_ref[o, 0:pad, :] = zrow
            h1p_ref[o, he - pad:he, :] = zrow

        # PFM1 on interior rows only; relu1 + interior-column mask, stored to VMEM scratch.
        y1 = _pfm(x_ref, pad, CW1, cin, paired1, taps1, a1a, b1a, w11a, b2a)
        msk = mask_ref[...]
        for o in range(cout):
            h1p_ref[o, pad:pad + H, :] = jnp.maximum(y1[o], 0.0) * msk

        # PFM2 reads padded h1 straight from VMEM scratch (never touches HBM).
        y2 = _pfm(h1p_ref, 0, CW2, cout, paired2, taps2, a1b, b1b, w11b, b2b)

        # Identity skip (re-sliced from the already-resident x block) + relu2.
        for o in range(cout):
            res = x_ref[o, 2 * pad:2 * pad + H, 2 * pad:2 * pad + CW2]
            out_ref[o] = jnp.maximum(y2[o] + res, 0.0)

    return kernel


def double_pfm_forward(x_nchw, params, max_images_per_block=8):
    """DoublePredefinedFilterModule.forward (stride=1, downsample=Identity), NCHW in/out."""
    N, cin, H, W = x_nchw.shape
    f, k = params["f"], params["k"]
    pad = k // 2
    cout = params["w1a"].shape[0]
    assert cin == cout, "stride=1 / Identity skip requires n_channels_in == n_channels_out"

    # Fold inference BatchNorm + filter signs into small SMEM tables (wrapper-side).
    paired1, taps1, a1a, sh1a, w11a, sh2a = _prep_pfm_tables(
        params["bank1"], f, cin,
        params["g1a"], params["b1a"], params.get("rm1a", 0.0), params.get("rv1a", 1.0),
        params["w1a"],
        params["g2a"], params["b2a"], params.get("rm2a", 0.0), params.get("rv2a", 1.0))
    paired2, taps2, a1b, sh1b, w11b, sh2b = _prep_pfm_tables(
        params["bank2"], f, cout,
        params["g1b"], params["b1b"], params.get("rm1b", 0.0), params.get("rv1b", 1.0),
        params["w1b"],
        params["g2b"], params["b2b"], params.get("rm2b", 0.0), params.get("rv2b", 1.0))

    # How many images share one grid step (packed along the lane axis).  NB divides N so no
    # dead padded images are computed.  Note: on v7x (2 TCs) a grid of length 1 idles a core;
    # at realistic N this resolves itself (NB<=8, grid=N/NB>=2).
    NB = max(d for d in range(1, min(N, max_images_per_block) + 1) if N % d == 0)
    NG = N // NB
    wp, hp = W + 4 * pad, H + 4 * pad
    he = H + 2 * pad
    LW = NB * wp
    CW1, CW2 = LW - 2 * pad, LW - 4 * pad

    # Pack NB images along the lane (W) axis; per-image 2*pad zero columns double as halos so
    # every kxk window slice stays inside its own image.
    # TODO(synk): for large images do this in-kernel from an unpadded-x DMA (saves one HBM pass).
    xp = jnp.pad(x_nchw.astype(jnp.float32),
                 ((0, 0), (0, 0), (2 * pad, 2 * pad), (2 * pad, 2 * pad)))
    xp = xp.reshape(NG, NB, cin, hp, wp).transpose(0, 2, 3, 1, 4).reshape(NG, cin, hp, LW)

    # Interior-column mask for the padded-h1 scratch (per-image ring columns -> 0).
    col = np.arange(CW1)
    in_col = ((col % wp) >= pad) & ((col % wp) < pad + W)
    mask = jnp.asarray(np.tile(in_col.astype(np.float32)[None, :], (H, 1)))

    kernel = make_double_pfm_kernel(cin, cout, f, k, H, W, NB, paired1, paired2)
    smem = pl.BlockSpec(memory_space=pltpu.MemorySpace.SMEM)

    outp = pl.pallas_call(
        kernel,
        out_shape=jax.ShapeDtypeStruct((NG, cout, H, CW2), jnp.float32),
        grid=(NG,),
        in_specs=[pl.BlockSpec((None, cin, hp, LW), lambda g: (g, 0, 0, 0)),
                  pl.BlockSpec((H, CW1), lambda g: (0, 0)),
                  smem, smem, smem, smem, smem,
                  smem, smem, smem, smem, smem],
        out_specs=pl.BlockSpec((None, cout, H, CW2), lambda g: (g, 0, 0, 0)),
        scratch_shapes=[pltpu.VMEM((cout, he, CW1), jnp.float32)],   # h1 stays on-chip
        compiler_params=pltpu.CompilerParams(
            dimension_semantics=("parallel",),            # image blocks are independent
            vmem_limit_bytes=48 * 1024 * 1024),           # <= 48 MiB: safe on v7x's 64 MiB/TC
    )(xp, mask,
      taps1, a1a, sh1a, w11a, sh2a,
      taps2, a1b, sh1b, w11b, sh2b)

    # Unpack the lane-packed output slab back to NCHW (wrapper-side layout plumbing).
    per_img = [outp[:, :, :, b * wp: b * wp + W] for b in range(NB)]
    out = jnp.stack(per_img, axis=1).reshape(NG * NB, cout, H, W)
    return out[:N]


# ----------------------------------------------------------------------------
# Pure-JAX reference (lax grouped conv) for correctness verification
# ----------------------------------------------------------------------------
def ref_pfm(x_nhwc, bank, f, gamma1, beta1, w1x1, gamma2, beta2,
            mean1=0.0, var1=1.0, mean2=0.0, var2=1.0):
    nk, k, _ = bank.shape
    Cin = x_nhwc.shape[-1]
    Cmid = Cin * f
    ncpk = Cmid // nk
    internal = jnp.tile(jnp.asarray(bank), (ncpk, 1, 1))             # (Cmid,k,k), [o]=bank[o%nk]
    rhs = jnp.transpose(internal, (1, 2, 0))[:, :, None, :]          # HWIO (k,k,1,Cmid)
    y = lax.conv_general_dilated(
        x_nhwc, rhs, window_strides=(1, 1),
        padding=((k // 2, k // 2), (k // 2, k // 2)),
        dimension_numbers=("NHWC", "HWIO", "NHWC"),
        feature_group_count=Cin)
    s1, b1 = fold_bn(gamma1, beta1, mean1, var1)
    y = jnp.maximum(y * s1 + b1, 0.0)
    y = jnp.einsum("nhwc,oc->nhwo", y, w1x1)
    s2, b2 = fold_bn(gamma2, beta2, mean2, var2)
    return y * s2 + b2


def ref_double(x_nchw, p):
    x = jnp.transpose(x_nchw, (0, 2, 3, 1))
    h1 = jnp.maximum(ref_pfm(x, p["bank1"], p["f"], p["g1a"], p["b1a"],
                             p["w1a"], p["g2a"], p["b2a"]), 0.0)
    h2 = ref_pfm(h1, p["bank2"], p["f"], p["g1b"], p["b1b"],
                 p["w1b"], p["g2b"], p["b2b"]) + x
    return jnp.transpose(jnp.maximum(h2, 0.0), (0, 3, 1, 2))


# ----------------------------------------------------------------------------
if __name__ == "__main__":
    # Shapes consistent with the module:
    # n_channels_in = n_channels_out = 4 (identity skip), f = 4, k = 3,
    # filter_mode_1 = All (n_kernels=16), filter_mode_2 = Uneven (n_kernels=8),
    # n_angles = 4, stride = 1.
    N, C, H, W = 2, 4, 16, 16
    f, ksz, n_angles = 4, 3, 4
    Cmid = C * f

    key = jax.random.PRNGKey(0)
    ks = jax.random.split(key, 12)

    x_nchw = jax.random.normal(ks[0], (N, C, H, W), jnp.float32)

    params = {
        "f": f,
        "k": ksz,
        "bank1": build_filter_bank(ksz, "all", n_angles),      # (16,3,3)
        "bank2": build_filter_bank(ksz, "uneven", n_angles),   # (8,3,3)
        # PFM1 params
        "g1a": 1.0 + 0.1 * jax.random.normal(ks[1], (Cmid,), jnp.float32),
        "b1a": 0.1 * jax.random.normal(ks[2], (Cmid,), jnp.float32),
        "w1a": 0.2 * jax.random.normal(ks[3], (C, Cmid), jnp.float32),  # conv1x1 (Cout,Cmid)
        "g2a": 1.0 + 0.1 * jax.random.normal(ks[4], (C,), jnp.float32),
        "b2a": 0.1 * jax.random.normal(ks[5], (C,), jnp.float32),
        # PFM2 params
        "g1b": 1.0 + 0.1 * jax.random.normal(ks[6], (Cmid,), jnp.float32),
        "b1b": 0.1 * jax.random.normal(ks[7], (Cmid,), jnp.float32),
        "w1b": 0.2 * jax.random.normal(ks[8], (C, Cmid), jnp.float32),
        "g2b": 1.0 + 0.1 * jax.random.normal(ks[9], (C,), jnp.float32),
        "b2b": 0.1 * jax.random.normal(ks[10], (C,), jnp.float32),
    }

    out = jax.block_until_ready(double_pfm_forward(x_nchw, params))
    assert out.shape == (N, C, H, W) and out.dtype == jnp.float32

    ref = jax.block_until_ready(ref_double(x_nchw, params))
    if not np.allclose(np.asarray(out), np.asarray(ref), rtol=1e-4, atol=1e-4):
        raise AssertionError("Pallas output does not match reference")

    print("KERNEL_OK")
</pallas_src>

<mosaic_0001>
module attributes {stable_mosaic.version = 11 : i64} {
  func.func @kernel(%arg0: i32, %arg1: memref<1x4x20x40xf32, #tpu.memory_space<vmem>>, %arg2: memref<16x38xf32, #tpu.memory_space<vmem>>, %arg3: memref<8x9xf32, #tpu.memory_space<smem>>, %arg4: memref<16xf32, #tpu.memory_space<smem>>, %arg5: memref<16xf32, #tpu.memory_space<smem>>, %arg6: memref<4x16xf32, #tpu.memory_space<smem>>, %arg7: memref<4xf32, #tpu.memory_space<smem>>, %arg8: memref<8x9xf32, #tpu.memory_space<smem>>, %arg9: memref<16xf32, #tpu.memory_space<smem>>, %arg10: memref<16xf32, #tpu.memory_space<smem>>, %arg11: memref<4x16xf32, #tpu.memory_space<smem>>, %arg12: memref<4xf32, #tpu.memory_space<smem>>, %arg13: memref<1x4x16x36xf32, #tpu.memory_space<vmem>>, %arg14: memref<4x18x38xf32, #tpu.memory_space<vmem>>) attributes {dimension_semantics = [#tpu.dimension_semantics<parallel>], iteration_bounds = array<i64: 1>, scalar_prefetch = 0 : i64, scratch_operands = 1 : i64, tpu.core_type = #tpu.core_type<tc>, window_params = [{transform_indices = @transform_0, window_bounds = array<i64: 1, 4, 20, 40>}, {pipeline_mode = #tpu.pipeline_mode<synchronous>, transform_indices = @transform_1, window_bounds = array<i64: 16, 38>}, {transform_indices = @transform_2, window_bounds = array<i64: 8, 9>}, {transform_indices = @transform_3, window_bounds = array<i64: 16>}, {transform_indices = @transform_4, window_bounds = array<i64: 16>}, {transform_indices = @transform_5, window_bounds = array<i64: 4, 16>}, {transform_indices = @transform_6, window_bounds = array<i64: 4>}, {transform_indices = @transform_7, window_bounds = array<i64: 8, 9>}, {transform_indices = @transform_8, window_bounds = array<i64: 16>}, {transform_indices = @transform_9, window_bounds = array<i64: 16>}, {transform_indices = @transform_10, window_bounds = array<i64: 4, 16>}, {transform_indices = @transform_11, window_bounds = array<i64: 4>}, {transform_indices = @transform_12, window_bounds = array<i64: 1, 4, 16, 36>}]} {
    %cst = arith.constant 0.000000e+00 : f32
    %0 = vector.broadcast %cst : f32 to vector<1x38xf32>
    %c0 = arith.constant 0 : index
    %c0_0 = arith.constant 0 : index
    %c0_1 = arith.constant 0 : index
    %1 = vector.load %arg14[%c0, %c0_0, %c0_1] : memref<4x18x38xf32, #tpu.memory_space<vmem>>, vector<1x1x38xf32>
    %2 = vector.shape_cast %1 : vector<1x1x38xf32> to vector<1x38xf32>
    %3 = vector.shape_cast %0 : vector<1x38xf32> to vector<1x1x38xf32>
    tpu.vector_store %arg14[%c0, %c0_0, %c0_1], %3 {strides = array<i32>} : memref<4x18x38xf32, #tpu.memory_space<vmem>>, vector<1x1x38xf32>,
    %c0_2 = arith.constant 0 : index
    %c17 = arith.constant 17 : index
    %c0_3 = arith.constant 0 : index
    %4 = vector.load %arg14[%c0_2, %c17, %c0_3] : memref<4x18x38xf32, #tpu.memory_space<vmem>>, vector<1x1x38xf32>
    %5 = vector.shape_cast %4 : vector<1x1x38xf32> to vector<1x38xf32>
    %6 = vector.shape_cast %0 : vector<1x38xf32> to vector<1x1x38xf32>
    tpu.vector_store %arg14[%c0_2, %c17, %c0_3], %6 {strides = array<i32>} : memref<4x18x38xf32, #tpu.memory_space<vmem>>, vector<1x1x38xf32>,
    %c1 = arith.constant 1 : index
    %c0_4 = arith.constant 0 : index
    %c0_5 = arith.constant 0 : index
    %7 = vector.load %arg14[%c1, %c0_4, %c0_5] : memref<4x18x38xf32, #tpu.memory_space<vmem>>, vector<1x1x38xf32>
    %8 = vector.shape_cast %7 : vector<1x1x38xf32> to vector<1x38xf32>
    %9 = vector.shape_cast %0 : vector<1x38xf32> to vector<1x1x38xf32>
    tpu.vector_store %arg14[%c1, %c0_4, %c0_5], %9 {strides = array<i32>} : memref<4x18x38xf32, #tpu.memory_space<vmem>>, vector<1x1x38xf32>,
    %c1_6 = arith.constant 1 : index
    %c17_7 = arith.constant 17 : index
    %c0_8 = arith.constant 0 : index
    %10 = vector.load %arg14[%c1_6, %c17_7, %c0_8] : memref<4x18x38xf32, #tpu.memory_space<vmem>>, vector<1x1x38xf32>
    %11 = vector.shape_cast %10 : vector<1x1x38xf32> to vector<1x38xf32>
    %12 = vector.shape_cast %0 : vector<1x38xf32> to vector<1x1x38xf32>
    tpu.vector_store %arg14[%c1_6, %c17_7, %c0_8], %12 {strides = array<i32>} : memref<4x18x38xf32, #tpu.memory_space<vmem>>, vector<1x1x38xf32>,
    %c2 = arith.constant 2 : index
    %c0_9 = arith.constant 0 : index
    %c0_10 = arith.constant 0 : index
    %13 = vector.load %arg14[%c2, %c0_9, %c0_10] : memref<4x18x38xf32, #tpu.memory_space<vmem>>, vector<1x1x38xf32>
    %14 = vector.shape_cast %13 : vector<1x1x38xf32> to vector<1x38xf32>
    %15 = vector.shape_cast %0 : vector<1x38xf32> to vector<1x1x38xf32>
    tpu.vector_store %arg14[%c2, %c0_9, %c0_10], %15 {strides = array<i32>} : memref<4x18x38xf32, #tpu.memory_space<vmem>>, vector<1x1x38xf32>,
    %c2_11 = arith.constant 2 : index
    %c17_12 = arith.constant 17 : index
    %c0_13 = arith.constant 0 : index
    %16 = vector.load %arg14[%c2_11, %c17_12, %c0_13] : memref<4x18x38xf32, #tpu.memory_space<vmem>>, vector<1x1x38xf32>
    %17 = vector.shape_cast %16 : vector<1x1x38xf32> to vector<1x38xf32>
    %18 = vector.shape_cast %0 : vector<1x38xf32> to vector<1x1x38xf32>
    tpu.vector_store %arg14[%c2_11, %c17_12, %c0_13], %18 {strides = array<i32>} : memref<4x18x38xf32, #tpu.memory_space<vmem>>, vector<1x1x38xf32>,
    %c3 = arith.constant 3 : index
    %c0_14 = arith.constant 0 : index
    %c0_15 = arith.constant 0 : index
    %19 = vector.load %arg14[%c3, %c0_14, %c0_15] : memref<4x18x38xf32, #tpu.memory_space<vmem>>, vector<1x1x38xf32>
    %20 = vector.shape_cast %19 : vector<1x1x38xf32> to vector<1x38xf32>
    %21 = vector.shape_cast %0 : vector<1x38xf32> to vector<1x1x38xf32>
    tpu.vector_store %arg14[%c3, %c0_14, %c0_15], %21 {strides = array<i32>} : memref<4x18x38xf32, #tpu.memory_space<vmem>>, vector<1x1x38xf32>,
    %c3_16 = arith.constant 3 : index
    %c17_17 = arith.constant 17 : index
    %c0_18 = arith.constant 0 : index
    %22 = vector.load %arg14[%c3_16, %c17_17, %c0_18] : memref<4x18x38xf32, #tpu.memory_space<vmem>>, vector<1x1x38xf32>
    %23 = vector.shape_cast %22 : vector<1x1x38xf32> to vector<1x38xf32>
    %24 = vector.shape_cast %0 : vector<1x38xf32> to vector<1x1x38xf32>
    tpu.vector_store %arg14[%c3_16, %c17_17, %c0_18], %24 {strides = array<i32>} : memref<4x18x38xf32, #tpu.memory_space<vmem>>, vector<1x1x38xf32>,
    %c0_19 = arith.constant 0 : index
    %c0_20 = arith.constant 0 : index
    %c1_21 = arith.constant 1 : index
    %c0_22 = arith.constant 0 : index
    %25 = vector.load %arg1[%c0_19, %c0_20, %c1_21, %c0_22] : memref<1x4x20x40xf32, #tpu.memory_space<vmem>>, vector<1x1x16x40xf32>
    %26 = vector.shape_cast %25 : vector<1x1x16x40xf32> to vector<16x40xf32>
    %c0_23 = arith.constant 0 : index
    %c0_24 = arith.constant 0 : index
    %c2_25 = arith.constant 2 : index
    %c0_26 = arith.constant 0 : index
    %27 = vector.load %arg1[%c0_23, %c0_24, %c2_25, %c0_26] : memref<1x4x20x40xf32, #tpu.memory_space<vmem>>, vector<1x1x16x40xf32>
    %28 = vector.shape_cast %27 : vector<1x1x16x40xf32> to vector<16x40xf32>
    %c0_27 = arith.constant 0 : index
    %c0_28 = arith.constant 0 : index
    %c3_29 = arith.constant 3 : index
    %c0_30 = arith.constant 0 : index
    %29 = vector.load %arg1[%c0_27, %c0_28, %c3_29, %c0_30] : memref<1x4x20x40xf32, #tpu.memory_space<vmem>>, vector<1x1x16x40xf32>
    %30 = vector.shape_cast %29 : vector<1x1x16x40xf32> to vector<16x40xf32>
    %31 = vector.extract_strided_slice %26 {offsets = [0, 0], sizes = [16, 38], strides = [1, 1]} : vector<16x40xf32> to vector<16x38xf32>
    %c0_31 = arith.constant 0 : index
    %c0_32 = arith.constant 0 : index
    %32 = memref.load %arg3[%c0_31, %c0_32] : memref<8x9xf32, #tpu.memory_space<smem>>
    %33 = vector.broadcast %32 : f32 to vector<16x38xf32>
    %34 = arith.mulf %31, %33 : vector<16x38xf32>
    %35 = vector.extract_strided_slice %26 {offsets = [0, 1], sizes = [16, 38], strides = [1, 1]} : vector<16x40xf32> to vector<16x38xf32>
    %c0_33 = arith.constant 0 : index
    %c1_34 = arith.constant 1 : index
    %36 = memref.load %arg3[%c0_33, %c1_34] : memref<8x9xf32, #tpu.memory_space<smem>>
    %37 = vector.broadcast %36 : f32 to vector<16x38xf32>
    %38 = arith.mulf %35, %37 : vector<16x38xf32>
    %39 = arith.addf %34, %38 : vector<16x38xf32>
    %40 = vector.extract_strided_slice %26 {offsets = [0, 2], sizes = [16, 38], strides = [1, 1]} : vector<16x40xf32> to vector<16x38xf32>
    %c0_35 = arith.constant 0 : index
    %c2_36 = arith.constant 2 : index
    %41 = memref.load %arg3[%c0_35, %c2_36] : memref<8x9xf32, #tpu.memory_space<smem>>
    %42 = vector.broadcast %41 : f32 to vector<16x38xf32>
    %43 = arith.mulf %40, %42 : vector<16x38xf32>
    %44 = arith.addf %39, %43 : vector<16x38xf32>
    %45 = vector.extract_strided_slice %28 {offsets = [0, 0], sizes = [16, 38], strides = [1, 1]} : vector<16x40xf32> to vector<16x38xf32>
    %c0_37 = arith.constant 0 : index
    %c3_38 = arith.constant 3 : index
    %46 = memref.load %arg3[%c0_37, %c3_38] : memref<8x9xf32, #tpu.memory_space<smem>>
    %47 = vector.broadcast %46 : f32 to vector<16x38xf32>
    %48 = arith.mulf %45, %47 : vector<16x38xf32>
    %49 = arith.addf %44, %48 : vector<16x38xf32>
    %50 = vector.extract_strided_slice %28 {offsets = [0, 1], sizes = [16, 38], strides = [1, 1]} : vector<16x40xf32> to vector<16x38xf32>
    %c0_39 = arith.constant 0 : index
    %c4 = arith.constant 4 : index
    %51 = memref.load %arg3[%c0_39, %c4] : memref<8x9xf32, #tpu.memory_space<smem>>
    %52 = vector.broadcast %51 : f32 to vector<16x38xf32>
    %53 = arith.mulf %50, %52 : vector<16x38xf32>
    %54 = arith.addf %49, %53 : vector<16x38xf32>
    %55 = vector.extract_strided_slice %28 {offsets = [0, 2], sizes = [16, 38], strides = [1, 1]} : vector<16x40xf32> to vector<16x38xf32>
    %c0_40 = arith.constant 0 : index
    %c5 = arith.constant 5 : index
    %56 = memref.load %arg3[%c0_40, %c5] : memref<8x9xf32, #tpu.memory_space<smem>>
    %57 = vector.broadcast %56 : f32 to vector<16x38xf32>
    %58 = arith.mulf %55, %57 : vector<16x38xf32>
    %59 = arith.addf %54, %58 : vector<16x38xf32>
    %60 = vector.extract_strided_slice %30 {offsets = [0, 0], sizes = [16, 38], strides = [1, 1]} : vector<16x40xf32> to vector<16x38xf32>
    %c0_41 = arith.constant 0 : index
    %c6 = arith.constant 6 : index
    %61 = memref.load %arg3[%c0_41, %c6] : memref<8x9xf32, #tpu.memory_space<smem>>
    %62 = vector.broadcast %61 : f32 to vector<16x38xf32>
    %63 = arith.mulf %60, %62 : vector<16x38xf32>
    %64 = arith.addf %59, %63 : vector<16x38xf32>
    %65 = vector.extract_strided_slice %30 {offsets = [0, 1], sizes = [16, 38], strides = [1, 1]} : vector<16x40xf32> to vector<16x38xf32>
    %c0_42 = arith.constant 0 : index
    %c7 = arith.constant 7 : index
    %66 = memref.load %arg3[%c0_42, %c7] : memref<8x9xf32, #tpu.memory_space<smem>>
    %67 = vector.broadcast %66 : f32 to vector<16x38xf32>
    %68 = arith.mulf %65, %67 : vector<16x38xf32>
    %69 = arith.addf %64, %68 : vector<16x38xf32>
    %70 = vector.extract_strided_slice %30 {offsets = [0, 2], sizes = [16, 38], strides = [1, 1]} : vector<16x40xf32> to vector<16x38xf32>
    %c0_43 = arith.constant 0 : index
    %c8 = arith.constant 8 : index
    %71 = memref.load %arg3[%c0_43, %c8] : memref<8x9xf32, #tpu.memory_space<smem>>
    %72 = vector.broadcast %71 : f32 to vector<16x38xf32>
    %73 = arith.mulf %70, %72 : vector<16x38xf32>
    %74 = arith.addf %69, %73 : vector<16x38xf32>
    %c0_44 = arith.constant 0 : index
    %75 = memref.load %arg4[%c0_44] : memref<16xf32, #tpu.memory_space<smem>>
    %76 = vector.broadcast %75 : f32 to vector<16x38xf32>
    %77 = arith.mulf %74, %76 : vector<16x38xf32>
    %c0_45 = arith.constant 0 : index
    %78 = memref.load %arg5[%c0_45] : memref<16xf32, #tpu.memory_space<smem>>
    %79 = vector.broadcast %78 : f32 to vector<16x38xf32>
    %80 = arith.addf %77, %79 : vector<16x38xf32>
    %cst_46 = arith.constant 0.000000e+00 : f32
    %81 = vector.broadcast %cst_46 : f32 to vector<16x38xf32>
    %82 = arith.maximumf %80, %81 : vector<16x38xf32>
    %c0_47 = arith.constant 0 : index
    %c0_48 = arith.constant 0 : index
    %83 = memref.load %arg6[%c0_47, %c0_48] : memref<4x16xf32, #tpu.memory_space<smem>>
    %84 = vector.broadcast %83 : f32 to vector<16x38xf32>
    %85 = arith.mulf %82, %84 : vector<16x38xf32>
    %c1_49 = arith.constant 1 : index
    %c0_50 = arith.constant 0 : index
    %86 = memref.load %arg6[%c1_49, %c0_50] : memref<4x16xf32, #tpu.memory_space<smem>>
    %87 = vector.broadcast %86 : f32 to vector<16x38xf32>
    %88 = arith.mulf %82, %87 : vector<16x38xf32>
    %c2_51 = arith.constant 2 : index
    %c0_52 = arith.constant 0 : index
    %89 = memref.load %arg6[%c2_51, %c0_52] : memref<4x16xf32, #tpu.memory_space<smem>>
    %90 = vector.broadcast %89 : f32 to vector<16x38xf32>
    %91 = arith.mulf %82, %90 : vector<16x38xf32>
    %c3_53 = arith.constant 3 : index
    %c0_54 = arith.constant 0 : index
    %92 = memref.load %arg6[%c3_53, %c0_54] : memref<4x16xf32, #tpu.memory_space<smem>>
    %93 = vector.broadcast %92 : f32 to vector<16x38xf32>
    %94 = arith.mulf %82, %93 : vector<16x38xf32>
    %c1_55 = arith.constant 1 : index
    %95 = memref.load %arg4[%c1_55] : memref<16xf32, #tpu.memory_space<smem>>
    %96 = vector.broadcast %95 : f32 to vector<16x38xf32>
    %97 = arith.mulf %74, %96 : vector<16x38xf32>
    %c1_56 = arith.constant 1 : index
    %98 = memref.load %arg5[%c1_56] : memref<16xf32, #tpu.memory_space<smem>>
    %99 = vector.broadcast %98 : f32 to vector<16x38xf32>
    %100 = arith.addf %97, %99 : vector<16x38xf32>
    %cst_57 = arith.constant 0.000000e+00 : f32
    %101 = vector.broadcast %cst_57 : f32 to vector<16x38xf32>
    %102 = arith.maximumf %100, %101 : vector<16x38xf32>
    %c0_58 = arith.constant 0 : index
    %c1_59 = arith.constant 1 : index
    %103 = memref.load %arg6[%c0_58, %c1_59] : memref<4x16xf32, #tpu.memory_space<smem>>
    %104 = vector.broadcast %103 : f32 to vector<16x38xf32>
    %105 = arith.mulf %102, %104 : vector<16x38xf32>
    %106 = arith.addf %85, %105 : vector<16x38xf32>
    %c1_60 = arith.constant 1 : index
    %c1_61 = arith.constant 1 : index
    %107 = memref.load %arg6[%c1_60, %c1_61] : memref<4x16xf32, #tpu.memory_space<smem>>
    %108 = vector.broadcast %107 : f32 to vector<16x38xf32>
    %109 = arith.mulf %102, %108 : vector<16x38xf32>
    %110 = arith.addf %88, %109 : vector<16x38xf32>
    %c2_62 = arith.constant 2 : index
    %c1_63 = arith.constant 1 : index
    %111 = memref.load %arg6[%c2_62, %c1_63] : memref<4x16xf32, #tpu.memory_space<smem>>
    %112 = vector.broadcast %111 : f32 to vector<16x38xf32>
    %113 = arith.mulf %102, %112 : vector<16x38xf32>
    %114 = arith.addf %91, %113 : vector<16x38xf32>
    %c3_64 = arith.constant 3 : index
    %c1_65 = arith.constant 1 : index
    %115 = memref.load %arg6[%c3_64, %c1_65] : memref<4x16xf32, #tpu.memory_space<smem>>
    %116 = vector.broadcast %115 : f32 to vector<16x38xf32>
    %117 = arith.mulf %102, %116 : vector<16x38xf32>
    %118 = arith.addf %94, %117 : vector<16x38xf32>
    %119 = vector.extract_strided_slice %26 {offsets = [0, 0], sizes = [16, 38], strides = [1, 1]} : vector<16x40xf32> to vector<16x38xf32>
    %c1_66 = arith.constant 1 : index
    %c0_67 = arith.constant 0 : index
    %120 = memref.load %arg3[%c1_66, %c0_67] : memref<8x9xf32, #tpu.memory_space<smem>>
    %121 = vector.broadcast %120 : f32 to vector<16x38xf32>
    %122 = arith.mulf %119, %121 : vector<16x38xf32>
    %123 = vector.extract_strided_slice %26 {offsets = [0, 1], sizes = [16, 38], strides = [1, 1]} : vector<16x40xf32> to vector<16x38xf32>
    %c1_68 = arith.constant 1 : index
    %c1_69 = arith.constant 1 : index
    %124 = memref.load %arg3[%c1_68, %c1_69] : memref<8x9xf32, #tpu.memory_space<smem>>
    %125 = vector.broadcast %124 : f32 to vector<16x38xf32>
    %126 = arith.mulf %123, %125 : vector<16x38xf32>
    %127 = arith.addf %122, %126 : vector<16x38xf32>
    %128 = vector.extract_strided_slice %26 {offsets = [0, 2], sizes = [16, 38], strides = [1, 1]} : vector<16x40xf32> to vector<16x38xf32>
    %c1_70 = arith.constant 1 : index
    %c2_71 = arith.constant 2 : index
    %129 = memref.load %arg3[%c1_70, %c2_71] : memref<8x9xf32, #tpu.memory_space<smem>>
    %130 = vector.broadcast %129 : f32 to vector<16x38xf32>
    %131 = arith.mulf %128, %130 : vector<16x38xf32>
    %132 = arith.addf %127, %131 : vector<16x38xf32>
    %133 = vector.extract_strided_slice %28 {offsets = [0, 0], sizes = [16, 38], strides = [1, 1]} : vector<16x40xf32> to vector<16x38xf32>
    %c1_72 = arith.constant 1 : index
    %c3_73 = arith.constant 3 : index
    %134 = memref.load %arg3[%c1_72, %c3_73] : memref<8x9xf32, #tpu.memory_space<smem>>
    %135 = vector.broadcast %134 : f32 to vector<16x38xf32>
    %136 = arith.mulf %133, %135 : vector<16x38xf32>
    %137 = arith.addf %132, %136 : vector<16x38xf32>
    %138 = vector.extract_strided_slice %28 {offsets = [0, 1], sizes = [16, 38], strides = [1, 1]} : vector<16x40xf32> to vector<16x38xf32>
    %c1_74 = arith.constant 1 : index
    %c4_75 = arith.constant 4 : index
    %139 = memref.load %arg3[%c1_74, %c4_75] : memref<8x9xf32, #tpu.memory_space<smem>>
    %140 = vector.broadcast %139 : f32 to vector<16x38xf32>
    %141 = arith.mulf %138, %140 : vector<16x38xf32>
    %142 = arith.addf %137, %141 : vector<16x38xf32>
    %143 = vector.extract_strided_slice %28 {offsets = [0, 2], sizes = [16, 38], strides = [1, 1]} : vector<16x40xf32> to vector<16x38xf32>
    %c1_76 = arith.constant 1 : index
    %c5_77 = arith.constant 5 : index
    %144 = memref.load %arg3[%c1_76, %c5_77] : memref<8x9xf32, #tpu.memory_space<smem>>
    %145 = vector.broadcast %144 : f32 to vector<16x38xf32>
    %146 = arith.mulf %143, %145 : vector<16x38xf32>
    %147 = arith.addf %142, %146 : vector<16x38xf32>
    %148 = vector.extract_strided_slice %30 {offsets = [0, 0], sizes = [16, 38], strides = [1, 1]} : vector<16x40xf32> to vector<16x38xf32>
    %c1_78 = arith.constant 1 : index
    %c6_79 = arith.constant 6 : index
    %149 = memref.load %arg3[%c1_78, %c6_79] : memref<8x9xf32, #tpu.memory_space<smem>>
    %150 = vector.broadcast %149 : f32 to vector<16x38xf32>
    %151 = arith.mulf %148, %150 : vector<16x38xf32>
    %152 = arith.addf %147, %151 : vector<16x38xf32>
    %153 = vector.extract_strided_slice %30 {offsets = [0, 1], sizes = [16, 38], strides = [1, 1]} : vector<16x40xf32> to vector<16x38xf32>
    %c1_80 = arith.constant 1 : index
    %c7_81 = arith.constant 7 : index
    %154 = memref.load %arg3[%c1_80, %c7_81] : memref<8x9xf32, #tpu.memory_space<smem>>
    %155 = vector.broadcast %154 : f32 to vector<16x38xf32>
    %156 = arith.mulf %153, %155 : vector<16x38xf32>
    %157 = arith.addf %152, %156 : vector<16x38xf32>
    %158 = vector.extract_strided_slice %30 {offsets = [0, 2], sizes = [16, 38], strides = [1, 1]} : vector<16x40xf32> to vector<16x38xf32>
    %c1_82 = arith.constant 1 : index
    %c8_83 = arith.constant 8 : index
    %159 = memref.load %arg3[%c1_82, %c8_83] : memref<8x9xf32, #tpu.memory_space<smem>>
    %160 = vector.broadcast %159 : f32 to vector<16x38xf32>
    %161 = arith.mulf %158, %160 : vector<16x38xf32>
    %162 = arith.addf %157, %161 : vector<16x38xf32>
    %c2_84 = arith.constant 2 : index
    %163 = memref.load %arg4[%c2_84] : memref<16xf32, #tpu.memory_space<smem>>
    %164 = vector.broadcast %163 : f32 to vector<16x38xf32>
    %165 = arith.mulf %162, %164 : vector<16x38xf32>
    %c2_85 = arith.constant 2 : index
    %166 = memref.load %arg5[%c2_85] : memref<16xf32, #tpu.memory_space<smem>>
    %167 = vector.broadcast %166 : f32 to vector<16x38xf32>
    %168 = arith.addf %165, %167 : vector<16x38xf32>
    %cst_86 = arith.constant 0.000000e+00 : f32
    %169 = vector.broadcast %cst_86 : f32 to vector<16x38xf32>
    %170 = arith.maximumf %168, %169 : vector<16x38xf32>
    %c0_87 = arith.constant 0 : index
    %c2_88 = arith.constant 2 : index
    %171 = memref.load %arg6[%c0_87, %c2_88] : memref<4x16xf32, #tpu.memory_space<smem>>
    %172 = vector.broadcast %171 : f32 to vector<16x38xf32>
    %173 = arith.mulf %170, %172 : vector<16x38xf32>
    %174 = arith.addf %106, %173 : vector<16x38xf32>
    %c1_89 = arith.constant 1 : index
    %c2_90 = arith.constant 2 : index
    %175 = memref.load %arg6[%c1_89, %c2_90] : memref<4x16xf32, #tpu.memory_space<smem>>
    %176 = vector.broadcast %175 : f32 to vector<16x38xf32>
    %177 = arith.mulf %170, %176 : vector<16x38xf32>
    %178 = arith.addf %110, %177 : vector<16x38xf32>
    %c2_91 = arith.constant 2 : index
    %c2_92 = arith.constant 2 : index
    %179 = memref.load %arg6[%c2_91, %c2_92] : memref<4x16xf32, #tpu.memory_space<smem>>
    %180 = vector.broadcast %179 : f32 to vector<16x38xf32>
    %181 = arith.mulf %170, %180 : vector<16x38xf32>
    %182 = arith.addf %114, %181 : vector<16x38xf32>
    %c3_93 = arith.constant 3 : index
    %c2_94 = arith.constant 2 : index
    %183 = memref.load %arg6[%c3_93, %c2_94] : memref<4x16xf32, #tpu.memory_space<smem>>
    %184 = vector.broadcast %183 : f32 to vector<16x38xf32>
    %185 = arith.mulf %170, %184 : vector<16x38xf32>
    %186 = arith.addf %118, %185 : vector<16x38xf32>
    %c3_95 = arith.constant 3 : index
    %187 = memref.load %arg4[%c3_95] : memref<16xf32, #tpu.memory_space<smem>>
    %188 = vector.broadcast %187 : f32 to vector<16x38xf32>
    %189 = arith.mulf %162, %188 : vector<16x38xf32>
    %c3_96 = arith.constant 3 : index
    %190 = memref.load %arg5[%c3_96] : memref<16xf32, #tpu.memory_space<smem>>
    %191 = vector.broadcast %190 : f32 to vector<16x38xf32>
    %192 = arith.addf %189, %191 : vector<16x38xf32>
    %cst_97 = arith.constant 0.000000e+00 : f32
    %193 = vector.broadcast %cst_97 : f32 to vector<16x38xf32>
    %194 = arith.maximumf %192, %193 : vector<16x38xf32>
    %c0_98 = arith.constant 0 : index
    %c3_99 = arith.constant 3 : index
    %195 = memref.load %arg6[%c0_98, %c3_99] : memref<4x16xf32, #tpu.memory_space<smem>>
    %196 = vector.broadcast %195 : f32 to vector<16x38xf32>
    %197 = arith.mulf %194, %196 : vector<16x38xf32>
    %198 = arith.addf %174, %197 : vector<16x38xf32>
    %c1_100 = arith.constant 1 : index
    %c3_101 = arith.constant 3 : index
    %199 = memref.load %arg6[%c1_100, %c3_101] : memref<4x16xf32, #tpu.memory_space<smem>>
    %200 = vector.broadcast %199 : f32 to vector<16x38xf32>
    %201 = arith.mulf %194, %200 : vector<16x38xf32>
    %202 = arith.addf %178, %201 : vector<16x38xf32>
    %c2_102 = arith.constant 2 : index
    %c3_103 = arith.constant 3 : index
    %203 = memref.load %arg6[%c2_102, %c3_103] : memref<4x16xf32, #tpu.memory_space<smem>>
    %204 = vector.broadcast %203 : f32 to vector<16x38xf32>
    %205 = arith.mulf %194, %204 : vector<16x38xf32>
    %206 = arith.addf %182, %205 : vector<16x38xf32>
    %c3_104 = arith.constant 3 : index
    %c3_105 = arith.constant 3 : index
    %207 = memref.load %arg6[%c3_104, %c3_105] : memref<4x16xf32, #tpu.memory_space<smem>>
    %208 = vector.broadcast %207 : f32 to vector<16x38xf32>
    %209 = arith.mulf %194, %208 : vector<16x38xf32>
    %210 = arith.addf %186, %209 : vector<16x38xf32>
    %c0_106 = arith.constant 0 : index
    %c1_107 = arith.constant 1 : index
    %c1_108 = arith.constant 1 : index
    %c0_109 = arith.constant 0 : index
    %211 = vector.load %arg1[%c0_106, %c1_107, %c1_108, %c0_109] : memref<1x4x20x40xf32, #tpu.memory_space<vmem>>, vector<1x1x16x40xf32>
    %212 = vector.shape_cast %211 : vector<1x1x16x40xf32> to vector<16x40xf32>
    %c0_110 = arith.constant 0 : index
    %c1_111 = arith.constant 1 : index
    %c2_112 = arith.constant 2 : index
    %c0_113 = arith.constant 0 : index
    %213 = vector.load %arg1[%c0_110, %c1_111, %c2_112, %c0_113] : memref<1x4x20x40xf32, #tpu.memory_space<vmem>>, vector<1x1x16x40xf32>
    %214 = vector.shape_cast %213 : vector<1x1x16x40xf32> to vector<16x40xf32>
    %c0_114 = arith.constant 0 : index
    %c1_115 = arith.constant 1 : index
    %c3_116 = arith.constant 3 : index
    %c0_117 = arith.constant 0 : index
    %215 = vector.load %arg1[%c0_114, %c1_115, %c3_116, %c0_117] : memref<1x4x20x40xf32, #tpu.memory_space<vmem>>, vector<1x1x16x40xf32>
    %216 = vector.shape_cast %215 : vector<1x1x16x40xf32> to vector<16x40xf32>
    %217 = vector.extract_strided_slice %212 {offsets = [0, 0], sizes = [16, 38], strides = [1, 1]} : vector<16x40xf32> to vector<16x38xf32>
    %c2_118 = arith.constant 2 : index
    %c0_119 = arith.constant 0 : index
    %218 = memref.load %arg3[%c2_118, %c0_119] : memref<8x9xf32, #tpu.memory_space<smem>>
    %219 = vector.broadcast %218 : f32 to vector<16x38xf32>
    %220 = arith.mulf %217, %219 : vector<16x38xf32>
    %221 = vector.extract_strided_slice %212 {offsets = [0, 1], sizes = [16, 38], strides = [1, 1]} : vector<16x40xf32> to vector<16x38xf32>
    %c2_120 = arith.constant 2 : index
    %c1_121 = arith.constant 1 : index
    %222 = memref.load %arg3[%c2_120, %c1_121] : memref<8x9xf32, #tpu.memory_space<smem>>
    %223 = vector.broadcast %222 : f32 to vector<16x38xf32>
    %224 = arith.mulf %221, %223 : vector<16x38xf32>
    %225 = arith.addf %220, %224 : vector<16x38xf32>
    %226 = vector.extract_strided_slice %212 {offsets = [0, 2], sizes = [16, 38], strides = [1, 1]} : vector<16x40xf32> to vector<16x38xf32>
    %c2_122 = arith.constant 2 : index
    %c2_123 = arith.constant 2 : index
    %227 = memref.load %arg3[%c2_122, %c2_123] : memref<8x9xf32, #tpu.memory_space<smem>>
    %228 = vector.broadcast %227 : f32 to vector<16x38xf32>
    %229 = arith.mulf %226, %228 : vector<16x38xf32>
    %230 = arith.addf %225, %229 : vector<16x38xf32>
    %231 = vector.extract_strided_slice %214 {offsets = [0, 0], sizes = [16, 38], strides = [1, 1]} : vector<16x40xf32> to vector<16x38xf32>
    %c2_124 = arith.constant 2 : index
    %c3_125 = arith.constant 3 : index
    %232 = memref.load %arg3[%c2_124, %c3_125] : memref<8x9xf32, #tpu.memory_space<smem>>
    %233 = vector.broadcast %232 : f32 to vector<16x38xf32>
    %234 = arith.mulf %231, %233 : vector<16x38xf32>
    %235 = arith.addf %230, %234 : vector<16x38xf32>
    %236 = vector.extract_strided_slice %214 {offsets = [0, 1], sizes = [16, 38], strides = [1, 1]} : vector<16x40xf32> to vector<16x38xf32>
    %c2_126 = arith.constant 2 : index
    %c4_127 = arith.constant 4 : index
    %237 = memref.load %arg3[%c2_126, %c4_127] : memref<8x9xf32, #tpu.memory_space<smem>>
    %238 = vector.broadcast %237 : f32 to vector<16x38xf32>
    %239 = arith.mulf %236, %238 : vector<16x38xf32>
    %240 = arith.addf %235, %239 : vector<16x38xf32>
    %241 = vector.extract_strided_slice %214 {offsets = [0, 2], sizes = [16, 38], strides = [1, 1]} : vector<16x40xf32> to vector<16x38xf32>
    %c2_128 = arith.constant 2 : index
    %c5_129 = arith.constant 5 : index
    %242 = memref.load %arg3[%c2_128, %c5_129] : memref<8x9xf32, #tpu.memory_space<smem>>
    %243 = vector.broadcast %242 : f32 to vector<16x38xf32>
    %244 = arith.mulf %241, %243 : vector<16x38xf32>
    %245 = arith.addf %240, %244 : vector<16x38xf32>
    %246 = vector.extract_strided_slice %216 {offsets = [0, 0], sizes = [16, 38], strides = [1, 1]} : vector<16x40xf32> to vector<16x38xf32>
    %c2_130 = arith.constant 2 : index
    %c6_131 = arith.constant 6 : index
    %247 = memref.load %arg3[%c2_130, %c6_131] : memref<8x9xf32, #tpu.memory_space<smem>>
    %248 = vector.broadcast %247 : f32 to vector<16x38xf32>
    %249 = arith.mulf %246, %248 : vector<16x38xf32>
    %250 = arith.addf %245, %249 : vector<16x38xf32>
    %251 = vector.extract_strided_slice %216 {offsets = [0, 1], sizes = [16, 38], strides = [1, 1]} : vector<16x40xf32> to vector<16x38xf32>
    %c2_132 = arith.constant 2 : index
    %c7_133 = arith.constant 7 : index
    %252 = memref.load %arg3[%c2_132, %c7_133] : memref<8x9xf32, #tpu.memory_space<smem>>
    %253 = vector.broadcast %252 : f32 to vector<16x38xf32>
    %254 = arith.mulf %251, %253 : vector<16x38xf32>
    %255 = arith.addf %250, %254 : vector<16x38xf32>
    %256 = vector.extract_strided_slice %216 {offsets = [0, 2], sizes = [16, 38], strides = [1, 1]} : vector<16x40xf32> to vector<16x38xf32>
    %c2_134 = arith.constant 2 : index
    %c8_135 = arith.constant 8 : index
    %257 = memref.load %arg3[%c2_134, %c8_135] : memref<8x9xf32, #tpu.memory_space<smem>>
    %258 = vector.broadcast %257 : f32 to vector<16x38xf32>
    %259 = arith.mulf %256, %258 : vector<16x38xf32>
    %260 = arith.addf %255, %259 : vector<16x38xf32>
    %c4_136 = arith.constant 4 : index
    %261 = memref.load %arg4[%c4_136] : memref<16xf32, #tpu.memory_space<smem>>
    %262 = vector.broadcast %261 : f32 to vector<16x38xf32>
    %263 = arith.mulf %260, %262 : vector<16x38xf32>
    %c4_137 = arith.constant 4 : index
    %264 = memref.load %arg5[%c4_137] : memref<16xf32, #tpu.memory_space<smem>>
    %265 = vector.broadcast %264 : f32 to vector<16x38xf32>
    %266 = arith.addf %263, %265 : vector<16x38xf32>
    %cst_138 = arith.constant 0.000000e+00 : f32
    %267 = vector.broadcast %cst_138 : f32 to vector<16x38xf32>
    %268 = arith.maximumf %266, %267 : vector<16x38xf32>
    %c0_139 = arith.constant 0 : index
    %c4_140 = arith.constant 4 : index
    %269 = memref.load %arg6[%c0_139, %c4_140] : memref<4x16xf32, #tpu.memory_space<smem>>
    %270 = vector.broadcast %269 : f32 to vector<16x38xf32>
    %271 = arith.mulf %268, %270 : vector<16x38xf32>
    %272 = arith.addf %198, %271 : vector<16x38xf32>
    %c1_141 = arith.constant 1 : index
    %c4_142 = arith.constant 4 : index
    %273 = memref.load %arg6[%c1_141, %c4_142] : memref<4x16xf32, #tpu.memory_space<smem>>
    %274 = vector.broadcast %273 : f32 to vector<16x38xf32>
    %275 = arith.mulf %268, %274 : vector<16x38xf32>
    %276 = arith.addf %202, %275 : vector<16x38xf32>
    %c2_143 = arith.constant 2 : index
    %c4_144 = arith.constant 4 : index
    %277 = memref.load %arg6[%c2_143, %c4_144] : memref<4x16xf32, #tpu.memory_space<smem>>
    %278 = vector.broadcast %277 : f32 to vector<16x38xf32>
    %279 = arith.mulf %268, %278 : vector<16x38xf32>
    %280 = arith.addf %206, %279 : vector<16x38xf32>
    %c3_145 = arith.constant 3 : index
    %c4_146 = arith.constant 4 : index
    %281 = memref.load %arg6[%c3_145, %c4_146] : memref<4x16xf32, #tpu.memory_space<smem>>
    %282 = vector.broadcast %281 : f32 to vector<16x38xf32>
    %283 = arith.mulf %268, %282 : vector<16x38xf32>
    %284 = arith.addf %210, %283 : vector<16x38xf32>
    %c5_147 = arith.constant 5 : index
    %285 = memref.load %arg4[%c5_147] : memref<16xf32, #tpu.memory_space<smem>>
    %286 = vector.broadcast %285 : f32 to vector<16x38xf32>
    %287 = arith.mulf %260, %286 : vector<16x38xf32>
    %c5_148 = arith.constant 5 : index
    %288 = memref.load %arg5[%c5_148] : memref<16xf32, #tpu.memory_space<smem>>
    %289 = vector.broadcast %288 : f32 to vector<16x38xf32>
    %290 = arith.addf %287, %289 : vector<16x38xf32>
    %cst_149 = arith.constant 0.000000e+00 : f32
    %291 = vector.broadcast %cst_149 : f32 to vector<16x38xf32>
    %292 = arith.maximumf %290, %291 : vector<16x38xf32>
    %c0_150 = arith.constant 0 : index
    %c5_151 = arith.constant 5 : index
    %293 = memref.load %arg6[%c0_150, %c5_151] : memref<4x16xf32, #tpu.memory_space<smem>>
    %294 = vector.broadcast %293 : f32 to vector<16x38xf32>
    %295 = arith.mulf %292, %294 : vector<16x38xf32>
    %296 = arith.addf %272, %295 : vector<16x38xf32>
    %c1_152 = arith.constant 1 : index
    %c5_153 = arith.constant 5 : index
    %297 = memref.load %arg6[%c1_152, %c5_153] : memref<4x16xf32, #tpu.memory_space<smem>>
    %298 = vector.broadcast %297 : f32 to vector<16x38xf32>
    %299 = arith.mulf %292, %298 : vector<16x38xf32>
    %300 = arith.addf %276, %299 : vector<16x38xf32>
    %c2_154 = arith.constant 2 : index
    %c5_155 = arith.constant 5 : index
    %301 = memref.load %arg6[%c2_154, %c5_155] : memref<4x16xf32, #tpu.memory_space<smem>>
    %302 = vector.broadcast %301 : f32 to vector<16x38xf32>
    %303 = arith.mulf %292, %302 : vector<16x38xf32>
    %304 = arith.addf %280, %303 : vector<16x38xf32>
    %c3_156 = arith.constant 3 : index
    %c5_157 = arith.constant 5 : index
    %305 = memref.load %arg6[%c3_156, %c5_157] : memref<4x16xf32, #tpu.memory_space<smem>>
    %306 = vector.broadcast %305 : f32 to vector<16x38xf32>
    %307 = arith.mulf %292, %306 : vector<16x38xf32>
    %308 = arith.addf %284, %307 : vector<16x38xf32>
    %309 = vector.extract_strided_slice %212 {offsets = [0, 0], sizes = [16, 38], strides = [1, 1]} : vector<16x40xf32> to vector<16x38xf32>
    %c3_158 = arith.constant 3 : index
    %c0_159 = arith.constant 0 : index
    %310 = memref.load %arg3[%c3_158, %c0_159] : memref<8x9xf32, #tpu.memory_space<smem>>
    %311 = vector.broadcast %310 : f32 to vector<16x38xf32>
    %312 = arith.mulf %309, %311 : vector<16x38xf32>
    %313 = vector.extract_strided_slice %212 {offsets = [0, 1], sizes = [16, 38], strides = [1, 1]} : vector<16x40xf32> to vector<16x38xf32>
    %c3_160 = arith.constant 3 : index
    %c1_161 = arith.constant 1 : index
    %314 = memref.load %arg3[%c3_160, %c1_161] : memref<8x9xf32, #tpu.memory_space<smem>>
    %315 = vector.broadcast %314 : f32 to vector<16x38xf32>
    %316 = arith.mulf %313, %315 : vector<16x38xf32>
    %317 = arith.addf %312, %316 : vector<16x38xf32>
    %318 = vector.extract_strided_slice %212 {offsets = [0, 2], sizes = [16, 38], strides = [1, 1]} : vector<16x40xf32> to vector<16x38xf32>
    %c3_162 = arith.constant 3 : index
    %c2_163 = arith.constant 2 : index
    %319 = memref.load %arg3[%c3_162, %c2_163] : memref<8x9xf32, #tpu.memory_space<smem>>
    %320 = vector.broadcast %319 : f32 to vector<16x38xf32>
    %321 = arith.mulf %318, %320 : vector<16x38xf32>
    %322 = arith.addf %317, %321 : vector<16x38xf32>
    %323 = vector.extract_strided_slice %214 {offsets = [0, 0], sizes = [16, 38], strides = [1, 1]} : vector<16x40xf32> to vector<16x38xf32>
    %c3_164 = arith.constant 3 : index
    %c3_165 = arith.constant 3 : index
    %324 = memref.load %arg3[%c3_164, %c3_165] : memref<8x9xf32, #tpu.memory_space<smem>>
    %325 = vector.broadcast %324 : f32 to vector<16x38xf32>
    %326 = arith.mulf %323, %325 : vector<16x38xf32>
    %327 = arith.addf %322, %326 : vector<16x38xf32>
    %328 = vector.extract_strided_slice %214 {offsets = [0, 1], sizes = [16, 38], strides = [1, 1]} : vector<16x40xf32> to vector<16x38xf32>
    %c3_166 = arith.constant 3 : index
    %c4_167 = arith.constant 4 : index
    %329 = memref.load %arg3[%c3_166, %c4_167] : memref<8x9xf32, #tpu.memory_space<smem>>
    %330 = vector.broadcast %329 : f32 to vector<16x38xf32>
    %331 = arith.mulf %328, %330 : vector<16x38xf32>
    %332 = arith.addf %327, %331 : vector<16x38xf32>
    %333 = vector.extract_strided_slice %214 {offsets = [0, 2], sizes = [16, 38], strides = [1, 1]} : vector<16x40xf32> to vector<16x38xf32>
    %c3_168 = arith.constant 3 : index
    %c5_169 = arith.constant 5 : index
    %334 = memref.load %arg3[%c3_168, %c5_169] : memref<8x9xf32, #tpu.memory_space<smem>>
    %335 = vector.broadcast %334 : f32 to vector<16x38xf32>
    %336 = arith.mulf %333, %335 : vector<16x38xf32>
    %337 = arith.addf %332, %336 : vector<16x38xf32>
    %338 = vector.extract_strided_slice %216 {offsets = [0, 0], sizes = [16, 38], strides = [1, 1]} : vector<16x40xf32> to vector<16x38xf32>
    %c3_170 = arith.constant 3 : index
    %c6_171 = arith.constant 6 : index
    %339 = memref.load %arg3[%c3_170, %c6_171] : memref<8x9xf32, #tpu.memory_space<smem>>
    %340 = vector.broadcast %339 : f32 to vector<16x38xf32>
    %341 = arith.mulf %338, %340 : vector<16x38xf32>
    %342 = arith.addf %337, %341 : vector<16x38xf32>
    %343 = vector.extract_strided_slice %216 {offsets = [0, 1], sizes = [16, 38], strides = [1, 1]} : vector<16x40xf32> to vector<16x38xf32>
    %c3_172 = arith.constant 3 : index
    %c7_173 = arith.constant 7 : index
    %344 = memref.load %arg3[%c3_172, %c7_173] : memref<8x9xf32, #tpu.memory_space<smem>>
    %345 = vector.broadcast %344 : f32 to vector<16x38xf32>
    %346 = arith.mulf %343, %345 : vector<16x38xf32>
    %347 = arith.addf %342, %346 : vector<16x38xf32>
    %348 = vector.extract_strided_slice %216 {offsets = [0, 2], sizes = [16, 38], strides = [1, 1]} : vector<16x40xf32> to vector<16x38xf32>
    %c3_174 = arith.constant 3 : index
    %c8_175 = arith.constant 8 : index
    %349 = memref.load %arg3[%c3_174, %c8_175] : memref<8x9xf32, #tpu.memory_space<smem>>
    %350 = vector.broadcast %349 : f32 to vector<16x38xf32>
    %351 = arith.mulf %348, %350 : vector<16x38xf32>
    %352 = arith.addf %347, %351 : vector<16x38xf32>
    %c6_176 = arith.constant 6 : index
    %353 = memref.load %arg4[%c6_176] : memref<16xf32, #tpu.memory_space<smem>>
    %354 = vector.broadcast %353 : f32 to vector<16x38xf32>
    %355 = arith.mulf %352, %354 : vector<16x38xf32>
    %c6_177 = arith.constant 6 : index
    %356 = memref.load %arg5[%c6_177] : memref<16xf32, #tpu.memory_space<smem>>
    %357 = vector.broadcast %356 : f32 to vector<16x38xf32>
    %358 = arith.addf %355, %357 : vector<16x38xf32>
    %cst_178 = arith.constant 0.000000e+00 : f32
    %359 = vector.broadcast %cst_178 : f32 to vector<16x38xf32>
    %360 = arith.maximumf %358, %359 : vector<16x38xf32>
    %c0_179 = arith.constant 0 : index
    %c6_180 = arith.constant 6 : index
    %361 = memref.load %arg6[%c0_179, %c6_180] : memref<4x16xf32, #tpu.memory_space<smem>>
    %362 = vector.broadcast %361 : f32 to vector<16x38xf32>
    %363 = arith.mulf %360, %362 : vector<16x38xf32>
    %364 = arith.addf %296, %363 : vector<16x38xf32>
    %c1_181 = arith.constant 1 : index
    %c6_182 = arith.constant 6 : index
    %365 = memref.load %arg6[%c1_181, %c6_182] : memref<4x16xf32, #tpu.memory_space<smem>>
    %366 = vector.broadcast %365 : f32 to vector<16x38xf32>
    %367 = arith.mulf %360, %366 : vector<16x38xf32>
    %368 = arith.addf %300, %367 : vector<16x38xf32>
    %c2_183 = arith.constant 2 : index
    %c6_184 = arith.constant 6 : index
    %369 = memref.load %arg6[%c2_183, %c6_184] : memref<4x16xf32, #tpu.memory_space<smem>>
    %370 = vector.broadcast %369 : f32 to vector<16x38xf32>
    %371 = arith.mulf %360, %370 : vector<16x38xf32>
    %372 = arith.addf %304, %371 : vector<16x38xf32>
    %c3_185 = arith.constant 3 : index
    %c6_186 = arith.constant 6 : index
    %373 = memref.load %arg6[%c3_185, %c6_186] : memref<4x16xf32, #tpu.memory_space<smem>>
    %374 = vector.broadcast %373 : f32 to vector<16x38xf32>
    %375 = arith.mulf %360, %374 : vector<16x38xf32>
    %376 = arith.addf %308, %375 : vector<16x38xf32>
    %c7_187 = arith.constant 7 : index
    %377 = memref.load %arg4[%c7_187] : memref<16xf32, #tpu.memory_space<smem>>
    %378 = vector.broadcast %377 : f32 to vector<16x38xf32>
    %379 = arith.mulf %352, %378 : vector<16x38xf32>
    %c7_188 = arith.constant 7 : index
    %380 = memref.load %arg5[%c7_188] : memref<16xf32, #tpu.memory_space<smem>>
    %381 = vector.broadcast %380 : f32 to vector<16x38xf32>
    %382 = arith.addf %379, %381 : vector<16x38xf32>
    %cst_189 = arith.constant 0.000000e+00 : f32
    %383 = vector.broadcast %cst_189 : f32 to vector<16x38xf32>
    %384 = arith.maximumf %382, %383 : vector<16x38xf32>
    %c0_190 = arith.constant 0 : index
    %c7_191 = arith.constant 7 : index
    %385 = memref.load %arg6[%c0_190, %c7_191] : memref<4x16xf32, #tpu.memory_space<smem>>
    %386 = vector.broadcast %385 : f32 to vector<16x38xf32>
    %387 = arith.mulf %384, %386 : vector<16x38xf32>
    %388 = arith.addf %364, %387 : vector<16x38xf32>
    %c1_192 = arith.constant 1 : index
    %c7_193 = arith.constant 7 : index
    %389 = memref.load %arg6[%c1_192, %c7_193] : memref<4x16xf32, #tpu.memory_space<smem>>
    %390 = vector.broadcast %389 : f32 to vector<16x38xf32>
    %391 = arith.mulf %384, %390 : vector<16x38xf32>
    %392 = arith.addf %368, %391 : vector<16x38xf32>
    %c2_194 = arith.constant 2 : index
    %c7_195 = arith.constant 7 : index
    %393 = memref.load %arg6[%c2_194, %c7_195] : memref<4x16xf32, #tpu.memory_space<smem>>
    %394 = vector.broadcast %393 : f32 to vector<16x38xf32>
    %395 = arith.mulf %384, %394 : vector<16x38xf32>
    %396 = arith.addf %372, %395 : vector<16x38xf32>
    %c3_196 = arith.constant 3 : index
    %c7_197 = arith.constant 7 : index
    %397 = memref.load %arg6[%c3_196, %c7_197] : memref<4x16xf32, #tpu.memory_space<smem>>
    %398 = vector.broadcast %397 : f32 to vector<16x38xf32>
    %399 = arith.mulf %384, %398 : vector<16x38xf32>
    %400 = arith.addf %376, %399 : vector<16x38xf32>
    %c0_198 = arith.constant 0 : index
    %c2_199 = arith.constant 2 : index
    %c1_200 = arith.constant 1 : index
    %c0_201 = arith.constant 0 : index
    %401 = vector.load %arg1[%c0_198, %c2_199, %c1_200, %c0_201] : memref<1x4x20x40xf32, #tpu.memory_space<vmem>>, vector<1x1x16x40xf32>
    %402 = vector.shape_cast %401 : vector<1x1x16x40xf32> to vector<16x40xf32>
    %c0_202 = arith.constant 0 : index
    %c2_203 = arith.constant 2 : index
    %c2_204 = arith.constant 2 : index
    %c0_205 = arith.constant 0 : index
    %403 = vector.load %arg1[%c0_202, %c2_203, %c2_204, %c0_205] : memref<1x4x20x40xf32, #tpu.memory_space<vmem>>, vector<1x1x16x40xf32>
    %404 = vector.shape_cast %403 : vector<1x1x16x40xf32> to vector<16x40xf32>
    %c0_206 = arith.constant 0 : index
    %c2_207 = arith.constant 2 : index
    %c3_208 = arith.constant 3 : index
    %c0_209 = arith.constant 0 : index
    %405 = vector.load %arg1[%c0_206, %c2_207, %c3_208, %c0_209] : memref<1x4x20x40xf32, #tpu.memory_space<vmem>>, vector<1x1x16x40xf32>
    %406 = vector.shape_cast %405 : vector<1x1x16x40xf32> to vector<16x40xf32>
    %407 = vector.extract_strided_slice %402 {offsets = [0, 0], sizes = [16, 38], strides = [1, 1]} : vector<16x40xf32> to vector<16x38xf32>
    %c4_210 = arith.constant 4 : index
    %c0_211 = arith.constant 0 : index
    %408 = memref.load %arg3[%c4_210, %c0_211] : memref<8x9xf32, #tpu.memory_space<smem>>
    %409 = vector.broadcast %408 : f32 to vector<16x38xf32>
    %410 = arith.mulf %407, %409 : vector<16x38xf32>
    %411 = vector.extract_strided_slice %402 {offsets = [0, 1], sizes = [16, 38], strides = [1, 1]} : vector<16x40xf32> to vector<16x38xf32>
    %c4_212 = arith.constant 4 : index
    %c1_213 = arith.constant 1 : index
    %412 = memref.load %arg3[%c4_212, %c1_213] : memref<8x9xf32, #tpu.memory_space<smem>>
    %413 = vector.broadcast %412 : f32 to vector<16x38xf32>
    %414 = arith.mulf %411, %413 : vector<16x38xf32>
    %415 = arith.addf %410, %414 : vector<16x38xf32>
    %416 = vector.extract_strided_slice %402 {offsets = [0, 2], sizes = [16, 38], strides = [1, 1]} : vector<16x40xf32> to vector<16x38xf32>
    %c4_214 = arith.constant 4 : index
    %c2_215 = arith.constant 2 : index
    %417 = memref.load %arg3[%c4_214, %c2_215] : memref<8x9xf32, #tpu.memory_space<smem>>
    %418 = vector.broadcast %417 : f32 to vector<16x38xf32>
    %419 = arith.mulf %416, %418 : vector<16x38xf32>
    %420 = arith.addf %415, %419 : vector<16x38xf32>
    %421 = vector.extract_strided_slice %404 {offsets = [0, 0], sizes = [16, 38], strides = [1, 1]} : vector<16x40xf32> to vector<16x38xf32>
    %c4_216 = arith.constant 4 : index
    %c3_217 = arith.constant 3 : index
    %422 = memref.load %arg3[%c4_216, %c3_217] : memref<8x9xf32, #tpu.memory_space<smem>>
    %423 = vector.broadcast %422 : f32 to vector<16x38xf32>
    %424 = arith.mulf %421, %423 : vector<16x38xf32>
    %425 = arith.addf %420, %424 : vector<16x38xf32>
    %426 = vector.extract_strided_slice %404 {offsets = [0, 1], sizes = [16, 38], strides = [1, 1]} : vector<16x40xf32> to vector<16x38xf32>
    %c4_218 = arith.constant 4 : index
    %c4_219 = arith.constant 4 : index
    %427 = memref.load %arg3[%c4_218, %c4_219] : memref<8x9xf32, #tpu.memory_space<smem>>
    %428 = vector.broadcast %427 : f32 to vector<16x38xf32>
    %429 = arith.mulf %426, %428 : vector<16x38xf32>
    %430 = arith.addf %425, %429 : vector<16x38xf32>
    %431 = vector.extract_strided_slice %404 {offsets = [0, 2], sizes = [16, 38], strides = [1, 1]} : vector<16x40xf32> to vector<16x38xf32>
    %c4_220 = arith.constant 4 : index
    %c5_221 = arith.constant 5 : index
    %432 = memref.load %arg3[%c4_220, %c5_221] : memref<8x9xf32, #tpu.memory_space<smem>>
    %433 = vector.broadcast %432 : f32 to vector<16x38xf32>
    %434 = arith.mulf %431, %433 : vector<16x38xf32>
    %435 = arith.addf %430, %434 : vector<16x38xf32>
    %436 = vector.extract_strided_slice %406 {offsets = [0, 0], sizes = [16, 38], strides = [1, 1]} : vector<16x40xf32> to vector<16x38xf32>
    %c4_222 = arith.constant 4 : index
    %c6_223 = arith.constant 6 : index
    %437 = memref.load %arg3[%c4_222, %c6_223] : memref<8x9xf32, #tpu.memory_space<smem>>
    %438 = vector.broadcast %437 : f32 to vector<16x38xf32>
    %439 = arith.mulf %436, %438 : vector<16x38xf32>
    %440 = arith.addf %435, %439 : vector<16x38xf32>
    %441 = vector.extract_strided_slice %406 {offsets = [0, 1], sizes = [16, 38], strides = [1, 1]} : vector<16x40xf32> to vector<16x38xf32>
    %c4_224 = arith.constant 4 : index
    %c7_225 = arith.constant 7 : index
    %442 = memref.load %arg3[%c4_224, %c7_225] : memref<8x9xf32, #tpu.memory_space<smem>>
    %443 = vector.broadcast %442 : f32 to vector<16x38xf32>
    %444 = arith.mulf %441, %443 : vector<16x38xf32>
    %445 = arith.addf %440, %444 : vector<16x38xf32>
    %446 = vector.extract_strided_slice %406 {offsets = [0, 2], sizes = [16, 38], strides = [1, 1]} : vector<16x40xf32> to vector<16x38xf32>
    %c4_226 = arith.constant 4 : index
    %c8_227 = arith.constant 8 : index
    %447 = memref.load %arg3[%c4_226, %c8_227] : memref<8x9xf32, #tpu.memory_space<smem>>
    %448 = vector.broadcast %447 : f32 to vector<16x38xf32>
    %449 = arith.mulf %446, %448 : vector<16x38xf32>
    %450 = arith.addf %445, %449 : vector<16x38xf32>
    %c8_228 = arith.constant 8 : index
    %451 = memref.load %arg4[%c8_228] : memref<16xf32, #tpu.memory_space<smem>>
    %452 = vector.broadcast %451 : f32 to vector<16x38xf32>
    %453 = arith.mulf %450, %452 : vector<16x38xf32>
    %c8_229 = arith.constant 8 : index
    %454 = memref.load %arg5[%c8_229] : memref<16xf32, #tpu.memory_space<smem>>
    %455 = vector.broadcast %454 : f32 to vector<16x38xf32>
    %456 = arith.addf %453, %455 : vector<16x38xf32>
    %cst_230 = arith.constant 0.000000e+00 : f32
    %457 = vector.broadcast %cst_230 : f32 to vector<16x38xf32>
    %458 = arith.maximumf %456, %457 : vector<16x38xf32>
    %c0_231 = arith.constant 0 : index
    %c8_232 = arith.constant 8 : index
    %459 = memref.load %arg6[%c0_231, %c8_232] : memref<4x16xf32, #tpu.memory_space<smem>>
    %460 = vector.broadcast %459 : f32 to vector<16x38xf32>
    %461 = arith.mulf %458, %460 : vector<16x38xf32>
    %462 = arith.addf %388, %461 : vector<16x38xf32>
    %c1_233 = arith.constant 1 : index
    %c8_234 = arith.constant 8 : index
    %463 = memref.load %arg6[%c1_233, %c8_234] : memref<4x16xf32, #tpu.memory_space<smem>>
    %464 = vector.broadcast %463 : f32 to vector<16x38xf32>
    %465 = arith.mulf %458, %464 : vector<16x38xf32>
    %466 = arith.addf %392, %465 : vector<16x38xf32>
    %c2_235 = arith.constant 2 : index
    %c8_236 = arith.constant 8 : index
    %467 = memref.load %arg6[%c2_235, %c8_236] : memref<4x16xf32, #tpu.memory_space<smem>>
    %468 = vector.broadcast %467 : f32 to vector<16x38xf32>
    %469 = arith.mulf %458, %468 : vector<16x38xf32>
    %470 = arith.addf %396, %469 : vector<16x38xf32>
    %c3_237 = arith.constant 3 : index
    %c8_238 = arith.constant 8 : index
    %471 = memref.load %arg6[%c3_237, %c8_238] : memref<4x16xf32, #tpu.memory_space<smem>>
    %472 = vector.broadcast %471 : f32 to vector<16x38xf32>
    %473 = arith.mulf %458, %472 : vector<16x38xf32>
    %474 = arith.addf %400, %473 : vector<16x38xf32>
    %c9 = arith.constant 9 : index
    %475 = memref.load %arg4[%c9] : memref<16xf32, #tpu.memory_space<smem>>
    %476 = vector.broadcast %475 : f32 to vector<16x38xf32>
    %477 = arith.mulf %450, %476 : vector<16x38xf32>
    %c9_239 = arith.constant 9 : index
    %478 = memref.load %arg5[%c9_239] : memref<16xf32, #tpu.memory_space<smem>>
    %479 = vector.broadcast %478 : f32 to vector<16x38xf32>
    %480 = arith.addf %477, %479 : vector<16x38xf32>
    %cst_240 = arith.constant 0.000000e+00 : f32
    %481 = vector.broadcast %cst_240 : f32 to vector<16x38xf32>
    %482 = arith.maximumf %480, %481 : vector<16x38xf32>
    %c0_241 = arith.constant 0 : index
    %c9_242 = arith.constant 9 : index
    %483 = memref.load %arg6[%c0_241, %c9_242] : memref<4x16xf32, #tpu.memory_space<smem>>
    %484 = vector.broadcast %483 : f32 to vector<16x38xf32>
    %485 = arith.mulf %482, %484 : vector<16x38xf32>
    %486 = arith.addf %462, %485 : vector<16x38xf32>
    %c1_243 = arith.constant 1 : index
    %c9_244 = arith.constant 9 : index
    %487 = memref.load %arg6[%c1_243, %c9_244] : memref<4x16xf32, #tpu.memory_space<smem>>
    %488 = vector.broadcast %487 : f32 to vector<16x38xf32>
    %489 = arith.mulf %482, %488 : vector<16x38xf32>
    %490 = arith.addf %466, %489 : vector<16x38xf32>
    %c2_245 = arith.constant 2 : index
    %c9_246 = arith.constant 9 : index
    %491 = memref.load %arg6[%c2_245, %c9_246] : memref<4x16xf32, #tpu.memory_space<smem>>
    %492 = vector.broadcast %491 : f32 to vector<16x38xf32>
    %493 = arith.mulf %482, %492 : vector<16x38xf32>
    %494 = arith.addf %470, %493 : vector<16x38xf32>
    %c3_247 = arith.constant 3 : index
    %c9_248 = arith.constant 9 : index
    %495 = memref.load %arg6[%c3_247, %c9_248] : memref<4x16xf32, #tpu.memory_space<smem>>
    %496 = vector.broadcast %495 : f32 to vector<16x38xf32>
    %497 = arith.mulf %482, %496 : vector<16x38xf32>
    %498 = arith.addf %474, %497 : vector<16x38xf32>
    %499 = vector.extract_strided_slice %402 {offsets = [0, 0], sizes = [16, 38], strides = [1, 1]} : vector<16x40xf32> to vector<16x38xf32>
    %c5_249 = arith.constant 5 : index
    %c0_250 = arith.constant 0 : index
    %500 = memref.load %arg3[%c5_249, %c0_250] : memref<8x9xf32, #tpu.memory_space<smem>>
    %501 = vector.broadcast %500 : f32 to vector<16x38xf32>
    %502 = arith.mulf %499, %501 : vector<16x38xf32>
    %503 = vector.extract_strided_slice %402 {offsets = [0, 1], sizes = [16, 38], strides = [1, 1]} : vector<16x40xf32> to vector<16x38xf32>
    %c5_251 = arith.constant 5 : index
    %c1_252 = arith.constant 1 : index
    %504 = memref.load %arg3[%c5_251, %c1_252] : memref<8x9xf32, #tpu.memory_space<smem>>
    %505 = vector.broadcast %504 : f32 to vector<16x38xf32>
    %506 = arith.mulf %503, %505 : vector<16x38xf32>
    %507 = arith.addf %502, %506 : vector<16x38xf32>
    %508 = vector.extract_strided_slice %402 {offsets = [0, 2], sizes = [16, 38], strides = [1, 1]} : vector<16x40xf32> to vector<16x38xf32>
    %c5_253 = arith.constant 5 : index
    %c2_254 = arith.constant 2 : index
    %509 = memref.load %arg3[%c5_253, %c2_254] : memref<8x9xf32, #tpu.memory_space<smem>>
    %510 = vector.broadcast %509 : f32 to vector<16x38xf32>
    %511 = arith.mulf %508, %510 : vector<16x38xf32>
    %512 = arith.addf %507, %511 : vector<16x38xf32>
    %513 = vector.extract_strided_slice %404 {offsets = [0, 0], sizes = [16, 38], strides = [1, 1]} : vector<16x40xf32> to vector<16x38xf32>
    %c5_255 = arith.constant 5 : index
    %c3_256 = arith.constant 3 : index
    %514 = memref.load %arg3[%c5_255, %c3_256] : memref<8x9xf32, #tpu.memory_space<smem>>
    %515 = vector.broadcast %514 : f32 to vector<16x38xf32>
    %516 = arith.mulf %513, %515 : vector<16x38xf32>
    %517 = arith.addf %512, %516 : vector<16x38xf32>
    %518 = vector.extract_strided_slice %404 {offsets = [0, 1], sizes = [16, 38], strides = [1, 1]} : vector<16x40xf32> to vector<16x38xf32>
    %c5_257 = arith.constant 5 : index
    %c4_258 = arith.constant 4 : index
    %519 = memref.load %arg3[%c5_257, %c4_258] : memref<8x9xf32, #tpu.memory_space<smem>>
    %520 = vector.broadcast %519 : f32 to vector<16x38xf32>
    %521 = arith.mulf %518, %520 : vector<16x38xf32>
    %522 = arith.addf %517, %521 : vector<16x38xf32>
    %523 = vector.extract_strided_slice %404 {offsets = [0, 2], sizes = [16, 38], strides = [1, 1]} : vector<16x40xf32> to vector<16x38xf32>
    %c5_259 = arith.constant 5 : index
    %c5_260 = arith.constant 5 : index
    %524 = memref.load %arg3[%c5_259, %c5_260] : memref<8x9xf32, #tpu.memory_space<smem>>
    %525 = vector.broadcast %524 : f32 to vector<16x38xf32>
    %526 = arith.mulf %523, %525 : vector<16x38xf32>
    %527 = arith.addf %522, %526 : vector<16x38xf32>
    %528 = vector.extract_strided_slice %406 {offsets = [0, 0], sizes = [16, 38], strides = [1, 1]} : vector<16x40xf32> to vector<16x38xf32>
    %c5_261 = arith.constant 5 : index
    %c6_262 = arith.constant 6 : index
    %529 = memref.load %arg3[%c5_261, %c6_262] : memref<8x9xf32, #tpu.memory_space<smem>>
    %530 = vector.broadcast %529 : f32 to vector<16x38xf32>
    %531 = arith.mulf %528, %530 : vector<16x38xf32>
    %532 = arith.addf %527, %531 : vector<16x38xf32>
    %533 = vector.extract_strided_slice %406 {offsets = [0, 1], sizes = [16, 38], strides = [1, 1]} : vector<16x40xf32> to vector<16x38xf32>
    %c5_263 = arith.constant 5 : index
    %c7_264 = arith.constant 7 : index
    %534 = memref.load %arg3[%c5_263, %c7_264] : memref<8x9xf32, #tpu.memory_space<smem>>
    %535 = vector.broadcast %534 : f32 to vector<16x38xf32>
    %536 = arith.mulf %533, %535 : vector<16x38xf32>
    %537 = arith.addf %532, %536 : vector<16x38xf32>
    %538 = vector.extract_strided_slice %406 {offsets = [0, 2], sizes = [16, 38], strides = [1, 1]} : vector<16x40xf32> to vector<16x38xf32>
    %c5_265 = arith.constant 5 : index
    %c8_266 = arith.constant 8 : index
    %539 = memref.load %arg3[%c5_265, %c8_266] : memref<8x9xf32, #tpu.memory_space<smem>>
    %540 = vector.broadcast %539 : f32 to vector<16x38xf32>
    %541 = arith.mulf %538, %540 : vector<16x38xf32>
    %542 = arith.addf %537, %541 : vector<16x38xf32>
    %c10 = arith.constant 10 : index
    %543 = memref.load %arg4[%c10] : memref<16xf32, #tpu.memory_space<smem>>
    %544 = vector.broadcast %543 : f32 to vector<16x38xf32>
    %545 = arith.mulf %542, %544 : vector<16x38xf32>
    %c10_267 = arith.constant 10 : index
    %546 = memref.load %arg5[%c10_267] : memref<16xf32, #tpu.memory_space<smem>>
    %547 = vector.broadcast %546 : f32 to vector<16x38xf32>
    %548 = arith.addf %545, %547 : vector<16x38xf32>
    %cst_268 = arith.constant 0.000000e+00 : f32
    %549 = vector.broadcast %cst_268 : f32 to vector<16x38xf32>
    %550 = arith.maximumf %548, %549 : vector<16x38xf32>
    %c0_269 = arith.constant 0 : index
    %c10_270 = arith.constant 10 : index
    %551 = memref.load %arg6[%c0_269, %c10_270] : memref<4x16xf32, #tpu.memory_space<smem>>
    %552 = vector.broadcast %551 : f32 to vector<16x38xf32>
    %553 = arith.mulf %550, %552 : vector<16x38xf32>
    %554 = arith.addf %486, %553 : vector<16x38xf32>
    %c1_271 = arith.constant 1 : index
    %c10_272 = arith.constant 10 : index
    %555 = memref.load %arg6[%c1_271, %c10_272] : memref<4x16xf32, #tpu.memory_space<smem>>
    %556 = vector.broadcast %555 : f32 to vector<16x38xf32>
    %557 = arith.mulf %550, %556 : vector<16x38xf32>
    %558 = arith.addf %490, %557 : vector<16x38xf32>
    %c2_273 = arith.constant 2 : index
    %c10_274 = arith.constant 10 : index
    %559 = memref.load %arg6[%c2_273, %c10_274] : memref<4x16xf32, #tpu.memory_space<smem>>
    %560 = vector.broadcast %559 : f32 to vector<16x38xf32>
    %561 = arith.mulf %550, %560 : vector<16x38xf32>
    %562 = arith.addf %494, %561 : vector<16x38xf32>
    %c3_275 = arith.constant 3 : index
    %c10_276 = arith.constant 10 : index
    %563 = memref.load %arg6[%c3_275, %c10_276] : memref<4x16xf32, #tpu.memory_space<smem>>
    %564 = vector.broadcast %563 : f32 to vector<16x38xf32>
    %565 = arith.mulf %550, %564 : vector<16x38xf32>
    %566 = arith.addf %498, %565 : vector<16x38xf32>
    %c11 = arith.constant 11 : index
    %567 = memref.load %arg4[%c11] : memref<16xf32, #tpu.memory_space<smem>>
    %568 = vector.broadcast %567 : f32 to vector<16x38xf32>
    %569 = arith.mulf %542, %568 : vector<16x38xf32>
    %c11_277 = arith.constant 11 : index
    %570 = memref.load %arg5[%c11_277] : memref<16xf32, #tpu.memory_space<smem>>
    %571 = vector.broadcast %570 : f32 to vector<16x38xf32>
    %572 = arith.addf %569, %571 : vector<16x38xf32>
    %cst_278 = arith.constant 0.000000e+00 : f32
    %573 = vector.broadcast %cst_278 : f32 to vector<16x38xf32>
    %574 = arith.maximumf %572, %573 : vector<16x38xf32>
    %c0_279 = arith.constant 0 : index
    %c11_280 = arith.constant 11 : index
    %575 = memref.load %arg6[%c0_279, %c11_280] : memref<4x16xf32, #tpu.memory_space<smem>>
    %576 = vector.broadcast %575 : f32 to vector<16x38xf32>
    %577 = arith.mulf %574, %576 : vector<16x38xf32>
    %578 = arith.addf %554, %577 : vector<16x38xf32>
    %c1_281 = arith.constant 1 : index
    %c11_282 = arith.constant 11 : index
    %579 = memref.load %arg6[%c1_281, %c11_282] : memref<4x16xf32, #tpu.memory_space<smem>>
    %580 = vector.broadcast %579 : f32 to vector<16x38xf32>
    %581 = arith.mulf %574, %580 : vector<16x38xf32>
    %582 = arith.addf %558, %581 : vector<16x38xf32>
    %c2_283 = arith.constant 2 : index
    %c11_284 = arith.constant 11 : index
    %583 = memref.load %arg6[%c2_283, %c11_284] : memref<4x16xf32, #tpu.memory_space<smem>>
    %584 = vector.broadcast %583 : f32 to vector<16x38xf32>
    %585 = arith.mulf %574, %584 : vector<16x38xf32>
    %586 = arith.addf %562, %585 : vector<16x38xf32>
    %c3_285 = arith.constant 3 : index
    %c11_286 = arith.constant 11 : index
    %587 = memref.load %arg6[%c3_285, %c11_286] : memref<4x16xf32, #tpu.memory_space<smem>>
    %588 = vector.broadcast %587 : f32 to vector<16x38xf32>
    %589 = arith.mulf %574, %588 : vector<16x38xf32>
    %590 = arith.addf %566, %589 : vector<16x38xf32>
    %c0_287 = arith.constant 0 : index
    %c3_288 = arith.constant 3 : index
    %c1_289 = arith.constant 1 : index
    %c0_290 = arith.constant 0 : index
    %591 = vector.load %arg1[%c0_287, %c3_288, %c1_289, %c0_290] : memref<1x4x20x40xf32, #tpu.memory_space<vmem>>, vector<1x1x16x40xf32>
    %592 = vector.shape_cast %591 : vector<1x1x16x40xf32> to vector<16x40xf32>
    %c0_291 = arith.constant 0 : index
    %c3_292 = arith.constant 3 : index
    %c2_293 = arith.constant 2 : index
    %c0_294 = arith.constant 0 : index
    %593 = vector.load %arg1[%c0_291, %c3_292, %c2_293, %c0_294] : memref<1x4x20x40xf32, #tpu.memory_space<vmem>>, vector<1x1x16x40xf32>
    %594 = vector.shape_cast %593 : vector<1x1x16x40xf32> to vector<16x40xf32>
    %c0_295 = arith.constant 0 : index
    %c3_296 = arith.constant 3 : index
    %c3_297 = arith.constant 3 : index
    %c0_298 = arith.constant 0 : index
    %595 = vector.load %arg1[%c0_295, %c3_296, %c3_297, %c0_298] : memref<1x4x20x40xf32, #tpu.memory_space<vmem>>, vector<1x1x16x40xf32>
    %596 = vector.shape_cast %595 : vector<1x1x16x40xf32> to vector<16x40xf32>
    %597 = vector.extract_strided_slice %592 {offsets = [0, 0], sizes = [16, 38], strides = [1, 1]} : vector<16x40xf32> to vector<16x38xf32>
    %c6_299 = arith.constant 6 : index
    %c0_300 = arith.constant 0 : index
    %598 = memref.load %arg3[%c6_299, %c0_300] : memref<8x9xf32, #tpu.memory_space<smem>>
    %599 = vector.broadcast %598 : f32 to vector<16x38xf32>
    %600 = arith.mulf %597, %599 : vector<16x38xf32>
    %601 = vector.extract_strided_slice %592 {offsets = [0, 1], sizes = [16, 38], strides = [1, 1]} : vector<16x40xf32> to vector<16x38xf32>
    %c6_301 = arith.constant 6 : index
    %c1_302 = arith.constant 1 : index
    %602 = memref.load %arg3[%c6_301, %c1_302] : memref<8x9xf32, #tpu.memory_space<smem>>
    %603 = vector.broadcast %602 : f32 to vector<16x38xf32>
    %604 = arith.mulf %601, %603 : vector<16x38xf32>
    %605 = arith.addf %600, %604 : vector<16x38xf32>
    %606 = vector.extract_strided_slice %592 {offsets = [0, 2], sizes = [16, 38], strides = [1, 1]} : vector<16x40xf32> to vector<16x38xf32>
    %c6_303 = arith.constant 6 : index
    %c2_304 = arith.constant 2 : index
    %607 = memref.load %arg3[%c6_303, %c2_304] : memref<8x9xf32, #tpu.memory_space<smem>>
    %608 = vector.broadcast %607 : f32 to vector<16x38xf32>
    %609 = arith.mulf %606, %608 : vector<16x38xf32>
    %610 = arith.addf %605, %609 : vector<16x38xf32>
    %611 = vector.extract_strided_slice %594 {offsets = [0, 0], sizes = [16, 38], strides = [1, 1]} : vector<16x40xf32> to vector<16x38xf32>
    %c6_305 = arith.constant 6 : index
    %c3_306 = arith.constant 3 : index
    %612 = memref.load %arg3[%c6_305, %c3_306] : memref<8x9xf32, #tpu.memory_space<smem>>
    %613 = vector.broadcast %612 : f32 to vector<16x38xf32>
    %614 = arith.mulf %611, %613 : vector<16x38xf32>
    %615 = arith.addf %610, %614 : vector<16x38xf32>
    %616 = vector.extract_strided_slice %594 {offsets = [0, 1], sizes = [16, 38], strides = [1, 1]} : vector<16x40xf32> to vector<16x38xf32>
    %c6_307 = arith.constant 6 : index
    %c4_308 = arith.constant 4 : index
    %617 = memref.load %arg3[%c6_307, %c4_308] : memref<8x9xf32, #tpu.memory_space<smem>>
    %618 = vector.broadcast %617 : f32 to vector<16x38xf32>
    %619 = arith.mulf %616, %618 : vector<16x38xf32>
    %620 = arith.addf %615, %619 : vector<16x38xf32>
    %621 = vector.extract_strided_slice %594 {offsets = [0, 2], sizes = [16, 38], strides = [1, 1]} : vector<16x40xf32> to vector<16x38xf32>
    %c6_309 = arith.constant 6 : index
    %c5_310 = arith.constant 5 : index
    %622 = memref.load %arg3[%c6_309, %c5_310] : memref<8x9xf32, #tpu.memory_space<smem>>
    %623 = vector.broadcast %622 : f32 to vector<16x38xf32>
    %624 = arith.mulf %621, %623 : vector<16x38xf32>
    %625 = arith.addf %620, %624 : vector<16x38xf32>
    %626 = vector.extract_strided_slice %596 {offsets = [0, 0], sizes = [16, 38], strides = [1, 1]} : vector<16x40xf32> to vector<16x38xf32>
    %c6_311 = arith.constant 6 : index
    %c6_312 = arith.constant 6 : index
    %627 = memref.load %arg3[%c6_311, %c6_312] : memref<8x9xf32, #tpu.memory_space<smem>>
    %628 = vector.broadcast %627 : f32 to vector<16x38xf32>
    %629 = arith.mulf %626, %628 : vector<16x38xf32>
    %630 = arith.addf %625, %629 : vector<16x38xf32>
    %631 = vector.extract_strided_slice %596 {offsets = [0, 1], sizes = [16, 38], strides = [1, 1]} : vector<16x40xf32> to vector<16x38xf32>
    %c6_313 = arith.constant 6 : index
    %c7_314 = arith.constant 7 : index
    %632 = memref.load %arg3[%c6_313, %c7_314] : memref<8x9xf32, #tpu.memory_space<smem>>
    %633 = vector.broadcast %632 : f32 to vector<16x38xf32>
    %634 = arith.mulf %631, %633 : vector<16x38xf32>
    %635 = arith.addf %630, %634 : vector<16x38xf32>
    %636 = vector.extract_strided_slice %596 {offsets = [0, 2], sizes = [16, 38], strides = [1, 1]} : vector<16x40xf32> to vector<16x38xf32>
    %c6_315 = arith.constant 6 : index
    %c8_316 = arith.constant 8 : index
    %637 = memref.load %arg3[%c6_315, %c8_316] : memref<8x9xf32, #tpu.memory_space<smem>>
    %638 = vector.broadcast %637 : f32 to vector<16x38xf32>
    %639 = arith.mulf %636, %638 : vector<16x38xf32>
    %640 = arith.addf %635, %639 : vector<16x38xf32>
    %c12 = arith.constant 12 : index
    %641 = memref.load %arg4[%c12] : memref<16xf32, #tpu.memory_space<smem>>
    %642 = vector.broadcast %641 : f32 to vector<16x38xf32>
    %643 = arith.mulf %640, %642 : vector<16x38xf32>
    %c12_317 = arith.constant 12 : index
    %644 = memref.load %arg5[%c12_317] : memref<16xf32, #tpu.memory_space<smem>>
    %645 = vector.broadcast %644 : f32 to vector<16x38xf32>
    %646 = arith.addf %643, %645 : vector<16x38xf32>
    %cst_318 = arith.constant 0.000000e+00 : f32
    %647 = vector.broadcast %cst_318 : f32 to vector<16x38xf32>
    %648 = arith.maximumf %646, %647 : vector<16x38xf32>
    %c0_319 = arith.constant 0 : index
    %c12_320 = arith.constant 12 : index
    %649 = memref.load %arg6[%c0_319, %c12_320] : memref<4x16xf32, #tpu.memory_space<smem>>
    %650 = vector.broadcast %649 : f32 to vector<16x38xf32>
    %651 = arith.mulf %648, %650 : vector<16x38xf32>
    %652 = arith.addf %578, %651 : vector<16x38xf32>
    %c1_321 = arith.constant 1 : index
    %c12_322 = arith.constant 12 : index
    %653 = memref.load %arg6[%c1_321, %c12_322] : memref<4x16xf32, #tpu.memory_space<smem>>
    %654 = vector.broadcast %653 : f32 to vector<16x38xf32>
    %655 = arith.mulf %648, %654 : vector<16x38xf32>
    %656 = arith.addf %582, %655 : vector<16x38xf32>
    %c2_323 = arith.constant 2 : index
    %c12_324 = arith.constant 12 : index
    %657 = memref.load %arg6[%c2_323, %c12_324] : memref<4x16xf32, #tpu.memory_space<smem>>
    %658 = vector.broadcast %657 : f32 to vector<16x38xf32>
    %659 = arith.mulf %648, %658 : vector<16x38xf32>
    %660 = arith.addf %586, %659 : vector<16x38xf32>
    %c3_325 = arith.constant 3 : index
    %c12_326 = arith.constant 12 : index
    %661 = memref.load %arg6[%c3_325, %c12_326] : memref<4x16xf32, #tpu.memory_space<smem>>
    %662 = vector.broadcast %661 : f32 to vector<16x38xf32>
    %663 = arith.mulf %648, %662 : vector<16x38xf32>
    %664 = arith.addf %590, %663 : vector<16x38xf32>
    %c13 = arith.constant 13 : index
    %665 = memref.load %arg4[%c13] : memref<16xf32, #tpu.memory_space<smem>>
    %666 = vector.broadcast %665 : f32 to vector<16x38xf32>
    %667 = arith.mulf %640, %666 : vector<16x38xf32>
    %c13_327 = arith.constant 13 : index
    %668 = memref.load %arg5[%c13_327] : memref<16xf32, #tpu.memory_space<smem>>
    %669 = vector.broadcast %668 : f32 to vector<16x38xf32>
    %670 = arith.addf %667, %669 : vector<16x38xf32>
    %cst_328 = arith.constant 0.000000e+00 : f32
    %671 = vector.broadcast %cst_328 : f32 to vector<16x38xf32>
    %672 = arith.maximumf %670, %671 : vector<16x38xf32>
    %c0_329 = arith.constant 0 : index
    %c13_330 = arith.constant 13 : index
    %673 = memref.load %arg6[%c0_329, %c13_330] : memref<4x16xf32, #tpu.memory_space<smem>>
    %674 = vector.broadcast %673 : f32 to vector<16x38xf32>
    %675 = arith.mulf %672, %674 : vector<16x38xf32>
    %676 = arith.addf %652, %675 : vector<16x38xf32>
    %c1_331 = arith.constant 1 : index
    %c13_332 = arith.constant 13 : index
    %677 = memref.load %arg6[%c1_331, %c13_332] : memref<4x16xf32, #tpu.memory_space<smem>>
    %678 = vector.broadcast %677 : f32 to vector<16x38xf32>
    %679 = arith.mulf %672, %678 : vector<16x38xf32>
    %680 = arith.addf %656, %679 : vector<16x38xf32>
    %c2_333 = arith.constant 2 : index
    %c13_334 = arith.constant 13 : index
    %681 = memref.load %arg6[%c2_333, %c13_334] : memref<4x16xf32, #tpu.memory_space<smem>>
    %682 = vector.broadcast %681 : f32 to vector<16x38xf32>
    %683 = arith.mulf %672, %682 : vector<16x38xf32>
    %684 = arith.addf %660, %683 : vector<16x38xf32>
    %c3_335 = arith.constant 3 : index
    %c13_336 = arith.constant 13 : index
    %685 = memref.load %arg6[%c3_335, %c13_336] : memref<4x16xf32, #tpu.memory_space<smem>>
    %686 = vector.broadcast %685 : f32 to vector<16x38xf32>
    %687 = arith.mulf %672, %686 : vector<16x38xf32>
    %688 = arith.addf %664, %687 : vector<16x38xf32>
    %689 = vector.extract_strided_slice %592 {offsets = [0, 0], sizes = [16, 38], strides = [1, 1]} : vector<16x40xf32> to vector<16x38xf32>
    %c7_337 = arith.constant 7 : index
    %c0_338 = arith.constant 0 : index
    %690 = memref.load %arg3[%c7_337, %c0_338] : memref<8x9xf32, #tpu.memory_space<smem>>
    %691 = vector.broadcast %690 : f32 to vector<16x38xf32>
    %692 = arith.mulf %689, %691 : vector<16x38xf32>
    %693 = vector.extract_strided_slice %592 {offsets = [0, 1], sizes = [16, 38], strides = [1, 1]} : vector<16x40xf32> to vector<16x38xf32>
    %c7_339 = arith.constant 7 : index
    %c1_340 = arith.constant 1 : index
    %694 = memref.load %arg3[%c7_339, %c1_340] : memref<8x9xf32, #tpu.memory_space<smem>>
    %695 = vector.broadcast %694 : f32 to vector<16x38xf32>
    %696 = arith.mulf %693, %695 : vector<16x38xf32>
    %697 = arith.addf %692, %696 : vector<16x38xf32>
    %698 = vector.extract_strided_slice %592 {offsets = [0, 2], sizes = [16, 38], strides = [1, 1]} : vector<16x40xf32> to vector<16x38xf32>
    %c7_341 = arith.constant 7 : index
    %c2_342 = arith.constant 2 : index
    %699 = memref.load %arg3[%c7_341, %c2_342] : memref<8x9xf32, #tpu.memory_space<smem>>
    %700 = vector.broadcast %699 : f32 to vector<16x38xf32>
    %701 = arith.mulf %698, %700 : vector<16x38xf32>
    %702 = arith.addf %697, %701 : vector<16x38xf32>
    %703 = vector.extract_strided_slice %594 {offsets = [0, 0], sizes = [16, 38], strides = [1, 1]} : vector<16x40xf32> to vector<16x38xf32>
    %c7_343 = arith.constant 7 : index
    %c3_344 = arith.constant 3 : index
    %704 = memref.load %arg3[%c7_343, %c3_344] : memref<8x9xf32, #tpu.memory_space<smem>>
    %705 = vector.broadcast %704 : f32 to vector<16x38xf32>
    %706 = arith.mulf %703, %705 : vector<16x38xf32>
    %707 = arith.addf %702, %706 : vector<16x38xf32>
    %708 = vector.extract_strided_slice %594 {offsets = [0, 1], sizes = [16, 38], strides = [1, 1]} : vector<16x40xf32> to vector<16x38xf32>
    %c7_345 = arith.constant 7 : index
    %c4_346 = arith.constant 4 : index
    %709 = memref.load %arg3[%c7_345, %c4_346] : memref<8x9xf32, #tpu.memory_space<smem>>
    %710 = vector.broadcast %709 : f32 to vector<16x38xf32>
    %711 = arith.mulf %708, %710 : vector<16x38xf32>
    %712 = arith.addf %707, %711 : vector<16x38xf32>
    %713 = vector.extract_strided_slice %594 {offsets = [0, 2], sizes = [16, 38], strides = [1, 1]} : vector<16x40xf32> to vector<16x38xf32>
    %c7_347 = arith.constant 7 : index
    %c5_348 = arith.constant 5 : index
    %714 = memref.load %arg3[%c7_347, %c5_348] : memref<8x9xf32, #tpu.memory_space<smem>>
    %715 = vector.broadcast %714 : f32 to vector<16x38xf32>
    %716 = arith.mulf %713, %715 : vector<16x38xf32>
    %717 = arith.addf %712, %716 : vector<16x38xf32>
    %718 = vector.extract_strided_slice %596 {offsets = [0, 0], sizes = [16, 38], strides = [1, 1]} : vector<16x40xf32> to vector<16x38xf32>
    %c7_349 = arith.constant 7 : index
    %c6_350 = arith.constant 6 : index
    %719 = memref.load %arg3[%c7_349, %c6_350] : memref<8x9xf32, #tpu.memory_space<smem>>
    %720 = vector.broadcast %719 : f32 to vector<16x38xf32>
    %721 = arith.mulf %718, %720 : vector<16x38xf32>
    %722 = arith.addf %717, %721 : vector<16x38xf32>
    %723 = vector.extract_strided_slice %596 {offsets = [0, 1], sizes = [16, 38], strides = [1, 1]} : vector<16x40xf32> to vector<16x38xf32>
    %c7_351 = arith.constant 7 : index
    %c7_352 = arith.constant 7 : index
    %724 = memref.load %arg3[%c7_351, %c7_352] : memref<8x9xf32, #tpu.memory_space<smem>>
    %725 = vector.broadcast %724 : f32 to vector<16x38xf32>
    %726 = arith.mulf %723, %725 : vector<16x38xf32>
    %727 = arith.addf %722, %726 : vector<16x38xf32>
    %728 = vector.extract_strided_slice %596 {offsets = [0, 2], sizes = [16, 38], strides = [1, 1]} : vector<16x40xf32> to vector<16x38xf32>
    %c7_353 = arith.constant 7 : index
    %c8_354 = arith.constant 8 : index
    %729 = memref.load %arg3[%c7_353, %c8_354] : memref<8x9xf32, #tpu.memory_space<smem>>
    %730 = vector.broadcast %729 : f32 to vector<16x38xf32>
    %731 = arith.mulf %728, %730 : vector<16x38xf32>
    %732 = arith.addf %727, %731 : vector<16x38xf32>
    %c14 = arith.constant 14 : index
    %733 = memref.load %arg4[%c14] : memref<16xf32, #tpu.memory_space<smem>>
    %734 = vector.broadcast %733 : f32 to vector<16x38xf32>
    %735 = arith.mulf %732, %734 : vector<16x38xf32>
    %c14_355 = arith.constant 14 : index
    %736 = memref.load %arg5[%c14_355] : memref<16xf32, #tpu.memory_space<smem>>
    %737 = vector.broadcast %736 : f32 to vector<16x38xf32>
    %738 = arith.addf %735, %737 : vector<16x38xf32>
    %cst_356 = arith.constant 0.000000e+00 : f32
    %739 = vector.broadcast %cst_356 : f32 to vector<16x38xf32>
    %740 = arith.maximumf %738, %739 : vector<16x38xf32>
    %c0_357 = arith.constant 0 : index
    %c14_358 = arith.constant 14 : index
    %741 = memref.load %arg6[%c0_357, %c14_358] : memref<4x16xf32, #tpu.memory_space<smem>>
    %742 = vector.broadcast %741 : f32 to vector<16x38xf32>
    %743 = arith.mulf %740, %742 : vector<16x38xf32>
    %744 = arith.addf %676, %743 : vector<16x38xf32>
    %c1_359 = arith.constant 1 : index
    %c14_360 = arith.constant 14 : index
    %745 = memref.load %arg6[%c1_359, %c14_360] : memref<4x16xf32, #tpu.memory_space<smem>>
    %746 = vector.broadcast %745 : f32 to vector<16x38xf32>
    %747 = arith.mulf %740, %746 : vector<16x38xf32>
    %748 = arith.addf %680, %747 : vector<16x38xf32>
    %c2_361 = arith.constant 2 : index
    %c14_362 = arith.constant 14 : index
    %749 = memref.load %arg6[%c2_361, %c14_362] : memref<4x16xf32, #tpu.memory_space<smem>>
    %750 = vector.broadcast %749 : f32 to vector<16x38xf32>
    %751 = arith.mulf %740, %750 : vector<16x38xf32>
    %752 = arith.addf %684, %751 : vector<16x38xf32>
    %c3_363 = arith.constant 3 : index
    %c14_364 = arith.constant 14 : index
    %753 = memref.load %arg6[%c3_363, %c14_364] : memref<4x16xf32, #tpu.memory_space<smem>>
    %754 = vector.broadcast %753 : f32 to vector<16x38xf32>
    %755 = arith.mulf %740, %754 : vector<16x38xf32>
    %756 = arith.addf %688, %755 : vector<16x38xf32>
    %c15 = arith.constant 15 : index
    %757 = memref.load %arg4[%c15] : memref<16xf32, #tpu.memory_space<smem>>
    %758 = vector.broadcast %757 : f32 to vector<16x38xf32>
    %759 = arith.mulf %732, %758 : vector<16x38xf32>
    %c15_365 = arith.constant 15 : index
    %760 = memref.load %arg5[%c15_365] : memref<16xf32, #tpu.memory_space<smem>>
    %761 = vector.broadcast %760 : f32 to vector<16x38xf32>
    %762 = arith.addf %759, %761 : vector<16x38xf32>
    %cst_366 = arith.constant 0.000000e+00 : f32
    %763 = vector.broadcast %cst_366 : f32 to vector<16x38xf32>
    %764 = arith.maximumf %762, %763 : vector<16x38xf32>
    %c0_367 = arith.constant 0 : index
    %c15_368 = arith.constant 15 : index
    %765 = memref.load %arg6[%c0_367, %c15_368] : memref<4x16xf32, #tpu.memory_space<smem>>
    %766 = vector.broadcast %765 : f32 to vector<16x38xf32>
    %767 = arith.mulf %764, %766 : vector<16x38xf32>
    %768 = arith.addf %744, %767 : vector<16x38xf32>
    %c1_369 = arith.constant 1 : index
    %c15_370 = arith.constant 15 : index
    %769 = memref.load %arg6[%c1_369, %c15_370] : memref<4x16xf32, #tpu.memory_space<smem>>
    %770 = vector.broadcast %769 : f32 to vector<16x38xf32>
    %771 = arith.mulf %764, %770 : vector<16x38xf32>
    %772 = arith.addf %748, %771 : vector<16x38xf32>
    %c2_371 = arith.constant 2 : index
    %c15_372 = arith.constant 15 : index
    %773 = memref.load %arg6[%c2_371, %c15_372] : memref<4x16xf32, #tpu.memory_space<smem>>
    %774 = vector.broadcast %773 : f32 to vector<16x38xf32>
    %775 = arith.mulf %764, %774 : vector<16x38xf32>
    %776 = arith.addf %752, %775 : vector<16x38xf32>
    %c3_373 = arith.constant 3 : index
    %c15_374 = arith.constant 15 : index
    %777 = memref.load %arg6[%c3_373, %c15_374] : memref<4x16xf32, #tpu.memory_space<smem>>
    %778 = vector.broadcast %777 : f32 to vector<16x38xf32>
    %779 = arith.mulf %764, %778 : vector<16x38xf32>
    %780 = arith.addf %756, %779 : vector<16x38xf32>
    %c0_375 = arith.constant 0 : index
    %781 = memref.load %arg7[%c0_375] : memref<4xf32, #tpu.memory_space<smem>>
    %782 = vector.broadcast %781 : f32 to vector<16x38xf32>
    %783 = arith.addf %768, %782 : vector<16x38xf32>
    %c1_376 = arith.constant 1 : index
    %784 = memref.load %arg7[%c1_376] : memref<4xf32, #tpu.memory_space<smem>>
    %785 = vector.broadcast %784 : f32 to vector<16x38xf32>
    %786 = arith.addf %772, %785 : vector<16x38xf32>
    %c2_377 = arith.constant 2 : index
    %787 = memref.load %arg7[%c2_377] : memref<4xf32, #tpu.memory_space<smem>>
    %788 = vector.broadcast %787 : f32 to vector<16x38xf32>
    %789 = arith.addf %776, %788 : vector<16x38xf32>
    %c3_378 = arith.constant 3 : index
    %790 = memref.load %arg7[%c3_378] : memref<4xf32, #tpu.memory_space<smem>>
    %791 = vector.broadcast %790 : f32 to vector<16x38xf32>
    %792 = arith.addf %780, %791 : vector<16x38xf32>
    %c0_379 = arith.constant 0 : index
    %c0_380 = arith.constant 0 : index
    %793 = vector.load %arg2[%c0_379, %c0_380] : memref<16x38xf32, #tpu.memory_space<vmem>>, vector<16x38xf32>
    %cst_381 = arith.constant 0.000000e+00 : f32
    %794 = vector.broadcast %cst_381 : f32 to vector<16x38xf32>
    %795 = arith.maximumf %783, %794 : vector<16x38xf32>
    %796 = arith.mulf %795, %793 : vector<16x38xf32>
    %c0_382 = arith.constant 0 : index
    %c1_383 = arith.constant 1 : index
    %c0_384 = arith.constant 0 : index
    %797 = vector.load %arg14[%c0_382, %c1_383, %c0_384] : memref<4x18x38xf32, #tpu.memory_space<vmem>>, vector<1x16x38xf32>
    %798 = vector.shape_cast %797 : vector<1x16x38xf32> to vector<16x38xf32>
    %799 = vector.shape_cast %796 : vector<16x38xf32> to vector<1x16x38xf32>
    tpu.vector_store %arg14[%c0_382, %c1_383, %c0_384], %799 {strides = array<i32>} : memref<4x18x38xf32, #tpu.memory_space<vmem>>, vector<1x16x38xf32>,
    %cst_385 = arith.constant 0.000000e+00 : f32
    %800 = vector.broadcast %cst_385 : f32 to vector<16x38xf32>
    %801 = arith.maximumf %786, %800 : vector<16x38xf32>
    %802 = arith.mulf %801, %793 : vector<16x38xf32>
    %c1_386 = arith.constant 1 : index
    %c1_387 = arith.constant 1 : index
    %c0_388 = arith.constant 0 : index
    %803 = vector.load %arg14[%c1_386, %c1_387, %c0_388] : memref<4x18x38xf32, #tpu.memory_space<vmem>>, vector<1x16x38xf32>
    %804 = vector.shape_cast %803 : vector<1x16x38xf32> to vector<16x38xf32>
    %805 = vector.shape_cast %802 : vector<16x38xf32> to vector<1x16x38xf32>
    tpu.vector_store %arg14[%c1_386, %c1_387, %c0_388], %805 {strides = array<i32>} : memref<4x18x38xf32, #tpu.memory_space<vmem>>, vector<1x16x38xf32>,
    %cst_389 = arith.constant 0.000000e+00 : f32
    %806 = vector.broadcast %cst_389 : f32 to vector<16x38xf32>
    %807 = arith.maximumf %789, %806 : vector<16x38xf32>
    %808 = arith.mulf %807, %793 : vector<16x38xf32>
    %c2_390 = arith.constant 2 : index
    %c1_391 = arith.constant 1 : index
    %c0_392 = arith.constant 0 : index
    %809 = vector.load %arg14[%c2_390, %c1_391, %c0_392] : memref<4x18x38xf32, #tpu.memory_space<vmem>>, vector<1x16x38xf32>
    %810 = vector.shape_cast %809 : vector<1x16x38xf32> to vector<16x38xf32>
    %811 = vector.shape_cast %808 : vector<16x38xf32> to vector<1x16x38xf32>
    tpu.vector_store %arg14[%c2_390, %c1_391, %c0_392], %811 {strides = array<i32>} : memref<4x18x38xf32, #tpu.memory_space<vmem>>, vector<1x16x38xf32>,
    %cst_393 = arith.constant 0.000000e+00 : f32
    %812 = vector.broadcast %cst_393 : f32 to vector<16x38xf32>
    %813 = arith.maximumf %792, %812 : vector<16x38xf32>
    %814 = arith.mulf %813, %793 : vector<16x38xf32>
    %c3_394 = arith.constant 3 : index
    %c1_395 = arith.constant 1 : index
    %c0_396 = arith.constant 0 : index
    %815 = vector.load %arg14[%c3_394, %c1_395, %c0_396] : memref<4x18x38xf32, #tpu.memory_space<vmem>>, vector<1x16x38xf32>
    %816 = vector.shape_cast %815 : vector<1x16x38xf32> to vector<16x38xf32>
    %817 = vector.shape_cast %814 : vector<16x38xf32> to vector<1x16x38xf32>
    tpu.vector_store %arg14[%c3_394, %c1_395, %c0_396], %817 {strides = array<i32>} : memref<4x18x38xf32, #tpu.memory_space<vmem>>, vector<1x16x38xf32>,
    %c0_397 = arith.constant 0 : index
    %c0_398 = arith.constant 0 : index
    %c0_399 = arith.constant 0 : index
    %818 = vector.load %arg14[%c0_397, %c0_398, %c0_399] : memref<4x18x38xf32, #tpu.memory_space<vmem>>, vector<1x16x38xf32>
    %819 = vector.shape_cast %818 : vector<1x16x38xf32> to vector<16x38xf32>
    %c0_400 = arith.constant 0 : index
    %c1_401 = arith.constant 1 : index
    %c0_402 = arith.constant 0 : index
    %820 = vector.load %arg14[%c0_400, %c1_401, %c0_402] : memref<4x18x38xf32, #tpu.memory_space<vmem>>, vector<1x16x38xf32>
    %821 = vector.shape_cast %820 : vector<1x16x38xf32> to vector<16x38xf32>
    %c0_403 = arith.constant 0 : index
    %c2_404 = arith.constant 2 : index
    %c0_405 = arith.constant 0 : index
    %822 = vector.load %arg14[%c0_403, %c2_404, %c0_405] : memref<4x18x38xf32, #tpu.memory_space<vmem>>, vector<1x16x38xf32>
    %823 = vector.shape_cast %822 : vector<1x16x38xf32> to vector<16x38xf32>
    %824 = vector.extract_strided_slice %819 {offsets = [0, 0], sizes = [16, 36], strides = [1, 1]} : vector<16x38xf32> to vector<16x36xf32>
    %c0_406 = arith.constant 0 : index
    %c0_407 = arith.constant 0 : index
    %825 = memref.load %arg8[%c0_406, %c0_407] : memref<8x9xf32, #tpu.memory_space<smem>>
    %826 = vector.broadcast %825 : f32 to vector<16x36xf32>
    %827 = arith.mulf %824, %826 : vector<16x36xf32>
    %828 = vector.extract_strided_slice %819 {offsets = [0, 1], sizes = [16, 36], strides = [1, 1]} : vector<16x38xf32> to vector<16x36xf32>
    %c0_408 = arith.constant 0 : index
    %c1_409 = arith.constant 1 : index
    %829 = memref.load %arg8[%c0_408, %c1_409] : memref<8x9xf32, #tpu.memory_space<smem>>
    %830 = vector.broadcast %829 : f32 to vector<16x36xf32>
    %831 = arith.mulf %828, %830 : vector<16x36xf32>
    %832 = arith.addf %827, %831 : vector<16x36xf32>
    %833 = vector.extract_strided_slice %819 {offsets = [0, 2], sizes = [16, 36], strides = [1, 1]} : vector<16x38xf32> to vector<16x36xf32>
    %c0_410 = arith.constant 0 : index
    %c2_411 = arith.constant 2 : index
    %834 = memref.load %arg8[%c0_410, %c2_411] : memref<8x9xf32, #tpu.memory_space<smem>>
    %835 = vector.broadcast %834 : f32 to vector<16x36xf32>
    %836 = arith.mulf %833, %835 : vector<16x36xf32>
    %837 = arith.addf %832, %836 : vector<16x36xf32>
    %838 = vector.extract_strided_slice %821 {offsets = [0, 0], sizes = [16, 36], strides = [1, 1]} : vector<16x38xf32> to vector<16x36xf32>
    %c0_412 = arith.constant 0 : index
    %c3_413 = arith.constant 3 : index
    %839 = memref.load %arg8[%c0_412, %c3_413] : memref<8x9xf32, #tpu.memory_space<smem>>
    %840 = vector.broadcast %839 : f32 to vector<16x36xf32>
    %841 = arith.mulf %838, %840 : vector<16x36xf32>
    %842 = arith.addf %837, %841 : vector<16x36xf32>
    %843 = vector.extract_strided_slice %821 {offsets = [0, 1], sizes = [16, 36], strides = [1, 1]} : vector<16x38xf32> to vector<16x36xf32>
    %c0_414 = arith.constant 0 : index
    %c4_415 = arith.constant 4 : index
    %844 = memref.load %arg8[%c0_414, %c4_415] : memref<8x9xf32, #tpu.memory_space<smem>>
    %845 = vector.broadcast %844 : f32 to vector<16x36xf32>
    %846 = arith.mulf %843, %845 : vector<16x36xf32>
    %847 = arith.addf %842, %846 : vector<16x36xf32>
    %848 = vector.extract_strided_slice %821 {offsets = [0, 2], sizes = [16, 36], strides = [1, 1]} : vector<16x38xf32> to vector<16x36xf32>
    %c0_416 = arith.constant 0 : index
    %c5_417 = arith.constant 5 : index
    %849 = memref.load %arg8[%c0_416, %c5_417] : memref<8x9xf32, #tpu.memory_space<smem>>
    %850 = vector.broadcast %849 : f32 to vector<16x36xf32>
    %851 = arith.mulf %848, %850 : vector<16x36xf32>
    %852 = arith.addf %847, %851 : vector<16x36xf32>
    %853 = vector.extract_strided_slice %823 {offsets = [0, 0], sizes = [16, 36], strides = [1, 1]} : vector<16x38xf32> to vector<16x36xf32>
    %c0_418 = arith.constant 0 : index
    %c6_419 = arith.constant 6 : index
    %854 = memref.load %arg8[%c0_418, %c6_419] : memref<8x9xf32, #tpu.memory_space<smem>>
    %855 = vector.broadcast %854 : f32 to vector<16x36xf32>
    %856 = arith.mulf %853, %855 : vector<16x36xf32>
    %857 = arith.addf %852, %856 : vector<16x36xf32>
    %858 = vector.extract_strided_slice %823 {offsets = [0, 1], sizes = [16, 36], strides = [1, 1]} : vector<16x38xf32> to vector<16x36xf32>
    %c0_420 = arith.constant 0 : index
    %c7_421 = arith.constant 7 : index
    %859 = memref.load %arg8[%c0_420, %c7_421] : memref<8x9xf32, #tpu.memory_space<smem>>
    %860 = vector.broadcast %859 : f32 to vector<16x36xf32>
    %861 = arith.mulf %858, %860 : vector<16x36xf32>
    %862 = arith.addf %857, %861 : vector<16x36xf32>
    %863 = vector.extract_strided_slice %823 {offsets = [0, 2], sizes = [16, 36], strides = [1, 1]} : vector<16x38xf32> to vector<16x36xf32>
    %c0_422 = arith.constant 0 : index
    %c8_423 = arith.constant 8 : index
    %864 = memref.load %arg8[%c0_422, %c8_423] : memref<8x9xf32, #tpu.memory_space<smem>>
    %865 = vector.broadcast %864 : f32 to vector<16x36xf32>
    %866 = arith.mulf %863, %865 : vector<16x36xf32>
    %867 = arith.addf %862, %866 : vector<16x36xf32>
    %c0_424 = arith.constant 0 : index
    %868 = memref.load %arg9[%c0_424] : memref<16xf32, #tpu.memory_space<smem>>
    %869 = vector.broadcast %868 : f32 to vector<16x36xf32>
    %870 = arith.mulf %867, %869 : vector<16x36xf32>
    %c0_425 = arith.constant 0 : index
    %871 = memref.load %arg10[%c0_425] : memref<16xf32, #tpu.memory_space<smem>>
    %872 = vector.broadcast %871 : f32 to vector<16x36xf32>
    %873 = arith.addf %870, %872 : vector<16x36xf32>
    %cst_426 = arith.constant 0.000000e+00 : f32
    %874 = vector.broadcast %cst_426 : f32 to vector<16x36xf32>
    %875 = arith.maximumf %873, %874 : vector<16x36xf32>
    %c0_427 = arith.constant 0 : index
    %c0_428 = arith.constant 0 : index
    %876 = memref.load %arg11[%c0_427, %c0_428] : memref<4x16xf32, #tpu.memory_space<smem>>
    %877 = vector.broadcast %876 : f32 to vector<16x36xf32>
    %878 = arith.mulf %875, %877 : vector<16x36xf32>
    %c1_429 = arith.constant 1 : index
    %c0_430 = arith.constant 0 : index
    %879 = memref.load %arg11[%c1_429, %c0_430] : memref<4x16xf32, #tpu.memory_space<smem>>
    %880 = vector.broadcast %879 : f32 to vector<16x36xf32>
    %881 = arith.mulf %875, %880 : vector<16x36xf32>
    %c2_431 = arith.constant 2 : index
    %c0_432 = arith.constant 0 : index
    %882 = memref.load %arg11[%c2_431, %c0_432] : memref<4x16xf32, #tpu.memory_space<smem>>
    %883 = vector.broadcast %882 : f32 to vector<16x36xf32>
    %884 = arith.mulf %875, %883 : vector<16x36xf32>
    %c3_433 = arith.constant 3 : index
    %c0_434 = arith.constant 0 : index
    %885 = memref.load %arg11[%c3_433, %c0_434] : memref<4x16xf32, #tpu.memory_space<smem>>
    %886 = vector.broadcast %885 : f32 to vector<16x36xf32>
    %887 = arith.mulf %875, %886 : vector<16x36xf32>
    %c1_435 = arith.constant 1 : index
    %888 = memref.load %arg9[%c1_435] : memref<16xf32, #tpu.memory_space<smem>>
    %889 = vector.broadcast %888 : f32 to vector<16x36xf32>
    %890 = arith.mulf %867, %889 : vector<16x36xf32>
    %c1_436 = arith.constant 1 : index
    %891 = memref.load %arg10[%c1_436] : memref<16xf32, #tpu.memory_space<smem>>
    %892 = vector.broadcast %891 : f32 to vector<16x36xf32>
    %893 = arith.addf %890, %892 : vector<16x36xf32>
    %cst_437 = arith.constant 0.000000e+00 : f32
    %894 = vector.broadcast %cst_437 : f32 to vector<16x36xf32>
    %895 = arith.maximumf %893, %894 : vector<16x36xf32>
    %c0_438 = arith.constant 0 : index
    %c1_439 = arith.constant 1 : index
    %896 = memref.load %arg11[%c0_438, %c1_439] : memref<4x16xf32, #tpu.memory_space<smem>>
    %897 = vector.broadcast %896 : f32 to vector<16x36xf32>
    %898 = arith.mulf %895, %897 : vector<16x36xf32>
    %899 = arith.addf %878, %898 : vector<16x36xf32>
    %c1_440 = arith.constant 1 : index
    %c1_441 = arith.constant 1 : index
    %900 = memref.load %arg11[%c1_440, %c1_441] : memref<4x16xf32, #tpu.memory_space<smem>>
    %901 = vector.broadcast %900 : f32 to vector<16x36xf32>
    %902 = arith.mulf %895, %901 : vector<16x36xf32>
    %903 = arith.addf %881, %902 : vector<16x36xf32>
    %c2_442 = arith.constant 2 : index
    %c1_443 = arith.constant 1 : index
    %904 = memref.load %arg11[%c2_442, %c1_443] : memref<4x16xf32, #tpu.memory_space<smem>>
    %905 = vector.broadcast %904 : f32 to vector<16x36xf32>
    %906 = arith.mulf %895, %905 : vector<16x36xf32>
    %907 = arith.addf %884, %906 : vector<16x36xf32>
    %c3_444 = arith.constant 3 : index
    %c1_445 = arith.constant 1 : index
    %908 = memref.load %arg11[%c3_444, %c1_445] : memref<4x16xf32, #tpu.memory_space<smem>>
    %909 = vector.broadcast %908 : f32 to vector<16x36xf32>
    %910 = arith.mulf %895, %909 : vector<16x36xf32>
    %911 = arith.addf %887, %910 : vector<16x36xf32>
    %912 = vector.extract_strided_slice %819 {offsets = [0, 0], sizes = [16, 36], strides = [1, 1]} : vector<16x38xf32> to vector<16x36xf32>
    %c1_446 = arith.constant 1 : index
    %c0_447 = arith.constant 0 : index
    %913 = memref.load %arg8[%c1_446, %c0_447] : memref<8x9xf32, #tpu.memory_space<smem>>
    %914 = vector.broadcast %913 : f32 to vector<16x36xf32>
    %915 = arith.mulf %912, %914 : vector<16x36xf32>
    %916 = vector.extract_strided_slice %819 {offsets = [0, 1], sizes = [16, 36], strides = [1, 1]} : vector<16x38xf32> to vector<16x36xf32>
    %c1_448 = arith.constant 1 : index
    %c1_449 = arith.constant 1 : index
    %917 = memref.load %arg8[%c1_448, %c1_449] : memref<8x9xf32, #tpu.memory_space<smem>>
    %918 = vector.broadcast %917 : f32 to vector<16x36xf32>
    %919 = arith.mulf %916, %918 : vector<16x36xf32>
    %920 = arith.addf %915, %919 : vector<16x36xf32>
    %921 = vector.extract_strided_slice %819 {offsets = [0, 2], sizes = [16, 36], strides = [1, 1]} : vector<16x38xf32> to vector<16x36xf32>
    %c1_450 = arith.constant 1 : index
    %c2_451 = arith.constant 2 : index
    %922 = memref.load %arg8[%c1_450, %c2_451] : memref<8x9xf32, #tpu.memory_space<smem>>
    %923 = vector.broadcast %922 : f32 to vector<16x36xf32>
    %924 = arith.mulf %921, %923 : vector<16x36xf32>
    %925 = arith.addf %920, %924 : vector<16x36xf32>
    %926 = vector.extract_strided_slice %821 {offsets = [0, 0], sizes = [16, 36], strides = [1, 1]} : vector<16x38xf32> to vector<16x36xf32>
    %c1_452 = arith.constant 1 : index
    %c3_453 = arith.constant 3 : index
    %927 = memref.load %arg8[%c1_452, %c3_453] : memref<8x9xf32, #tpu.memory_space<smem>>
    %928 = vector.broadcast %927 : f32 to vector<16x36xf32>
    %929 = arith.mulf %926, %928 : vector<16x36xf32>
    %930 = arith.addf %925, %929 : vector<16x36xf32>
    %931 = vector.extract_strided_slice %821 {offsets = [0, 1], sizes = [16, 36], strides = [1, 1]} : vector<16x38xf32> to vector<16x36xf32>
    %c1_454 = arith.constant 1 : index
    %c4_455 = arith.constant 4 : index
    %932 = memref.load %arg8[%c1_454, %c4_455] : memref<8x9xf32, #tpu.memory_space<smem>>
    %933 = vector.broadcast %932 : f32 to vector<16x36xf32>
    %934 = arith.mulf %931, %933 : vector<16x36xf32>
    %935 = arith.addf %930, %934 : vector<16x36xf32>
    %936 = vector.extract_strided_slice %821 {offsets = [0, 2], sizes = [16, 36], strides = [1, 1]} : vector<16x38xf32> to vector<16x36xf32>
    %c1_456 = arith.constant 1 : index
    %c5_457 = arith.constant 5 : index
    %937 = memref.load %arg8[%c1_456, %c5_457] : memref<8x9xf32, #tpu.memory_space<smem>>
    %938 = vector.broadcast %937 : f32 to vector<16x36xf32>
    %939 = arith.mulf %936, %938 : vector<16x36xf32>
    %940 = arith.addf %935, %939 : vector<16x36xf32>
    %941 = vector.extract_strided_slice %823 {offsets = [0, 0], sizes = [16, 36], strides = [1, 1]} : vector<16x38xf32> to vector<16x36xf32>
    %c1_458 = arith.constant 1 : index
    %c6_459 = arith.constant 6 : index
    %942 = memref.load %arg8[%c1_458, %c6_459] : memref<8x9xf32, #tpu.memory_space<smem>>
    %943 = vector.broadcast %942 : f32 to vector<16x36xf32>
    %944 = arith.mulf %941, %943 : vector<16x36xf32>
    %945 = arith.addf %940, %944 : vector<16x36xf32>
    %946 = vector.extract_strided_slice %823 {offsets = [0, 1], sizes = [16, 36], strides = [1, 1]} : vector<16x38xf32> to vector<16x36xf32>
    %c1_460 = arith.constant 1 : index
    %c7_461 = arith.constant 7 : index
    %947 = memref.load %arg8[%c1_460, %c7_461] : memref<8x9xf32, #tpu.memory_space<smem>>
    %948 = vector.broadcast %947 : f32 to vector<16x36xf32>
    %949 = arith.mulf %946, %948 : vector<16x36xf32>
    %950 = arith.addf %945, %949 : vector<16x36xf32>
    %951 = vector.extract_strided_slice %823 {offsets = [0, 2], sizes = [16, 36], strides = [1, 1]} : vector<16x38xf32> to vector<16x36xf32>
    %c1_462 = arith.constant 1 : index
    %c8_463 = arith.constant 8 : index
    %952 = memref.load %arg8[%c1_462, %c8_463] : memref<8x9xf32, #tpu.memory_space<smem>>
    %953 = vector.broadcast %952 : f32 to vector<16x36xf32>
    %954 = arith.mulf %951, %953 : vector<16x36xf32>
    %955 = arith.addf %950, %954 : vector<16x36xf32>
    %c2_464 = arith.constant 2 : index
    %956 = memref.load %arg9[%c2_464] : memref<16xf32, #tpu.memory_space<smem>>
    %957 = vector.broadcast %956 : f32 to vector<16x36xf32>
    %958 = arith.mulf %955, %957 : vector<16x36xf32>
    %c2_465 = arith.constant 2 : index
    %959 = memref.load %arg10[%c2_465] : memref<16xf32, #tpu.memory_space<smem>>
    %960 = vector.broadcast %959 : f32 to vector<16x36xf32>
    %961 = arith.addf %958, %960 : vector<16x36xf32>
    %cst_466 = arith.constant 0.000000e+00 : f32
    %962 = vector.broadcast %cst_466 : f32 to vector<16x36xf32>
    %963 = arith.maximumf %961, %962 : vector<16x36xf32>
    %c0_467 = arith.constant 0 : index
    %c2_468 = arith.constant 2 : index
    %964 = memref.load %arg11[%c0_467, %c2_468] : memref<4x16xf32, #tpu.memory_space<smem>>
    %965 = vector.broadcast %964 : f32 to vector<16x36xf32>
    %966 = arith.mulf %963, %965 : vector<16x36xf32>
    %967 = arith.addf %899, %966 : vector<16x36xf32>
    %c1_469 = arith.constant 1 : index
    %c2_470 = arith.constant 2 : index
    %968 = memref.load %arg11[%c1_469, %c2_470] : memref<4x16xf32, #tpu.memory_space<smem>>
    %969 = vector.broadcast %968 : f32 to vector<16x36xf32>
    %970 = arith.mulf %963, %969 : vector<16x36xf32>
    %971 = arith.addf %903, %970 : vector<16x36xf32>
    %c2_471 = arith.constant 2 : index
    %c2_472 = arith.constant 2 : index
    %972 = memref.load %arg11[%c2_471, %c2_472] : memref<4x16xf32, #tpu.memory_space<smem>>
    %973 = vector.broadcast %972 : f32 to vector<16x36xf32>
    %974 = arith.mulf %963, %973 : vector<16x36xf32>
    %975 = arith.addf %907, %974 : vector<16x36xf32>
    %c3_473 = arith.constant 3 : index
    %c2_474 = arith.constant 2 : index
    %976 = memref.load %arg11[%c3_473, %c2_474] : memref<4x16xf32, #tpu.memory_space<smem>>
    %977 = vector.broadcast %976 : f32 to vector<16x36xf32>
    %978 = arith.mulf %963, %977 : vector<16x36xf32>
    %979 = arith.addf %911, %978 : vector<16x36xf32>
    %c3_475 = arith.constant 3 : index
    %980 = memref.load %arg9[%c3_475] : memref<16xf32, #tpu.memory_space<smem>>
    %981 = vector.broadcast %980 : f32 to vector<16x36xf32>
    %982 = arith.mulf %955, %981 : vector<16x36xf32>
    %c3_476 = arith.constant 3 : index
    %983 = memref.load %arg10[%c3_476] : memref<16xf32, #tpu.memory_space<smem>>
    %984 = vector.broadcast %983 : f32 to vector<16x36xf32>
    %985 = arith.addf %982, %984 : vector<16x36xf32>
    %cst_477 = arith.constant 0.000000e+00 : f32
    %986 = vector.broadcast %cst_477 : f32 to vector<16x36xf32>
    %987 = arith.maximumf %985, %986 : vector<16x36xf32>
    %c0_478 = arith.constant 0 : index
    %c3_479 = arith.constant 3 : index
    %988 = memref.load %arg11[%c0_478, %c3_479] : memref<4x16xf32, #tpu.memory_space<smem>>
    %989 = vector.broadcast %988 : f32 to vector<16x36xf32>
    %990 = arith.mulf %987, %989 : vector<16x36xf32>
    %991 = arith.addf %967, %990 : vector<16x36xf32>
    %c1_480 = arith.constant 1 : index
    %c3_481 = arith.constant 3 : index
    %992 = memref.load %arg11[%c1_480, %c3_481] : memref<4x16xf32, #tpu.memory_space<smem>>
    %993 = vector.broadcast %992 : f32 to vector<16x36xf32>
    %994 = arith.mulf %987, %993 : vector<16x36xf32>
    %995 = arith.addf %971, %994 : vector<16x36xf32>
    %c2_482 = arith.constant 2 : index
    %c3_483 = arith.constant 3 : index
    %996 = memref.load %arg11[%c2_482, %c3_483] : memref<4x16xf32, #tpu.memory_space<smem>>
    %997 = vector.broadcast %996 : f32 to vector<16x36xf32>
    %998 = arith.mulf %987, %997 : vector<16x36xf32>
    %999 = arith.addf %975, %998 : vector<16x36xf32>
    %c3_484 = arith.constant 3 : index
    %c3_485 = arith.constant 3 : index
    %1000 = memref.load %arg11[%c3_484, %c3_485] : memref<4x16xf32, #tpu.memory_space<smem>>
    %1001 = vector.broadcast %1000 : f32 to vector<16x36xf32>
    %1002 = arith.mulf %987, %1001 : vector<16x36xf32>
    %1003 = arith.addf %979, %1002 : vector<16x36xf32>
    %c1_486 = arith.constant 1 : index
    %c0_487 = arith.constant 0 : index
    %c0_488 = arith.constant 0 : index
    %1004 = vector.load %arg14[%c1_486, %c0_487, %c0_488] : memref<4x18x38xf32, #tpu.memory_space<vmem>>, vector<1x16x38xf32>
    %1005 = vector.shape_cast %1004 : vector<1x16x38xf32> to vector<16x38xf32>
    %c1_489 = arith.constant 1 : index
    %c1_490 = arith.constant 1 : index
    %c0_491 = arith.constant 0 : index
    %1006 = vector.load %arg14[%c1_489, %c1_490, %c0_491] : memref<4x18x38xf32, #tpu.memory_space<vmem>>, vector<1x16x38xf32>
    %1007 = vector.shape_cast %1006 : vector<1x16x38xf32> to vector<16x38xf32>
    %c1_492 = arith.constant 1 : index
    %c2_493 = arith.constant 2 : index
    %c0_494 = arith.constant 0 : index
    %1008 = vector.load %arg14[%c1_492, %c2_493, %c0_494] : memref<4x18x38xf32, #tpu.memory_space<vmem>>, vector<1x16x38xf32>
    %1009 = vector.shape_cast %1008 : vector<1x16x38xf32> to vector<16x38xf32>
    %1010 = vector.extract_strided_slice %1005 {offsets = [0, 0], sizes = [16, 36], strides = [1, 1]} : vector<16x38xf32> to vector<16x36xf32>
    %c2_495 = arith.constant 2 : index
    %c0_496 = arith.constant 0 : index
    %1011 = memref.load %arg8[%c2_495, %c0_496] : memref<8x9xf32, #tpu.memory_space<smem>>
    %1012 = vector.broadcast %1011 : f32 to vector<16x36xf32>
    %1013 = arith.mulf %1010, %1012 : vector<16x36xf32>
    %1014 = vector.extract_strided_slice %1005 {offsets = [0, 1], sizes = [16, 36], strides = [1, 1]} : vector<16x38xf32> to vector<16x36xf32>
    %c2_497 = arith.constant 2 : index
    %c1_498 = arith.constant 1 : index
    %1015 = memref.load %arg8[%c2_497, %c1_498] : memref<8x9xf32, #tpu.memory_space<smem>>
    %1016 = vector.broadcast %1015 : f32 to vector<16x36xf32>
    %1017 = arith.mulf %1014, %1016 : vector<16x36xf32>
    %1018 = arith.addf %1013, %1017 : vector<16x36xf32>
    %1019 = vector.extract_strided_slice %1005 {offsets = [0, 2], sizes = [16, 36], strides = [1, 1]} : vector<16x38xf32> to vector<16x36xf32>
    %c2_499 = arith.constant 2 : index
    %c2_500 = arith.constant 2 : index
    %1020 = memref.load %arg8[%c2_499, %c2_500] : memref<8x9xf32, #tpu.memory_space<smem>>
    %1021 = vector.broadcast %1020 : f32 to vector<16x36xf32>
    %1022 = arith.mulf %1019, %1021 : vector<16x36xf32>
    %1023 = arith.addf %1018, %1022 : vector<16x36xf32>
    %1024 = vector.extract_strided_slice %1007 {offsets = [0, 0], sizes = [16, 36], strides = [1, 1]} : vector<16x38xf32> to vector<16x36xf32>
    %c2_501 = arith.constant 2 : index
    %c3_502 = arith.constant 3 : index
    %1025 = memref.load %arg8[%c2_501, %c3_502] : memref<8x9xf32, #tpu.memory_space<smem>>
    %1026 = vector.broadcast %1025 : f32 to vector<16x36xf32>
    %1027 = arith.mulf %1024, %1026 : vector<16x36xf32>
    %1028 = arith.addf %1023, %1027 : vector<16x36xf32>
    %1029 = vector.extract_strided_slice %1007 {offsets = [0, 1], sizes = [16, 36], strides = [1, 1]} : vector<16x38xf32> to vector<16x36xf32>
    %c2_503 = arith.constant 2 : index
    %c4_504 = arith.constant 4 : index
    %1030 = memref.load %arg8[%c2_503, %c4_504] : memref<8x9xf32, #tpu.memory_space<smem>>
    %1031 = vector.broadcast %1030 : f32 to vector<16x36xf32>
    %1032 = arith.mulf %1029, %1031 : vector<16x36xf32>
    %1033 = arith.addf %1028, %1032 : vector<16x36xf32>
    %1034 = vector.extract_strided_slice %1007 {offsets = [0, 2], sizes = [16, 36], strides = [1, 1]} : vector<16x38xf32> to vector<16x36xf32>
    %c2_505 = arith.constant 2 : index
    %c5_506 = arith.constant 5 : index
    %1035 = memref.load %arg8[%c2_505, %c5_506] : memref<8x9xf32, #tpu.memory_space<smem>>
    %1036 = vector.broadcast %1035 : f32 to vector<16x36xf32>
    %1037 = arith.mulf %1034, %1036 : vector<16x36xf32>
    %1038 = arith.addf %1033, %1037 : vector<16x36xf32>
    %1039 = vector.extract_strided_slice %1009 {offsets = [0, 0], sizes = [16, 36], strides = [1, 1]} : vector<16x38xf32> to vector<16x36xf32>
    %c2_507 = arith.constant 2 : index
    %c6_508 = arith.constant 6 : index
    %1040 = memref.load %arg8[%c2_507, %c6_508] : memref<8x9xf32, #tpu.memory_space<smem>>
    %1041 = vector.broadcast %1040 : f32 to vector<16x36xf32>
    %1042 = arith.mulf %1039, %1041 : vector<16x36xf32>
    %1043 = arith.addf %1038, %1042 : vector<16x36xf32>
    %1044 = vector.extract_strided_slice %1009 {offsets = [0, 1], sizes = [16, 36], strides = [1, 1]} : vector<16x38xf32> to vector<16x36xf32>
    %c2_509 = arith.constant 2 : index
    %c7_510 = arith.constant 7 : index
    %1045 = memref.load %arg8[%c2_509, %c7_510] : memref<8x9xf32, #tpu.memory_space<smem>>
    %1046 = vector.broadcast %1045 : f32 to vector<16x36xf32>
    %1047 = arith.mulf %1044, %1046 : vector<16x36xf32>
    %1048 = arith.addf %1043, %1047 : vector<16x36xf32>
    %1049 = vector.extract_strided_slice %1009 {offsets = [0, 2], sizes = [16, 36], strides = [1, 1]} : vector<16x38xf32> to vector<16x36xf32>
    %c2_511 = arith.constant 2 : index
    %c8_512 = arith.constant 8 : index
    %1050 = memref.load %arg8[%c2_511, %c8_512] : memref<8x9xf32, #tpu.memory_space<smem>>
    %1051 = vector.broadcast %1050 : f32 to vector<16x36xf32>
    %1052 = arith.mulf %1049, %1051 : vector<16x36xf32>
    %1053 = arith.addf %1048, %1052 : vector<16x36xf32>
    %c4_513 = arith.constant 4 : index
    %1054 = memref.load %arg9[%c4_513] : memref<16xf32, #tpu.memory_space<smem>>
    %1055 = vector.broadcast %1054 : f32 to vector<16x36xf32>
    %1056 = arith.mulf %1053, %1055 : vector<16x36xf32>
    %c4_514 = arith.constant 4 : index
    %1057 = memref.load %arg10[%c4_514] : memref<16xf32, #tpu.memory_space<smem>>
    %1058 = vector.broadcast %1057 : f32 to vector<16x36xf32>
    %1059 = arith.addf %1056, %1058 : vector<16x36xf32>
    %cst_515 = arith.constant 0.000000e+00 : f32
    %1060 = vector.broadcast %cst_515 : f32 to vector<16x36xf32>
    %1061 = arith.maximumf %1059, %1060 : vector<16x36xf32>
    %c0_516 = arith.constant 0 : index
    %c4_517 = arith.constant 4 : index
    %1062 = memref.load %arg11[%c0_516, %c4_517] : memref<4x16xf32, #tpu.memory_space<smem>>
    %1063 = vector.broadcast %1062 : f32 to vector<16x36xf32>
    %1064 = arith.mulf %1061, %1063 : vector<16x36xf32>
    %1065 = arith.addf %991, %1064 : vector<16x36xf32>
    %c1_518 = arith.constant 1 : index
    %c4_519 = arith.constant 4 : index
    %1066 = memref.load %arg11[%c1_518, %c4_519] : memref<4x16xf32, #tpu.memory_space<smem>>
    %1067 = vector.broadcast %1066 : f32 to vector<16x36xf32>
    %1068 = arith.mulf %1061, %1067 : vector<16x36xf32>
    %1069 = arith.addf %995, %1068 : vector<16x36xf32>
    %c2_520 = arith.constant 2 : index
    %c4_521 = arith.constant 4 : index
    %1070 = memref.load %arg11[%c2_520, %c4_521] : memref<4x16xf32, #tpu.memory_space<smem>>
    %1071 = vector.broadcast %1070 : f32 to vector<16x36xf32>
    %1072 = arith.mulf %1061, %1071 : vector<16x36xf32>
    %1073 = arith.addf %999, %1072 : vector<16x36xf32>
    %c3_522 = arith.constant 3 : index
    %c4_523 = arith.constant 4 : index
    %1074 = memref.load %arg11[%c3_522, %c4_523] : memref<4x16xf32, #tpu.memory_space<smem>>
    %1075 = vector.broadcast %1074 : f32 to vector<16x36xf32>
    %1076 = arith.mulf %1061, %1075 : vector<16x36xf32>
    %1077 = arith.addf %1003, %1076 : vector<16x36xf32>
    %c5_524 = arith.constant 5 : index
    %1078 = memref.load %arg9[%c5_524] : memref<16xf32, #tpu.memory_space<smem>>
    %1079 = vector.broadcast %1078 : f32 to vector<16x36xf32>
    %1080 = arith.mulf %1053, %1079 : vector<16x36xf32>
    %c5_525 = arith.constant 5 : index
    %1081 = memref.load %arg10[%c5_525] : memref<16xf32, #tpu.memory_space<smem>>
    %1082 = vector.broadcast %1081 : f32 to vector<16x36xf32>
    %1083 = arith.addf %1080, %1082 : vector<16x36xf32>
    %cst_526 = arith.constant 0.000000e+00 : f32
    %1084 = vector.broadcast %cst_526 : f32 to vector<16x36xf32>
    %1085 = arith.maximumf %1083, %1084 : vector<16x36xf32>
    %c0_527 = arith.constant 0 : index
    %c5_528 = arith.constant 5 : index
    %1086 = memref.load %arg11[%c0_527, %c5_528] : memref<4x16xf32, #tpu.memory_space<smem>>
    %1087 = vector.broadcast %1086 : f32 to vector<16x36xf32>
    %1088 = arith.mulf %1085, %1087 : vector<16x36xf32>
    %1089 = arith.addf %1065, %1088 : vector<16x36xf32>
    %c1_529 = arith.constant 1 : index
    %c5_530 = arith.constant 5 : index
    %1090 = memref.load %arg11[%c1_529, %c5_530] : memref<4x16xf32, #tpu.memory_space<smem>>
    %1091 = vector.broadcast %1090 : f32 to vector<16x36xf32>
    %1092 = arith.mulf %1085, %1091 : vector<16x36xf32>
    %1093 = arith.addf %1069, %1092 : vector<16x36xf32>
    %c2_531 = arith.constant 2 : index
    %c5_532 = arith.constant 5 : index
    %1094 = memref.load %arg11[%c2_531, %c5_532] : memref<4x16xf32, #tpu.memory_space<smem>>
    %1095 = vector.broadcast %1094 : f32 to vector<16x36xf32>
    %1096 = arith.mulf %1085, %1095 : vector<16x36xf32>
    %1097 = arith.addf %1073, %1096 : vector<16x36xf32>
    %c3_533 = arith.constant 3 : index
    %c5_534 = arith.constant 5 : index
    %1098 = memref.load %arg11[%c3_533, %c5_534] : memref<4x16xf32, #tpu.memory_space<smem>>
    %1099 = vector.broadcast %1098 : f32 to vector<16x36xf32>
    %1100 = arith.mulf %1085, %1099 : vector<16x36xf32>
    %1101 = arith.addf %1077, %1100 : vector<16x36xf32>
    %1102 = vector.extract_strided_slice %1005 {offsets = [0, 0], sizes = [16, 36], strides = [1, 1]} : vector<16x38xf32> to vector<16x36xf32>
    %c3_535 = arith.constant 3 : index
    %c0_536 = arith.constant 0 : index
    %1103 = memref.load %arg8[%c3_535, %c0_536] : memref<8x9xf32, #tpu.memory_space<smem>>
    %1104 = vector.broadcast %1103 : f32 to vector<16x36xf32>
    %1105 = arith.mulf %1102, %1104 : vector<16x36xf32>
    %1106 = vector.extract_strided_slice %1005 {offsets = [0, 1], sizes = [16, 36], strides = [1, 1]} : vector<16x38xf32> to vector<16x36xf32>
    %c3_537 = arith.constant 3 : index
    %c1_538 = arith.constant 1 : index
    %1107 = memref.load %arg8[%c3_537, %c1_538] : memref<8x9xf32, #tpu.memory_space<smem>>
    %1108 = vector.broadcast %1107 : f32 to vector<16x36xf32>
    %1109 = arith.mulf %1106, %1108 : vector<16x36xf32>
    %1110 = arith.addf %1105, %1109 : vector<16x36xf32>
    %1111 = vector.extract_strided_slice %1005 {offsets = [0, 2], sizes = [16, 36], strides = [1, 1]} : vector<16x38xf32> to vector<16x36xf32>
    %c3_539 = arith.constant 3 : index
    %c2_540 = arith.constant 2 : index
    %1112 = memref.load %arg8[%c3_539, %c2_540] : memref<8x9xf32, #tpu.memory_space<smem>>
    %1113 = vector.broadcast %1112 : f32 to vector<16x36xf32>
    %1114 = arith.mulf %1111, %1113 : vector<16x36xf32>
    %1115 = arith.addf %1110, %1114 : vector<16x36xf32>
    %1116 = vector.extract_strided_slice %1007 {offsets = [0, 0], sizes = [16, 36], strides = [1, 1]} : vector<16x38xf32> to vector<16x36xf32>
    %c3_541 = arith.constant 3 : index
    %c3_542 = arith.constant 3 : index
    %1117 = memref.load %arg8[%c3_541, %c3_542] : memref<8x9xf32, #tpu.memory_space<smem>>
    %1118 = vector.broadcast %1117 : f32 to vector<16x36xf32>
    %1119 = arith.mulf %1116, %1118 : vector<16x36xf32>
    %1120 = arith.addf %1115, %1119 : vector<16x36xf32>
    %1121 = vector.extract_strided_slice %1007 {offsets = [0, 1], sizes = [16, 36], strides = [1, 1]} : vector<16x38xf32> to vector<16x36xf32>
    %c3_543 = arith.constant 3 : index
    %c4_544 = arith.constant 4 : index
    %1122 = memref.load %arg8[%c3_543, %c4_544] : memref<8x9xf32, #tpu.memory_space<smem>>
    %1123 = vector.broadcast %1122 : f32 to vector<16x36xf32>
    %1124 = arith.mulf %1121, %1123 : vector<16x36xf32>
    %1125 = arith.addf %1120, %1124 : vector<16x36xf32>
    %1126 = vector.extract_strided_slice %1007 {offsets = [0, 2], sizes = [16, 36], strides = [1, 1]} : vector<16x38xf32> to vector<16x36xf32>
    %c3_545 = arith.constant 3 : index
    %c5_546 = arith.constant 5 : index
    %1127 = memref.load %arg8[%c3_545, %c5_546] : memref<8x9xf32, #tpu.memory_space<smem>>
    %1128 = vector.broadcast %1127 : f32 to vector<16x36xf32>
    %1129 = arith.mulf %1126, %1128 : vector<16x36xf32>
    %1130 = arith.addf %1125, %1129 : vector<16x36xf32>
    %1131 = vector.extract_strided_slice %1009 {offsets = [0, 0], sizes = [16, 36], strides = [1, 1]} : vector<16x38xf32> to vector<16x36xf32>
    %c3_547 = arith.constant 3 : index
    %c6_548 = arith.constant 6 : index
    %1132 = memref.load %arg8[%c3_547, %c6_548] : memref<8x9xf32, #tpu.memory_space<smem>>
    %1133 = vector.broadcast %1132 : f32 to vector<16x36xf32>
    %1134 = arith.mulf %1131, %1133 : vector<16x36xf32>
    %1135 = arith.addf %1130, %1134 : vector<16x36xf32>
    %1136 = vector.extract_strided_slice %1009 {offsets = [0, 1], sizes = [16, 36], strides = [1, 1]} : vector<16x38xf32> to vector<16x36xf32>
    %c3_549 = arith.constant 3 : index
    %c7_550 = arith.constant 7 : index
    %1137 = memref.load %arg8[%c3_549, %c7_550] : memref<8x9xf32, #tpu.memory_space<smem>>
    %1138 = vector.broadcast %1137 : f32 to vector<16x36xf32>
    %1139 = arith.mulf %1136, %1138 : vector<16x36xf32>
    %1140 = arith.addf %1135, %1139 : vector<16x36xf32>
    %1141 = vector.extract_strided_slice %1009 {offsets = [0, 2], sizes = [16, 36], strides = [1, 1]} : vector<16x38xf32> to vector<16x36xf32>
    %c3_551 = arith.constant 3 : index
    %c8_552 = arith.constant 8 : index
    %1142 = memref.load %arg8[%c3_551, %c8_552] : memref<8x9xf32, #tpu.memory_space<smem>>
    %1143 = vector.broadcast %1142 : f32 to vector<16x36xf32>
    %1144 = arith.mulf %1141, %1143 : vector<16x36xf32>
    %1145 = arith.addf %1140, %1144 : vector<16x36xf32>
    %c6_553 = arith.constant 6 : index
    %1146 = memref.load %arg9[%c6_553] : memref<16xf32, #tpu.memory_space<smem>>
    %1147 = vector.broadcast %1146 : f32 to vector<16x36xf32>
    %1148 = arith.mulf %1145, %1147 : vector<16x36xf32>
    %c6_554 = arith.constant 6 : index
    %1149 = memref.load %arg10[%c6_554] : memref<16xf32, #tpu.memory_space<smem>>
    %1150 = vector.broadcast %1149 : f32 to vector<16x36xf32>
    %1151 = arith.addf %1148, %1150 : vector<16x36xf32>
    %cst_555 = arith.constant 0.000000e+00 : f32
    %1152 = vector.broadcast %cst_555 : f32 to vector<16x36xf32>
    %1153 = arith.maximumf %1151, %1152 : vector<16x36xf32>
    %c0_556 = arith.constant 0 : index
    %c6_557 = arith.constant 6 : index
    %1154 = memref.load %arg11[%c0_556, %c6_557] : memref<4x16xf32, #tpu.memory_space<smem>>
    %1155 = vector.broadcast %1154 : f32 to vector<16x36xf32>
    %1156 = arith.mulf %1153, %1155 : vector<16x36xf32>
    %1157 = arith.addf %1089, %1156 : vector<16x36xf32>
    %c1_558 = arith.constant 1 : index
    %c6_559 = arith.constant 6 : index
    %1158 = memref.load %arg11[%c1_558, %c6_559] : memref<4x16xf32, #tpu.memory_space<smem>>
    %1159 = vector.broadcast %1158 : f32 to vector<16x36xf32>
    %1160 = arith.mulf %1153, %1159 : vector<16x36xf32>
    %1161 = arith.addf %1093, %1160 : vector<16x36xf32>
    %c2_560 = arith.constant 2 : index
    %c6_561 = arith.constant 6 : index
    %1162 = memref.load %arg11[%c2_560, %c6_561] : memref<4x16xf32, #tpu.memory_space<smem>>
    %1163 = vector.broadcast %1162 : f32 to vector<16x36xf32>
    %1164 = arith.mulf %1153, %1163 : vector<16x36xf32>
    %1165 = arith.addf %1097, %1164 : vector<16x36xf32>
    %c3_562 = arith.constant 3 : index
    %c6_563 = arith.constant 6 : index
    %1166 = memref.load %arg11[%c3_562, %c6_563] : memref<4x16xf32, #tpu.memory_space<smem>>
    %1167 = vector.broadcast %1166 : f32 to vector<16x36xf32>
    %1168 = arith.mulf %1153, %1167 : vector<16x36xf32>
    %1169 = arith.addf %1101, %1168 : vector<16x36xf32>
    %c7_564 = arith.constant 7 : index
    %1170 = memref.load %arg9[%c7_564] : memref<16xf32, #tpu.memory_space<smem>>
    %1171 = vector.broadcast %1170 : f32 to vector<16x36xf32>
    %1172 = arith.mulf %1145, %1171 : vector<16x36xf32>
    %c7_565 = arith.constant 7 : index
    %1173 = memref.load %arg10[%c7_565] : memref<16xf32, #tpu.memory_space<smem>>
    %1174 = vector.broadcast %1173 : f32 to vector<16x36xf32>
    %1175 = arith.addf %1172, %1174 : vector<16x36xf32>
    %cst_566 = arith.constant 0.000000e+00 : f32
    %1176 = vector.broadcast %cst_566 : f32 to vector<16x36xf32>
    %1177 = arith.maximumf %1175, %1176 : vector<16x36xf32>
    %c0_567 = arith.constant 0 : index
    %c7_568 = arith.constant 7 : index
    %1178 = memref.load %arg11[%c0_567, %c7_568] : memref<4x16xf32, #tpu.memory_space<smem>>
    %1179 = vector.broadcast %1178 : f32 to vector<16x36xf32>
    %1180 = arith.mulf %1177, %1179 : vector<16x36xf32>
    %1181 = arith.addf %1157, %1180 : vector<16x36xf32>
    %c1_569 = arith.constant 1 : index
    %c7_570 = arith.constant 7 : index
    %1182 = memref.load %arg11[%c1_569, %c7_570] : memref<4x16xf32, #tpu.memory_space<smem>>
    %1183 = vector.broadcast %1182 : f32 to vector<16x36xf32>
    %1184 = arith.mulf %1177, %1183 : vector<16x36xf32>
    %1185 = arith.addf %1161, %1184 : vector<16x36xf32>
    %c2_571 = arith.constant 2 : index
    %c7_572 = arith.constant 7 : index
    %1186 = memref.load %arg11[%c2_571, %c7_572] : memref<4x16xf32, #tpu.memory_space<smem>>
    %1187 = vector.broadcast %1186 : f32 to vector<16x36xf32>
    %1188 = arith.mulf %1177, %1187 : vector<16x36xf32>
    %1189 = arith.addf %1165, %1188 : vector<16x36xf32>
    %c3_573 = arith.constant 3 : index
    %c7_574 = arith.constant 7 : index
    %1190 = memref.load %arg11[%c3_573, %c7_574] : memref<4x16xf32, #tpu.memory_space<smem>>
    %1191 = vector.broadcast %1190 : f32 to vector<16x36xf32>
    %1192 = arith.mulf %1177, %1191 : vector<16x36xf32>
    %1193 = arith.addf %1169, %1192 : vector<16x36xf32>
    %c2_575 = arith.constant 2 : index
    %c0_576 = arith.constant 0 : index
    %c0_577 = arith.constant 0 : index
    %1194 = vector.load %arg14[%c2_575, %c0_576, %c0_577] : memref<4x18x38xf32, #tpu.memory_space<vmem>>, vector<1x16x38xf32>
    %1195 = vector.shape_cast %1194 : vector<1x16x38xf32> to vector<16x38xf32>
    %c2_578 = arith.constant 2 : index
    %c1_579 = arith.constant 1 : index
    %c0_580 = arith.constant 0 : index
    %1196 = vector.load %arg14[%c2_578, %c1_579, %c0_580] : memref<4x18x38xf32, #tpu.memory_space<vmem>>, vector<1x16x38xf32>
    %1197 = vector.shape_cast %1196 : vector<1x16x38xf32> to vector<16x38xf32>
    %c2_581 = arith.constant 2 : index
    %c2_582 = arith.constant 2 : index
    %c0_583 = arith.constant 0 : index
    %1198 = vector.load %arg14[%c2_581, %c2_582, %c0_583] : memref<4x18x38xf32, #tpu.memory_space<vmem>>, vector<1x16x38xf32>
    %1199 = vector.shape_cast %1198 : vector<1x16x38xf32> to vector<16x38xf32>
    %1200 = vector.extract_strided_slice %1195 {offsets = [0, 0], sizes = [16, 36], strides = [1, 1]} : vector<16x38xf32> to vector<16x36xf32>
    %c4_584 = arith.constant 4 : index
    %c0_585 = arith.constant 0 : index
    %1201 = memref.load %arg8[%c4_584, %c0_585] : memref<8x9xf32, #tpu.memory_space<smem>>
    %1202 = vector.broadcast %1201 : f32 to vector<16x36xf32>
    %1203 = arith.mulf %1200, %1202 : vector<16x36xf32>
    %1204 = vector.extract_strided_slice %1195 {offsets = [0, 1], sizes = [16, 36], strides = [1, 1]} : vector<16x38xf32> to vector<16x36xf32>
    %c4_586 = arith.constant 4 : index
    %c1_587 = arith.constant 1 : index
    %1205 = memref.load %arg8[%c4_586, %c1_587] : memref<8x9xf32, #tpu.memory_space<smem>>
    %1206 = vector.broadcast %1205 : f32 to vector<16x36xf32>
    %1207 = arith.mulf %1204, %1206 : vector<16x36xf32>
    %1208 = arith.addf %1203, %1207 : vector<16x36xf32>
    %1209 = vector.extract_strided_slice %1195 {offsets = [0, 2], sizes = [16, 36], strides = [1, 1]} : vector<16x38xf32> to vector<16x36xf32>
    %c4_588 = arith.constant 4 : index
    %c2_589 = arith.constant 2 : index
    %1210 = memref.load %arg8[%c4_588, %c2_589] : memref<8x9xf32, #tpu.memory_space<smem>>
    %1211 = vector.broadcast %1210 : f32 to vector<16x36xf32>
    %1212 = arith.mulf %1209, %1211 : vector<16x36xf32>
    %1213 = arith.addf %1208, %1212 : vector<16x36xf32>
    %1214 = vector.extract_strided_slice %1197 {offsets = [0, 0], sizes = [16, 36], strides = [1, 1]} : vector<16x38xf32> to vector<16x36xf32>
    %c4_590 = arith.constant 4 : index
    %c3_591 = arith.constant 3 : index
    %1215 = memref.load %arg8[%c4_590, %c3_591] : memref<8x9xf32, #tpu.memory_space<smem>>
    %1216 = vector.broadcast %1215 : f32 to vector<16x36xf32>
    %1217 = arith.mulf %1214, %1216 : vector<16x36xf32>
    %1218 = arith.addf %1213, %1217 : vector<16x36xf32>
    %1219 = vector.extract_strided_slice %1197 {offsets = [0, 1], sizes = [16, 36], strides = [1, 1]} : vector<16x38xf32> to vector<16x36xf32>
    %c4_592 = arith.constant 4 : index
    %c4_593 = arith.constant 4 : index
    %1220 = memref.load %arg8[%c4_592, %c4_593] : memref<8x9xf32, #tpu.memory_space<smem>>
    %1221 = vector.broadcast %1220 : f32 to vector<16x36xf32>
    %1222 = arith.mulf %1219, %1221 : vector<16x36xf32>
    %1223 = arith.addf %1218, %1222 : vector<16x36xf32>
    %1224 = vector.extract_strided_slice %1197 {offsets = [0, 2], sizes = [16, 36], strides = [1, 1]} : vector<16x38xf32> to vector<16x36xf32>
    %c4_594 = arith.constant 4 : index
    %c5_595 = arith.constant 5 : index
    %1225 = memref.load %arg8[%c4_594, %c5_595] : memref<8x9xf32, #tpu.memory_space<smem>>
    %1226 = vector.broadcast %1225 : f32 to vector<16x36xf32>
    %1227 = arith.mulf %1224, %1226 : vector<16x36xf32>
    %1228 = arith.addf %1223, %1227 : vector<16x36xf32>
    %1229 = vector.extract_strided_slice %1199 {offsets = [0, 0], sizes = [16, 36], strides = [1, 1]} : vector<16x38xf32> to vector<16x36xf32>
    %c4_596 = arith.constant 4 : index
    %c6_597 = arith.constant 6 : index
    %1230 = memref.load %arg8[%c4_596, %c6_597] : memref<8x9xf32, #tpu.memory_space<smem>>
    %1231 = vector.broadcast %1230 : f32 to vector<16x36xf32>
    %1232 = arith.mulf %1229, %1231 : vector<16x36xf32>
    %1233 = arith.addf %1228, %1232 : vector<16x36xf32>
    %1234 = vector.extract_strided_slice %1199 {offsets = [0, 1], sizes = [16, 36], strides = [1, 1]} : vector<16x38xf32> to vector<16x36xf32>
    %c4_598 = arith.constant 4 : index
    %c7_599 = arith.constant 7 : index
    %1235 = memref.load %arg8[%c4_598, %c7_599] : memref<8x9xf32, #tpu.memory_space<smem>>
    %1236 = vector.broadcast %1235 : f32 to vector<16x36xf32>
    %1237 = arith.mulf %1234, %1236 : vector<16x36xf32>
    %1238 = arith.addf %1233, %1237 : vector<16x36xf32>
    %1239 = vector.extract_strided_slice %1199 {offsets = [0, 2], sizes = [16, 36], strides = [1, 1]} : vector<16x38xf32> to vector<16x36xf32>
    %c4_600 = arith.constant 4 : index
    %c8_601 = arith.constant 8 : index
    %1240 = memref.load %arg8[%c4_600, %c8_601] : memref<8x9xf32, #tpu.memory_space<smem>>
    %1241 = vector.broadcast %1240 : f32 to vector<16x36xf32>
    %1242 = arith.mulf %1239, %1241 : vector<16x36xf32>
    %1243 = arith.addf %1238, %1242 : vector<16x36xf32>
    %c8_602 = arith.constant 8 : index
    %1244 = memref.load %arg9[%c8_602] : memref<16xf32, #tpu.memory_space<smem>>
    %1245 = vector.broadcast %1244 : f32 to vector<16x36xf32>
    %1246 = arith.mulf %1243, %1245 : vector<16x36xf32>
    %c8_603 = arith.constant 8 : index
    %1247 = memref.load %arg10[%c8_603] : memref<16xf32, #tpu.memory_space<smem>>
    %1248 = vector.broadcast %1247 : f32 to vector<16x36xf32>
    %1249 = arith.addf %1246, %1248 : vector<16x36xf32>
    %cst_604 = arith.constant 0.000000e+00 : f32
    %1250 = vector.broadcast %cst_604 : f32 to vector<16x36xf32>
    %1251 = arith.maximumf %1249, %1250 : vector<16x36xf32>
    %c0_605 = arith.constant 0 : index
    %c8_606 = arith.constant 8 : index
    %1252 = memref.load %arg11[%c0_605, %c8_606] : memref<4x16xf32, #tpu.memory_space<smem>>
    %1253 = vector.broadcast %1252 : f32 to vector<16x36xf32>
    %1254 = arith.mulf %1251, %1253 : vector<16x36xf32>
    %1255 = arith.addf %1181, %1254 : vector<16x36xf32>
    %c1_607 = arith.constant 1 : index
    %c8_608 = arith.constant 8 : index
    %1256 = memref.load %arg11[%c1_607, %c8_608] : memref<4x16xf32, #tpu.memory_space<smem>>
    %1257 = vector.broadcast %1256 : f32 to vector<16x36xf32>
    %1258 = arith.mulf %1251, %1257 : vector<16x36xf32>
    %1259 = arith.addf %1185, %1258 : vector<16x36xf32>
    %c2_609 = arith.constant 2 : index
    %c8_610 = arith.constant 8 : index
    %1260 = memref.load %arg11[%c2_609, %c8_610] : memref<4x16xf32, #tpu.memory_space<smem>>
    %1261 = vector.broadcast %1260 : f32 to vector<16x36xf32>
    %1262 = arith.mulf %1251, %1261 : vector<16x36xf32>
    %1263 = arith.addf %1189, %1262 : vector<16x36xf32>
    %c3_611 = arith.constant 3 : index
    %c8_612 = arith.constant 8 : index
    %1264 = memref.load %arg11[%c3_611, %c8_612] : memref<4x16xf32, #tpu.memory_space<smem>>
    %1265 = vector.broadcast %1264 : f32 to vector<16x36xf32>
    %1266 = arith.mulf %1251, %1265 : vector<16x36xf32>
    %1267 = arith.addf %1193, %1266 : vector<16x36xf32>
    %c9_613 = arith.constant 9 : index
    %1268 = memref.load %arg9[%c9_613] : memref<16xf32, #tpu.memory_space<smem>>
    %1269 = vector.broadcast %1268 : f32 to vector<16x36xf32>
    %1270 = arith.mulf %1243, %1269 : vector<16x36xf32>
    %c9_614 = arith.constant 9 : index
    %1271 = memref.load %arg10[%c9_614] : memref<16xf32, #tpu.memory_space<smem>>
    %1272 = vector.broadcast %1271 : f32 to vector<16x36xf32>
    %1273 = arith.addf %1270, %1272 : vector<16x36xf32>
    %cst_615 = arith.constant 0.000000e+00 : f32
    %1274 = vector.broadcast %cst_615 : f32 to vector<16x36xf32>
    %1275 = arith.maximumf %1273, %1274 : vector<16x36xf32>
    %c0_616 = arith.constant 0 : index
    %c9_617 = arith.constant 9 : index
    %1276 = memref.load %arg11[%c0_616, %c9_617] : memref<4x16xf32, #tpu.memory_space<smem>>
    %1277 = vector.broadcast %1276 : f32 to vector<16x36xf32>
    %1278 = arith.mulf %1275, %1277 : vector<16x36xf32>
    %1279 = arith.addf %1255, %1278 : vector<16x36xf32>
    %c1_618 = arith.constant 1 : index
    %c9_619 = arith.constant 9 : index
    %1280 = memref.load %arg11[%c1_618, %c9_619] : memref<4x16xf32, #tpu.memory_space<smem>>
    %1281 = vector.broadcast %1280 : f32 to vector<16x36xf32>
    %1282 = arith.mulf %1275, %1281 : vector<16x36xf32>
    %1283 = arith.addf %1259, %1282 : vector<16x36xf32>
    %c2_620 = arith.constant 2 : index
    %c9_621 = arith.constant 9 : index
    %1284 = memref.load %arg11[%c2_620, %c9_621] : memref<4x16xf32, #tpu.memory_space<smem>>
    %1285 = vector.broadcast %1284 : f32 to vector<16x36xf32>
    %1286 = arith.mulf %1275, %1285 : vector<16x36xf32>
    %1287 = arith.addf %1263, %1286 : vector<16x36xf32>
    %c3_622 = arith.constant 3 : index
    %c9_623 = arith.constant 9 : index
    %1288 = memref.load %arg11[%c3_622, %c9_623] : memref<4x16xf32, #tpu.memory_space<smem>>
    %1289 = vector.broadcast %1288 : f32 to vector<16x36xf32>
    %1290 = arith.mulf %1275, %1289 : vector<16x36xf32>
    %1291 = arith.addf %1267, %1290 : vector<16x36xf32>
    %1292 = vector.extract_strided_slice %1195 {offsets = [0, 0], sizes = [16, 36], strides = [1, 1]} : vector<16x38xf32> to vector<16x36xf32>
    %c5_624 = arith.constant 5 : index
    %c0_625 = arith.constant 0 : index
    %1293 = memref.load %arg8[%c5_624, %c0_625] : memref<8x9xf32, #tpu.memory_space<smem>>
    %1294 = vector.broadcast %1293 : f32 to vector<16x36xf32>
    %1295 = arith.mulf %1292, %1294 : vector<16x36xf32>
    %1296 = vector.extract_strided_slice %1195 {offsets = [0, 1], sizes = [16, 36], strides = [1, 1]} : vector<16x38xf32> to vector<16x36xf32>
    %c5_626 = arith.constant 5 : index
    %c1_627 = arith.constant 1 : index
    %1297 = memref.load %arg8[%c5_626, %c1_627] : memref<8x9xf32, #tpu.memory_space<smem>>
    %1298 = vector.broadcast %1297 : f32 to vector<16x36xf32>
    %1299 = arith.mulf %1296, %1298 : vector<16x36xf32>
    %1300 = arith.addf %1295, %1299 : vector<16x36xf32>
    %1301 = vector.extract_strided_slice %1195 {offsets = [0, 2], sizes = [16, 36], strides = [1, 1]} : vector<16x38xf32> to vector<16x36xf32>
    %c5_628 = arith.constant 5 : index
    %c2_629 = arith.constant 2 : index
    %1302 = memref.load %arg8[%c5_628, %c2_629] : memref<8x9xf32, #tpu.memory_space<smem>>
    %1303 = vector.broadcast %1302 : f32 to vector<16x36xf32>
    %1304 = arith.mulf %1301, %1303 : vector<16x36xf32>
    %1305 = arith.addf %1300, %1304 : vector<16x36xf32>
    %1306 = vector.extract_strided_slice %1197 {offsets = [0, 0], sizes = [16, 36], strides = [1, 1]} : vector<16x38xf32> to vector<16x36xf32>
    %c5_630 = arith.constant 5 : index
    %c3_631 = arith.constant 3 : index
    %1307 = memref.load %arg8[%c5_630, %c3_631] : memref<8x9xf32, #tpu.memory_space<smem>>
    %1308 = vector.broadcast %1307 : f32 to vector<16x36xf32>
    %1309 = arith.mulf %1306, %1308 : vector<16x36xf32>
    %1310 = arith.addf %1305, %1309 : vector<16x36xf32>
    %1311 = vector.extract_strided_slice %1197 {offsets = [0, 1], sizes = [16, 36], strides = [1, 1]} : vector<16x38xf32> to vector<16x36xf32>
    %c5_632 = arith.constant 5 : index
    %c4_633 = arith.constant 4 : index
    %1312 = memref.load %arg8[%c5_632, %c4_633] : memref<8x9xf32, #tpu.memory_space<smem>>
    %1313 = vector.broadcast %1312 : f32 to vector<16x36xf32>
    %1314 = arith.mulf %1311, %1313 : vector<16x36xf32>
    %1315 = arith.addf %1310, %1314 : vector<16x36xf32>
    %1316 = vector.extract_strided_slice %1197 {offsets = [0, 2], sizes = [16, 36], strides = [1, 1]} : vector<16x38xf32> to vector<16x36xf32>
    %c5_634 = arith.constant 5 : index
    %c5_635 = arith.constant 5 : index
    %1317 = memref.load %arg8[%c5_634, %c5_635] : memref<8x9xf32, #tpu.memory_space<smem>>
    %1318 = vector.broadcast %1317 : f32 to vector<16x36xf32>
    %1319 = arith.mulf %1316, %1318 : vector<16x36xf32>
    %1320 = arith.addf %1315, %1319 : vector<16x36xf32>
    %1321 = vector.extract_strided_slice %1199 {offsets = [0, 0], sizes = [16, 36], strides = [1, 1]} : vector<16x38xf32> to vector<16x36xf32>
    %c5_636 = arith.constant 5 : index
    %c6_637 = arith.constant 6 : index
    %1322 = memref.load %arg8[%c5_636, %c6_637] : memref<8x9xf32, #tpu.memory_space<smem>>
    %1323 = vector.broadcast %1322 : f32 to vector<16x36xf32>
    %1324 = arith.mulf %1321, %1323 : vector<16x36xf32>
    %1325 = arith.addf %1320, %1324 : vector<16x36xf32>
    %1326 = vector.extract_strided_slice %1199 {offsets = [0, 1], sizes = [16, 36], strides = [1, 1]} : vector<16x38xf32> to vector<16x36xf32>
    %c5_638 = arith.constant 5 : index
    %c7_639 = arith.constant 7 : index
    %1327 = memref.load %arg8[%c5_638, %c7_639] : memref<8x9xf32, #tpu.memory_space<smem>>
    %1328 = vector.broadcast %1327 : f32 to vector<16x36xf32>
    %1329 = arith.mulf %1326, %1328 : vector<16x36xf32>
    %1330 = arith.addf %1325, %1329 : vector<16x36xf32>
    %1331 = vector.extract_strided_slice %1199 {offsets = [0, 2], sizes = [16, 36], strides = [1, 1]} : vector<16x38xf32> to vector<16x36xf32>
    %c5_640 = arith.constant 5 : index
    %c8_641 = arith.constant 8 : index
    %1332 = memref.load %arg8[%c5_640, %c8_641] : memref<8x9xf32, #tpu.memory_space<smem>>
    %1333 = vector.broadcast %1332 : f32 to vector<16x36xf32>
    %1334 = arith.mulf %1331, %1333 : vector<16x36xf32>
    %1335 = arith.addf %1330, %1334 : vector<16x36xf32>
    %c10_642 = arith.constant 10 : index
    %1336 = memref.load %arg9[%c10_642] : memref<16xf32, #tpu.memory_space<smem>>
    %1337 = vector.broadcast %1336 : f32 to vector<16x36xf32>
    %1338 = arith.mulf %1335, %1337 : vector<16x36xf32>
    %c10_643 = arith.constant 10 : index
    %1339 = memref.load %arg10[%c10_643] : memref<16xf32, #tpu.memory_space<smem>>
    %1340 = vector.broadcast %1339 : f32 to vector<16x36xf32>
    %1341 = arith.addf %1338, %1340 : vector<16x36xf32>
    %cst_644 = arith.constant 0.000000e+00 : f32
    %1342 = vector.broadcast %cst_644 : f32 to vector<16x36xf32>
    %1343 = arith.maximumf %1341, %1342 : vector<16x36xf32>
    %c0_645 = arith.constant 0 : index
    %c10_646 = arith.constant 10 : index
    %1344 = memref.load %arg11[%c0_645, %c10_646] : memref<4x16xf32, #tpu.memory_space<smem>>
    %1345 = vector.broadcast %1344 : f32 to vector<16x36xf32>
    %1346 = arith.mulf %1343, %1345 : vector<16x36xf32>
    %1347 = arith.addf %1279, %1346 : vector<16x36xf32>
    %c1_647 = arith.constant 1 : index
    %c10_648 = arith.constant 10 : index
    %1348 = memref.load %arg11[%c1_647, %c10_648] : memref<4x16xf32, #tpu.memory_space<smem>>
    %1349 = vector.broadcast %1348 : f32 to vector<16x36xf32>
    %1350 = arith.mulf %1343, %1349 : vector<16x36xf32>
    %1351 = arith.addf %1283, %1350 : vector<16x36xf32>
    %c2_649 = arith.constant 2 : index
    %c10_650 = arith.constant 10 : index
    %1352 = memref.load %arg11[%c2_649, %c10_650] : memref<4x16xf32, #tpu.memory_space<smem>>
    %1353 = vector.broadcast %1352 : f32 to vector<16x36xf32>
    %1354 = arith.mulf %1343, %1353 : vector<16x36xf32>
    %1355 = arith.addf %1287, %1354 : vector<16x36xf32>
    %c3_651 = arith.constant 3 : index
    %c10_652 = arith.constant 10 : index
    %1356 = memref.load %arg11[%c3_651, %c10_652] : memref<4x16xf32, #tpu.memory_space<smem>>
    %1357 = vector.broadcast %1356 : f32 to vector<16x36xf32>
    %1358 = arith.mulf %1343, %1357 : vector<16x36xf32>
    %1359 = arith.addf %1291, %1358 : vector<16x36xf32>
    %c11_653 = arith.constant 11 : index
    %1360 = memref.load %arg9[%c11_653] : memref<16xf32, #tpu.memory_space<smem>>
    %1361 = vector.broadcast %1360 : f32 to vector<16x36xf32>
    %1362 = arith.mulf %1335, %1361 : vector<16x36xf32>
    %c11_654 = arith.constant 11 : index
    %1363 = memref.load %arg10[%c11_654] : memref<16xf32, #tpu.memory_space<smem>>
    %1364 = vector.broadcast %1363 : f32 to vector<16x36xf32>
    %1365 = arith.addf %1362, %1364 : vector<16x36xf32>
    %cst_655 = arith.constant 0.000000e+00 : f32
    %1366 = vector.broadcast %cst_655 : f32 to vector<16x36xf32>
    %1367 = arith.maximumf %1365, %1366 : vector<16x36xf32>
    %c0_656 = arith.constant 0 : index
    %c11_657 = arith.constant 11 : index
    %1368 = memref.load %arg11[%c0_656, %c11_657] : memref<4x16xf32, #tpu.memory_space<smem>>
    %1369 = vector.broadcast %1368 : f32 to vector<16x36xf32>
    %1370 = arith.mulf %1367, %1369 : vector<16x36xf32>
    %1371 = arith.addf %1347, %1370 : vector<16x36xf32>
    %c1_658 = arith.constant 1 : index
    %c11_659 = arith.constant 11 : index
    %1372 = memref.load %arg11[%c1_658, %c11_659] : memref<4x16xf32, #tpu.memory_space<smem>>
    %1373 = vector.broadcast %1372 : f32 to vector<16x36xf32>
    %1374 = arith.mulf %1367, %1373 : vector<16x36xf32>
    %1375 = arith.addf %1351, %1374 : vector<16x36xf32>
    %c2_660 = arith.constant 2 : index
    %c11_661 = arith.constant 11 : index
    %1376 = memref.load %arg11[%c2_660, %c11_661] : memref<4x16xf32, #tpu.memory_space<smem>>
    %1377 = vector.broadcast %1376 : f32 to vector<16x36xf32>
    %1378 = arith.mulf %1367, %1377 : vector<16x36xf32>
    %1379 = arith.addf %1355, %1378 : vector<16x36xf32>
    %c3_662 = arith.constant 3 : index
    %c11_663 = arith.constant 11 : index
    %1380 = memref.load %arg11[%c3_662, %c11_663] : memref<4x16xf32, #tpu.memory_space<smem>>
    %1381 = vector.broadcast %1380 : f32 to vector<16x36xf32>
    %1382 = arith.mulf %1367, %1381 : vector<16x36xf32>
    %1383 = arith.addf %1359, %1382 : vector<16x36xf32>
    %c3_664 = arith.constant 3 : index
    %c0_665 = arith.constant 0 : index
    %c0_666 = arith.constant 0 : index
    %1384 = vector.load %arg14[%c3_664, %c0_665, %c0_666] : memref<4x18x38xf32, #tpu.memory_space<vmem>>, vector<1x16x38xf32>
    %1385 = vector.shape_cast %1384 : vector<1x16x38xf32> to vector<16x38xf32>
    %c3_667 = arith.constant 3 : index
    %c1_668 = arith.constant 1 : index
    %c0_669 = arith.constant 0 : index
    %1386 = vector.load %arg14[%c3_667, %c1_668, %c0_669] : memref<4x18x38xf32, #tpu.memory_space<vmem>>, vector<1x16x38xf32>
    %1387 = vector.shape_cast %1386 : vector<1x16x38xf32> to vector<16x38xf32>
    %c3_670 = arith.constant 3 : index
    %c2_671 = arith.constant 2 : index
    %c0_672 = arith.constant 0 : index
    %1388 = vector.load %arg14[%c3_670, %c2_671, %c0_672] : memref<4x18x38xf32, #tpu.memory_space<vmem>>, vector<1x16x38xf32>
    %1389 = vector.shape_cast %1388 : vector<1x16x38xf32> to vector<16x38xf32>
    %1390 = vector.extract_strided_slice %1385 {offsets = [0, 0], sizes = [16, 36], strides = [1, 1]} : vector<16x38xf32> to vector<16x36xf32>
    %c6_673 = arith.constant 6 : index
    %c0_674 = arith.constant 0 : index
    %1391 = memref.load %arg8[%c6_673, %c0_674] : memref<8x9xf32, #tpu.memory_space<smem>>
    %1392 = vector.broadcast %1391 : f32 to vector<16x36xf32>
    %1393 = arith.mulf %1390, %1392 : vector<16x36xf32>
    %1394 = vector.extract_strided_slice %1385 {offsets = [0, 1], sizes = [16, 36], strides = [1, 1]} : vector<16x38xf32> to vector<16x36xf32>
    %c6_675 = arith.constant 6 : index
    %c1_676 = arith.constant 1 : index
    %1395 = memref.load %arg8[%c6_675, %c1_676] : memref<8x9xf32, #tpu.memory_space<smem>>
    %1396 = vector.broadcast %1395 : f32 to vector<16x36xf32>
    %1397 = arith.mulf %1394, %1396 : vector<16x36xf32>
    %1398 = arith.addf %1393, %1397 : vector<16x36xf32>
    %1399 = vector.extract_strided_slice %1385 {offsets = [0, 2], sizes = [16, 36], strides = [1, 1]} : vector<16x38xf32> to vector<16x36xf32>
    %c6_677 = arith.constant 6 : index
    %c2_678 = arith.constant 2 : index
    %1400 = memref.load %arg8[%c6_677, %c2_678] : memref<8x9xf32, #tpu.memory_space<smem>>
    %1401 = vector.broadcast %1400 : f32 to vector<16x36xf32>
    %1402 = arith.mulf %1399, %1401 : vector<16x36xf32>
    %1403 = arith.addf %1398, %1402 : vector<16x36xf32>
    %1404 = vector.extract_strided_slice %1387 {offsets = [0, 0], sizes = [16, 36], strides = [1, 1]} : vector<16x38xf32> to vector<16x36xf32>
    %c6_679 = arith.constant 6 : index
    %c3_680 = arith.constant 3 : index
    %1405 = memref.load %arg8[%c6_679, %c3_680] : memref<8x9xf32, #tpu.memory_space<smem>>
    %1406 = vector.broadcast %1405 : f32 to vector<16x36xf32>
    %1407 = arith.mulf %1404, %1406 : vector<16x36xf32>
    %1408 = arith.addf %1403, %1407 : vector<16x36xf32>
    %1409 = vector.extract_strided_slice %1387 {offsets = [0, 1], sizes = [16, 36], strides = [1, 1]} : vector<16x38xf32> to vector<16x36xf32>
    %c6_681 = arith.constant 6 : index
    %c4_682 = arith.constant 4 : index
    %1410 = memref.load %arg8[%c6_681, %c4_682] : memref<8x9xf32, #tpu.memory_space<smem>>
    %1411 = vector.broadcast %1410 : f32 to vector<16x36xf32>
    %1412 = arith.mulf %1409, %1411 : vector<16x36xf32>
    %1413 = arith.addf %1408, %1412 : vector<16x36xf32>
    %1414 = vector.extract_strided_slice %1387 {offsets = [0, 2], sizes = [16, 36], strides = [1, 1]} : vector<16x38xf32> to vector<16x36xf32>
    %c6_683 = arith.constant 6 : index
    %c5_684 = arith.constant 5 : index
    %1415 = memref.load %arg8[%c6_683, %c5_684] : memref<8x9xf32, #tpu.memory_space<smem>>
    %1416 = vector.broadcast %1415 : f32 to vector<16x36xf32>
    %1417 = arith.mulf %1414, %1416 : vector<16x36xf32>
    %1418 = arith.addf %1413, %1417 : vector<16x36xf32>
    %1419 = vector.extract_strided_slice %1389 {offsets = [0, 0], sizes = [16, 36], strides = [1, 1]} : vector<16x38xf32> to vector<16x36xf32>
    %c6_685 = arith.constant 6 : index
    %c6_686 = arith.constant 6 : index
    %1420 = memref.load %arg8[%c6_685, %c6_686] : memref<8x9xf32, #tpu.memory_space<smem>>
    %1421 = vector.broadcast %1420 : f32 to vector<16x36xf32>
    %1422 = arith.mulf %1419, %1421 : vector<16x36xf32>
    %1423 = arith.addf %1418, %1422 : vector<16x36xf32>
    %1424 = vector.extract_strided_slice %1389 {offsets = [0, 1], sizes = [16, 36], strides = [1, 1]} : vector<16x38xf32> to vector<16x36xf32>
    %c6_687 = arith.constant 6 : index
    %c7_688 = arith.constant 7 : index
    %1425 = memref.load %arg8[%c6_687, %c7_688] : memref<8x9xf32, #tpu.memory_space<smem>>
    %1426 = vector.broadcast %1425 : f32 to vector<16x36xf32>
    %1427 = arith.mulf %1424, %1426 : vector<16x36xf32>
    %1428 = arith.addf %1423, %1427 : vector<16x36xf32>
    %1429 = vector.extract_strided_slice %1389 {offsets = [0, 2], sizes = [16, 36], strides = [1, 1]} : vector<16x38xf32> to vector<16x36xf32>
    %c6_689 = arith.constant 6 : index
    %c8_690 = arith.constant 8 : index
    %1430 = memref.load %arg8[%c6_689, %c8_690] : memref<8x9xf32, #tpu.memory_space<smem>>
    %1431 = vector.broadcast %1430 : f32 to vector<16x36xf32>
    %1432 = arith.mulf %1429, %1431 : vector<16x36xf32>
    %1433 = arith.addf %1428, %1432 : vector<16x36xf32>
    %c12_691 = arith.constant 12 : index
    %1434 = memref.load %arg9[%c12_691] : memref<16xf32, #tpu.memory_space<smem>>
    %1435 = vector.broadcast %1434 : f32 to vector<16x36xf32>
    %1436 = arith.mulf %1433, %1435 : vector<16x36xf32>
    %c12_692 = arith.constant 12 : index
    %1437 = memref.load %arg10[%c12_692] : memref<16xf32, #tpu.memory_space<smem>>
    %1438 = vector.broadcast %1437 : f32 to vector<16x36xf32>
    %1439 = arith.addf %1436, %1438 : vector<16x36xf32>
    %cst_693 = arith.constant 0.000000e+00 : f32
    %1440 = vector.broadcast %cst_693 : f32 to vector<16x36xf32>
    %1441 = arith.maximumf %1439, %1440 : vector<16x36xf32>
    %c0_694 = arith.constant 0 : index
    %c12_695 = arith.constant 12 : index
    %1442 = memref.load %arg11[%c0_694, %c12_695] : memref<4x16xf32, #tpu.memory_space<smem>>
    %1443 = vector.broadcast %1442 : f32 to vector<16x36xf32>
    %1444 = arith.mulf %1441, %1443 : vector<16x36xf32>
    %1445 = arith.addf %1371, %1444 : vector<16x36xf32>
    %c1_696 = arith.constant 1 : index
    %c12_697 = arith.constant 12 : index
    %1446 = memref.load %arg11[%c1_696, %c12_697] : memref<4x16xf32, #tpu.memory_space<smem>>
    %1447 = vector.broadcast %1446 : f32 to vector<16x36xf32>
    %1448 = arith.mulf %1441, %1447 : vector<16x36xf32>
    %1449 = arith.addf %1375, %1448 : vector<16x36xf32>
    %c2_698 = arith.constant 2 : index
    %c12_699 = arith.constant 12 : index
    %1450 = memref.load %arg11[%c2_698, %c12_699] : memref<4x16xf32, #tpu.memory_space<smem>>
    %1451 = vector.broadcast %1450 : f32 to vector<16x36xf32>
    %1452 = arith.mulf %1441, %1451 : vector<16x36xf32>
    %1453 = arith.addf %1379, %1452 : vector<16x36xf32>
    %c3_700 = arith.constant 3 : index
    %c12_701 = arith.constant 12 : index
    %1454 = memref.load %arg11[%c3_700, %c12_701] : memref<4x16xf32, #tpu.memory_space<smem>>
    %1455 = vector.broadcast %1454 : f32 to vector<16x36xf32>
    %1456 = arith.mulf %1441, %1455 : vector<16x36xf32>
    %1457 = arith.addf %1383, %1456 : vector<16x36xf32>
    %c13_702 = arith.constant 13 : index
    %1458 = memref.load %arg9[%c13_702] : memref<16xf32, #tpu.memory_space<smem>>
    %1459 = vector.broadcast %1458 : f32 to vector<16x36xf32>
    %1460 = arith.mulf %1433, %1459 : vector<16x36xf32>
    %c13_703 = arith.constant 13 : index
    %1461 = memref.load %arg10[%c13_703] : memref<16xf32, #tpu.memory_space<smem>>
    %1462 = vector.broadcast %1461 : f32 to vector<16x36xf32>
    %1463 = arith.addf %1460, %1462 : vector<16x36xf32>
    %cst_704 = arith.constant 0.000000e+00 : f32
    %1464 = vector.broadcast %cst_704 : f32 to vector<16x36xf32>
    %1465 = arith.maximumf %1463, %1464 : vector<16x36xf32>
    %c0_705 = arith.constant 0 : index
    %c13_706 = arith.constant 13 : index
    %1466 = memref.load %arg11[%c0_705, %c13_706] : memref<4x16xf32, #tpu.memory_space<smem>>
    %1467 = vector.broadcast %1466 : f32 to vector<16x36xf32>
    %1468 = arith.mulf %1465, %1467 : vector<16x36xf32>
    %1469 = arith.addf %1445, %1468 : vector<16x36xf32>
    %c1_707 = arith.constant 1 : index
    %c13_708 = arith.constant 13 : index
    %1470 = memref.load %arg11[%c1_707, %c13_708] : memref<4x16xf32, #tpu.memory_space<smem>>
    %1471 = vector.broadcast %1470 : f32 to vector<16x36xf32>
    %1472 = arith.mulf %1465, %1471 : vector<16x36xf32>
    %1473 = arith.addf %1449, %1472 : vector<16x36xf32>
    %c2_709 = arith.constant 2 : index
    %c13_710 = arith.constant 13 : index
    %1474 = memref.load %arg11[%c2_709, %c13_710] : memref<4x16xf32, #tpu.memory_space<smem>>
    %1475 = vector.broadcast %1474 : f32 to vector<16x36xf32>
    %1476 = arith.mulf %1465, %1475 : vector<16x36xf32>
    %1477 = arith.addf %1453, %1476 : vector<16x36xf32>
    %c3_711 = arith.constant 3 : index
    %c13_712 = arith.constant 13 : index
    %1478 = memref.load %arg11[%c3_711, %c13_712] : memref<4x16xf32, #tpu.memory_space<smem>>
    %1479 = vector.broadcast %1478 : f32 to vector<16x36xf32>
    %1480 = arith.mulf %1465, %1479 : vector<16x36xf32>
    %1481 = arith.addf %1457, %1480 : vector<16x36xf32>
    %1482 = vector.extract_strided_slice %1385 {offsets = [0, 0], sizes = [16, 36], strides = [1, 1]} : vector<16x38xf32> to vector<16x36xf32>
    %c7_713 = arith.constant 7 : index
    %c0_714 = arith.constant 0 : index
    %1483 = memref.load %arg8[%c7_713, %c0_714] : memref<8x9xf32, #tpu.memory_space<smem>>
    %1484 = vector.broadcast %1483 : f32 to vector<16x36xf32>
    %1485 = arith.mulf %1482, %1484 : vector<16x36xf32>
    %1486 = vector.extract_strided_slice %1385 {offsets = [0, 1], sizes = [16, 36], strides = [1, 1]} : vector<16x38xf32> to vector<16x36xf32>
    %c7_715 = arith.constant 7 : index
    %c1_716 = arith.constant 1 : index
    %1487 = memref.load %arg8[%c7_715, %c1_716] : memref<8x9xf32, #tpu.memory_space<smem>>
    %1488 = vector.broadcast %1487 : f32 to vector<16x36xf32>
    %1489 = arith.mulf %1486, %1488 : vector<16x36xf32>
    %1490 = arith.addf %1485, %1489 : vector<16x36xf32>
    %1491 = vector.extract_strided_slice %1385 {offsets = [0, 2], sizes = [16, 36], strides = [1, 1]} : vector<16x38xf32> to vector<16x36xf32>
    %c7_717 = arith.constant 7 : index
    %c2_718 = arith.constant 2 : index
    %1492 = memref.load %arg8[%c7_717, %c2_718] : memref<8x9xf32, #tpu.memory_space<smem>>
    %1493 = vector.broadcast %1492 : f32 to vector<16x36xf32>
    %1494 = arith.mulf %1491, %1493 : vector<16x36xf32>
    %1495 = arith.addf %1490, %1494 : vector<16x36xf32>
    %1496 = vector.extract_strided_slice %1387 {offsets = [0, 0], sizes = [16, 36], strides = [1, 1]} : vector<16x38xf32> to vector<16x36xf32>
    %c7_719 = arith.constant 7 : index
    %c3_720 = arith.constant 3 : index
    %1497 = memref.load %arg8[%c7_719, %c3_720] : memref<8x9xf32, #tpu.memory_space<smem>>
    %1498 = vector.broadcast %1497 : f32 to vector<16x36xf32>
    %1499 = arith.mulf %1496, %1498 : vector<16x36xf32>
    %1500 = arith.addf %1495, %1499 : vector<16x36xf32>
    %1501 = vector.extract_strided_slice %1387 {offsets = [0, 1], sizes = [16, 36], strides = [1, 1]} : vector<16x38xf32> to vector<16x36xf32>
    %c7_721 = arith.constant 7 : index
    %c4_722 = arith.constant 4 : index
    %1502 = memref.load %arg8[%c7_721, %c4_722] : memref<8x9xf32, #tpu.memory_space<smem>>
    %1503 = vector.broadcast %1502 : f32 to vector<16x36xf32>
    %1504 = arith.mulf %1501, %1503 : vector<16x36xf32>
    %1505 = arith.addf %1500, %1504 : vector<16x36xf32>
    %1506 = vector.extract_strided_slice %1387 {offsets = [0, 2], sizes = [16, 36], strides = [1, 1]} : vector<16x38xf32> to vector<16x36xf32>
    %c7_723 = arith.constant 7 : index
    %c5_724 = arith.constant 5 : index
    %1507 = memref.load %arg8[%c7_723, %c5_724] : memref<8x9xf32, #tpu.memory_space<smem>>
    %1508 = vector.broadcast %1507 : f32 to vector<16x36xf32>
    %1509 = arith.mulf %1506, %1508 : vector<16x36xf32>
    %1510 = arith.addf %1505, %1509 : vector<16x36xf32>
    %1511 = vector.extract_strided_slice %1389 {offsets = [0, 0], sizes = [16, 36], strides = [1, 1]} : vector<16x38xf32> to vector<16x36xf32>
    %c7_725 = arith.constant 7 : index
    %c6_726 = arith.constant 6 : index
    %1512 = memref.load %arg8[%c7_725, %c6_726] : memref<8x9xf32, #tpu.memory_space<smem>>
    %1513 = vector.broadcast %1512 : f32 to vector<16x36xf32>
    %1514 = arith.mulf %1511, %1513 : vector<16x36xf32>
    %1515 = arith.addf %1510, %1514 : vector<16x36xf32>
    %1516 = vector.extract_strided_slice %1389 {offsets = [0, 1], sizes = [16, 36], strides = [1, 1]} : vector<16x38xf32> to vector<16x36xf32>
    %c7_727 = arith.constant 7 : index
    %c7_728 = arith.constant 7 : index
    %1517 = memref.load %arg8[%c7_727, %c7_728] : memref<8x9xf32, #tpu.memory_space<smem>>
    %1518 = vector.broadcast %1517 : f32 to vector<16x36xf32>
    %1519 = arith.mulf %1516, %1518 : vector<16x36xf32>
    %1520 = arith.addf %1515, %1519 : vector<16x36xf32>
    %1521 = vector.extract_strided_slice %1389 {offsets = [0, 2], sizes = [16, 36], strides = [1, 1]} : vector<16x38xf32> to vector<16x36xf32>
    %c7_729 = arith.constant 7 : index
    %c8_730 = arith.constant 8 : index
    %1522 = memref.load %arg8[%c7_729, %c8_730] : memref<8x9xf32, #tpu.memory_space<smem>>
    %1523 = vector.broadcast %1522 : f32 to vector<16x36xf32>
    %1524 = arith.mulf %1521, %1523 : vector<16x36xf32>
    %1525 = arith.addf %1520, %1524 : vector<16x36xf32>
    %c14_731 = arith.constant 14 : index
    %1526 = memref.load %arg9[%c14_731] : memref<16xf32, #tpu.memory_space<smem>>
    %1527 = vector.broadcast %1526 : f32 to vector<16x36xf32>
    %1528 = arith.mulf %1525, %1527 : vector<16x36xf32>
    %c14_732 = arith.constant 14 : index
    %1529 = memref.load %arg10[%c14_732] : memref<16xf32, #tpu.memory_space<smem>>
    %1530 = vector.broadcast %1529 : f32 to vector<16x36xf32>
    %1531 = arith.addf %1528, %1530 : vector<16x36xf32>
    %cst_733 = arith.constant 0.000000e+00 : f32
    %1532 = vector.broadcast %cst_733 : f32 to vector<16x36xf32>
    %1533 = arith.maximumf %1531, %1532 : vector<16x36xf32>
    %c0_734 = arith.constant 0 : index
    %c14_735 = arith.constant 14 : index
    %1534 = memref.load %arg11[%c0_734, %c14_735] : memref<4x16xf32, #tpu.memory_space<smem>>
    %1535 = vector.broadcast %1534 : f32 to vector<16x36xf32>
    %1536 = arith.mulf %1533, %1535 : vector<16x36xf32>
    %1537 = arith.addf %1469, %1536 : vector<16x36xf32>
    %c1_736 = arith.constant 1 : index
    %c14_737 = arith.constant 14 : index
    %1538 = memref.load %arg11[%c1_736, %c14_737] : memref<4x16xf32, #tpu.memory_space<smem>>
    %1539 = vector.broadcast %1538 : f32 to vector<16x36xf32>
    %1540 = arith.mulf %1533, %1539 : vector<16x36xf32>
    %1541 = arith.addf %1473, %1540 : vector<16x36xf32>
    %c2_738 = arith.constant 2 : index
    %c14_739 = arith.constant 14 : index
    %1542 = memref.load %arg11[%c2_738, %c14_739] : memref<4x16xf32, #tpu.memory_space<smem>>
    %1543 = vector.broadcast %1542 : f32 to vector<16x36xf32>
    %1544 = arith.mulf %1533, %1543 : vector<16x36xf32>
    %1545 = arith.addf %1477, %1544 : vector<16x36xf32>
    %c3_740 = arith.constant 3 : index
    %c14_741 = arith.constant 14 : index
    %1546 = memref.load %arg11[%c3_740, %c14_741] : memref<4x16xf32, #tpu.memory_space<smem>>
    %1547 = vector.broadcast %1546 : f32 to vector<16x36xf32>
    %1548 = arith.mulf %1533, %1547 : vector<16x36xf32>
    %1549 = arith.addf %1481, %1548 : vector<16x36xf32>
    %c15_742 = arith.constant 15 : index
    %1550 = memref.load %arg9[%c15_742] : memref<16xf32, #tpu.memory_space<smem>>
    %1551 = vector.broadcast %1550 : f32 to vector<16x36xf32>
    %1552 = arith.mulf %1525, %1551 : vector<16x36xf32>
    %c15_743 = arith.constant 15 : index
    %1553 = memref.load %arg10[%c15_743] : memref<16xf32, #tpu.memory_space<smem>>
    %1554 = vector.broadcast %1553 : f32 to vector<16x36xf32>
    %1555 = arith.addf %1552, %1554 : vector<16x36xf32>
    %cst_744 = arith.constant 0.000000e+00 : f32
    %1556 = vector.broadcast %cst_744 : f32 to vector<16x36xf32>
    %1557 = arith.maximumf %1555, %1556 : vector<16x36xf32>
    %c0_745 = arith.constant 0 : index
    %c15_746 = arith.constant 15 : index
    %1558 = memref.load %arg11[%c0_745, %c15_746] : memref<4x16xf32, #tpu.memory_space<smem>>
    %1559 = vector.broadcast %1558 : f32 to vector<16x36xf32>
    %1560 = arith.mulf %1557, %1559 : vector<16x36xf32>
    %1561 = arith.addf %1537, %1560 : vector<16x36xf32>
    %c1_747 = arith.constant 1 : index
    %c15_748 = arith.constant 15 : index
    %1562 = memref.load %arg11[%c1_747, %c15_748] : memref<4x16xf32, #tpu.memory_space<smem>>
    %1563 = vector.broadcast %1562 : f32 to vector<16x36xf32>
    %1564 = arith.mulf %1557, %1563 : vector<16x36xf32>
    %1565 = arith.addf %1541, %1564 : vector<16x36xf32>
    %c2_749 = arith.constant 2 : index
    %c15_750 = arith.constant 15 : index
    %1566 = memref.load %arg11[%c2_749, %c15_750] : memref<4x16xf32, #tpu.memory_space<smem>>
    %1567 = vector.broadcast %1566 : f32 to vector<16x36xf32>
    %1568 = arith.mulf %1557, %1567 : vector<16x36xf32>
    %1569 = arith.addf %1545, %1568 : vector<16x36xf32>
    %c3_751 = arith.constant 3 : index
    %c15_752 = arith.constant 15 : index
    %1570 = memref.load %arg11[%c3_751, %c15_752] : memref<4x16xf32, #tpu.memory_space<smem>>
    %1571 = vector.broadcast %1570 : f32 to vector<16x36xf32>
    %1572 = arith.mulf %1557, %1571 : vector<16x36xf32>
    %1573 = arith.addf %1549, %1572 : vector<16x36xf32>
    %c0_753 = arith.constant 0 : index
    %1574 = memref.load %arg12[%c0_753] : memref<4xf32, #tpu.memory_space<smem>>
    %1575 = vector.broadcast %1574 : f32 to vector<16x36xf32>
    %1576 = arith.addf %1561, %1575 : vector<16x36xf32>
    %c1_754 = arith.constant 1 : index
    %1577 = memref.load %arg12[%c1_754] : memref<4xf32, #tpu.memory_space<smem>>
    %1578 = vector.broadcast %1577 : f32 to vector<16x36xf32>
    %1579 = arith.addf %1565, %1578 : vector<16x36xf32>
    %c2_755 = arith.constant 2 : index
    %1580 = memref.load %arg12[%c2_755] : memref<4xf32, #tpu.memory_space<smem>>
    %1581 = vector.broadcast %1580 : f32 to vector<16x36xf32>
    %1582 = arith.addf %1569, %1581 : vector<16x36xf32>
    %c3_756 = arith.constant 3 : index
    %1583 = memref.load %arg12[%c3_756] : memref<4xf32, #tpu.memory_space<smem>>
    %1584 = vector.broadcast %1583 : f32 to vector<16x36xf32>
    %1585 = arith.addf %1573, %1584 : vector<16x36xf32>
    %c0_757 = arith.constant 0 : index
    %c0_758 = arith.constant 0 : index
    %c2_759 = arith.constant 2 : index
    %c2_760 = arith.constant 2 : index
    %1586 = vector.load %arg1[%c0_757, %c0_758, %c2_759, %c2_760] : memref<1x4x20x40xf32, #tpu.memory_space<vmem>>, vector<1x1x16x36xf32>
    %1587 = vector.shape_cast %1586 : vector<1x1x16x36xf32> to vector<16x36xf32>
    %1588 = arith.addf %1576, %1587 : vector<16x36xf32>
    %cst_761 = arith.constant 0.000000e+00 : f32
    %1589 = vector.broadcast %cst_761 : f32 to vector<16x36xf32>
    %1590 = arith.maximumf %1588, %1589 : vector<16x36xf32>
    %c0_762 = arith.constant 0 : index
    %c0_763 = arith.constant 0 : index
    %c0_764 = arith.constant 0 : index
    %c0_765 = arith.constant 0 : index
    %1591 = vector.load %arg13[%c0_762, %c0_763, %c0_764, %c0_765] : memref<1x4x16x36xf32, #tpu.memory_space<vmem>>, vector<1x1x16x36xf32>
    %1592 = vector.shape_cast %1591 : vector<1x1x16x36xf32> to vector<16x36xf32>
    %1593 = vector.shape_cast %1590 : vector<16x36xf32> to vector<1x1x16x36xf32>
    tpu.vector_store %arg13[%c0_762, %c0_763, %c0_764, %c0_765], %1593 {strides = array<i32>} : memref<1x4x16x36xf32, #tpu.memory_space<vmem>>, vector<1x1x16x36xf32>,
    %c0_766 = arith.constant 0 : index
    %c1_767 = arith.constant 1 : index
    %c2_768 = arith.constant 2 : index
    %c2_769 = arith.constant 2 : index
    %1594 = vector.load %arg1[%c0_766, %c1_767, %c2_768, %c2_769] : memref<1x4x20x40xf32, #tpu.memory_space<vmem>>, vector<1x1x16x36xf32>
    %1595 = vector.shape_cast %1594 : vector<1x1x16x36xf32> to vector<16x36xf32>
    %1596 = arith.addf %1579, %1595 : vector<16x36xf32>
    %cst_770 = arith.constant 0.000000e+00 : f32
    %1597 = vector.broadcast %cst_770 : f32 to vector<16x36xf32>
    %1598 = arith.maximumf %1596, %1597 : vector<16x36xf32>
    %c0_771 = arith.constant 0 : index
    %c1_772 = arith.constant 1 : index
    %c0_773 = arith.constant 0 : index
    %c0_774 = arith.constant 0 : index
    %1599 = vector.load %arg13[%c0_771, %c1_772, %c0_773, %c0_774] : memref<1x4x16x36xf32, #tpu.memory_space<vmem>>, vector<1x1x16x36xf32>
    %1600 = vector.shape_cast %1599 : vector<1x1x16x36xf32> to vector<16x36xf32>
    %1601 = vector.shape_cast %1598 : vector<16x36xf32> to vector<1x1x16x36xf32>
    tpu.vector_store %arg13[%c0_771, %c1_772, %c0_773, %c0_774], %1601 {strides = array<i32>} : memref<1x4x16x36xf32, #tpu.memory_space<vmem>>, vector<1x1x16x36xf32>,
    %c0_775 = arith.constant 0 : index
    %c2_776 = arith.constant 2 : index
    %c2_777 = arith.constant 2 : index
    %c2_778 = arith.constant 2 : index
    %1602 = vector.load %arg1[%c0_775, %c2_776, %c2_777, %c2_778] : memref<1x4x20x40xf32, #tpu.memory_space<vmem>>, vector<1x1x16x36xf32>
    %1603 = vector.shape_cast %1602 : vector<1x1x16x36xf32> to vector<16x36xf32>
    %1604 = arith.addf %1582, %1603 : vector<16x36xf32>
    %cst_779 = arith.constant 0.000000e+00 : f32
    %1605 = vector.broadcast %cst_779 : f32 to vector<16x36xf32>
    %1606 = arith.maximumf %1604, %1605 : vector<16x36xf32>
    %c0_780 = arith.constant 0 : index
    %c2_781 = arith.constant 2 : index
    %c0_782 = arith.constant 0 : index
    %c0_783 = arith.constant 0 : index
    %1607 = vector.load %arg13[%c0_780, %c2_781, %c0_782, %c0_783] : memref<1x4x16x36xf32, #tpu.memory_space<vmem>>, vector<1x1x16x36xf32>
    %1608 = vector.shape_cast %1607 : vector<1x1x16x36xf32> to vector<16x36xf32>
    %1609 = vector.shape_cast %1606 : vector<16x36xf32> to vector<1x1x16x36xf32>
    tpu.vector_store %arg13[%c0_780, %c2_781, %c0_782, %c0_783], %1609 {strides = array<i32>} : memref<1x4x16x36xf32, #tpu.memory_space<vmem>>, vector<1x1x16x36xf32>,
    %c0_784 = arith.constant 0 : index
    %c3_785 = arith.constant 3 : index
    %c2_786 = arith.constant 2 : index
    %c2_787 = arith.constant 2 : index
    %1610 = vector.load %arg1[%c0_784, %c3_785, %c2_786, %c2_787] : memref<1x4x20x40xf32, #tpu.memory_space<vmem>>, vector<1x1x16x36xf32>
    %1611 = vector.shape_cast %1610 : vector<1x1x16x36xf32> to vector<16x36xf32>
    %1612 = arith.addf %1585, %1611 : vector<16x36xf32>
    %cst_788 = arith.constant 0.000000e+00 : f32
    %1613 = vector.broadcast %cst_788 : f32 to vector<16x36xf32>
    %1614 = arith.maximumf %1612, %1613 : vector<16x36xf32>
    %c0_789 = arith.constant 0 : index
    %c3_790 = arith.constant 3 : index
    %c0_791 = arith.constant 0 : index
    %c0_792 = arith.constant 0 : index
    %1615 = vector.load %arg13[%c0_789, %c3_790, %c0_791, %c0_792] : memref<1x4x16x36xf32, #tpu.memory_space<vmem>>, vector<1x1x16x36xf32>
    %1616 = vector.shape_cast %1615 : vector<1x1x16x36xf32> to vector<16x36xf32>
    %1617 = vector.shape_cast %1614 : vector<16x36xf32> to vector<1x1x16x36xf32>
    tpu.vector_store %arg13[%c0_789, %c3_790, %c0_791, %c0_792], %1617 {strides = array<i32>} : memref<1x4x16x36xf32, #tpu.memory_space<vmem>>, vector<1x1x16x36xf32>,
    return
  }
  func.func @transform_0(%arg0: i32) -> (i32, i32, i32, i32) {
    %c0_i32 = arith.constant 0 : i32
    %c0_i32_0 = arith.constant 0 : i32
    %c0_i32_1 = arith.constant 0 : i32
    %c0_i32_2 = arith.constant 0 : i32
    return %arg0, %c0_i32, %c0_i32_0, %c0_i32_1 : i32, i32, i32, i32
  }
  func.func @transform_1(%arg0: i32) -> (i32, i32) {
    %c0_i32 = arith.constant 0 : i32
    %c0_i32_0 = arith.constant 0 : i32
    %c0_i32_1 = arith.constant 0 : i32
    return %c0_i32, %c0_i32_0 : i32, i32
  }
  func.func @transform_2(%arg0: i32) -> (i32, i32) {
    %c0_i32 = arith.constant 0 : i32
    %c0_i32_0 = arith.constant 0 : i32
    %c0_i32_1 = arith.constant 0 : i32
    return %c0_i32, %c0_i32_0 : i32, i32
  }
  func.func @transform_3(%arg0: i32) -> i32 {
    %c0_i32 = arith.constant 0 : i32
    %c0_i32_0 = arith.constant 0 : i32
    return %c0_i32 : i32
  }
  func.func @transform_4(%arg0: i32) -> i32 {
    %c0_i32 = arith.constant 0 : i32
    %c0_i32_0 = arith.constant 0 : i32
    return %c0_i32 : i32
  }
  func.func @transform_5(%arg0: i32) -> (i32, i32) {
    %c0_i32 = arith.constant 0 : i32
    %c0_i32_0 = arith.constant 0 : i32
    %c0_i32_1 = arith.constant 0 : i32
    return %c0_i32, %c0_i32_0 : i32, i32
  }
  func.func @transform_6(%arg0: i32) -> i32 {
    %c0_i32 = arith.constant 0 : i32
    %c0_i32_0 = arith.constant 0 : i32
    return %c0_i32 : i32
  }
  func.func @transform_7(%arg0: i32) -> (i32, i32) {
    %c0_i32 = arith.constant 0 : i32
    %c0_i32_0 = arith.constant 0 : i32
    %c0_i32_1 = arith.constant 0 : i32
    return %c0_i32, %c0_i32_0 : i32, i32
  }
  func.func @transform_8(%arg0: i32) -> i32 {
    %c0_i32 = arith.constant 0 : i32
    %c0_i32_0 = arith.constant 0 : i32
    return %c0_i32 : i32
  }
  func.func @transform_9(%arg0: i32) -> i32 {
    %c0_i32 = arith.constant 0 : i32
    %c0_i32_0 = arith.constant 0 : i32
    return %c0_i32 : i32
  }
  func.func @transform_10(%arg0: i32) -> (i32, i32) {
    %c0_i32 = arith.constant 0 : i32
    %c0_i32_0 = arith.constant 0 : i32
    %c0_i32_1 = arith.constant 0 : i32
    return %c0_i32, %c0_i32_0 : i32, i32
  }
  func.func @transform_11(%arg0: i32) -> i32 {
    %c0_i32 = arith.constant 0 : i32
    %c0_i32_0 = arith.constant 0 : i32
    return %c0_i32 : i32
  }
  func.func @transform_12(%arg0: i32) -> (i32, i32, i32, i32) {
    %c0_i32 = arith.constant 0 : i32
    %c0_i32_0 = arith.constant 0 : i32
    %c0_i32_1 = arith.constant 0 : i32
    %c0_i32_2 = arith.constant 0 : i32
    return %arg0, %c0_i32, %c0_i32_0, %c0_i32_1 : i32, i32, i32, i32
  }
}

</mosaic_0001>

<bundles_post_ra>
// kernel: tpu_custom_call.1
= control target key start
LH: loop header
LB: loop body
LE: loop exit
PB: predicated region body
PF: predicated region fallthrough
CT: control target
= control target key end

     0   :  { %s6372_s0 = inlined_call_operand.vmem [shape: f32[1,4,20,40], index: 0, kind: input, shape index: {}]   ;;  %s6373_s1 = inlined_call_operand.vmem [shape: f32[16,38], index: 1, kind: input, shape index: {}]   ;;  %s6374_s2 = inlined_call_operand.vmem [shape: f32[8,9], index: 2, kind: input, shape index: {}]   ;;  %s6375_s3 = inlined_call_operand.vmem [shape: f32[16], index: 3, kind: input, shape index: {}]   ;;  %s6376_s4 = inlined_call_operand.vmem [shape: f32[16], index: 4, kind: input, shape index: {}]   ;;  %s6377_s5 = inlined_call_operand.vmem [shape: f32[4,16], index: 5, kind: input, shape index: {}]   ;;  %s6378_s6 = inlined_call_operand.vmem [shape: f32[4], index: 6, kind: input, shape index: {}]   ;;  %s6379_s7 = inlined_call_operand.vmem [shape: f32[8,9], index: 7, kind: input, shape index: {}]   ;;  %s6380_s8 = inlined_call_operand.vmem [shape: f32[16], index: 8, kind: input, shape index: {}]   ;;  %s6381_s9 = inlined_call_operand.vmem [shape: f32[16], index: 9, kind: input, shape index: {}]   ;;  %s6382_s10 = inlined_call_operand.vmem [shape: f32[4,16], index: 10, kind: input, shape index: {}]   ;;  %s6383_s11 = inlined_call_operand.vmem [shape: f32[4], index: 11, kind: input, shape index: {}]   ;;  %s6384_s12 = inlined_call_operand.hbm [shape: f32[1,4,16,36], index: 12, kind: output, shape index: {}]  }
   0x1   :  { %6458 = sst [smem:[#allocation54_spill]] %s6372_s0 }
   0x2   :  { %6459 = sst [smem:[#allocation55_spill]] %s6373_s1 }
   0x3   :  { %6460 = sst [smem:[#allocation56_spill]] %s6384_s12 }
   0x4   :  { %17 = vsyncpa [#allocation5], 0 }
   0x5   :  { %18 = vsyncpa [#allocation7], 0 }
   0x6   :  { %19 = vsyncpa [#allocation10], 0 }
   0x7   :  { %20 = vsyncpa [#allocation13], 0 }
   0x8   :  { %21 = vsyncpa [#allocation16], 0 }
   0x9   :  { %22 = vsyncpa [#allocation19], 0  ;;  %s44_s23 = sshll.u32 %s6375_s3, 4  ;;  %s45_s23 = int_to_ptr.vmem [resolvable:$true] %s44_s23 }
   0xa   :  { %23 = vsyncpa [#allocation4], 0  ;;  %s64_s26 = sshll.u32 %s6377_s5, 4  ;;  %s3443_s27 = scalar_lea.vmem %s45_s23, 16  ;;  %s65_s26 = int_to_ptr.vmem [resolvable:$true] %s64_s26 }
   0xb   :  { %p3444_p0 = scmp.ne.s32.totalorder %s45_s23, %s3443_s27  ;;  %p3448_p1 = scmp.lt.s32.totalorder %s45_s23, %s45_s23 }
   0xc   :  { %p3449_p2 = scmp.lt.s32.totalorder %s3443_s27, %s3443_s27 }
   0xe   :  { %p3450_p3 = por %p3449_p2, %p3448_p1 }
  0x10   :  { %p3451_p4 = pnand %p3450_p3, %p3444_p0 }
  0x12   :  { %3454 = shalt.err (!%p3451_p4)
}
  0x13   :  { %s3599_s28 = smov [#allocation6]   ;;  %s3455_s29 = scalar_lea.vmem %s65_s26, 64 }
  0x14   :  { %47 = dma.vmem_to_smem %s45_s23, 16, %s3599_s28, [#allocation7]  }
  0x15   :  { %p3456_p5 = scmp.ne.s32.totalorder %s65_s26, %s3455_s29  ;;  %p3460_p6 = scmp.lt.s32.totalorder %s65_s26, %s65_s26 }
  0x16   :  { %p3461_p7 = scmp.lt.s32.totalorder %s3455_s29, %s3455_s29 }
  0x18   :  { %p3462_p8 = por %p3461_p7, %p3460_p6 }
  0x1a   :  { %p3463_p9 = pnand %p3462_p8, %p3456_p5 }
  0x1c   :  { %3466 = shalt.err (!%p3463_p9)
}
  0x1d   :  { %s3600_s3 = smov [#allocation9]   ;;  %s84_s13 = sshll.u32 %s6379_s7, 4  ;;  %s85_s13 = int_to_ptr.vmem [resolvable:$true] %s84_s13 }
  0x1e   :  { %67 = dma.vmem_to_smem %s65_s26, 64, %s3600_s3, [#allocation10]  }
  0x1f   :  { %s104_s16 = sshll.u32 %s6381_s9, 4  ;;  %s3467_s17 = scalar_lea.vmem %s85_s13, 128  ;;  %s105_s16 = int_to_ptr.vmem [resolvable:$true] %s104_s16 }
  0x20   :  { %p3468_p10 = scmp.ne.s32.totalorder %s85_s13, %s3467_s17  ;;  %p3472_p11 = scmp.lt.s32.totalorder %s85_s13, %s85_s13 }
  0x21   :  { %p3473_p12 = scmp.lt.s32.totalorder %s3467_s17, %s3467_s17 }
  0x23   :  { %p3474_p13 = por %p3473_p12, %p3472_p11 }
  0x25   :  { %p3475_p0 = pnand %p3474_p13, %p3468_p10 }
  0x27   :  { %3478 = shalt.err (!%p3475_p0)
}
  0x28   :  { %s3601_s18 = smov [#allocation12]   ;;  %s3479_s19 = scalar_lea.vmem %s105_s16, 16 }
  0x29   :  { %87 = dma.vmem_to_smem %s85_s13, 128, %s3601_s18, [#allocation13]  }
  0x2a   :  { %p3480_p1 = scmp.ne.s32.totalorder %s105_s16, %s3479_s19  ;;  %p3484_p2 = scmp.lt.s32.totalorder %s105_s16, %s105_s16 }
  0x2b   :  { %p3485_p3 = scmp.lt.s32.totalorder %s3479_s19, %s3479_s19 }
  0x2d   :  { %p3486_p4 = por %p3485_p3, %p3484_p2 }
  0x2f   :  { %p3487_p5 = pnand %p3486_p4, %p3480_p1 }
  0x31   :  { %3490 = shalt.err (!%p3487_p5)
}
  0x32   :  { %s3602_s7 = smov [#allocation15]   ;;  %s34_s21 = sshll.u32 %s6374_s2, 4  ;;  %s35_s21 = int_to_ptr.vmem [resolvable:$true] %s34_s21 }
  0x33   :  { %107 = dma.vmem_to_smem %s105_s16, 16, %s3602_s7, [#allocation16]  }
  0x34   :  { %s54_s24 = sshll.u32 %s6376_s4, 4  ;;  %s3491_s25 = scalar_lea.vmem %s35_s21, 128  ;;  %s55_s24 = int_to_ptr.vmem [resolvable:$true] %s54_s24 }
  0x35   :  { %p3492_p6 = scmp.ne.s32.totalorder %s35_s21, %s3491_s25  ;;  %p3496_p7 = scmp.lt.s32.totalorder %s35_s21, %s35_s21 }
  0x36   :  { %p3497_p8 = scmp.lt.s32.totalorder %s3491_s25, %s3491_s25 }
  0x38   :  { %p3498_p9 = por %p3497_p8, %p3496_p7 }
  0x3a   :  { %p3499_p10 = pnand %p3498_p9, %p3492_p6 }
  0x3c   :  { %3502 = shalt.err (!%p3499_p10)
}
  0x3d   :  { %s3603_s26 = smov [#allocation3]   ;;  %s3503_s27 = scalar_lea.vmem %s55_s24, 16 }
  0x3e   :  { %37 = dma.vmem_to_smem %s35_s21, 128, %s3603_s26, [#allocation5]  }
  0x3f   :  { %p3504_p11 = scmp.ne.s32.totalorder %s55_s24, %s3503_s27  ;;  %p3508_p12 = scmp.lt.s32.totalorder %s55_s24, %s55_s24 }
  0x40   :  { %p3509_p13 = scmp.lt.s32.totalorder %s3503_s27, %s3503_s27 }
  0x42   :  { %p3510_p0 = por %p3509_p13, %p3508_p12 }
  0x44   :  { %p3511_p1 = pnand %p3510_p0, %p3504_p11 }
  0x46   :  { %3514 = shalt.err (!%p3511_p1)
}
  0x47   :  { %s3604_s2 = smov [#allocation8]   ;;  %s74_s29 = sshll.u32 %s6378_s6, 4  ;;  %s75_s29 = int_to_ptr.vmem [resolvable:$true] %s74_s29 }
  0x48   :  { %57 = dma.vmem_to_smem %s55_s24, 16, %s3604_s2, [#allocation7]  }
  0x49   :  { %s94_s30 = sshll.u32 %s6380_s8, 4  ;;  %s3515_s13 = scalar_lea.vmem %s75_s29, 16  ;;  %s95_s30 = int_to_ptr.vmem [resolvable:$true] %s94_s30 }
  0x4a   :  { %p3516_p2 = scmp.ne.s32.totalorder %s75_s29, %s3515_s13  ;;  %p3520_p3 = scmp.lt.s32.totalorder %s75_s29, %s75_s29 }
  0x4b   :  { %p3521_p4 = scmp.lt.s32.totalorder %s3515_s13, %s3515_s13 }
  0x4d   :  { %p3522_p5 = por %p3521_p4, %p3520_p3 }
  0x4f   :  { %p3523_p6 = pnand %p3522_p5, %p3516_p2 }
  0x51   :  { %3526 = shalt.err (!%p3523_p6)
}
  0x52   :  { %s3605_s14 = smov [#allocation11]   ;;  %s3527_s15 = scalar_lea.vmem %s95_s30, 16 }
  0x53   :  { %77 = dma.vmem_to_smem %s75_s29, 16, %s3605_s14, [#allocation10]  }
  0x54   :  { %p3528_p7 = scmp.ne.s32.totalorder %s95_s30, %s3527_s15  ;;  %p3532_p8 = scmp.lt.s32.totalorder %s95_s30, %s95_s30 }
  0x55   :  { %p3533_p9 = scmp.lt.s32.totalorder %s3527_s15, %s3527_s15 }
  0x57   :  { %p3534_p10 = por %p3533_p9, %p3532_p8 }
  0x59   :  { %p3535_p11 = pnand %p3534_p10, %p3528_p7 }
  0x5b   :  { %3538 = shalt.err (!%p3535_p11)
}
  0x5c   :  { %s3606_s6 = smov [#allocation14]   ;;  %s114_s17 = sshll.u32 %s6382_s10, 4  ;;  %s115_s17 = int_to_ptr.vmem [resolvable:$true] %s114_s17 }
  0x5d   :  { %97 = dma.vmem_to_smem %s95_s30, 16, %s3606_s6, [#allocation13]  }
  0x5e   :  { %s124_s7 = sshll.u32 %s6383_s11, 4  ;;  %s3539_s9 = scalar_lea.vmem %s115_s17, 64  ;;  %s125_s7 = int_to_ptr.vmem [resolvable:$true] %s124_s7 }
  0x5f   :  { %p3540_p12 = scmp.ne.s32.totalorder %s115_s17, %s3539_s9  ;;  %p3544_p13 = scmp.lt.s32.totalorder %s115_s17, %s115_s17 }
  0x60   :  { %p3545_p0 = scmp.lt.s32.totalorder %s3539_s9, %s3539_s9 }
  0x62   :  { %p3546_p1 = por %p3545_p0, %p3544_p13 }
  0x64   :  { %p3547_p2 = pnand %p3546_p1, %p3540_p12 }
  0x66   :  { %3550 = shalt.err (!%p3547_p2)
}
  0x67   :  { %s3607_s20 = smov [#allocation17]   ;;  %s3551_s21 = scalar_lea.vmem %s125_s7, 16 }
  0x68   :  { %117 = dma.vmem_to_smem %s115_s17, 64, %s3607_s20, [#allocation16]  }
  0x69   :  { %p3552_p3 = scmp.ne.s32.totalorder %s125_s7, %s3551_s21  ;;  %p3556_p4 = scmp.lt.s32.totalorder %s125_s7, %s125_s7 }
  0x6a   :  { %p3557_p5 = scmp.lt.s32.totalorder %s3551_s21, %s3551_s21 }
  0x6c   :  { %p3558_p6 = por %p3557_p5, %p3556_p4 }
  0x6e   :  { %p3559_p7 = pnand %p3558_p6, %p3552_p3 }
  0x70   :  { %3562 = shalt.err (!%p3559_p7)
}
  0x71   :  { %s3608_s10 = smov [#allocation18]  }
  0x72   :  { %127 = dma.vmem_to_smem %s125_s7, 16, %s3608_s10, [#allocation19]  }
  0x73   :  { %3585 = dma.done.wait [#allocation5], 128  }
  0x74   :  { %3586 = vsyncadd [#allocation5], 4294967168 }
  0x75   :  { %3587 = dma.done.wait [#allocation7], 32  }
  0x76   :  { %3588 = vsyncadd [#allocation7], 4294967264 }
  0x77   :  { %3589 = dma.done.wait [#allocation10], 80  }
  0x78   :  { %3590 = vsyncadd [#allocation10], 4294967216 }
  0x79   :  { %3591 = dma.done.wait [#allocation13], 144  }
  0x7a   :  { %3592 = vsyncadd [#allocation13], 4294967152 }
  0x7b   :  { %3593 = dma.done.wait [#allocation16], 80  }
  0x7c   :  { %3594 = vsyncadd [#allocation16], 4294967216 }
  0x7d   :  { %3595 = dma.done.wait [#allocation19], 16  }
  0x7e   :  { %3596 = vsyncadd [#allocation19], 4294967280 }
  0x7f   :  { %158 = sfence }
  0x80   :  { %s3044_s11 = sld [smem:[#allocation3 + $0x2]]  ;;  %s3043_s22 = sld [smem:[#allocation3 + $0x1]]  ;;  %v3713_v0 = vld [vmem:[%s6372_s0 + $0x1] sm:$0xff]  ;;  %v3718_v1 = vld [vmem:[%s6372_s0 + $0x9] sm:$0xff]  ;;  %v3794_v44 = vld [vmem:[%s6372_s0 + $0x19] sm:$0xff]  ;;  %vm159_vm0 = vcmask 303104  }
  0x81   :  { %s3046_s23 = sld [smem:[#allocation3 + $0x4]]  ;;  %s3047_s2 = sld [smem:[#allocation3 + $0x5]]  ;;  %v3729_v8 = vld [vmem:[%s6372_s0 + $0xa] sm:$0xff]  ;;  %v3734_v10 = vld [vmem:[%s6372_s0 + $0x2] sm:$0xff]  ;;  %v3812_v52 = vld [vmem:[%s6372_s0 + $0x1a] sm:$0xff]  ;;  %vm1556_vm1 = vcmask 310272  }
  0x82   :  { %s6387_s4 = smov 126   ;;  %s6385_s28 = smov 127   ;;  %v3747_v16 = vld [vmem:[%s6372_s0 + $0xb] sm:$0xff]  ;;  %v3752_v18 = vld [vmem:[%s6372_s0 + $0x3] sm:$0xff]  ;;  %v3830_v60 = vld [vmem:[%s6372_s0 + $0x1b] sm:$0xff]  ;;  %vm2967_vm2 = vcmask 293888  }
  0x83   :  { %s3049_s5 = sld [smem:[#allocation3 + $0x7]]  ;;  %s3050_s14 = sld [smem:[#allocation3 + $0x8]]  ;;  %v3789_v42 = vld [vmem:[%s6372_s0 + $0x21] sm:$0xff] }
  0x84   :  { %s3061_s8 = sld [smem:[#allocation3 + $0x81]]  ;;  %s3062_s18 = sld [smem:[#allocation3 + $0x82]]  ;;  %v3807_v50 = vld [vmem:[%s6372_s0 + $0x22] sm:$0xff] }
  0x85   :  { %s3064_s19 = sld [smem:[#allocation3 + $0x84]]  ;;  %s3065_s7 = sld [smem:[#allocation3 + $0x85]]  ;;  %v3825_v58 = vld [vmem:[%s6372_s0 + $0x23] sm:$0xff] }
  0x86   :  { %v196_v2 = vstv %s3044_s11  ;;  %v182_v4 = vstv %s3043_s22  ;;  %s3067_s9 = sld [smem:[#allocation3 + $0x87]]  ;;  %s3068_s20 = sld [smem:[#allocation3 + $0x88]] }
  0x87   :  { %v197_v3 = vmul.f32 %v196_v2, %v3713_v0  ;;  %v183_v5 = vmul.f32 %v182_v4, %v3713_v0  ;;  %v198_v6 = vmul.f32 %v196_v2, %v3718_v1  ;;  %v184_v7 = vmul.f32 %v182_v4, %v3718_v1  ;;  %s3088_s21 = sld [smem:[#allocation3 + $0x101]]  ;;  %s3089_s10 = sld [smem:[#allocation3 + $0x102]] }
  0x88   :  { %v216_v9 = vstv %s3046_s23  ;;  %v230_v13 = vstv %s3047_s2  ;;  %s3091_s23 = sld [smem:[#allocation3 + $0x104]]  ;;  %s3092_s26 = sld [smem:[#allocation3 + $0x105]] }
  0x89   :  { %201 = vrot.lane.b32.xlu1 %v197_v3, %s6387_s4  ;;  %187 = vrot.lane.b32.xlu0 %v183_v5, %s6385_s28  ;;  %v218_v11 = vmul.f32 %v216_v9, %v3729_v8  ;;  %v217_v12 = vmul.f32 %v216_v9, %v3734_v10  ;;  %v232_v14 = vmul.f32 %v230_v13, %v3729_v8  ;;  %v250_v17 = vstv %s3049_s5  ;;  %s3094_s29 = sld [smem:[#allocation3 + $0x107]]  ;;  %s3095_s30 = sld [smem:[#allocation3 + $0x108]] }
  0x8a   :  { %v231_v15 = vmul.f32 %v230_v13, %v3734_v10  ;;  %v252_v19 = vmul.f32 %v250_v17, %v3747_v16  ;;  %v251_v20 = vmul.f32 %v250_v17, %v3752_v18  ;;  %v264_v21 = vstv %s3050_s14  ;;  %s3109_s15 = sld [smem:[#allocation3 + $0x181]]  ;;  %s3110_s16 = sld [smem:[#allocation3 + $0x182]] }
  0x8b   :  { %v266_v22 = vmul.f32 %v264_v21, %v3747_v16  ;;  %v265_v23 = vmul.f32 %v264_v21, %v3752_v18  ;;  %v342_v24 = vstv %s3061_s8  ;;  %v356_v27 = vstv %s3062_s18  ;;  %s3112_s17 = sld [smem:[#allocation3 + $0x184]]  ;;  %s3113_s18 = sld [smem:[#allocation3 + $0x185]] }
  0x8c   :  { %v344_v25 = vmul.f32 %v342_v24, %v3718_v1  ;;  %v343_v26 = vmul.f32 %v342_v24, %v3713_v0  ;;  %v358_v28 = vmul.f32 %v356_v27, %v3718_v1  ;;  %v357_v29 = vmul.f32 %v356_v27, %v3713_v0  ;;  %s3139_s11 = sld [smem:[#allocation3 + $0x204]]  ;;  %s3140_s24 = sld [smem:[#allocation3 + $0x205]] }
  0x8d   :  { %203 = vrot.lane.b32.xlu1 %v198_v6, %s6387_s4  ;;  %189 = vrot.lane.b32.xlu0 %v184_v7, %s6385_s28  ;;  %v376_v30 = vstv %s3064_s19  ;;  %v390_v33 = vstv %s3065_s7  ;;  %s3115_s19 = sld [smem:[#allocation3 + $0x187]]  ;;  %s3116_s7 = sld [smem:[#allocation3 + $0x188]] }
  0x8e   :  { %v378_v31 = vmul.f32 %v376_v30, %v3729_v8  ;;  %v377_v32 = vmul.f32 %v376_v30, %v3734_v10  ;;  %v392_v34 = vmul.f32 %v390_v33, %v3729_v8  ;;  %v391_v35 = vmul.f32 %v390_v33, %v3734_v10  ;;  %s3142_s27 = sld [smem:[#allocation3 + $0x207]]  ;;  %s3896_s3 = sld [smem:[#allocation3]] }
  0x8f   :  { %v410_v36 = vstv %s3067_s9  ;;  %v424_v39 = vstv %s3068_s20  ;;  %v517_v43 = vstv %s3088_s21  ;;  %v531_v47 = vstv %s3089_s10  ;;  %s3136_s9 = sld [smem:[#allocation3 + $0x201]]  ;;  %s3137_s20 = sld [smem:[#allocation3 + $0x202]] }
  0x90   :  { %v412_v37 = vmul.f32 %v410_v36, %v3747_v16  ;;  %v411_v38 = vmul.f32 %v410_v36, %v3752_v18  ;;  %v426_v40 = vmul.f32 %v424_v39, %v3747_v16  ;;  %v425_v41 = vmul.f32 %v424_v39, %v3752_v18  ;;  %v3890_v36 = vld [vmem:[%s6372_s0 + $0x32] sm:$0xff]  ;;  %s3143_s5 = sld [smem:[#allocation3 + $0x208]]  ;;  %s3157_s14 = sld [smem:[#allocation3 + $0x281]] }
  0x91   :  { %223 = vrot.lane.b32.xlu1 %v218_v11, %s6385_s28  ;;  %221 = vrot.lane.b32.xlu0 %v217_v12, %s6385_s28  ;;  %v519_v45 = vmul.f32 %v3789_v42, %v517_v43  ;;  %v518_v46 = vmul.f32 %v3794_v44, %v517_v43  ;;  %v533_v48 = vmul.f32 %v3789_v42, %v531_v47  ;;  %v551_v51 = vstv %s3091_s23  ;;  %v3905_v43 = vld [vmem:[%s6372_s0 + $0x3b] sm:$0xff]  ;;  %s3952_s21 = sld [smem:[#allocation3 + $0x287]]  ;;  %s3954_s10 = sld [smem:[#allocation9 + $0x80]] }
  0x92   :  { %v532_v49 = vmul.f32 %v3794_v44, %v531_v47  ;;  %v553_v53 = vmul.f32 %v3807_v50, %v551_v51  ;;  %v552_v54 = vmul.f32 %v3812_v52, %v551_v51  ;;  %v565_v55 = vstv %s3092_s26  ;;  %s3959_s22 = sld [smem:[#allocation9 + $0x180]]  ;;  %s3961_s23 = sld [smem:[#allocation6 + $0x1]] }
  0x93   :  { %v567_v56 = vmul.f32 %v3807_v50, %v565_v55  ;;  %v566_v57 = vmul.f32 %v3812_v52, %v565_v55  ;;  %v585_v59 = vstv %s3094_s29  ;;  %v599_v63 = vstv %s3095_s30  ;;  %s3967_s25 = sld [smem:[#allocation9 + $0x1]]  ;;  %s3980_s29 = sld [smem:[#allocation3 + $0x80]] }
  0x94   :  { %v587_v61 = vmul.f32 %v3825_v58, %v585_v59  ;;  %v586_v62 = vmul.f32 %v3830_v60, %v585_v59  ;;  %v601_v2 = vmul.f32 %v3825_v58, %v599_v63  ;;  %v600_v3 = vmul.f32 %v3830_v60, %v599_v63  ;;  %s3972_s26 = sld [smem:[#allocation9 + $0x81]]  ;;  %s3990_s13 = sld [smem:[#allocation3 + $0x302]] }
  0x95   :  { %237 = vrot.lane.b32.xlu1 %v232_v14, %s6387_s4  ;;  %235 = vrot.lane.b32.xlu0 %v231_v15, %s6387_s4  ;;  %v685_v4 = vstv %s3109_s15  ;;  %v699_v7 = vstv %s3110_s16  ;;  %s3907_s15 = sld [smem:[#allocation3 + $0x3]]  ;;  %s3919_s16 = sld [smem:[#allocation3 + $0x282]] }
  0x96   :  { %v687_v5 = vmul.f32 %v3789_v42, %v685_v4  ;;  %v686_v6 = vmul.f32 %v3794_v44, %v685_v4  ;;  %v701_v9 = vmul.f32 %v3789_v42, %v699_v7  ;;  %v700_v11 = vmul.f32 %v3794_v44, %v699_v7  ;;  %s3978_s2 = sld [smem:[#allocation9 + $0x101]]  ;;  %s4003_s6 = sld [smem:[#allocation3 + $0x305]] }
  0x97   :  { %v719_v12 = vstv %s3112_s17  ;;  %v733_v15 = vstv %s3113_s18  ;;  %v860_v27 = vstv %s3136_s9  ;;  %v908_v39 = vstv %s3140_s24  ;;  %s3927_s17 = sld [smem:[#allocation3 + $0x284]]  ;;  %s3929_s18 = sld [smem:[#allocation3 + $0x6]] }
  0x98   :  { %v721_v13 = vmul.f32 %v3807_v50, %v719_v12  ;;  %v720_v14 = vmul.f32 %v3812_v52, %v719_v12  ;;  %v735_v17 = vmul.f32 %v3807_v50, %v733_v15  ;;  %v942_v51 = vstv %s3143_s5  ;;  %s3945_s9 = sld [smem:[#allocation8]]  ;;  %s3965_s24 = sld [smem:[#allocation8 + $0x1]] }
  0x99   :  { %257 = vrot.lane.b32.xlu1 %v252_v19, %s6385_s28  ;;  %255 = vrot.lane.b32.xlu0 %v251_v20, %s6385_s28  ;;  %v734_v19 = vmul.f32 %v3812_v52, %v733_v15  ;;  %v753_v20 = vstv %s3115_s19  ;;  %s3938_s19 = sld [smem:[#allocation3 + $0x285]]  ;;  %s3984_s5 = sld [smem:[#allocation3 + $0x83]] }
  0x9a   :  { %v755_v21 = vmul.f32 %v3825_v58, %v753_v20  ;;  %6461 = sst [smem:[#allocation28_spill]] %s3972_s26  ;;  %s3988_s30 = sld [smem:[#allocation9 + $0x181]] }
  0x9b   :  { %s4005_s8 = sld [smem:[#allocation6 + $0x2]]  ;;  %s4054_s1 = sld [smem:[#allocation9 + $0x3]] }
  0x9c   :  { %6462 = sst [smem:[#allocation29_spill]] %s3978_s2  ;;  %s4033_s12 = sld [smem:[#allocation9 + $0x102]] }
  0x9d   :  { %271 = vrot.lane.b32.xlu1 %v266_v22, %s6387_s4  ;;  %269 = vrot.lane.b32.xlu0 %v265_v23, %s6387_s4  ;;  %v754_v22 = vmul.f32 %v3830_v60, %v753_v20  ;;  %v767_v23 = vstv %s3116_s7  ;;  %s3943_s7 = sld [smem:[#allocation6]] }
  0x9e   :  { %v769_v24 = vmul.f32 %v3825_v58, %v767_v23 }
  0xa0   :  { %6463 = sst [smem:[#allocation30_spill]] %s3988_s30 }
  0xa1   :  { %349 = vrot.lane.b32.xlu1 %v344_v25, %s6385_s28  ;;  %347 = vrot.lane.b32.xlu0 %v343_v26, %s6385_s28  ;;  %v768_v25 = vmul.f32 %v3830_v60, %v767_v23  ;;  %v3867_v26 = vld [vmem:[%s6372_s0 + $0x39] sm:$0xff] }
  0xa5   :  { %363 = vrot.lane.b32.xlu1 %v358_v28, %s6387_s4  ;;  %361 = vrot.lane.b32.xlu0 %v357_v29, %s6387_s4  ;;  %v3872_v28 = vld [vmem:[%s6372_s0 + $0x31] sm:$0xff]  ;;  %v862_v29 = vmul.f32 %v3867_v26, %v860_v27 }
  0xa6   :  { %v861_v30 = vmul.f32 %v3872_v28, %v860_v27 }
  0xa9   :  { %383 = vrot.lane.b32.xlu1 %v378_v31, %s6385_s28  ;;  %381 = vrot.lane.b32.xlu0 %v377_v32, %s6385_s28  ;;  %v874_v31 = vstv %s3137_s20  ;;  %s3950_s20 = sld [smem:[#allocation9]] }
  0xaa   :  { %v876_v32 = vmul.f32 %v3867_v26, %v874_v31  ;;  %v875_v33 = vmul.f32 %v3872_v28, %v874_v31 }
  0xad   :  { %397 = vrot.lane.b32.xlu1 %v392_v34, %s6387_s4  ;;  %395 = vrot.lane.b32.xlu0 %v391_v35, %s6387_s4  ;;  %v3885_v34 = vld [vmem:[%s6372_s0 + $0x3a] sm:$0xff]  ;;  %v894_v35 = vstv %s3139_s11  ;;  %s3956_s11 = sld [smem:[#allocation9 + $0x100]] }
  0xb1   :  { %417 = vrot.lane.b32.xlu1 %v412_v37, %s6385_s28  ;;  %415 = vrot.lane.b32.xlu0 %v411_v38, %s6385_s28  ;;  %v896_v37 = vmul.f32 %v3885_v34, %v894_v35  ;;  %v895_v38 = vmul.f32 %v3890_v36, %v894_v35 }
  0xb5   :  { %431 = vrot.lane.b32.xlu1 %v426_v40, %s6387_s4  ;;  %429 = vrot.lane.b32.xlu0 %v425_v41, %s6387_s4  ;;  %v910_v40 = vmul.f32 %v3885_v34, %v908_v39  ;;  %v909_v41 = vmul.f32 %v3890_v36, %v908_v39  ;;  %v1096_v39 = vstv %s3952_s21  ;;  %s4052_s21 = sld [smem:[#allocation8 + $0x3]] }
  0xb9   :  { %524 = vrot.lane.b32.xlu1 %v519_v45, %s6385_s28  ;;  %522 = vrot.lane.b32.xlu0 %v518_v46, %s6385_s28  ;;  %v928_v45 = vstv %s3142_s27  ;;  %v3912_v46 = vld [vmem:[%s6372_s0 + $0x33] sm:$0xff]  ;;  %s3974_s27 = sld [smem:[#allocation3 + $0x288]] }
  0xba   :  { %v930_v47 = vmul.f32 %v3905_v43, %v928_v45  ;;  %v943_v55 = vmul.f32 %v3912_v46, %v942_v51 }
  0xbd   :  { %538 = vrot.lane.b32.xlu1 %v533_v48, %s6387_s4  ;;  %536 = vrot.lane.b32.xlu0 %v532_v49, %s6387_s4  ;;  %v929_v48 = vmul.f32 %v3912_v46, %v928_v45  ;;  %v178_v49 = vstv %s3896_s3  ;;  %s3982_s3 = sld [smem:[#allocation3 + $0x301]] }
  0xbe   :  { %v180_v63 = vmul.f32 %v178_v49, %v3718_v1 }
  0xc1   :  { %558 = vrot.lane.b32.xlu1 %v553_v53, %s6385_s28  ;;  %556 = vrot.lane.b32.xlu0 %v552_v54, %s6385_s28  ;;  %v179_v53 = vmul.f32 %v178_v49, %v3713_v0  ;;  %v944_v54 = vmul.f32 %v3905_v43, %v942_v51  ;;  %v1098_v49 = vmul.f32 %v3905_v43, %v1096_v39  ;;  %v292_v51 = vstv %s3954_s10  ;;  %s4312_s10 = sld [smem:[#allocation3 + $0x387]] }
  0xc5   :  { %572 = vrot.lane.b32.xlu1 %v567_v56, %s6387_s4  ;;  %570 = vrot.lane.b32.xlu0 %v566_v57, %s6387_s4  ;;  %v1028_v56 = vstv %s3157_s14  ;;  %v210_v57 = vstv %s3907_s15  ;;  %s3995_s14 = sld [smem:[#allocation3 + $0x304]]  ;;  %s3997_s15 = sld [smem:[#allocation3 + $0x86]] }
  0xc6   :  { %v1029_v4 = vmul.f32 %v3872_v28, %v1028_v56  ;;  %v212_v12 = vmul.f32 %v210_v57, %v3729_v8 }
  0xc9   :  { %592 = vrot.lane.b32.xlu1 %v587_v61, %s6385_s28  ;;  %590 = vrot.lane.b32.xlu0 %v586_v62, %s6385_s28 }
  0xcd   :  { %606 = vrot.lane.b32.xlu1 %v601_v2, %s6387_s4  ;;  %604 = vrot.lane.b32.xlu0 %v600_v3, %s6387_s4  ;;  %v1030_v2 = vmul.f32 %v3867_v26, %v1028_v56  ;;  %v211_v3 = vmul.f32 %v210_v57, %v3734_v10  ;;  %v4024_v56 = vld [vmem:[%s6372_s0 + $0x51] sm:$0xff]  ;;  %v4029_v57 = vld [vmem:[%s6372_s0 + $0x49] sm:$0xff] }
  0xd1   :  { %692 = vrot.lane.b32.xlu1 %v687_v5, %s6385_s28  ;;  %690 = vrot.lane.b32.xlu0 %v686_v6, %s6385_s28  ;;  %v1042_v5 = vstv %s3919_s16  ;;  %s4012_s16 = sld [smem:[#allocation8 + $0x2]] }
  0xd2   :  { %v1043_v15 = vmul.f32 %v3872_v28, %v1042_v5 }
  0xd5   :  { %706 = vrot.lane.b32.xlu1 %v701_v9, %s6387_s4  ;;  %704 = vrot.lane.b32.xlu0 %v700_v11, %s6387_s4 }
  0xd7   :  { %6464 = sst [smem:[#allocation31_spill]] %s4012_s16 }
  0xd9   :  { %726 = vrot.lane.b32.xlu1 %v721_v13, %s6385_s28  ;;  %724 = vrot.lane.b32.xlu0 %v720_v14, %s6385_s28  ;;  %v1044_v14 = vmul.f32 %v3867_v26, %v1042_v5  ;;  %v1076_v26 = vstv %s3938_s19  ;;  %s4075_s19 = sld [smem:[#allocation9 + $0x103]] }
  0xdd   :  { %740 = vrot.lane.b32.xlu1 %v735_v17, %s6387_s4  ;;  %738 = vrot.lane.b32.xlu0 %v734_v19, %s6387_s4  ;;  %v1062_v17 = vstv %s3927_s17  ;;  %s4014_s17 = sld [smem:[#allocation9 + $0x2]] }
  0xe1   :  { %760 = vrot.lane.b32.xlu1 %v755_v21, %s6385_s28  ;;  %758 = vrot.lane.b32.xlu0 %v754_v22, %s6385_s28  ;;  %v244_v22 = vstv %s3929_s18  ;;  %s4041_s18 = sld [smem:[#allocation6 + $0x3]] }
  0xe2   :  { %v245_v31 = vmul.f32 %v244_v22, %v3752_v18 }
  0xe3   :  { %6465 = sst [smem:[#allocation32_spill]] %s4014_s17 }
  0xe5   :  { %774 = vrot.lane.b32.xlu1 %v769_v24, %s6387_s4  ;;  %772 = vrot.lane.b32.xlu0 %v768_v25, %s6387_s4  ;;  %v1064_v24 = vmul.f32 %v3885_v34, %v1062_v17  ;;  %v1063_v25 = vmul.f32 %v3890_v36, %v1062_v17 }
  0xe9   :  { %867 = vrot.lane.b32.xlu1 %v862_v29, %s6385_s28  ;;  %865 = vrot.lane.b32.xlu0 %v861_v30, %s6385_s28  ;;  %v246_v30 = vmul.f32 %v244_v22, %v3747_v16 }
  0xed   :  { %881 = vrot.lane.b32.xlu1 %v876_v32, %s6387_s4  ;;  %879 = vrot.lane.b32.xlu0 %v875_v33, %s6387_s4 }
  0xf1   :  { %901 = vrot.lane.b32.xlu1 %v896_v37, %s6385_s28  ;;  %899 = vrot.lane.b32.xlu0 %v895_v38, %s6385_s28  ;;  %v1078_v37 = vmul.f32 %v3885_v34, %v1076_v26  ;;  %v1077_v38 = vmul.f32 %v3890_v36, %v1076_v26  ;;  %v278_v36 = vstv %s3943_s7  ;;  %s4168_s7 = sld [smem:[#allocation3 + $0x106]] }
  0xf5   :  { %915 = vrot.lane.b32.xlu1 %v910_v40, %s6387_s4  ;;  %913 = vrot.lane.b32.xlu0 %v909_v41, %s6387_s4 }
  0xf9   :  { %935 = vrot.lane.b32.xlu1 %v930_v47, %s6385_s28  ;;  %933 = vrot.lane.b32.xlu0 %v929_v48, %s6385_s28  ;;  %v282_v47 = vstv %s3945_s9  ;;  %v288_v48 = vstv %s3950_s20  ;;  %s4481_s20 = sld [smem:[#allocation9 + $0x106]]  ;;  %s4669_s9 = sld [smem:[#allocation9 + $0x10b]] }
  0xfb   :  { %v202_v59 = vpop.permute.xlu1 %201  ;;  %v188_v61 = vpop.permute.xlu0 %187 }
  0xfc   :  { %v193_v62 = vadd.f32 %v188_v61, %v179_v53  ;;  %v296_v53 = vstv %s3956_s11  ;;  %v304_v61 = vstv %s3961_s23  ;;  %s4224_s23 = sld [smem:[#allocation3 + $0x385]]  ;;  %s4346_s11 = sld [smem:[#allocation8 + $0x4]] }
  0xfd   :  { %949 = vrot.lane.b32.xlu1 %v944_v54, %s6387_s4  ;;  %947 = vrot.lane.b32.xlu0 %v943_v55, %s6387_s4  ;;  %v1097_v54 = vmul.f32 %v3912_v46, %v1096_v39  ;;  %v1110_v55 = vstv %s3974_s27  ;;  %s4039_s27 = sld [smem:[#allocation9 + $0x182]] }
  0xfe   :  { %v207_v6 = vadd.f32 %v202_v59, %v193_v62  ;;  %v300_v59 = vstv %s3959_s22  ;;  %v308_v62 = vstv %s3965_s24  ;;  %v1111_v17 = vmul.f32 %v3912_v46, %v1110_v55  ;;  %s4357_s22 = sld [smem:[#allocation3 + $0x180]]  ;;  %s4475_s24 = sld [smem:[#allocation8 + $0x7]] }
  0xff   :  { %v204_v7 = vpop.permute.xlu1 %203  ;;  %v190_v9 = vpop.permute.xlu0 %189  ;;  %6496 = sst [smem:[#allocation41_spill]] %s4669_s9  ;;  %s4790_s9 = sld [smem:[#allocation9 + $0x8e]] }
 0x100   :  { %v194_v11 = vadd.f32 %v190_v9, %v180_v63  ;;  %v213_v13 = vadd.f32 %v211_v3, %v207_v6  ;;  %v314_v3 = vstv %s3967_s25  ;;  %v1203_v6 = vstv %s3982_s3  ;;  %v4050_v9 = vld [vmem:[%s6372_s0 + $0x52] sm:$0xff]  ;;  %s4063_s3 = sld [smem:[#allocation3 + $0x307]]  ;;  %s4369_s25 = sld [smem:[#allocation9 + $0x84]] }
 0x101   :  { %1035 = vrot.lane.b32.xlu1 %v1030_v2, %s6385_s28  ;;  %1033 = vrot.lane.b32.xlu0 %v1029_v4, %s6385_s28  ;;  %v338_v2 = vstv %s3980_s29  ;;  %v320_v4 = vstv %s3972_s26  ;;  %s6466_s29 = smov 127   ;;  %s4061_s26 = sld [smem:[#allocation9 + $0x83]] }
 0x102   :  { %v208_v19 = vadd.f32 %v204_v7, %v194_v11  ;;  %v370_v7 = vstv %s3984_s5  ;;  %v326_v11 = vstv %s3978_s2  ;;  %v339_v22 = vmul.f32 %v338_v2, %v3713_v0  ;;  %s6467_s5 = smov 126   ;;  %s4125_s2 = sld [smem:[#allocation3 + $0x103]] }
 0x103   :  { %v224_v20 = vpop.permute.xlu1 %223  ;;  %v222_v21 = vpop.permute.xlu0 %221  ;;  %v4083_v46 = vmul.f32 %v370_v7, %v3729_v8  ;;  %v4088_v26 = vmul.f32 %v370_v7, %v3734_v10 }
 0x104   :  { %v214_v23 = vadd.f32 %v212_v12, %v208_v19  ;;  %v227_v28 = vadd.f32 %v222_v21, %v213_v13  ;;  %v332_v12 = vstv %s3988_s30  ;;  %v1112_v13 = vmul.f32 %v3905_v43, %v1110_v55  ;;  %s4135_s30 = sld [smem:[#allocation3 + $0x382]] }
 0x105   :  { %1049 = vrot.lane.b32.xlu1 %v1044_v14, %s6387_s4  ;;  %1047 = vrot.lane.b32.xlu0 %v1043_v15, %s6387_s4  ;;  %v1217_v14 = vstv %s3990_s13  ;;  %v340_v15 = vmul.f32 %v338_v2, %v3718_v1  ;;  %v1237_v19 = vstv %s3995_s14  ;;  %s4077_s13 = sld [smem:[#allocation3 + $0x100]]  ;;  %v1204_v1 = vmul.f32 %v4029_v57, %v1203_v6 }
 0x106   :  { %v228_v27 = vadd.f32 %v224_v20, %v214_v23  ;;  %v4072_v20 = vld [vmem:[%s6372_s0 + $0x4a] sm:$0xff]  ;;  %v404_v21 = vstv %s3997_s15  ;;  %v1205_v23 = vmul.f32 %v4024_v56, %v1203_v6  ;;  %s4085_s14 = sld [smem:[#allocation3 + $0x308]]  ;;  %s4092_s15 = sld [smem:[#allocation9 + $0x183]]  ;;  %v1218_v0 = vmul.f32 %v4029_v57, %v1217_v14 }
 0x107   :  { %v238_v29 = vpop.permute.xlu1 %237  ;;  %v236_v32 = vpop.permute.xlu0 %235  ;;  %v4097_v8 = vmul.f32 %v4050_v9, %v1237_v19  ;;  %v4103_v10 = vmul.f32 %v404_v21, %v3747_v16 }
 0x108   :  { %v242_v33 = vadd.f32 %v238_v29, %v228_v27  ;;  %v241_v35 = vadd.f32 %v236_v32, %v227_v28  ;;  %v1219_v27 = vmul.f32 %v4024_v56, %v1217_v14  ;;  %v1251_v28 = vstv %s4003_s6  ;;  %s4144_s6 = sld [smem:[#allocation3 + $0x384]] }
 0x109   :  { %1069 = vrot.lane.b32.xlu1 %v1064_v24, %s6385_s28  ;;  %1067 = vrot.lane.b32.xlu0 %v1063_v25, %s6385_s28  ;;  %v4100_v29 = vmul.f32 %v4072_v20, %v1237_v19  ;;  %s4105_s28 = sld [smem:[#allocation3 + $0x381]]  ;;  %v4111_v32 = vmul.f32 %v404_v21, %v3752_v18  ;;  %v4115_v16 = vmul.f32 %v4050_v9, %v1251_v28 }
 0x10a   :  { %v248_v41 = vadd.f32 %v246_v30, %v242_v33  ;;  %v3999_v34 = vadd.f32 %v245_v31, %v241_v35  ;;  %v438_v33 = vstv %s4005_s8  ;;  %v4139_v55 = vmul.f32 %v4072_v20, %v1251_v28  ;;  %s4379_s8 = sld [smem:[#allocation9 + $0x104]] }
 0x10b   :  { %v258_v40 = vpop.permute.xlu1 %257  ;;  %v4001_v45 = vpop.permute.xlu0 %255  ;;  %v513_v14 = vstv %s4077_s13  ;;  %s4403_s13 = sld [smem:[#allocation9 + $0x185]] }
 0x10c   :  { %v262_v24 = vadd.f32 %v258_v40, %v248_v41  ;;  %v261_v30 = vadd.f32 %v4001_v45, %v3999_v34  ;;  %v4123_v40 = vld [vmem:[%s6372_s0 + $0x53] sm:$0xff]  ;;  %v460_v34 = vstv %s4033_s12  ;;  %s4334_s12 = sld [smem:[#allocation3 + $0x388]] }
 0x10d   :  { %1083 = vrot.lane.b32.xlu1 %v1078_v37, %s6387_s4  ;;  %1081 = vrot.lane.b32.xlu0 %v1077_v38, %s6387_s4  ;;  %s4031_s4 = sld [smem:[#allocation9 + $0x82]]  ;;  %v442_v37 = vstv %s4012_s16  ;;  %v448_v38 = vstv %s4014_s17  ;;  %s4382_s17 = sld [smem:[#allocation9 + $0x184]] }
 0x10e   :  { %s4479_s16 = sld [smem:[#allocation9 + $0x86]] }
 0x10f   :  { %v272_v63 = vpop.permute.xlu1 %271  ;;  %v270_v5 = vpop.permute.xlu0 %269 }
 0x110   :  { %v276_v31 = vadd.f32 %v272_v63, %v262_v24  ;;  %v275_v18 = vadd.f32 %v270_v5, %v261_v30  ;;  %v476_v63 = vstv %s4052_s21  ;;  %v1271_v5 = vstv %s4063_s3  ;;  %s4391_s21 = sld [smem:[#allocation3 + $0x183]]  ;;  %s4394_s3 = sld [smem:[#allocation9 + $0x85]] }
 0x111   :  { %1103 = vrot.lane.b32.xlu1 %v1098_v49, %s6466_s29  ;;  %1101 = vrot.lane.b32.xlu0 %v1097_v54, %s6466_s29  ;;  %v472_v49 = vstv %s4041_s18  ;;  %v4133_v54 = vld [vmem:[%s6372_s0 + $0x4b] sm:$0xff]  ;;  %v4159_v45 = vmul.f32 %v4123_v40, %v1271_v5  ;;  %s4389_s18 = sld [smem:[#allocation9 + $0x5]] }
 0x112   :  { %v280_v6 = vmul.f32 %v278_v36, %v276_v31  ;;  %v1285_v24 = vstv %s4085_s14  ;;  %v279_v28 = vmul.f32 %v278_v36, %v275_v18  ;;  %s4407_s14 = sld [smem:[#allocation3 + $0x186]] }
 0x113   :  { %v350_v43 = vpop.permute.xlu1 %349  ;;  %v348_v25 = vpop.permute.xlu0 %347  ;;  %v454_v39 = vstv %s4031_s4  ;;  %s4344_s4 = sld [smem:[#allocation6 + $0x4]] }
 0x114   :  { %v354_v19 = vadd.f32 %v350_v43, %v340_v15  ;;  %v353_v21 = vadd.f32 %v348_v25, %v339_v22  ;;  %v1371_v43 = vstv %s4105_s28  ;;  %v284_v36 = vadd.f32 %v282_v47, %v280_v6  ;;  %s4457_s28 = sld [smem:[#allocation6 + $0x7]] }
 0x115   :  { %1117 = vrot.lane.b32.xlu1 %v1112_v13, %s6467_s5  ;;  %1115 = vrot.lane.b32.xlu0 %v1111_v17, %s6467_s5  ;;  %v306_v17 = vmul.f32 %v304_v61, %v276_v31  ;;  %v305_v13 = vmul.f32 %v304_v61, %v275_v18  ;;  %v4174_v22 = vmul.f32 %v3789_v42, %v513_v14 }
 0x116   :  { %v4177_v25 = vmul.f32 %v3794_v44, %v513_v14  ;;  %v4180_v61 = vmul.f32 %v4123_v40, %v1285_v24  ;;  %v4193_v14 = vmul.f32 %v4024_v56, %v1371_v43 }
 0x117   :  { %v364_v35 = vpop.permute.xlu1 %363  ;;  %v362_v41 = vpop.permute.xlu0 %361  ;;  %v309_v2 = vadd.f32 %v308_v62, %v305_v13 }
 0x118   :  { %v368_v31 = vadd.f32 %v364_v35, %v354_v19  ;;  %v367_v15 = vadd.f32 %v362_v41, %v353_v21  ;;  %v4190_v19 = vmul.f32 %v4133_v54, %v1285_v24  ;;  %v1385_v21 = vstv %s4135_s30  ;;  %s4587_s30 = sld [smem:[#allocation6 + $0x9]] }
 0x119   :  { %1210 = vrot.lane.b32.xlu1 %v1205_v23, %s6466_s29  ;;  %1208 = vrot.lane.b32.xlu0 %v1204_v1, %s6466_s29  ;;  %v4162_v1 = vmul.f32 %v4133_v54, %v1271_v5  ;;  %v545_v5 = vstv %s4125_s2  ;;  %s4477_s2 = sld [smem:[#allocation9 + $0x6]] }
 0x11a   :  { %v374_v35 = vadd.f32 %v4083_v46, %v368_v31  ;;  %v373_v18 = vadd.f32 %v4088_v26, %v367_v15  ;;  %v1405_v46 = vstv %s4144_s6  ;;  %v286_v26 = vmax.f32 %v284_v36, 0.0  ;;  %s4591_s6 = sld [smem:[#allocation8 + $0x9]] }
 0x11b   :  { %v384_v23 = vpop.permute.xlu1 %383  ;;  %v382_v30 = vpop.permute.xlu0 %381  ;;  %v4207_v24 = vmul.f32 %v3807_v50, %v545_v5  ;;  %v4216_v15 = vmul.f32 %v4029_v57, %v1385_v21  ;;  %v311_v36 = vmax.f32 %v309_v2, 0.0 }
 0x11c   :  { %v388_v7 = vadd.f32 %v384_v23, %v374_v35  ;;  %v290_v35 = vmul.f32 %v288_v48, %v286_v26  ;;  %v302_v2 = vmul.f32 %v300_v59, %v286_v26 }
 0x11d   :  { %1224 = vrot.lane.b32.xlu1 %v1219_v27, %s6467_s5  ;;  %1222 = vrot.lane.b32.xlu0 %v1218_v0, %s6467_s5  ;;  %v310_v27 = vadd.f32 %v308_v62, %v306_v17  ;;  %v283_v0 = vadd.f32 %v282_v47, %v279_v28  ;;  %v387_v17 = vadd.f32 %v382_v30, %v373_v18 }
 0x11e   :  { %v4204_v47 = vmul.f32 %v4029_v57, %v1371_v43  ;;  %v4210_v28 = vmul.f32 %v3812_v52, %v545_v5  ;;  %v4219_v43 = vmul.f32 %v4050_v9, %v1405_v46  ;;  %v579_v57 = vstv %s4168_s7  ;;  %s4593_s7 = sld [smem:[#allocation9 + $0x9]] }
 0x11f   :  { %v398_v41 = vpop.permute.xlu1 %397  ;;  %v396_v6 = vpop.permute.xlu0 %395  ;;  %v312_v62 = vmax.f32 %v310_v27, 0.0  ;;  %v285_v30 = vmax.f32 %v283_v0, 0.0  ;;  %v294_v18 = vmul.f32 %v292_v51, %v286_v26 }
 0x120   :  { %v402_v13 = vadd.f32 %v398_v41, %v388_v7  ;;  %v4222_v7 = vmul.f32 %v4072_v20, %v1405_v46  ;;  %v298_v41 = vmul.f32 %v296_v53, %v286_v26 }
 0x121   :  { %1244 = vrot.lane.b32.xlu1 %v4097_v8, %s6466_s29  ;;  %1242 = vrot.lane.b32.xlu0 %v4100_v29, %s6466_s29  ;;  %v401_v8 = vadd.f32 %v396_v6, %v387_v17  ;;  %v4213_v29 = vmul.f32 %v4024_v56, %v1385_v21  ;;  %v328_v6 = vmul.f32 %v326_v11, %v312_v62 }
 0x122   :  { %v408_v56 = vadd.f32 %v4103_v10, %v402_v13  ;;  %v316_v10 = vmul.f32 %v314_v3, %v312_v62  ;;  %v334_v21 = vmul.f32 %v332_v12, %v312_v62  ;;  %v293_v17 = vmul.f32 %v292_v51, %v285_v30 }
 0x123   :  { %v418_v23 = vpop.permute.xlu1 %417  ;;  %v416_v31 = vpop.permute.xlu0 %415  ;;  %v407_v27 = vadd.f32 %v4111_v32, %v401_v8  ;;  %v322_v32 = vmul.f32 %v320_v4, %v312_v62  ;;  %v297_v26 = vmul.f32 %v296_v53, %v285_v30  ;;  %v301_v13 = vmul.f32 %v300_v59, %v285_v30 }
 0x124   :  { %v315_v62 = vmul.f32 %v314_v3, %v311_v36  ;;  %v327_v51 = vmul.f32 %v326_v11, %v311_v36  ;;  %v333_v53 = vmul.f32 %v332_v12, %v311_v36  ;;  %v1419_v11 = vstv %s4224_s23  ;;  %s4473_s23 = sld [smem:[#allocation8 + $0x6]]  ;;  %6485 = sst [smem:[#allocation30_spill]] %s4593_s7 }
 0x125   :  { %1258 = vrot.lane.b32.xlu1 %v4115_v16, %s6467_s5  ;;  %1256 = vrot.lane.b32.xlu0 %v4139_v55, %s6467_s5  ;;  %v422_v16 = vadd.f32 %v418_v23, %v408_v56  ;;  %v421_v5 = vadd.f32 %v416_v31, %v407_v27  ;;  %v289_v55 = vmul.f32 %v288_v48, %v285_v30 }
 0x126   :  { %v321_v48 = vmul.f32 %v320_v4, %v311_v36  ;;  %v318_v56 = vadd.f32 %v316_v10, %v290_v35  ;;  %v324_v4 = vadd.f32 %v322_v32, %v294_v18  ;;  %v330_v27 = vadd.f32 %v328_v6, %v298_v41 }
 0x127   :  { %v432_v0 = vpop.permute.xlu1 %431  ;;  %v430_v46 = vpop.permute.xlu0 %429  ;;  %v329_v41 = vadd.f32 %v327_v51, %v297_v26  ;;  %v6474_v26 = vstv %s4054_s1  ;;  %s4355_s1 = sld [smem:[#allocation9 + $0x4]] }
 0x128   :  { %v436_v8 = vadd.f32 %v432_v0, %v422_v16  ;;  %v435_v23 = vadd.f32 %v430_v46, %v421_v5  ;;  %v323_v35 = vadd.f32 %v321_v48, %v293_v17  ;;  %v6473_v17 = vstv %s4039_s27  ;;  %s4384_s27 = sld [smem:[#allocation8 + $0x5]] }
 0x129   :  { %1278 = vrot.lane.b32.xlu1 %v4159_v45, %s6466_s29  ;;  %1276 = vrot.lane.b32.xlu0 %v4162_v1, %s6466_s29  ;;  %v6477_v48 = vstv %s4092_s15  ;;  %s4455_s15 = sld [smem:[#allocation6 + $0x6]] }
 0x12a   :  { %v440_v59 = vmul.f32 %v438_v33, %v436_v8  ;;  %v474_v30 = vmul.f32 %v472_v49, %v436_v8  ;;  %v439_v45 = vmul.f32 %v438_v33, %v435_v23  ;;  %v473_v3 = vmul.f32 %v472_v49, %v435_v23 }
 0x12b   :  { %v525_v31 = vpop.permute.xlu1 %524  ;;  %v523_v16 = vpop.permute.xlu0 %522  ;;  %v336_v33 = vadd.f32 %v334_v21, %v302_v2  ;;  %v317_v49 = vadd.f32 %v315_v62, %v289_v55  ;;  %v6476_v23 = vstv %s4075_s19  ;;  %s4396_s19 = sld [smem:[#allocation9 + $0x105]] }
 0x12c   :  { %v444_v5 = vadd.f32 %v442_v37, %v440_v59  ;;  %v478_v12 = vadd.f32 %v476_v63, %v474_v30  ;;  %v443_v1 = vadd.f32 %v442_v37, %v439_v45  ;;  %v477_v36 = vadd.f32 %v476_v63, %v473_v3 }
 0x12d   :  { %1292 = vrot.lane.b32.xlu1 %v4180_v61, %s6467_s5  ;;  %v529_v18 = vadd.f32 %v525_v31, %v4174_v22  ;;  %1290 = vrot.lane.b32.xlu0 %v4190_v19, %s6467_s5  ;;  %v335_v37 = vadd.f32 %v333_v53, %v301_v13  ;;  %v528_v0 = vadd.f32 %v523_v16, %v4177_v25  ;;  %v6475_v25 = vstv %s4061_s26  ;;  %s4371_s26 = sld [smem:[#allocation6 + $0x5]] }
 0x12e   :  { %v446_v63 = vmax.f32 %v444_v5, 0.0  ;;  %v480_v61 = vmax.f32 %v478_v12, 0.0  ;;  %v445_v2 = vmax.f32 %v443_v1, 0.0  ;;  %v479_v32 = vmax.f32 %v477_v36, 0.0 }
 0x12f   :  { %v539_v10 = vpop.permute.xlu1 %538  ;;  %v537_v21 = vpop.permute.xlu0 %536  ;;  %v6478_v5 = vmov %v6473_v17 }
 0x130   :  { %v543_v6 = vadd.f32 %v539_v10, %v529_v18  ;;  %v450_v22 = vmul.f32 %v448_v38, %v446_v63  ;;  %v456_v19 = vmul.f32 %v454_v39, %v446_v63  ;;  %v462_v55 = vmul.f32 %v460_v34, %v446_v63 }
 0x131   :  { %v468_v46 = vmul.f32 %v6473_v17, %v446_v63  ;;  %1378 = vrot.lane.b32.xlu1 %v4193_v14, %s6466_s29  ;;  %v484_v13 = vmul.f32 %v6474_v26, %v480_v61  ;;  %v490_v8 = vmul.f32 %v6475_v25, %v480_v61  ;;  %v496_v62 = vmul.f32 %v6476_v23, %v480_v61 }
 0x132   :  { %v502_v51 = vmul.f32 %v6477_v48, %v480_v61  ;;  %1376 = vrot.lane.b32.xlu0 %v4204_v47, %s6466_s29  ;;  %v452_v53 = vadd.f32 %v450_v22, %v318_v56  ;;  %v458_v59 = vadd.f32 %v456_v19, %v324_v4  ;;  %v464_v30 = vadd.f32 %v462_v55, %v330_v27 }
 0x133   :  { %v470_v45 = vadd.f32 %v468_v46, %v336_v33  ;;  %v559_v3 = vpop.permute.xlu1 %558  ;;  %v449_v14 = vmul.f32 %v448_v38, %v445_v2  ;;  %v455_v31 = vmul.f32 %v454_v39, %v445_v2  ;;  %v461_v16 = vmul.f32 %v460_v34, %v445_v2  ;;  %v557_v47 = vpop.permute.xlu0 %556 }
 0x134   :  { %v467_v12 = vmul.f32 %v6478_v5, %v445_v2  ;;  %v4322_v1 = vadd.f32 %v484_v13, %v452_v53  ;;  %v4324_v56 = vadd.f32 %v490_v8, %v458_v59  ;;  %v4326_v4 = vadd.f32 %v496_v62, %v464_v30 }
 0x135   :  { %v4328_v27 = vadd.f32 %v502_v51, %v470_v45  ;;  %1392 = vrot.lane.b32.xlu1 %v4213_v29, %s6467_s5  ;;  %v451_v38 = vadd.f32 %v449_v14, %v317_v49  ;;  %v457_v39 = vadd.f32 %v455_v31, %v323_v35  ;;  %v463_v34 = vadd.f32 %v461_v16, %v329_v41 }
 0x136   :  { %v469_v36 = vadd.f32 %v467_v12, %v335_v37  ;;  %1390 = vrot.lane.b32.xlu0 %v4216_v15, %s6467_s5  ;;  %v6479_v33 = vmov %v6474_v26  ;;  %v6480_v63 = vmov %v6475_v25  ;;  %v6481_v10 = vmov %v6476_v23 }
 0x137   :  { %v483_v18 = vmul.f32 %v6479_v33, %v479_v32  ;;  %v489_v61 = vmul.f32 %v6480_v63, %v479_v32  ;;  %v495_v2 = vmul.f32 %v6481_v10, %v479_v32  ;;  %v6482_v22 = vmov %v6477_v48  ;;  %v573_v29 = vpop.permute.xlu1 %572  ;;  %v571_v15 = vpop.permute.xlu0 %570 }
 0x138   :  { %v501_v19 = vmul.f32 %v6482_v22, %v479_v32  ;;  %v542_v49 = vadd.f32 %v537_v21, %v528_v0  ;;  %v549_v35 = vadd.f32 %v4207_v24, %v543_v6  ;;  %v581_v41 = vmul.f32 %v3825_v58, %v579_v57 }
 0x139   :  { %v1421_v37 = vmul.f32 %v4050_v9, %v1419_v11  ;;  %v4359_v32 = vadd.f32 %v483_v18, %v451_v38  ;;  %v4361_v55 = vadd.f32 %v489_v61, %v457_v39  ;;  %v4363_v0 = vadd.f32 %v495_v2, %v463_v34  ;;  %1412 = vrot.lane.b32.xlu1 %v4219_v43, %s6466_s29 }
 0x13a   :  { %v4365_v24 = vadd.f32 %v501_v19, %v469_v36  ;;  %v563_v58 = vadd.f32 %v559_v3, %v549_v35  ;;  %v548_v9 = vadd.f32 %v4210_v28, %v542_v49  ;;  %1410 = vrot.lane.b32.xlu0 %v4222_v7, %s6466_s29  ;;  %v1420_v6 = vmul.f32 %v4072_v20, %v1419_v11 }
 0x13b   :  { %v1439_v21 = vstv %s4312_s10  ;;  %v593_v17 = vpop.permute.xlu1 %592  ;;  %v580_v28 = vmul.f32 %v3830_v60, %v579_v57  ;;  %v591_v26 = vpop.permute.xlu0 %590  ;;  %v1453_v11 = vstv %s4334_s12  ;;  %v613_v13 = vstv %s4344_s4  ;;  %s4483_s10 = sld [smem:[#allocation9 + $0x186]]  ;;  %s4485_s12 = sld [smem:[#allocation9 + $0x7]] }
 0x13c   :  { %v562_v43 = vadd.f32 %v557_v47, %v548_v9  ;;  %v577_v46 = vadd.f32 %v573_v29, %v563_v58  ;;  %v1441_v20 = vmul.f32 %v4123_v40, %v1439_v21  ;;  %v1440_v57 = vmul.f32 %v4133_v54, %v1439_v21  ;;  %s4487_s4 = sld [smem:[#allocation9 + $0x87]] }
 0x13d   :  { %1426 = vrot.lane.b32.xlu1 %v1421_v37, %s6467_s5  ;;  %v617_v62 = vstv %s4346_s11  ;;  %v681_v51 = vstv %s4357_s22  ;;  %v623_v53 = vstv %s4355_s1  ;;  %v1455_v45 = vmul.f32 %v4123_v40, %v1453_v11  ;;  %s4489_s11 = sld [smem:[#allocation9 + $0x107]]  ;;  %s4521_s22 = sld [smem:[#allocation3 + $0x200]] }
 0x13e   :  { %v576_v7 = vadd.f32 %v571_v15, %v562_v43  ;;  %v583_v60 = vadd.f32 %v581_v41, %v577_v46  ;;  %1424 = vrot.lane.b32.xlu0 %v1420_v6, %s6467_s5  ;;  %v629_v59 = vstv %s4369_s25  ;;  %v647_v30 = vstv %s4371_s26  ;;  %s4491_s1 = sld [smem:[#allocation9 + $0x187]]  ;;  %s4547_s25 = sld [smem:[#allocation3 + $0x203]] }
 0x13f   :  { %v607_v25 = vpop.permute.xlu1 %606  ;;  %v605_v48 = vpop.permute.xlu0 %604  ;;  %v635_v14 = vstv %s4379_s8  ;;  %v1454_v16 = vmul.f32 %v4133_v54, %v1453_v11  ;;  %v641_v5 = vstv %s4382_s17  ;;  %v651_v12 = vstv %s4384_s27  ;;  %s4559_s17 = sld [smem:[#allocation3 + $0x206]]  ;;  %s4563_s27 = sld [smem:[#allocation6 + $0x8]] }
 0x140   :  { %v597_v8 = vadd.f32 %v593_v17, %v583_v60  ;;  %v582_v23 = vadd.f32 %v580_v28, %v576_v7  ;;  %v683_v47 = vmul.f32 %v3789_v42, %v681_v51  ;;  %v682_v39 = vmul.f32 %v3794_v44, %v681_v51  ;;  %s4626_s26 = sld [smem:[#allocation9 + $0x10a]] }
 0x141   :  { %1446 = vrot.lane.b32.xlu1 %v1441_v20, %s6466_s29  ;;  %v713_v18 = vstv %s4391_s21  ;;  %v657_v63 = vstv %s4389_s18  ;;  %v663_v61 = vstv %s4394_s3  ;;  %s4565_s18 = sld [smem:[#allocation3 + $0x280]]  ;;  %s4630_s8 = sld [smem:[#allocation9 + $0x18a]] }
 0x142   :  { %v596_v3 = vadd.f32 %v591_v26, %v582_v23  ;;  %v611_v31 = vadd.f32 %v607_v25, %v597_v8  ;;  %1444 = vrot.lane.b32.xlu0 %v1440_v57, %s6466_s29  ;;  %v669_v10 = vstv %s4396_s19  ;;  %v675_v42 = vstv %s4403_s13  ;;  %s4567_s21 = sld [smem:[#allocation8 + $0x8]]  ;;  %s4686_s29 = sld [smem:[#allocation9 + $0xc]] }
 0x143   :  { %v693_v38 = vpop.permute.xlu1 %692  ;;  %v691_v33 = vpop.permute.xlu0 %690  ;;  %v715_v35 = vmul.f32 %v3807_v50, %v713_v18  ;;  %v714_v58 = vmul.f32 %v3812_v52, %v713_v18  ;;  %v747_v9 = vstv %s4407_s14  ;;  %s4569_s3 = sld [smem:[#allocation9 + $0x8]]  ;;  %s4659_s14 = sld [smem:[#allocation3 + $0x303]] }
 0x144   :  { %v615_v34 = vmul.f32 %v613_v13, %v611_v31  ;;  %v649_v40 = vmul.f32 %v647_v30, %v611_v31  ;;  %v610_v36 = vadd.f32 %v605_v48, %v596_v3  ;;  %v697_v44 = vadd.f32 %v693_v38, %v683_v47  ;;  %s4572_s19 = sld [smem:[#allocation9 + $0x88]] }
 0x145   :  { %1460 = vrot.lane.b32.xlu1 %v1455_v45, %s6467_s5  ;;  %v696_v29 = vadd.f32 %v691_v33, %v682_v39  ;;  %s4574_s13 = sld [smem:[#allocation9 + $0x108]] }
 0x146   :  { %v619_v54 = vadd.f32 %v617_v62, %v615_v34  ;;  %v653_v2 = vadd.f32 %v651_v12, %v649_v40  ;;  %v614_v22 = vmul.f32 %v613_v13, %v610_v36  ;;  %v648_v19 = vmul.f32 %v647_v30, %v610_v36  ;;  %1458 = vrot.lane.b32.xlu0 %v1454_v16, %s6467_s5  ;;  %6492 = sst [smem:[#allocation37_spill]] %s4626_s26  ;;  %s4671_s5 = sld [smem:[#allocation9 + $0x18b]] }
 0x147   :  { %v707_v49 = vpop.permute.xlu1 %706  ;;  %v705_v37 = vpop.permute.xlu0 %704  ;;  %6493 = sst [smem:[#allocation38_spill]] %s4630_s8  ;;  %s4728_s26 = sld [smem:[#allocation9 + $0x8d]] }
 0x148   :  { %v621_v15 = vmax.f32 %v619_v54, 0.0  ;;  %v655_v41 = vmax.f32 %v653_v2, 0.0  ;;  %v618_v6 = vadd.f32 %v617_v62, %v614_v22  ;;  %v652_v21 = vadd.f32 %v651_v12, %v648_v19  ;;  %s4740_s8 = sld [smem:[#allocation9 + $0x18d]] }
 0x149   :  { %v711_v17 = vadd.f32 %v707_v49, %v697_v44  ;;  %v710_v43 = vadd.f32 %v705_v37, %v696_v29  ;;  %v3611_v29 = vmov 0.0   ;;  %v781_v37 = vstv %s4455_s15  ;;  %s4661_s15 = sld [smem:[#allocation3 + $0x306]] }
 0x14a   :  { %v625_v46 = vmul.f32 %v623_v53, %v621_v15  ;;  %v631_v28 = vmul.f32 %v629_v59, %v621_v15  ;;  %v637_v26 = vmul.f32 %v635_v14, %v621_v15  ;;  %v643_v20 = vmul.f32 %v641_v5, %v621_v15  ;;  %160 = vst.msk [vmem:[#allocation2] sm:$0x1] %vm159_vm0, %v3611_v29 }
 0x14b   :  { %v659_v7 = vmul.f32 %v657_v63, %v655_v41  ;;  %v665_v60 = vmul.f32 %v663_v61, %v655_v41  ;;  %v671_v57 = vmul.f32 %v669_v10, %v655_v41  ;;  %v677_v50 = vmul.f32 %v675_v42, %v655_v41  ;;  %v727_v11 = vpop.permute.xlu1 %726  ;;  %v725_v23 = vpop.permute.xlu0 %724  ;;  %161 = vst.msk [vmem:[#allocation2 + $0x11] sm:$0x1] %vm159_vm0, %v3611_v29  ;;  %6483 = sst [smem:[#allocation28_spill]] %s4574_s13 }
 0x14c   :  { %v627_v52 = vadd.f32 %v625_v46, %v4322_v1  ;;  %v633_v13 = vadd.f32 %v631_v28, %v4324_v56  ;;  %v639_v25 = vadd.f32 %v637_v26, %v4326_v4  ;;  %v645_v8 = vadd.f32 %v643_v20, %v4328_v27  ;;  %163 = vst.msk [vmem:[#allocation2 + $0x18] sm:$0x1] %vm159_vm0, %v3611_v29  ;;  %6497 = sst [smem:[#allocation42_spill]] %s4671_s5 }
 0x14d   :  { %v620_v62 = vmax.f32 %v618_v6, 0.0  ;;  %v654_v48 = vmax.f32 %v652_v21, 0.0  ;;  %v717_v51 = vadd.f32 %v715_v35, %v711_v17  ;;  %v716_v30 = vadd.f32 %v714_v58, %v710_v43  ;;  %164 = vst.msk [vmem:[#allocation2 + $0x29] sm:$0x1] %vm159_vm0, %v3611_v29  ;;  %166 = vst.msk [vmem:[#allocation2 + $0x30] sm:$0x1] %vm159_vm0, %v3611_v29 }
 0x14e   :  { %v4439_v45 = vadd.f32 %v659_v7, %v627_v52  ;;  %v4441_v3 = vadd.f32 %v665_v60, %v633_v13  ;;  %v4443_v31 = vadd.f32 %v671_v57, %v639_v25  ;;  %v4445_v16 = vadd.f32 %v677_v50, %v645_v8  ;;  %167 = vst.msk [vmem:[#allocation2 + $0x41] sm:$0x1] %vm159_vm0, %v3611_v29  ;;  %6500 = sst [smem:[#allocation45_spill]] %s4728_s26  ;;  %s4788_s5 = sld [smem:[#allocation9 + $0xe]] }
 0x14f   :  { %v624_v1 = vmul.f32 %v623_v53, %v620_v62  ;;  %v630_v56 = vmul.f32 %v629_v59, %v620_v62  ;;  %v636_v4 = vmul.f32 %v635_v14, %v620_v62  ;;  %v642_v12 = vmul.f32 %v641_v5, %v620_v62  ;;  %v741_v27 = vpop.permute.xlu1 %740  ;;  %v739_v40 = vpop.permute.xlu0 %738  ;;  %v3417_v14 = vld [vmem:[%s6372_s0 + $0x23] sm:$0xff]  ;;  %169 = vst.msk [vmem:[#allocation2 + $0x48] sm:$0x1] %vm159_vm0, %v3611_v29  ;;  %6502 = sst [smem:[#allocation47_spill]] %s4740_s8  ;;  %s4825_s8 = sld [smem:[#allocation9 + $0x18f]] }
 0x150   :  { %v658_v47 = vmul.f32 %v657_v63, %v654_v48  ;;  %v664_v38 = vmul.f32 %v663_v61, %v654_v48  ;;  %v670_v39 = vmul.f32 %v669_v10, %v654_v48  ;;  %v676_v34 = vmul.f32 %v675_v42, %v654_v48  ;;  %170 = vst.msk [vmem:[#allocation2 + $0x59] sm:$0x1] %vm159_vm0, %v3611_v29 }
 0x151   :  { %v626_v36 = vadd.f32 %v624_v1, %v4359_v32  ;;  %v632_v33 = vadd.f32 %v630_v56, %v4361_v55  ;;  %v638_v18 = vadd.f32 %v636_v4, %v4363_v0  ;;  %v644_v54 = vadd.f32 %v642_v12, %v4365_v24  ;;  %v3418_v32 = vld [vmem:[%s6372_s0 + $0x1b] sm:$0xff] }
 0x152   :  { %v731_v53 = vadd.f32 %v727_v11, %v717_v51  ;;  %v730_v59 = vadd.f32 %v725_v23, %v716_v30  ;;  %v749_v5 = vmul.f32 %v3417_v14, %v747_v9  ;;  %v748_v55 = vmul.f32 %v3418_v32, %v747_v9 }
 0x153   :  { %v4465_v63 = vadd.f32 %v658_v47, %v626_v36  ;;  %v4467_v0 = vadd.f32 %v664_v38, %v632_v33  ;;  %v4469_v24 = vadd.f32 %v670_v39, %v638_v18  ;;  %v4471_v61 = vadd.f32 %v676_v34, %v644_v54  ;;  %v761_v10 = vpop.permute.xlu1 %760  ;;  %v759_v19 = vpop.permute.xlu0 %758 }
 0x154   :  { %v745_v2 = vadd.f32 %v741_v27, %v731_v53  ;;  %v744_v22 = vadd.f32 %v739_v40, %v730_v59  ;;  %v815_v58 = vstv %s4457_s28  ;;  %v785_v21 = vstv %s4473_s23  ;;  %s4585_s28 = sld [smem:[#allocation9 + $0x188]]  ;;  %s4644_s23 = sld [smem:[#allocation8 + $0xb]] }
 0x155   :  { %v819_v17 = vstv %s4475_s24  ;;  %v791_v60 = vstv %s4477_s2  ;;  %v797_v57 = vstv %s4479_s16  ;;  %v803_v25 = vstv %s4481_s20  ;;  %s4599_s24 = sld [smem:[#allocation9 + $0x89]]  ;;  %s4601_s2 = sld [smem:[#allocation3 + $0x283]] }
 0x156   :  { %v751_v42 = vadd.f32 %v749_v5, %v745_v2  ;;  %v750_v44 = vadd.f32 %v748_v55, %v744_v22  ;;  %v809_v8 = vstv %s4483_s10  ;;  %v825_v23 = vstv %s4485_s12  ;;  %s4603_s16 = sld [smem:[#allocation9 + $0x109]]  ;;  %s4605_s20 = sld [smem:[#allocation3 + $0x286]] }
 0x157   :  { %v775_v49 = vpop.permute.xlu1 %774  ;;  %v773_v41 = vpop.permute.xlu0 %772  ;;  %v831_v62 = vstv %s4487_s4  ;;  %v837_v51 = vstv %s4489_s11  ;;  %v843_v30 = vstv %s4491_s1  ;;  %s4608_s10 = sld [smem:[#allocation9 + $0x189]]  ;;  %s4612_s12 = sld [smem:[#allocation6 + $0xa]] }
 0x158   :  { %v765_v35 = vadd.f32 %v761_v10, %v751_v42  ;;  %v764_v15 = vadd.f32 %v759_v19, %v750_v44  ;;  %s4616_s4 = sld [smem:[#allocation8 + $0xa]]  ;;  %s4646_s1 = sld [smem:[#allocation9 + $0xb]] }
 0x159   :  { %s4618_s11 = sld [smem:[#allocation9 + $0xa]] }
 0x15a   :  { %v779_v9 = vadd.f32 %v775_v49, %v765_v35  ;;  %v778_v6 = vadd.f32 %v773_v41, %v764_v15  ;;  %6484 = sst [smem:[#allocation29_spill]] %s4585_s28 }
 0x15b   :  { %v4497_v43 = vpop.permute.xlu1 %867  ;;  %v4499_v7 = vpop.permute.xlu0 %865  ;;  %6486 = sst [smem:[#allocation31_spill]] %s4599_s24 }
 0x15c   :  { %v783_v46 = vmul.f32 %v781_v37, %v779_v9  ;;  %v817_v28 = vmul.f32 %v815_v58, %v779_v9  ;;  %v782_v26 = vmul.f32 %v781_v37, %v778_v6  ;;  %v816_v20 = vmul.f32 %v815_v58, %v778_v6  ;;  %6487 = sst [smem:[#allocation32_spill]] %s4603_s16 }
 0x15d   :  { %6488 = sst [smem:[#allocation33_spill]] %s4608_s10 }
 0x15e   :  { %v787_v50 = vadd.f32 %v785_v21, %v783_v46  ;;  %v821_v11 = vadd.f32 %v819_v17, %v817_v28  ;;  %v786_v52 = vadd.f32 %v785_v21, %v782_v26  ;;  %v820_v13 = vadd.f32 %v819_v17, %v816_v20  ;;  %v3419_v46 = vld [vmem:[%s6372_s0 + $0x39] sm:$0xff]  ;;  %6489 = sst [smem:[#allocation34_spill]] %s4616_s4 }
 0x15f   :  { %v4507_v48 = vpop.permute.xlu1 %881  ;;  %v4511_v4 = vpop.permute.xlu0 %879  ;;  %v856_v21 = vstv %s4521_s22  ;;  %v888_v20 = vstv %s4547_s25  ;;  %6490 = sst [smem:[#allocation35_spill]] %s4618_s11  ;;  %s4624_s25 = sld [smem:[#allocation9 + $0x8a]] }
 0x160   :  { %v789_v1 = vmax.f32 %v787_v50, 0.0  ;;  %v823_v56 = vmax.f32 %v821_v11, 0.0  ;;  %v788_v12 = vmax.f32 %v786_v52, 0.0  ;;  %v822_v27 = vmax.f32 %v820_v13, 0.0  ;;  %v4582_v50 = vld [vmem:[%s6372_s0 + $0x31] sm:$0xff]  ;;  %v3421_v13 = vld [vmem:[%s6372_s0 + $0x3a] sm:$0xff] }
 0x161   :  { %v858_v28 = vmul.f32 %v3419_v46, %v856_v21  ;;  %v857_v11 = vmul.f32 %v4582_v50, %v856_v21  ;;  %6494 = sst [smem:[#allocation39_spill]] %s4646_s1  ;;  %s4721_s11 = sld [smem:[#allocation9 + $0xd]] }
 0x162   :  { %v793_v47 = vmul.f32 %v791_v60, %v789_v1  ;;  %v799_v38 = vmul.f32 %v797_v57, %v789_v1  ;;  %v805_v39 = vmul.f32 %v803_v25, %v789_v1  ;;  %v811_v34 = vmul.f32 %v809_v8, %v789_v1  ;;  %s4652_s22 = sld [smem:[#allocation9 + $0x8b]]  ;;  %s4796_s1 = sld [smem:[#allocation9 + $0x10e]] }
 0x163   :  { %v827_v40 = vmul.f32 %v825_v23, %v823_v56  ;;  %v833_v36 = vmul.f32 %v831_v62, %v823_v56  ;;  %v839_v33 = vmul.f32 %v837_v51, %v823_v56  ;;  %v845_v18 = vmul.f32 %v843_v30, %v823_v56  ;;  %v4513_v54 = vpop.permute.xlu1 %901  ;;  %v4519_v32 = vpop.permute.xlu0 %899 }
 0x164   :  { %v795_v53 = vadd.f32 %v793_v47, %v4439_v45  ;;  %v801_v59 = vadd.f32 %v799_v38, %v4441_v3  ;;  %v807_v14 = vadd.f32 %v805_v39, %v4443_v31  ;;  %v813_v5 = vadd.f32 %v811_v34, %v4445_v16  ;;  %v3424_v47 = vld [vmem:[%s6372_s0 + $0x33] sm:$0xff] }
 0x165   :  { %v792_v55 = vmul.f32 %v791_v60, %v788_v12  ;;  %v798_v10 = vmul.f32 %v797_v57, %v788_v12  ;;  %v804_v2 = vmul.f32 %v803_v25, %v788_v12  ;;  %v810_v22 = vmul.f32 %v809_v8, %v788_v12  ;;  %6491 = sst [smem:[#allocation36_spill]] %s4624_s25  ;;  %s4730_s25 = sld [smem:[#allocation3 + $0x386]] }
 0x166   :  { %v4523_v19 = vadd.f32 %v827_v40, %v795_v53  ;;  %v4525_v42 = vadd.f32 %v833_v36, %v801_v59  ;;  %v4527_v44 = vadd.f32 %v839_v33, %v807_v14  ;;  %v4529_v45 = vadd.f32 %v845_v18, %v813_v5 }
 0x167   :  { %v794_v3 = vadd.f32 %v792_v55, %v4465_v63  ;;  %v800_v31 = vadd.f32 %v798_v10, %v4467_v0  ;;  %v806_v16 = vadd.f32 %v804_v2, %v4469_v24  ;;  %v812_v29 = vadd.f32 %v810_v22, %v4471_v61  ;;  %v4535_v49 = vpop.permute.xlu1 %915  ;;  %v4537_v58 = vpop.permute.xlu0 %913  ;;  %6499 = sst [smem:[#allocation44_spill]] %s4721_s11  ;;  %s4852_s11 = sld [smem:[#allocation11 + $0x3]] }
 0x168   :  { %v826_v35 = vmul.f32 %v825_v23, %v822_v27  ;;  %v832_v15 = vmul.f32 %v831_v62, %v822_v27  ;;  %v838_v41 = vmul.f32 %v837_v51, %v822_v27  ;;  %v844_v37 = vmul.f32 %v843_v30, %v822_v27  ;;  %6495 = sst [smem:[#allocation40_spill]] %s4652_s22  ;;  %s4798_s22 = sld [smem:[#allocation9 + $0x18e]] }
 0x169   :  { %v872_v57 = vadd.f32 %v4497_v43, %v858_v28  ;;  %v890_v25 = vmul.f32 %v3421_v13, %v888_v20  ;;  %v871_v23 = vadd.f32 %v4499_v7, %v857_v11  ;;  %v1024_v51 = vstv %s4565_s18  ;;  %v3422_v7 = vld [vmem:[%s6372_s0 + $0x32] sm:$0xff]  ;;  %s4654_s18 = sld [smem:[#allocation3 + $0x300]] }
 0x16a   :  { %v4539_v9 = vadd.f32 %v826_v35, %v794_v3  ;;  %v4541_v6 = vadd.f32 %v832_v15, %v800_v31  ;;  %v4543_v63 = vadd.f32 %v838_v41, %v806_v16  ;;  %v4545_v0 = vadd.f32 %v844_v37, %v812_v29 }
 0x16b   :  { %v4549_v24 = vpop.permute.xlu1 %935  ;;  %v4551_v61 = vpop.permute.xlu0 %933  ;;  %v886_v43 = vadd.f32 %v4507_v48, %v872_v57  ;;  %v922_v48 = vstv %s4559_s17  ;;  %v885_v30 = vadd.f32 %v4511_v4, %v871_v23  ;;  %v889_v56 = vmul.f32 %v3422_v7, %v888_v20  ;;  %s4632_s17 = sld [smem:[#allocation6 + $0xb]]  ;;  %v3423_v4 = vld [vmem:[%s6372_s0 + $0x3b] sm:$0xff] }
 0x16c   :  { %v924_v27 = vmul.f32 %v3423_v4, %v922_v48  ;;  %v4640_v38 = vmul.f32 %v3424_v47, %v922_v48  ;;  %v1026_v39 = vmul.f32 %v3419_v46, %v1024_v51  ;;  %v956_v40 = vstv %s4563_s27  ;;  %s4850_s27 = sld [smem:[#allocation11 + $0x2]] }
 0x16d   :  { %v892_v1 = vadd.f32 %v890_v25, %v886_v43  ;;  %v960_v36 = vstv %s4567_s21  ;;  %v966_v33 = vstv %s4569_s3  ;;  %v972_v18 = vstv %s4572_s19  ;;  %6508 = sst [smem:[#allocation53_spill]] %s4852_s11  ;;  %s6516_s3 = sld [smem:[#allocation35_spill]] }
 0x16e   :  { %v891_v59 = vadd.f32 %v889_v56, %v885_v30  ;;  %v978_v14 = vstv %s4574_s13  ;;  %v1056_v5 = vstv %s4601_s2  ;;  %v984_v55 = vstv %s4585_s28  ;;  %s4679_s2 = sld [smem:[#allocation6 + $0xc]]  ;;  %s4713_s28 = sld [smem:[#allocation8 + $0xd]] }
 0x16f   :  { %v4554_v17 = vpop.permute.xlu1 %949  ;;  %v4561_v26 = vpop.permute.xlu0 %947  ;;  %v906_v53 = vadd.f32 %v4513_v54, %v892_v1  ;;  %v990_v10 = vstv %s4587_s30  ;;  %v994_v2 = vstv %s4591_s6  ;;  %v1090_v3 = vstv %s4605_s20  ;;  %s4684_s20 = sld [smem:[#allocation8 + $0xc]]  ;;  %s4723_s13 = sld [smem:[#allocation3 + $0x383]] }
 0x170   :  { %v1000_v31 = vstv %s4593_s7  ;;  %v1006_v16 = vstv %s4599_s24  ;;  %v1012_v15 = vstv %s4603_s16  ;;  %v1018_v41 = vstv %s4608_s10  ;;  %s4693_s24 = sld [smem:[#allocation9 + $0x8c]]  ;;  %s4706_s7 = sld [smem:[#allocation6 + $0xd]] }
 0x171   :  { %v920_v54 = vadd.f32 %v4535_v49, %v906_v53  ;;  %v1025_v37 = vmul.f32 %v4582_v50, %v1024_v51  ;;  %v1058_v21 = vmul.f32 %v3421_v13, %v1056_v5  ;;  %v905_v49 = vadd.f32 %v4519_v32, %v891_v59  ;;  %s4695_s10 = sld [smem:[#allocation9 + $0x10c]]  ;;  %v3430_v53 = vld [vmem:[%s6372_s0 + $0x4b] sm:$0xff]  ;;  %s6517_s19 = sld [smem:[#allocation36_spill]] }
 0x172   :  { %v4689_v28 = vmul.f32 %v3422_v7, %v1056_v5  ;;  %v4691_v20 = vmul.f32 %v3423_v4, %v1090_v3  ;;  %v4699_v57 = vmul.f32 %v3424_v47, %v1090_v3  ;;  %v1124_v32 = vstv %s4612_s12  ;;  %s4704_s16 = sld [smem:[#allocation9 + $0x18c]]  ;;  %6507 = sst [smem:[#allocation52_spill]] %s4850_s27 }
 0x173   :  { %v4576_v60 = vpop.permute.xlu1 %1035  ;;  %v4589_v52 = vpop.permute.xlu0 %1033  ;;  %v1128_v50 = vstv %s4616_s4  ;;  %v919_v43 = vadd.f32 %v4537_v58, %v905_v49  ;;  %v926_v13 = vadd.f32 %v924_v27, %v920_v54  ;;  %s4715_s4 = sld [smem:[#allocation3 + $0x380]]  ;;  %v1158_v51 = vstv %s4632_s17  ;;  %6503 = sst [smem:[#allocation48_spill]] %s4798_s22 }
 0x174   :  { %v1040_v29 = vadd.f32 %v4576_v60, %v1026_v39  ;;  %v1162_v30 = vstv %s4644_s23  ;;  %v1199_v1 = vstv %s4654_s18  ;;  %v1231_v56 = vstv %s4659_s14  ;;  %s4738_s18 = sld [smem:[#allocation9 + $0x10d]]  ;;  %s4780_s14 = sld [smem:[#allocation6 + $0xe]] }
 0x175   :  { %v1265_v4 = vstv %s4661_s15  ;;  %v1039_v27 = vadd.f32 %v4589_v52, %v1025_v37  ;;  %v940_v5 = vadd.f32 %v4549_v24, %v926_v13  ;;  %v925_v3 = vadd.f32 %v4640_v38, %v919_v43  ;;  %v3425_v52 = vld [vmem:[%s6372_s0 + $0x51] sm:$0xff]  ;;  %v3426_v37 = vld [vmem:[%s6372_s0 + $0x49] sm:$0xff]  ;;  %s4782_s15 = sld [smem:[#allocation8 + $0xe]]  ;;  %s6518_s12 = sld [smem:[#allocation37_spill]] }
 0x176   :  { %v3427_v38 = vld [vmem:[%s6372_s0 + $0x52] sm:$0xff]  ;;  %v4773_v39 = vmul.f32 %v3430_v53, %v1265_v4  ;;  %v1399_v7 = vstv %s4723_s13  ;;  %s4814_s13 = sld [smem:[#allocation9 + $0xf]]  ;;  %s6519_s22 = sld [smem:[#allocation38_spill]] }
 0x177   :  { %v1050_v8 = vpop.permute.xlu1 %1049  ;;  %v4610_v62 = vpop.permute.xlu0 %1047  ;;  %v4756_v49 = vmul.f32 %v3427_v38, %v1231_v56  ;;  %v3429_v13 = vld [vmem:[%s6372_s0 + $0x53] sm:$0xff]  ;;  %v4821_v11 = vmul.f32 %v3427_v38, %v1399_v7  ;;  %s6520_s30 = sld [smem:[#allocation39_spill]]  ;;  %s6522_s17 = sld [smem:[#allocation40_spill]] }
 0x178   :  { %v1054_v46 = vadd.f32 %v1050_v8, %v1040_v29  ;;  %6498 = sst [smem:[#allocation43_spill]] %s4704_s16  ;;  %v1201_v29 = vmul.f32 %v3425_v52, %v1199_v1  ;;  %v1053_v24 = vadd.f32 %v4610_v62, %v1039_v27  ;;  %v954_v62 = vadd.f32 %v4554_v17, %v940_v5  ;;  %s6523_s11 = sld [smem:[#allocation41_spill]] }
 0x179   :  { %v939_v17 = vadd.f32 %v4551_v61, %v925_v3  ;;  %v1367_v5 = vstv %s4715_s4  ;;  %s4805_s4 = sld [smem:[#allocation6 + $0xf]]  ;;  %s6553_s23 = sld [smem:[#allocation47_spill]] }
 0x17a   :  { %v1060_v58 = vadd.f32 %v1058_v21, %v1054_v46  ;;  %6501 = sst [smem:[#allocation46_spill]] %s4738_s18  ;;  %v1200_v21 = vmul.f32 %v3426_v37, %v1199_v1  ;;  %v3428_v46 = vld [vmem:[%s6372_s0 + $0x4a] sm:$0xff]  ;;  %v4766_v1 = vmul.f32 %v3429_v13, %v1265_v4  ;;  %v1059_v8 = vadd.f32 %v4689_v28, %v1053_v24  ;;  %s4807_s0 = sld [smem:[#allocation8 + $0xf]] }
 0x17b   :  { %v4628_v12 = vpop.permute.xlu1 %1069  ;;  %v4642_v34 = vpop.permute.xlu0 %1067  ;;  %v4761_v43 = vmul.f32 %v3428_v46, %v1231_v56  ;;  %v958_v61 = vmul.f32 %v956_v40, %v954_v62  ;;  %v1349_v28 = vstv %s4728_s26  ;;  %v4812_v23 = vmul.f32 %v3425_v52, %v1367_v5  ;;  %s4816_s16 = sld [smem:[#allocation9 + $0x8f]]  ;;  %s4834_s18 = sld [smem:[#allocation11]] }
 0x17c   :  { %v1074_v27 = vadd.f32 %v4628_v12, %v1060_v58  ;;  %6504 = sst [smem:[#allocation49_spill]] %s4814_s13  ;;  %v4819_v56 = vmul.f32 %v3426_v37, %v1367_v5  ;;  %v992_v52 = vmul.f32 %v990_v10, %v954_v62  ;;  %v1073_v48 = vadd.f32 %v4642_v34, %v1059_v8  ;;  %s4836_s26 = sld [smem:[#allocation11 + $0x1]] }
 0x17d   :  { %v4830_v24 = vmul.f32 %v3428_v46, %v1399_v7  ;;  %v1467_v46 = vstv %s4780_s14  ;;  %s6588_s13 = smov 127   ;;  %s3235_s21 = sld [smem:[#allocation12 + $0x8]] }
 0x17e   :  { %s3246_s6 = sld [smem:[#allocation12 + $0x81]]  ;;  %s3310_s14 = sld [smem:[#allocation12 + $0x202]] }
 0x17f   :  { %v4666_v22 = vpop.permute.xlu1 %1083  ;;  %v4677_v35 = vpop.permute.xlu0 %1081 }
 0x180   :  { %v1088_v12 = vadd.f32 %v4666_v22, %v1074_v27  ;;  %v953_v22 = vadd.f32 %v4561_v26, %v939_v17  ;;  %v1433_v27 = vstv %s4730_s25  ;;  %s4823_s25 = sld [smem:[#allocation9 + $0x10f]]  ;;  %v1087_v34 = vadd.f32 %v4677_v35, %v1073_v48 }
 0x181   :  { %6505 = sst [smem:[#allocation50_spill]] %s4834_s18  ;;  %v4843_v7 = vmul.f32 %v3430_v53, %v1433_v27  ;;  %v996_v35 = vadd.f32 %v994_v2, %v992_v52  ;;  %v1489_v53 = vstv %s4796_s1  ;;  %s3231_s1 = sld [smem:[#allocation12 + $0x4]] }
 0x182   :  { %v1094_v26 = vadd.f32 %v4691_v20, %v1088_v12  ;;  %v4832_v20 = vmul.f32 %v3429_v13, %v1433_v27  ;;  %6506 = sst [smem:[#allocation51_spill]] %s4836_s26  ;;  %v1471_v13 = vstv %s4782_s15  ;;  %v991_v48 = vmul.f32 %v990_v10, %v953_v22  ;;  %s6551_s26 = sld [smem:[#allocation46_spill]] }
 0x183   :  { %v4697_v60 = vpop.permute.xlu1 %1103  ;;  %v4709_v25 = vpop.permute.xlu0 %1101  ;;  %v1093_v27 = vadd.f32 %v4699_v57, %v1087_v34  ;;  %v1505_v10 = vstv %s4807_s0  ;;  %s6572_s0 = sld [smem:[#allocation50_spill]]  ;;  %s3309_s18 = sld [smem:[#allocation12 + $0x201]] }
 0x184   :  { %v1108_v62 = vadd.f32 %v4697_v60, %v1094_v26  ;;  %s6580_s15 = sld [smem:[#allocation55_spill]] }
 0x187   :  { %v4736_v59 = vpop.permute.xlu1 %1117  ;;  %v4744_v54 = vpop.permute.xlu0 %1115 }
 0x18b   :  { %v1211_v47 = vpop.permute.xlu1 %1210  ;;  %v1209_v58 = vpop.permute.xlu0 %1208 }
 0x18c   :  { %v1215_v17 = vadd.f32 %v1211_v47, %v1201_v29  ;;  %v962_v47 = vadd.f32 %v960_v36, %v958_v61  ;;  %v957_v29 = vmul.f32 %v956_v40, %v953_v22  ;;  %v1214_v37 = vadd.f32 %v1209_v58, %v1200_v21 }
 0x18d   :  { %v1477_v40 = vstv %s4788_s5  ;;  %v1483_v21 = vstv %s4790_s9  ;;  %v1122_v61 = vadd.f32 %v4736_v59, %v1108_v62  ;;  %v998_v59 = vmax.f32 %v996_v35, 0.0  ;;  %s3228_s5 = sld [smem:[#allocation12 + $0x1]]  ;;  %s3229_s9 = sld [smem:[#allocation12 + $0x2]] }
 0x18e   :  { %v964_v58 = vmax.f32 %v962_v47, 0.0 }
 0x18f   :  { %v1225_v4 = vpop.permute.xlu1 %1224  ;;  %v1223_v3 = vpop.permute.xlu0 %1222  ;;  %v1126_v22 = vmul.f32 %v1124_v32, %v1122_v61 }
 0x190   :  { %v1229_v38 = vadd.f32 %v1225_v4, %v1215_v17  ;;  %v1228_v12 = vadd.f32 %v1223_v3, %v1214_v37  ;;  %v961_v4 = vadd.f32 %v960_v36, %v957_v29  ;;  %v1501_v17 = vstv %s4805_s4  ;;  %s3232_s4 = sld [smem:[#allocation12 + $0x5]] }
 0x191   :  { %v968_v34 = vmul.f32 %v966_v33, %v964_v58  ;;  %v986_v35 = vmul.f32 %v984_v55, %v964_v58  ;;  %v1543_v29 = vstv %s4850_s27  ;;  %v1160_v36 = vmul.f32 %v1158_v51, %v1122_v61  ;;  %s6525_s27 = sld [smem:[#allocation42_spill]] }
 0x192   :  { %v1235_v3 = vadd.f32 %v4756_v49, %v1229_v38  ;;  %v1234_v52 = vadd.f32 %v4761_v43, %v1228_v12  ;;  %v995_v49 = vadd.f32 %v994_v2, %v991_v48  ;;  %v963_v62 = vmax.f32 %v961_v4, 0.0 }
 0x193   :  { %v1245_v8 = vpop.permute.xlu1 %1244  ;;  %v1243_v5 = vpop.permute.xlu0 %1242  ;;  %v974_v43 = vmul.f32 %v972_v18, %v964_v58  ;;  %v980_v12 = vmul.f32 %v978_v14, %v964_v58  ;;  %v1107_v2 = vadd.f32 %v4709_v25, %v1093_v27  ;;  %v970_v25 = vadd.f32 %v968_v34, %v4523_v19 }
 0x194   :  { %v1249_v60 = vadd.f32 %v1245_v8, %v1235_v3  ;;  %v1248_v57 = vadd.f32 %v1243_v5, %v1234_v52  ;;  %v1002_v8 = vmul.f32 %v1000_v31, %v998_v59  ;;  %v997_v3 = vmax.f32 %v995_v49, 0.0 }
 0x195   :  { %v1121_v58 = vadd.f32 %v4744_v54, %v1107_v2  ;;  %v1130_v5 = vadd.f32 %v1128_v50, %v1126_v22  ;;  %v982_v52 = vadd.f32 %v980_v12, %v4527_v44  ;;  %v988_v49 = vadd.f32 %v986_v35, %v4529_v45 }
 0x196   :  { %v967_v61 = vmul.f32 %v966_v33, %v963_v62  ;;  %v1008_v54 = vmul.f32 %v1006_v16, %v998_v59  ;;  %v1014_v19 = vmul.f32 %v1012_v15, %v998_v59  ;;  %v973_v34 = vmul.f32 %v972_v18, %v963_v62 }
 0x197   :  { %v1259_v26 = vpop.permute.xlu1 %1258  ;;  %v1257_v47 = vpop.permute.xlu0 %1256  ;;  %v979_v22 = vmul.f32 %v978_v14, %v963_v62  ;;  %v1164_v44 = vadd.f32 %v1162_v30, %v1160_v36  ;;  %v1125_v45 = vmul.f32 %v1124_v32, %v1121_v58  ;;  %v1004_v33 = vadd.f32 %v1002_v8, %v970_v25 }
 0x198   :  { %v1263_v38 = vadd.f32 %v1259_v26, %v1249_v60  ;;  %v1262_v60 = vadd.f32 %v1257_v47, %v1248_v57  ;;  %v976_v26 = vadd.f32 %v974_v43, %v4525_v42  ;;  %v985_v42 = vmul.f32 %v984_v55, %v963_v62 }
 0x199   :  { %v1132_v57 = vmax.f32 %v1130_v5, 0.0  ;;  %v1016_v43 = vadd.f32 %v1014_v19, %v982_v52  ;;  %v975_v32 = vadd.f32 %v973_v34, %v4541_v6  ;;  %v981_v36 = vadd.f32 %v979_v22, %v4543_v63 }
 0x19a   :  { %v1269_v27 = vadd.f32 %v4766_v1, %v1263_v38  ;;  %v1020_v1 = vmul.f32 %v1018_v41, %v998_v59  ;;  %v1268_v18 = vadd.f32 %v4773_v39, %v1262_v60  ;;  %v1010_v14 = vadd.f32 %v1008_v54, %v976_v26 }
 0x19b   :  { %v1279_v48 = vpop.permute.xlu1 %1278  ;;  %v1277_v37 = vpop.permute.xlu0 %1276  ;;  %v969_v59 = vadd.f32 %v967_v61, %v4539_v9  ;;  %v1159_v62 = vmul.f32 %v1158_v51, %v1121_v58  ;;  %v987_v2 = vadd.f32 %v985_v42, %v4545_v0  ;;  %v1166_v9 = vmax.f32 %v1164_v44, 0.0 }
 0x19c   :  { %v1283_v38 = vadd.f32 %v1279_v48, %v1269_v27  ;;  %v1022_v12 = vadd.f32 %v1020_v1, %v988_v49  ;;  %v1001_v48 = vmul.f32 %v1000_v31, %v997_v3  ;;  %v1129_v8 = vadd.f32 %v1128_v50, %v1125_v45 }
 0x19d   :  { %v1007_v25 = vmul.f32 %v1006_v16, %v997_v3  ;;  %v1013_v6 = vmul.f32 %v1012_v15, %v997_v3  ;;  %v6521_v63 = vstv %s6516_s3  ;;  %v1282_v51 = vadd.f32 %v1277_v37, %v1268_v18  ;;  %s3247_s3 = sld [smem:[#allocation12 + $0x82]] }
 0x19e   :  { %v1136_v5 = vmul.f32 %v6521_v63, %v1132_v57  ;;  %v1019_v58 = vmul.f32 %v1018_v41, %v997_v3  ;;  %v6524_v60 = vstv %s6517_s19  ;;  %v6526_v31 = vstv %s6518_s12  ;;  %s3249_s19 = sld [smem:[#allocation12 + $0x84]]  ;;  %s3250_s12 = sld [smem:[#allocation12 + $0x85]] }
 0x19f   :  { %v1293_v4 = vpop.permute.xlu1 %1292  ;;  %v1291_v47 = vpop.permute.xlu0 %1290  ;;  %v1142_v0 = vmul.f32 %v6524_v60, %v1132_v57  ;;  %v1148_v27 = vmul.f32 %v6526_v31, %v1132_v57  ;;  %v6527_v50 = vstv %s6519_s22  ;;  %v1163_v16 = vadd.f32 %v1162_v30, %v1159_v62  ;;  %s3252_s22 = sld [smem:[#allocation12 + $0x87]] }
 0x1a0   :  { %v1297_v35 = vadd.f32 %v1293_v4, %v1283_v38  ;;  %v1003_v4 = vadd.f32 %v1001_v48, %v969_v59  ;;  %v1154_v52 = vmul.f32 %v6527_v50, %v1132_v57  ;;  %v6528_v49 = vstv %s4679_s2  ;;  %s3294_s2 = sld [smem:[#allocation12 + $0x187]] }
 0x1a1   :  { %v1296_v61 = vadd.f32 %v1291_v47, %v1282_v51  ;;  %v1009_v37 = vadd.f32 %v1007_v25, %v975_v32  ;;  %v1015_v19 = vadd.f32 %v1013_v6, %v981_v36  ;;  %v6529_v34 = vstv %s6520_s30  ;;  %s3253_s30 = sld [smem:[#allocation12 + $0x88]] }
 0x1a2   :  { %v1301_v15 = vmul.f32 %v6528_v49, %v1297_v35  ;;  %v1170_v41 = vmul.f32 %v6529_v34, %v1166_v9  ;;  %v1131_v3 = vmax.f32 %v1129_v8, 0.0  ;;  %v1138_v22 = vadd.f32 %v1136_v5, %v1004_v33 }
 0x1a3   :  { %v1379_v55 = vpop.permute.xlu1 %1378  ;;  %v6530_v1 = vstv %s6522_s17  ;;  %v6531_v44 = vstv %s6523_s11  ;;  %v6532_v57 = vstv %s6525_s27  ;;  %v1144_v47 = vadd.f32 %v1142_v0, %v1010_v14 }
 0x1a4   :  { %v1377_v39 = vpop.permute.xlu0 %1376  ;;  %v1176_v42 = vmul.f32 %v6530_v1, %v1166_v9  ;;  %v1182_v45 = vmul.f32 %v6531_v44, %v1166_v9  ;;  %v1188_v30 = vmul.f32 %v6532_v57, %v1166_v9  ;;  %v1150_v38 = vadd.f32 %v1148_v27, %v1016_v43 }
 0x1a5   :  { %v1383_v18 = vadd.f32 %v1379_v55, %v4812_v23  ;;  %v1382_v59 = vadd.f32 %v1377_v39, %v4819_v56  ;;  %v1156_v36 = vadd.f32 %v1154_v52, %v1022_v12  ;;  %v1165_v62 = vmax.f32 %v1163_v16, 0.0 }
 0x1a6   :  { %v6533_v33 = vstv %s4684_s20  ;;  %v6534_v8 = vmov %v6528_v49  ;;  %v1135_v9 = vmul.f32 %v6521_v63, %v1131_v3  ;;  %v6535_v5 = vstv %s4706_s7  ;;  %s6545_s7 = sld [smem:[#allocation43_spill]]  ;;  %s6575_s20 = sld [smem:[#allocation53_spill]] }
 0x1a7   :  { %v1393_v26 = vpop.permute.xlu1 %1392  ;;  %v1305_v48 = vadd.f32 %v6533_v33, %v1301_v15  ;;  %v1300_v25 = vmul.f32 %v6534_v8, %v1296_v61  ;;  %v1335_v14 = vmul.f32 %v6535_v5, %v1297_v35  ;;  %v1141_v23 = vmul.f32 %v6524_v60, %v1131_v3 }
 0x1a8   :  { %v1391_v54 = vpop.permute.xlu0 %1390  ;;  %v1397_v43 = vadd.f32 %v1393_v26, %v1383_v18  ;;  %v6536_v56 = vmov %v6526_v31  ;;  %v6537_v12 = vmov %v6527_v50  ;;  %v6538_v0 = vmov %v6535_v5 }
 0x1a9   :  { %v1396_v51 = vadd.f32 %v1391_v54, %v1382_v59  ;;  %v1147_v55 = vmul.f32 %v6536_v56, %v1131_v3  ;;  %v1153_v39 = vmul.f32 %v6537_v12, %v1131_v3  ;;  %v1334_v31 = vmul.f32 %v6538_v0, %v1296_v61 }
 0x1aa   :  { %v1021_v27 = vadd.f32 %v1019_v58, %v987_v2  ;;  %v1172_v50 = vadd.f32 %v1170_v41, %v1138_v22  ;;  %v1178_v52 = vadd.f32 %v1176_v42, %v1144_v47  ;;  %v1184_v16 = vadd.f32 %v1182_v45, %v1150_v38 }
 0x1ab   :  { %v1413_v32 = vpop.permute.xlu1 %1412  ;;  %v1190_v35 = vadd.f32 %v1188_v30, %v1156_v36  ;;  %v6539_v26 = vmov %v6529_v34  ;;  %v1307_v54 = vmax.f32 %v1305_v48, 0.0  ;;  %v6540_v34 = vmov %v6533_v33 }
 0x1ac   :  { %v1411_v6 = vpop.permute.xlu0 %1410  ;;  %v1169_v15 = vmul.f32 %v6539_v26, %v1165_v62  ;;  %v1304_v1 = vadd.f32 %v6540_v34, %v1300_v25  ;;  %v1137_v3 = vadd.f32 %v1135_v9, %v1003_v4  ;;  %v6541_v61 = vstv %s4713_s28  ;;  %s6549_s28 = sld [smem:[#allocation44_spill]] }
 0x1ad   :  { %v1339_v2 = vadd.f32 %v6541_v61, %v1335_v14  ;;  %v1403_v58 = vadd.f32 %v4821_v11, %v1397_v43  ;;  %v1402_v41 = vadd.f32 %v4830_v24, %v1396_v51  ;;  %v1143_v22 = vadd.f32 %v1141_v23, %v1009_v37 }
 0x1ae   :  { %v1149_v42 = vadd.f32 %v1147_v55, %v1015_v19  ;;  %v1155_v45 = vadd.f32 %v1153_v39, %v1021_v27  ;;  %v6542_v57 = vmov %v6541_v61  ;;  %v6543_v47 = vstv %s6522_s17  ;;  %s3267_s17 = sld [smem:[#allocation12 + $0x101]] }
 0x1af   :  { %v1427_v49 = vpop.permute.xlu1 %1426  ;;  %v1338_v30 = vadd.f32 %v6542_v57, %v1334_v31  ;;  %v1175_v38 = vmul.f32 %v6543_v47, %v1165_v62  ;;  %v6544_v18 = vstv %s6523_s11  ;;  %v1417_v36 = vadd.f32 %v1413_v32, %v1403_v58  ;;  %s3271_s11 = sld [smem:[#allocation12 + $0x105]] }
 0x1b0   :  { %v1425_v44 = vpop.permute.xlu0 %1424  ;;  %v1181_v59 = vmul.f32 %v6544_v18, %v1165_v62  ;;  %v1416_v33 = vadd.f32 %v1411_v6, %v1402_v41  ;;  %v6546_v48 = vstv %s6525_s27  ;;  %v6547_v25 = vstv %s4686_s29  ;;  %s6563_s29 = sld [smem:[#allocation48_spill]]  ;;  %s6589_s27 = smov 126  }
 0x1b1   :  { %v1187_v8 = vmul.f32 %v6546_v48, %v1165_v62  ;;  %v1311_v11 = vmul.f32 %v6547_v25, %v1307_v54  ;;  %v6548_v63 = vstv %s4693_s24  ;;  %v1306_v37 = vmax.f32 %v1304_v1, 0.0  ;;  %s6565_s24 = sld [smem:[#allocation49_spill]] }
 0x1b2   :  { %v1317_v24 = vmul.f32 %v6548_v63, %v1307_v54  ;;  %v1171_v9 = vadd.f32 %v1169_v15, %v1137_v3  ;;  %v1341_v5 = vmax.f32 %v1339_v2, 0.0  ;;  %v1431_v14 = vadd.f32 %v1427_v49, %v1417_v36 }
 0x1b3   :  { %v1447_v4 = vpop.permute.xlu1 %1446  ;;  %v1430_v43 = vadd.f32 %v1425_v44, %v1416_v33  ;;  %v1177_v32 = vadd.f32 %v1175_v38, %v1143_v22  ;;  %v1183_v6 = vadd.f32 %v1181_v59, %v1149_v42  ;;  %v1189_v51 = vadd.f32 %v1187_v8, %v1155_v45 }
 0x1b4   :  { %v1445_v19 = vpop.permute.xlu0 %1444  ;;  %v1340_v60 = vmax.f32 %v1338_v30, 0.0  ;;  %v6552_v62 = vstv %s4695_s10  ;;  %v6554_v56 = vstv %s6545_s7  ;;  %v1437_v12 = vadd.f32 %v4832_v20, %v1431_v14  ;;  %s6573_s10 = sld [smem:[#allocation51_spill]]  ;;  %s3268_s7 = sld [smem:[#allocation12 + $0x102]] }
 0x1b5   :  { %v1323_v23 = vmul.f32 %v6552_v62, %v1307_v54  ;;  %v1329_v55 = vmul.f32 %v6554_v56, %v1307_v54  ;;  %v1436_v39 = vadd.f32 %v4843_v7, %v1430_v43  ;;  %v1313_v0 = vadd.f32 %v1311_v11, %v1172_v50 }
 0x1b6   :  { %v1319_v31 = vadd.f32 %v1317_v24, %v1178_v52  ;;  %v6555_v27 = vmov %v6547_v25  ;;  %v6556_v26 = vmov %v6548_v63  ;;  %v6557_v44 = vstv %s6549_s28  ;;  %s3270_s28 = sld [smem:[#allocation12 + $0x104]] }
 0x1b7   :  { %v1310_v49 = vmul.f32 %v6555_v27, %v1306_v37  ;;  %v1316_v15 = vmul.f32 %v6556_v26, %v1306_v37  ;;  %v1461_v34 = vpop.permute.xlu1 %1460  ;;  %v1345_v3 = vmul.f32 %v6557_v44, %v1341_v5  ;;  %v1351_v61 = vmul.f32 %v1349_v28, %v1341_v5 }
 0x1b8   :  { %v1459_v1 = vpop.permute.xlu0 %1458  ;;  %v1451_v54 = vadd.f32 %v1447_v4, %v1437_v12  ;;  %v1450_v2 = vadd.f32 %v1445_v19, %v1436_v39  ;;  %v6558_v20 = vstv %s6551_s26  ;;  %v6559_v50 = vstv %s6553_s23  ;;  %s3273_s26 = sld [smem:[#allocation12 + $0x107]]  ;;  %s3274_s23 = sld [smem:[#allocation12 + $0x108]] }
 0x1b9   :  { %v1357_v7 = vmul.f32 %v6558_v20, %v1341_v5  ;;  %v1363_v52 = vmul.f32 %v6559_v50, %v1341_v5  ;;  %v6560_v58 = vmov %v6552_v62  ;;  %v6561_v22 = vmov %v6554_v56 }
 0x1ba   :  { %v1322_v41 = vmul.f32 %v6560_v58, %v1306_v37  ;;  %v1328_v42 = vmul.f32 %v6561_v22, %v1306_v37  ;;  %v1325_v45 = vadd.f32 %v1323_v23, %v1184_v16  ;;  %v1331_v57 = vadd.f32 %v1329_v55, %v1190_v35 }
 0x1bb   :  { %v1465_v30 = vadd.f32 %v1461_v34, %v1451_v54  ;;  %v1464_v47 = vadd.f32 %v1459_v1, %v1450_v2  ;;  %v1347_v38 = vadd.f32 %v1345_v3, %v1313_v0  ;;  %v1353_v18 = vadd.f32 %v1351_v61, %v1319_v31 }
 0x1bc   :  { %v1312_v59 = vadd.f32 %v1310_v49, %v1171_v9  ;;  %v1318_v36 = vadd.f32 %v1316_v15, %v1177_v32  ;;  %v1324_v35 = vadd.f32 %v1322_v41, %v1183_v6  ;;  %v1330_v8 = vadd.f32 %v1328_v42, %v1189_v51 }
 0x1bd   :  { %v1469_v33 = vmul.f32 %v1467_v46, %v1465_v30  ;;  %v1503_v4 = vmul.f32 %v1501_v17, %v1465_v30  ;;  %v1468_v48 = vmul.f32 %v1467_v46, %v1464_v47  ;;  %v1502_v16 = vmul.f32 %v1501_v17, %v1464_v47 }
 0x1be   :  { %v6562_v25 = vmov %v6557_v44  ;;  %v1350_v63 = vmul.f32 %v1349_v28, %v1340_v60  ;;  %v1359_v46 = vadd.f32 %v1357_v7, %v1325_v45  ;;  %v1365_v17 = vadd.f32 %v1363_v52, %v1331_v57 }
 0x1bf   :  { %v1344_v11 = vmul.f32 %v6562_v25, %v1340_v60  ;;  %v1473_v24 = vadd.f32 %v1471_v13, %v1469_v33  ;;  %v1507_v37 = vadd.f32 %v1505_v10, %v1503_v4  ;;  %v1472_v19 = vadd.f32 %v1471_v13, %v1468_v48  ;;  %v1551_v4 = vld [vmem:[%s6580_s15 + $0x8] sm:$0xff] }
 0x1c0   :  { %v1506_v9 = vadd.f32 %v1505_v10, %v1502_v16  ;;  %v6564_v5 = vmov %v6558_v20  ;;  %v6566_v43 = vmov %v6559_v50  ;;  %v1352_v6 = vadd.f32 %v1350_v63, %v1318_v36 }
 0x1c1   :  { %v1356_v14 = vmul.f32 %v6564_v5, %v1340_v60  ;;  %v1362_v28 = vmul.f32 %v6566_v43, %v1340_v60  ;;  %v1346_v32 = vadd.f32 %v1344_v11, %v1312_v59  ;;  %v1475_v51 = vmax.f32 %v1473_v24, 0.0 }
 0x1c2   :  { %v1509_v62 = vmax.f32 %v1507_v37, 0.0  ;;  %v1474_v56 = vmax.f32 %v1472_v19, 0.0  ;;  %v1508_v10 = vmax.f32 %v1506_v9, 0.0  ;;  %v6567_v39 = vstv %s6563_s29  ;;  %s3288_s29 = sld [smem:[#allocation12 + $0x181]] }
 0x1c3   :  { %v1358_v23 = vadd.f32 %v1356_v14, %v1324_v35  ;;  %v1364_v13 = vadd.f32 %v1362_v28, %v1330_v8  ;;  %v1479_v55 = vmul.f32 %v1477_v40, %v1475_v51  ;;  %v1485_v12 = vmul.f32 %v1483_v21, %v1475_v51 }
 0x1c4   :  { %v1491_v60 = vmul.f32 %v1489_v53, %v1475_v51  ;;  %v1497_v0 = vmul.f32 %v6567_v39, %v1475_v51  ;;  %v6568_v31 = vstv %s6565_s24  ;;  %v6569_v49 = vstv %s4816_s16  ;;  %s3289_s24 = sld [smem:[#allocation12 + $0x182]]  ;;  %s3330_s16 = sld [smem:[#allocation12 + $0x281]] }
 0x1c5   :  { %v1513_v27 = vmul.f32 %v6568_v31, %v1509_v62  ;;  %v1519_v26 = vmul.f32 %v6569_v49, %v1509_v62  ;;  %v6570_v15 = vstv %s4823_s25  ;;  %v6571_v1 = vstv %s4825_s8  ;;  %s3234_s25 = sld [smem:[#allocation12 + $0x7]]  ;;  %s3331_s8 = sld [smem:[#allocation12 + $0x282]] }
 0x1c6   :  { %v1525_v34 = vmul.f32 %v6570_v15, %v1509_v62  ;;  %v1531_v44 = vmul.f32 %v6571_v1, %v1509_v62  ;;  %v1481_v3 = vadd.f32 %v1479_v55, %v1347_v38  ;;  %v1487_v61 = vadd.f32 %v1485_v12, %v1353_v18 }
 0x1c7   :  { %v1493_v54 = vadd.f32 %v1491_v60, %v1359_v46  ;;  %v1499_v2 = vadd.f32 %v1497_v0, %v1365_v17  ;;  %v1478_v20 = vmul.f32 %v1477_v40, %v1474_v56  ;;  %v1484_v7 = vmul.f32 %v1483_v21, %v1474_v56  ;;  %v1550_v60 = vld [vmem:[%s6580_s15] sm:$0xff]  ;;  %s3312_s15 = sld [smem:[#allocation12 + $0x204]] }
 0x1c8   :  { %v1490_v50 = vmul.f32 %v1489_v53, %v1474_v56  ;;  %v6576_v52 = vmov %v6567_v39  ;;  %v1515_v41 = vadd.f32 %v1513_v27, %v1481_v3  ;;  %v1521_v22 = vadd.f32 %v1519_v26, %v1487_v61 }
 0x1c9   :  { %v1496_v58 = vmul.f32 %v6576_v52, %v1474_v56  ;;  %v1527_v42 = vadd.f32 %v1525_v34, %v1493_v54  ;;  %v1533_v45 = vadd.f32 %v1531_v44, %v1499_v2  ;;  %v1480_v57 = vadd.f32 %v1478_v20, %v1346_v32 }
 0x1ca   :  { %v1486_v30 = vadd.f32 %v1484_v7, %v1352_v6  ;;  %v1492_v47 = vadd.f32 %v1490_v50, %v1358_v23  ;;  %v6577_v18 = vstv %s6572_s0  ;;  %v6578_v59 = vstv %s6573_s10  ;;  %s3291_s0 = sld [smem:[#allocation12 + $0x184]]  ;;  %s3292_s10 = sld [smem:[#allocation12 + $0x185]] }
 0x1cb   :  { %v1498_v38 = vadd.f32 %v1496_v58, %v1364_v13  ;;  %v1537_v40 = vadd.f32 %v6577_v18, %v1515_v41  ;;  %v1541_v21 = vadd.f32 %v6578_v59, %v1521_v22  ;;  %v1545_v36 = vadd.f32 %v1543_v29, %v1527_v42 }
 0x1cc   :  { %v6579_v53 = vstv %s6575_s20  ;;  %v6581_v48 = vmov %v6568_v31  ;;  %v6582_v35 = vmov %v6569_v49  ;;  %v6583_v25 = vmov %v6570_v15  ;;  %s3295_s20 = sld [smem:[#allocation12 + $0x188]] }
 0x1cd   :  { %v1549_v33 = vadd.f32 %v6579_v53, %v1533_v45  ;;  %v1512_v16 = vmul.f32 %v6581_v48, %v1508_v10  ;;  %v1518_v8 = vmul.f32 %v6582_v35, %v1508_v10  ;;  %v1524_v11 = vmul.f32 %v6583_v25, %v1508_v10 }
 0x1ce   :  { %v6584_v63 = vmov %v6571_v1  ;;  %v1553_v37 = vmax.f32 %v1537_v40, 0.0  ;;  %v1560_v19 = vmax.f32 %v1541_v21, 0.0  ;;  %v1566_v9 = vmax.f32 %v1545_v36, 0.0 }
 0x1cf   :  { %v1530_v24 = vmul.f32 %v6584_v63, %v1508_v10  ;;  %v1572_v46 = vmax.f32 %v1549_v33, 0.0  ;;  %v1514_v17 = vadd.f32 %v1512_v16, %v1480_v57  ;;  %v1520_v5 = vadd.f32 %v1518_v8, %v1486_v30 }
 0x1d0   :  { %v1526_v14 = vadd.f32 %v1524_v11, %v1492_v47  ;;  %v1555_v28 = vmul.f32 %v1553_v37, %v1551_v4  ;;  %v1562_v32 = vmul.f32 %v1560_v19, %v1551_v4  ;;  %v1568_v6 = vmul.f32 %v1566_v9, %v1551_v4 }
 0x1d1   :  { %v1532_v43 = vadd.f32 %v1530_v24, %v1498_v38  ;;  %v1574_v51 = vmul.f32 %v1572_v46, %v1551_v4  ;;  %v6585_v62 = vmov %v6577_v18  ;;  %v6586_v13 = vmov %v6578_v59 }
 0x1d2   :  { %v1536_v23 = vadd.f32 %v6585_v62, %v1514_v17  ;;  %v1540_v56 = vadd.f32 %v6586_v13, %v1520_v5  ;;  %v1544_v55 = vadd.f32 %v1543_v29, %v1526_v14  ;;  %v6587_v10 = vmov %v6579_v53  ;;  %1558 = vst.msk [vmem:[#allocation2 + $0x9] sm:$0xff] %vm1556_vm1, %v1555_v28  ;;  %1564 = vst.msk [vmem:[#allocation2 + $0x21] sm:$0xff] %vm1556_vm1, %v1562_v32 }
 0x1d3   :  { %v1548_v12 = vadd.f32 %v6587_v10, %v1532_v43  ;;  %1570 = vst.msk [vmem:[#allocation2 + $0x39] sm:$0xff] %vm1556_vm1, %v1568_v6  ;;  %1576 = vst.msk [vmem:[#allocation2 + $0x51] sm:$0xff] %vm1556_vm1, %v1574_v51  ;;  %v1588_v34 = vstv %s3228_s5  ;;  %v1602_v54 = vstv %s3229_s9  ;;  %v1622_v50 = vstv %s3231_s1  ;;  %s3313_s5 = sld [smem:[#allocation12 + $0x205]]  ;;  %s1583_s9 = sld [smem:[#allocation12]] }
 0x1d4   :  { %v1552_v39 = vmax.f32 %v1536_v23, 0.0  ;;  %v1559_v0 = vmax.f32 %v1540_v56, 0.0  ;;  %v1565_v31 = vmax.f32 %v1544_v55, 0.0  ;;  %v1636_v22 = vstv %s3232_s4  ;;  %s3351_s1 = sld [smem:[#allocation12 + $0x301]]  ;;  %s5236_s4 = sld [smem:[#allocation12 + $0x3]] }
 0x1d5   :  { %v1571_v27 = vmax.f32 %v1548_v12, 0.0  ;;  %v1656_v30 = vstv %s3234_s25  ;;  %v1670_v40 = vstv %s3235_s21  ;;  %v1748_v36 = vstv %s3246_s6  ;;  %s5238_s25 = sld [smem:[#allocation12 + $0x284]]  ;;  %s5250_s21 = sld [smem:[#allocation12 + $0x302]] }
 0x1d6   :  { %v1554_v29 = vmul.f32 %v1552_v39, %v1550_v60  ;;  %v1561_v49 = vmul.f32 %v1559_v0, %v1550_v60  ;;  %v1567_v26 = vmul.f32 %v1565_v31, %v1550_v60  ;;  %v1762_v4 = vstv %s3247_s3  ;;  %s5255_s6 = sld [smem:[#allocation12 + $0x6]]  ;;  %s5260_s3 = sld [smem:[#allocation12 + $0x207]] }
 0x1d7   :  { %v1573_v15 = vmul.f32 %v1571_v27, %v1550_v60  ;;  %v1782_v35 = vstv %s3249_s19  ;;  %v1796_v11 = vstv %s3250_s12  ;;  %v1816_v37 = vstv %s3252_s22  ;;  %s5266_s19 = sld [smem:[#allocation12 + $0x285]]  ;;  %s5268_s12 = sld [smem:[#allocation12 + $0x80]] }
 0x1d8   :  { %1557 = vst.msk [vmem:[#allocation2 + $0x1] sm:$0xff] %vm1556_vm1, %v1554_v29  ;;  %1563 = vst.msk [vmem:[#allocation2 + $0x19] sm:$0xff] %vm1556_vm1, %v1561_v49  ;;  %v1830_v46 = vstv %s3253_s30  ;;  %v1922_v43 = vstv %s3267_s17  ;;  %v1936_v51 = vstv %s3268_s7  ;;  %v1956_v56 = vstv %s3270_s28  ;;  %s5270_s22 = sld [smem:[#allocation12 + $0x381]]  ;;  %s5272_s30 = sld [smem:[#allocation12 + $0x208]] }
 0x1d9   :  { %1569 = vst.msk [vmem:[#allocation2 + $0x31] sm:$0xff] %vm1556_vm1, %v1567_v26  ;;  %1575 = vst.msk [vmem:[#allocation2 + $0x49] sm:$0xff] %vm1556_vm1, %v1573_v15  ;;  %v5112_v7 = vld [vmem:[#allocation2 + $0x9] sm:$0xff]  ;;  %v5172_v13 = vld [vmem:[#allocation2 + $0x21] sm:$0xff]  ;;  %v1970_v60 = vstv %s3271_s11  ;;  %v1990_v27 = vstv %s3273_s26  ;;  %v2004_v15 = vstv %s3274_s23  ;;  %s5276_s17 = sld [smem:[#allocation12 + $0x83]]  ;;  %s5278_s7 = sld [smem:[#allocation12 + $0x304]] }
 0x1da   :  { %v1624_v58 = vmul.f32 %v1622_v50, %v5112_v7  ;;  %v1638_v42 = vmul.f32 %v1636_v22, %v5112_v7  ;;  %v5124_v57 = vld [vmem:[#allocation2 + $0xa] sm:$0xff]  ;;  %v1784_v8 = vmul.f32 %v1782_v35, %v5112_v7  ;;  %v1798_v63 = vmul.f32 %v1796_v11, %v5112_v7  ;;  %v5184_v31 = vld [vmem:[#allocation2 + $0x22] sm:$0xff]  ;;  %s5281_s28 = sld [smem:[#allocation12 + $0x382]]  ;;  %s5283_s11 = sld [smem:[#allocation12 + $0x86]] }
 0x1db   :  { %v1658_v38 = vmul.f32 %v1656_v30, %v5124_v57  ;;  %v1672_v59 = vmul.f32 %v1670_v40, %v5124_v57  ;;  %v1818_v19 = vmul.f32 %v1816_v37, %v5124_v57  ;;  %v1832_v17 = vmul.f32 %v1830_v46, %v5124_v57  ;;  %s5288_s26 = sld [smem:[#allocation12 + $0x287]]  ;;  %s5290_s23 = sld [smem:[#allocation12 + $0x305]] }
 0x1dc   :  { %v1958_v10 = vmul.f32 %v1956_v56, %v5172_v13  ;;  %v1972_v39 = vmul.f32 %v1970_v60, %v5172_v13  ;;  %v1992_v49 = vmul.f32 %v1990_v27, %v5184_v31 }
 0x1df   :  { %v5102_v1 = vld [vmem:[#allocation2 + $0x8] sm:$0xff]  ;;  %v5104_v44 = vld [vmem:[#allocation2] sm:$0xff]  ;;  %v5162_v28 = vld [vmem:[#allocation2 + $0x18] sm:$0xff] }
 0x1e0   :  { %v1590_v3 = vmul.f32 %v1588_v34, %v5102_v1  ;;  %v1589_v61 = vmul.f32 %v1588_v34, %v5104_v44  ;;  %v1604_v2 = vmul.f32 %v1602_v54, %v5102_v1  ;;  %v1603_v20 = vmul.f32 %v1602_v54, %v5104_v44  ;;  %v5114_v52 = vld [vmem:[#allocation2 + $0x1] sm:$0xff]  ;;  %v5174_v55 = vld [vmem:[#allocation2 + $0x19] sm:$0xff] }
 0x1e1   :  { %v1623_v41 = vmul.f32 %v1622_v50, %v5114_v52  ;;  %v1637_v45 = vmul.f32 %v1636_v22, %v5114_v52  ;;  %v5126_v47 = vld [vmem:[#allocation2 + $0x2] sm:$0xff]  ;;  %v1750_v53 = vmul.f32 %v1748_v36, %v5102_v1  ;;  %v1749_v33 = vmul.f32 %v1748_v36, %v5104_v44  ;;  %v5186_v29 = vld [vmem:[#allocation2 + $0x1a] sm:$0xff] }
 0x1e2   :  { %1595 = vrot.lane.b32.xlu1 %v1590_v3, %s6588_s13  ;;  %1593 = vrot.lane.b32.xlu0 %v1589_v61, %s6588_s13  ;;  %v1657_v18 = vmul.f32 %v1656_v30, %v5126_v47  ;;  %v1671_v21 = vmul.f32 %v1670_v40, %v5126_v47  ;;  %v1764_v48 = vmul.f32 %v1762_v4, %v5102_v1  ;;  %v5160_v14 = vld [vmem:[#allocation2 + $0x20] sm:$0xff]  ;;  %v2090_v61 = vstv %s3288_s29  ;;  %s5292_s29 = sld [smem:[#allocation12 + $0x100]] }
 0x1e3   :  { %v1763_v16 = vmul.f32 %v1762_v4, %v5104_v44  ;;  %v1783_v25 = vmul.f32 %v1782_v35, %v5114_v52  ;;  %v1797_v24 = vmul.f32 %v1796_v11, %v5114_v52  ;;  %v1817_v9 = vmul.f32 %v1816_v37, %v5126_v47  ;;  %v5226_v37 = vld [vmem:[#allocation2 + $0x31] sm:$0xff] }
 0x1e4   :  { %v1831_v5 = vmul.f32 %v1830_v46, %v5126_v47  ;;  %v1924_v32 = vmul.f32 %v1922_v43, %v5160_v14  ;;  %v1923_v6 = vmul.f32 %v1922_v43, %v5162_v28  ;;  %v1938_v62 = vmul.f32 %v1936_v51, %v5160_v14 }
 0x1e5   :  { %v1937_v23 = vmul.f32 %v1936_v51, %v5162_v28  ;;  %v1957_v12 = vmul.f32 %v1956_v56, %v5174_v55  ;;  %v1971_v0 = vmul.f32 %v1970_v60, %v5174_v55  ;;  %v1991_v26 = vmul.f32 %v1990_v27, %v5186_v29 }
 0x1e6   :  { %1609 = vrot.lane.b32.xlu1 %v1604_v2, %s6589_s27  ;;  %1607 = vrot.lane.b32.xlu0 %v1603_v20, %s6589_s27  ;;  %v2006_v34 = vmul.f32 %v2004_v15, %v5184_v31  ;;  %v2005_v3 = vmul.f32 %v2004_v15, %v5186_v29  ;;  %v2092_v54 = vmul.f32 %v2090_v61, %v5160_v14  ;;  %v2104_v20 = vstv %s3289_s24  ;;  %s5294_s24 = sld [smem:[#allocation12 + $0x288]] }
 0x1e7   :  { %v2091_v2 = vmul.f32 %v2090_v61, %v5162_v28  ;;  %v2106_v50 = vmul.f32 %v2104_v20, %v5160_v14  ;;  %v2264_v4 = vstv %s3309_s18  ;;  %v2432_v46 = vstv %s3330_s16  ;;  %s5315_s18 = sld [smem:[#allocation14]] }
 0x1e8   :  { %v2446_v43 = vstv %s3331_s8  ;;  %v2312_v51 = vstv %s3313_s5  ;;  %v2606_v27 = vstv %s3351_s1  ;;  %s5321_s16 = sld [smem:[#allocation17]]  ;;  %s5331_s1 = sld [smem:[#allocation14 + $0x1]] }
 0x1e9   :  { %s5325_s8 = sld [smem:[#allocation17 + $0x80]] }
 0x1ea   :  { %1629 = vrot.lane.b32.xlu1 %v1624_v58, %s6588_s13  ;;  %1627 = vrot.lane.b32.xlu0 %v1623_v41, %s6588_s13  ;;  %v2105_v58 = vmul.f32 %v2104_v20, %v5162_v28  ;;  %v2124_v41 = vstv %s3291_s0  ;;  %v2466_v20 = vstv %s5238_s25  ;;  %s5299_s0 = sld [smem:[#allocation12 + $0x384]]  ;;  %s5327_s5 = sld [smem:[#allocation17 + $0x100]] }
 0x1eb   :  { %v2126_v22 = vmul.f32 %v2124_v41, %v5172_v13  ;;  %s5339_s25 = sld [smem:[#allocation17 + $0x1]] }
 0x1ee   :  { %1643 = vrot.lane.b32.xlu1 %v1638_v42, %s6589_s27  ;;  %1641 = vrot.lane.b32.xlu0 %v1637_v45, %s6589_s27  ;;  %v2125_v42 = vmul.f32 %v2124_v41, %v5174_v55  ;;  %v2138_v45 = vstv %s3292_s10  ;;  %s5301_s10 = sld [smem:[#allocation12 + $0x103]] }
 0x1ef   :  { %v2140_v30 = vmul.f32 %v2138_v45, %v5172_v13 }
 0x1f2   :  { %1663 = vrot.lane.b32.xlu1 %v1658_v38, %s6588_s13  ;;  %1661 = vrot.lane.b32.xlu0 %v1657_v18, %s6588_s13  ;;  %v2139_v38 = vmul.f32 %v2138_v45, %v5174_v55  ;;  %v2158_v18 = vstv %s3294_s2  ;;  %s5309_s2 = sld [smem:[#allocation12 + $0x307]] }
 0x1f3   :  { %v2160_v40 = vmul.f32 %v2158_v18, %v5184_v31 }
 0x1f6   :  { %1677 = vrot.lane.b32.xlu1 %v1672_v59, %s6589_s27  ;;  %1675 = vrot.lane.b32.xlu0 %v1671_v21, %s6589_s27  ;;  %v2159_v59 = vmul.f32 %v2158_v18, %v5186_v29  ;;  %v2172_v21 = vstv %s3295_s20  ;;  %s5311_s20 = sld [smem:[#allocation12 + $0x385]] }
 0x1f7   :  { %v2174_v36 = vmul.f32 %v2172_v21, %v5184_v31 }
 0x1fa   :  { %1755 = vrot.lane.b32.xlu1 %v1750_v53, %s6588_s13  ;;  %1753 = vrot.lane.b32.xlu0 %v1749_v33, %s6588_s13  ;;  %v2173_v53 = vmul.f32 %v2172_v21, %v5186_v29  ;;  %v2254_v33 = vld [vmem:[#allocation2 + $0x38] sm:$0xff]  ;;  %v1650_v21 = vstv %s5255_s6  ;;  %s5345_s6 = sld [smem:[#allocation17 + $0x101]] }
 0x1fe   :  { %1769 = vrot.lane.b32.xlu1 %v1764_v48, %s6589_s27  ;;  %1767 = vrot.lane.b32.xlu0 %v1763_v16, %s6589_s27  ;;  %v2253_v48 = vld [vmem:[#allocation2 + $0x30] sm:$0xff]  ;;  %v2266_v16 = vmul.f32 %v2264_v4, %v2254_v33 }
 0x1ff   :  { %v2265_v35 = vmul.f32 %v2264_v4, %v2253_v48 }
 0x202   :  { %1789 = vrot.lane.b32.xlu1 %v1784_v8, %s6588_s13  ;;  %1787 = vrot.lane.b32.xlu0 %v1783_v25, %s6588_s13  ;;  %v2278_v8 = vstv %s3310_s14  ;;  %s5317_s14 = sld [smem:[#allocation12 + $0x106]] }
 0x203   :  { %v2280_v25 = vmul.f32 %v2278_v8, %v2254_v33  ;;  %v2279_v11 = vmul.f32 %v2278_v8, %v2253_v48 }
 0x206   :  { %1803 = vrot.lane.b32.xlu1 %v1798_v63, %s6589_s27  ;;  %1801 = vrot.lane.b32.xlu0 %v1797_v24, %s6589_s27  ;;  %v5224_v63 = vld [vmem:[#allocation2 + $0x39] sm:$0xff]  ;;  %v2298_v24 = vstv %s3312_s15  ;;  %s5319_s15 = sld [smem:[#allocation15]] }
 0x207   :  { %v2468_v18 = vmul.f32 %v2466_v20, %v5224_v63 }
 0x20a   :  { %1823 = vrot.lane.b32.xlu1 %v1818_v19, %s6588_s13  ;;  %1821 = vrot.lane.b32.xlu0 %v1817_v9, %s6588_s13  ;;  %v2300_v19 = vmul.f32 %v2298_v24, %v5224_v63  ;;  %v2299_v9 = vmul.f32 %v2298_v24, %v5226_v37  ;;  %v1651_v24 = vmul.f32 %v1650_v21, %v5126_v47 }
 0x20e   :  { %1837 = vrot.lane.b32.xlu1 %v1832_v17, %s6589_s27  ;;  %1835 = vrot.lane.b32.xlu0 %v1831_v5, %s6589_s27  ;;  %v2434_v17 = vmul.f32 %v2432_v46, %v2254_v33  ;;  %v2433_v5 = vmul.f32 %v2432_v46, %v2253_v48 }
 0x212   :  { %1929 = vrot.lane.b32.xlu1 %v1924_v32, %s6588_s13  ;;  %1927 = vrot.lane.b32.xlu0 %v1923_v6, %s6588_s13  ;;  %v2448_v32 = vmul.f32 %v2446_v43, %v2254_v33  ;;  %v2447_v6 = vmul.f32 %v2446_v43, %v2253_v48 }
 0x216   :  { %1943 = vrot.lane.b32.xlu1 %v1938_v62, %s6589_s27  ;;  %1941 = vrot.lane.b32.xlu0 %v1937_v23, %s6589_s27  ;;  %v1584_v62 = vstv %s1583_s9  ;;  %s5329_s9 = sld [smem:[#allocation17 + $0x180]] }
 0x217   :  { %v1586_v60 = vmul.f32 %v1584_v62, %v5102_v1 }
 0x21a   :  { %1963 = vrot.lane.b32.xlu1 %v1958_v10, %s6588_s13  ;;  %1961 = vrot.lane.b32.xlu0 %v1957_v12, %s6588_s13  ;;  %v2314_v10 = vmul.f32 %v2312_v51, %v5224_v63  ;;  %v2313_v12 = vmul.f32 %v2312_v51, %v5226_v37 }
 0x21e   :  { %1977 = vrot.lane.b32.xlu1 %v1972_v39, %s6589_s27  ;;  %1975 = vrot.lane.b32.xlu0 %v1971_v0, %s6589_s27  ;;  %v1585_v39 = vmul.f32 %v1584_v62, %v5104_v44  ;;  %v5246_v0 = vld [vmem:[#allocation2 + $0x50] sm:$0xff] }
 0x222   :  { %1997 = vrot.lane.b32.xlu1 %v1992_v49, %s6588_s13  ;;  %1995 = vrot.lane.b32.xlu0 %v1991_v26, %s6588_s13  ;;  %v5248_v49 = vld [vmem:[#allocation2 + $0x48] sm:$0xff]  ;;  %v1616_v26 = vstv %s5236_s4  ;;  %s5337_s4 = sld [smem:[#allocation15 + $0x1]] }
 0x223   :  { %v1618_v41 = vmul.f32 %v1616_v26, %v5112_v7 }
 0x226   :  { %2011 = vrot.lane.b32.xlu1 %v2006_v34, %s6589_s27  ;;  %2009 = vrot.lane.b32.xlu0 %v2005_v3, %s6589_s27 }
 0x22a   :  { %2097 = vrot.lane.b32.xlu1 %v2092_v54, %s6588_s13  ;;  %2095 = vrot.lane.b32.xlu0 %v2091_v2, %s6588_s13  ;;  %v2608_v54 = vmul.f32 %v2606_v27, %v5246_v0  ;;  %v2607_v2 = vmul.f32 %v2606_v27, %v5248_v49  ;;  %v2788_v27 = vstv %s5281_s28  ;;  %s5426_s28 = sld [smem:[#allocation14 + $0x3]] }
 0x22e   :  { %2111 = vrot.lane.b32.xlu1 %v2106_v50, %s6589_s27  ;;  %2109 = vrot.lane.b32.xlu0 %v2105_v58, %s6589_s27 }
 0x232   :  { %2131 = vrot.lane.b32.xlu1 %v2126_v22, %s6588_s13  ;;  %2129 = vrot.lane.b32.xlu0 %v2125_v42, %s6588_s13  ;;  %v1617_v22 = vmul.f32 %v1616_v26, %v5114_v52  ;;  %v1810_v26 = vstv %s5283_s11  ;;  %s5434_s11 = sld [smem:[#allocation15 + $0x3]] }
 0x236   :  { %2145 = vrot.lane.b32.xlu1 %v2140_v30, %s6589_s27  ;;  %2143 = vrot.lane.b32.xlu0 %v2139_v38, %s6589_s27 }
 0x23a   :  { %2165 = vrot.lane.b32.xlu1 %v2160_v40, %s6588_s13  ;;  %2163 = vrot.lane.b32.xlu0 %v2159_v59, %s6588_s13  ;;  %v2467_v40 = vmul.f32 %v2466_v20, %v5226_v37  ;;  %v2620_v59 = vstv %s5250_s21  ;;  %s5343_s21 = sld [smem:[#allocation17 + $0x81]] }
 0x23b   :  { %v2622_v48 = vmul.f32 %v2620_v59, %v5246_v0 }
 0x23e   :  { %2179 = vrot.lane.b32.xlu1 %v2174_v36, %s6589_s27  ;;  %2177 = vrot.lane.b32.xlu0 %v2173_v53, %s6589_s27 }
 0x242   :  { %2271 = vrot.lane.b32.xlu1 %v2266_v16, %s6588_s13  ;;  %2269 = vrot.lane.b32.xlu0 %v2265_v35, %s6588_s13  ;;  %v2621_v16 = vmul.f32 %v2620_v59, %v5248_v49  ;;  %v2332_v35 = vstv %s5260_s3  ;;  %s5351_s3 = sld [smem:[#allocation17 + $0x181]] }
 0x246   :  { %2285 = vrot.lane.b32.xlu1 %v2280_v25, %s6589_s27  ;;  %2283 = vrot.lane.b32.xlu0 %v2279_v11, %s6589_s27  ;;  %v1652_v11 = vmul.f32 %v1650_v21, %v5124_v57 }
 0x24a   :  { %2305 = vrot.lane.b32.xlu1 %v2300_v19, %s6588_s13  ;;  %2303 = vrot.lane.b32.xlu0 %v2299_v9, %s6588_s13  ;;  %v5305_v19 = vld [vmem:[#allocation2 + $0x3a] sm:$0xff]  ;;  %v5307_v9 = vld [vmem:[#allocation2 + $0x32] sm:$0xff] }
 0x24e   :  { %2439 = vrot.lane.b32.xlu1 %v2434_v17, %s6588_s13  ;;  %2437 = vrot.lane.b32.xlu0 %v2433_v5, %s6588_s13 }
 0x252   :  { %2453 = vrot.lane.b32.xlu1 %v2448_v32, %s6589_s27  ;;  %2451 = vrot.lane.b32.xlu0 %v2447_v6, %s6589_s27  ;;  %v2334_v32 = vmul.f32 %v2332_v35, %v5305_v19  ;;  %v2333_v6 = vmul.f32 %v2332_v35, %v5307_v9  ;;  %v1710_v35 = vstv %s5331_s1  ;;  %s5678_s1 = sld [smem:[#allocation17 + $0x84]] }
 0x254   :  { %v1596_v23 = vpop.permute.xlu1 %1595  ;;  %v1594_v56 = vpop.permute.xlu0 %1593 }
 0x255   :  { %v1600_v15 = vadd.f32 %v1596_v23, %v1586_v60  ;;  %v1599_v34 = vadd.f32 %v1594_v56, %v1585_v39  ;;  %v2480_v23 = vstv %s5266_s19  ;;  %v1744_v56 = vstv %s5268_s12  ;;  %s5393_s19 = sld [smem:[#allocation14 + $0x2]] }
 0x256   :  { %2319 = vrot.lane.b32.xlu1 %v2314_v10, %s6589_s27  ;;  %2317 = vrot.lane.b32.xlu0 %v2313_v12, %s6589_s27  ;;  %v2774_v10 = vstv %s5270_s22  ;;  %v2346_v12 = vstv %s5272_s30  ;;  %s5399_s12 = sld [smem:[#allocation15 + $0x2]] }
 0x257   :  { %v1776_v60 = vstv %s5276_s17  ;;  %v2640_v39 = vstv %s5278_s7  ;;  %v2776_v21 = vmul.f32 %v2774_v10, %v5246_v0  ;;  %s5401_s22 = sld [smem:[#allocation17 + $0x2]] }
 0x258   :  { %v1610_v3 = vpop.permute.xlu1 %1609  ;;  %v1608_v61 = vpop.permute.xlu0 %1607  ;;  %s5414_s30 = sld [smem:[#allocation17 + $0x82]] }
 0x259   :  { %v1614_v50 = vadd.f32 %v1610_v3, %v1600_v15  ;;  %v1613_v58 = vadd.f32 %v1608_v61, %v1599_v34  ;;  %v2482_v3 = vmul.f32 %v2480_v23, %v5224_v63  ;;  %v2481_v61 = vmul.f32 %v2480_v23, %v5226_v37  ;;  %s5416_s17 = sld [smem:[#allocation17 + $0x102]] }
 0x25a   :  { %2613 = vrot.lane.b32.xlu1 %v2608_v54, %s6588_s13  ;;  %2611 = vrot.lane.b32.xlu0 %v2607_v2, %s6588_s13  ;;  %v2500_v54 = vstv %s5288_s26  ;;  %v2654_v2 = vstv %s5290_s23  ;;  %v1777_v23 = vmul.f32 %v1776_v60, %v5114_v52  ;;  %s5424_s7 = sld [smem:[#allocation17 + $0x182]]  ;;  %s5436_s26 = sld [smem:[#allocation17 + $0x3]] }
 0x25b   :  { %v1620_v42 = vadd.f32 %v1618_v41, %v1614_v50  ;;  %v1619_v45 = vadd.f32 %v1617_v22, %v1613_v58  ;;  %v1918_v58 = vstv %s5292_s29  ;;  %v2514_v41 = vstv %s5294_s24  ;;  %s5460_s23 = sld [smem:[#allocation17 + $0x83]] }
 0x25c   :  { %v1630_v30 = vpop.permute.xlu1 %1629  ;;  %v1628_v38 = vpop.permute.xlu0 %1627  ;;  %v2808_v22 = vstv %s5299_s0  ;;  %v1950_v63 = vstv %s5301_s10  ;;  %v1684_v37 = vstv %s5315_s18  ;;  %v5412_v52 = vmul.f32 %v2500_v54, %v5305_v19  ;;  %s5462_s29 = sld [smem:[#allocation17 + $0x103]]  ;;  %s5583_s0 = sld [smem:[#allocation12 + $0x308]] }
 0x25d   :  { %v1634_v36 = vadd.f32 %v1630_v30, %v1620_v42  ;;  %v1633_v53 = vadd.f32 %v1628_v38, %v1619_v45  ;;  %v2674_v42 = vstv %s5309_s2  ;;  %v6457_v45 = vstv %s5311_s20  ;;  %s5481_s24 = sld [smem:[#allocation17 + $0x183]]  ;;  %s5605_s10 = sld [smem:[#allocation12 + $0x387]] }
 0x25e   :  { %2473 = vrot.lane.b32.xlu1 %v2468_v18, %s6588_s13  ;;  %2471 = vrot.lane.b32.xlu0 %v2467_v40, %s6588_s13  ;;  %v1746_v38 = vmul.f32 %v1744_v56, %v5102_v1  ;;  %v1745_v40 = vmul.f32 %v1744_v56, %v5104_v44  ;;  %v5381_v44 = vld [vmem:[#allocation2 + $0x51] sm:$0xff]  ;;  %s5627_s2 = sld [smem:[#allocation12 + $0x180]] }
 0x25f   :  { %v2642_v56 = vmul.f32 %v2640_v39, %v5381_v44  ;;  %s5637_s18 = sld [smem:[#allocation12 + $0x388]] }
 0x260   :  { %v1644_v33 = vpop.permute.xlu1 %1643  ;;  %v1642_v4 = vpop.permute.xlu0 %1641 }
 0x261   :  { %v1648_v8 = vadd.f32 %v1644_v33, %v1634_v36  ;;  %v1647_v25 = vadd.f32 %v1642_v4, %v1633_v53  ;;  %v2775_v36 = vmul.f32 %v2774_v10, %v5248_v49  ;;  %v1688_v53 = vstv %s5319_s15  ;;  %s5645_s15 = sld [smem:[#allocation12 + $0x183]] }
 0x262   :  { %2627 = vrot.lane.b32.xlu1 %v2622_v48, %s6589_s27  ;;  %2625 = vrot.lane.b32.xlu0 %v2621_v16, %s6589_s27  ;;  %v1694_v33 = vstv %s5321_s16  ;;  %v1698_v4 = vstv %s5325_s8  ;;  %s5657_s16 = sld [smem:[#allocation14 + $0x4]] }
 0x263   :  { %v1654_v46 = vadd.f32 %v1652_v11, %v1648_v8  ;;  %v1653_v17 = vadd.f32 %v1651_v24, %v1647_v25  ;;  %v1702_v48 = vstv %s5327_s5  ;;  %v1706_v16 = vstv %s5329_s9  ;;  %v5383_v25 = vld [vmem:[#allocation2 + $0x49] sm:$0xff]  ;;  %s5662_s8 = sld [smem:[#allocation15 + $0x4]]  ;;  %s5670_s9 = sld [smem:[#allocation15 + $0x5]] }
 0x264   :  { %v1664_v5 = vpop.permute.xlu1 %1663  ;;  %v1662_v43 = vpop.permute.xlu0 %1661  ;;  %v1714_v11 = vstv %s5337_s4  ;;  %v1720_v24 = vstv %s5339_s25  ;;  %v2641_v10 = vmul.f32 %v2640_v39, %v5383_v25  ;;  %s5668_s5 = sld [smem:[#allocation17 + $0x4]] }
 0x265   :  { %v1668_v51 = vadd.f32 %v1664_v5, %v1654_v46  ;;  %v1667_v62 = vadd.f32 %v1662_v43, %v1653_v17  ;;  %v1726_v46 = vstv %s5343_s21  ;;  %v1732_v17 = vstv %s5345_s6  ;;  %s5680_s4 = sld [smem:[#allocation17 + $0x104]]  ;;  %s5688_s21 = sld [smem:[#allocation17 + $0x85]] }
 0x266   :  { %2339 = vrot.lane.b32.xlu1 %v2334_v32, %s6588_s13  ;;  %2337 = vrot.lane.b32.xlu0 %v2333_v6, %s6588_s13  ;;  %v1738_v5 = vstv %s5351_s3  ;;  %v2348_v6 = vmul.f32 %v2346_v12, %v5305_v19  ;;  %s5683_s25 = sld [smem:[#allocation17 + $0x184]]  ;;  %s5692_s6 = sld [smem:[#allocation17 + $0x105]] }
 0x267   :  { %s5694_s3 = sld [smem:[#allocation17 + $0x185]] }
 0x268   :  { %v1678_v15 = vpop.permute.xlu1 %1677  ;;  %v1676_v34 = vpop.permute.xlu0 %1675 }
 0x269   :  { %v1682_v20 = vadd.f32 %v1678_v15, %v1668_v51  ;;  %v5357_v50 = vadd.f32 %v1676_v34, %v1667_v62  ;;  %v2347_v51 = vmul.f32 %v2346_v12, %v5307_v9  ;;  %v1778_v62 = vmul.f32 %v1776_v60, %v5112_v7 }
 0x26a   :  { %2487 = vrot.lane.b32.xlu1 %v2482_v3, %s6589_s27  ;;  %2485 = vrot.lane.b32.xlu0 %v2481_v61, %s6589_s27  ;;  %v2790_v15 = vmul.f32 %v2788_v27, %v5246_v0  ;;  %v2789_v12 = vmul.f32 %v2788_v27, %v5248_v49  ;;  %v5406_v7 = vmul.f32 %v1810_v26, %v5124_v57 }
 0x26b   :  { %v5409_v34 = vmul.f32 %v1810_v26, %v5126_v47  ;;  %v1686_v0 = vmul.f32 %v1684_v37, %v1682_v20  ;;  %v5422_v57 = vmul.f32 %v2500_v54, %v5307_v9  ;;  %v5429_v47 = vmul.f32 %v2654_v2, %v5381_v44  ;;  %v5453_v54 = vld [vmem:[#allocation2 + $0x52] sm:$0xff] }
 0x26c   :  { %v1756_v18 = vpop.permute.xlu1 %1755  ;;  %v1754_v59 = vpop.permute.xlu0 %1753  ;;  %v5432_v49 = vmul.f32 %v2654_v2, %v5383_v25  ;;  %v1712_v60 = vmul.f32 %v1710_v35, %v1682_v20  ;;  %v5441_v26 = vmul.f32 %v1918_v58, %v5160_v14  ;;  %v5446_v3 = vmul.f32 %v1918_v58, %v5162_v28  ;;  %v5455_v2 = vld [vmem:[#allocation2 + $0x4a] sm:$0xff] }
 0x26d   :  { %v1760_v1 = vadd.f32 %v1756_v18, %v1746_v38  ;;  %v1759_v8 = vadd.f32 %v1754_v59, %v1745_v40  ;;  %v5451_v61 = vmul.f32 %v2514_v41, %v5305_v19  ;;  %v1685_v20 = vmul.f32 %v1684_v37, %v5357_v50 }
 0x26e   :  { %2781 = vrot.lane.b32.xlu1 %v2776_v21, %s6588_s13  ;;  %2779 = vrot.lane.b32.xlu0 %v2775_v36, %s6588_s13  ;;  %v5467_v58 = vmul.f32 %v2514_v41, %v5307_v9  ;;  %v5472_v19 = vmul.f32 %v2808_v22, %v5381_v44  ;;  %v5477_v38 = vmul.f32 %v2808_v22, %v5383_v25 }
 0x26f   :  { %v1711_v37 = vmul.f32 %v1710_v35, %v5357_v50  ;;  %v5486_v9 = vmul.f32 %v1950_v63, %v5172_v13  ;;  %v1690_v41 = vadd.f32 %v1688_v53, %v1686_v0  ;;  %v5494_v50 = vmul.f32 %v1950_v63, %v5174_v55 }
 0x270   :  { %v1770_v43 = vpop.permute.xlu1 %1769  ;;  %v1768_v32 = vpop.permute.xlu0 %1767  ;;  %v5499_v22 = vmul.f32 %v2674_v42, %v5453_v54  ;;  %v5504_v59 = vmul.f32 %v2674_v42, %v5455_v2  ;;  %v1716_v21 = vadd.f32 %v1714_v11, %v1712_v60  ;;  %v5511_v63 = vmul.f32 %v6457_v45, %v5381_v44 }
 0x271   :  { %v1774_v18 = vadd.f32 %v1770_v43, %v1760_v1  ;;  %v1773_v40 = vadd.f32 %v1768_v32, %v1759_v8  ;;  %v1689_v43 = vadd.f32 %v1688_v53, %v1685_v20  ;;  %v1844_v32 = vstv %s5393_s19  ;;  %s5810_s19 = sld [smem:[#allocation17 + $0x87]] }
 0x272   :  { %2353 = vrot.lane.b32.xlu1 %v2348_v6, %s6589_s27  ;;  %2351 = vrot.lane.b32.xlu0 %v2347_v51, %s6589_s27  ;;  %v1848_v6 = vstv %s5399_s12  ;;  %v1854_v51 = vstv %s5401_s22  ;;  %v1715_v42 = vadd.f32 %v1714_v11, %v1711_v37  ;;  %v1718_v20 = vmax.f32 %v1716_v21, 0.0  ;;  %s6601_s12 = sld [smem:[#allocation54_spill]]  ;;  %s5844_s22 = sld [smem:[#allocation12 + $0x206]] }
 0x273   :  { %v1780_v36 = vadd.f32 %v1778_v62, %v1774_v18  ;;  %v1779_v35 = vadd.f32 %v1777_v23, %v1773_v40  ;;  %v1860_v23 = vstv %s5414_s30  ;;  %v1866_v0 = vstv %s5416_s17  ;;  %s5729_s17 = sld [smem:[#allocation12 + $0x186]]  ;;  %s3350_s30 = sld [smem:[#allocation12 + $0x300]] }
 0x274   :  { %v1790_v39 = vpop.permute.xlu1 %1789  ;;  %v1788_v27 = vpop.permute.xlu0 %1787  ;;  %v1872_v60 = vstv %s5424_s7  ;;  %v1878_v53 = vstv %s5426_s28  ;;  %v1691_v37 = vmax.f32 %v1689_v43, 0.0  ;;  %v1734_v30 = vmul.f32 %v1732_v17, %v1718_v20  ;;  %s5879_s7 = sld [smem:[#allocation12 + $0x286]]  ;;  %s5883_s28 = sld [smem:[#allocation12 + $0x380]] }
 0x275   :  { %v1793_v62 = vadd.f32 %v1788_v27, %v1779_v35  ;;  %v1740_v45 = vmul.f32 %v1738_v5, %v1718_v20 }
 0x276   :  { %2647 = vrot.lane.b32.xlu1 %v2642_v56, %s6588_s13  ;;  %2645 = vrot.lane.b32.xlu0 %v2641_v10, %s6588_s13  ;;  %v1794_v56 = vadd.f32 %v1790_v39, %v1780_v36  ;;  %v1692_v10 = vmax.f32 %v1690_v41, 0.0  ;;  %v1717_v36 = vmax.f32 %v1715_v42, 0.0 }
 0x278   :  { %v1804_v1 = vpop.permute.xlu1 %1803  ;;  %v1802_v8 = vpop.permute.xlu0 %1801  ;;  %v1700_v43 = vmul.f32 %v1698_v4, %v1692_v10  ;;  %v1704_v42 = vmul.f32 %v1702_v48, %v1692_v10 }
 0x279   :  { %v1808_v18 = vadd.f32 %v1804_v1, %v1794_v56  ;;  %v1807_v11 = vadd.f32 %v1802_v8, %v1793_v62  ;;  %v1696_v8 = vmul.f32 %v1694_v33, %v1692_v10  ;;  %v1708_v56 = vmul.f32 %v1706_v16, %v1692_v10 }
 0x27a   :  { %2795 = vrot.lane.b32.xlu1 %v2790_v15, %s6589_s27  ;;  %2793 = vrot.lane.b32.xlu0 %v2789_v12, %s6589_s27  ;;  %v1882_v15 = vstv %s5434_s11  ;;  %v1695_v10 = vmul.f32 %v1694_v33, %v1691_v37  ;;  %v1703_v1 = vmul.f32 %v1702_v48, %v1691_v37  ;;  %v1707_v12 = vmul.f32 %v1706_v16, %v1691_v37  ;;  %s5889_s11 = sld [smem:[#allocation12 + $0x383]] }
 0x27b   :  { %v1814_v35 = vadd.f32 %v5406_v7, %v1808_v18  ;;  %v1813_v21 = vadd.f32 %v5409_v34, %v1807_v11  ;;  %v1722_v7 = vmul.f32 %v1720_v24, %v1718_v20  ;;  %v1728_v34 = vmul.f32 %v1726_v46, %v1718_v20 }
 0x27c   :  { %v1824_v39 = vpop.permute.xlu1 %1823  ;;  %v1822_v27 = vpop.permute.xlu0 %1821  ;;  %v1733_v20 = vmul.f32 %v1732_v17, %v1717_v36  ;;  %v1739_v33 = vmul.f32 %v1738_v5, %v1717_v36 }
 0x27d   :  { %v1827_v62 = vadd.f32 %v1822_v27, %v1813_v21  ;;  %v1727_v27 = vmul.f32 %v1726_v46, %v1717_v36 }
 0x27e   :  { %2507 = vrot.lane.b32.xlu1 %v5412_v52, %s6588_s13  ;;  %2505 = vrot.lane.b32.xlu0 %v5422_v57, %s6588_s13  ;;  %v1828_v52 = vadd.f32 %v1824_v39, %v1814_v35  ;;  %v1699_v57 = vmul.f32 %v1698_v4, %v1691_v37  ;;  %v1721_v39 = vmul.f32 %v1720_v24, %v1717_v36 }
 0x280   :  { %v1838_v18 = vpop.permute.xlu1 %1837  ;;  %v1836_v11 = vpop.permute.xlu0 %1835 }
 0x281   :  { %v1842_v41 = vadd.f32 %v1838_v18, %v1828_v52  ;;  %v1841_v40 = vadd.f32 %v1836_v11, %v1827_v62  ;;  %v1730_v52 = vadd.f32 %v1728_v34, %v1700_v43  ;;  %v6591_v34 = vstv %s5460_s23  ;;  %s5893_s23 = sld [smem:[#allocation12 + $0x386]] }
 0x282   :  { %2661 = vrot.lane.b32.xlu1 %v5429_v47, %s6589_s27  ;;  %2659 = vrot.lane.b32.xlu0 %v5432_v49, %s6589_s27  ;;  %v1724_v47 = vadd.f32 %v1722_v7, %v1696_v8  ;;  %v1736_v49 = vadd.f32 %v1734_v30, %v1704_v42  ;;  %v6592_v11 = vstv %s5462_s29  ;;  %s5895_s29 = sld [smem:[#allocation14 + $0x8]] }
 0x283   :  { %v1846_v4 = vmul.f32 %v1844_v32, %v1842_v41  ;;  %v1880_v48 = vmul.f32 %v1878_v53, %v1842_v41  ;;  %v1845_v16 = vmul.f32 %v1844_v32, %v1841_v40  ;;  %v1879_v37 = vmul.f32 %v1878_v53, %v1841_v40 }
 0x284   :  { %v1930_v35 = vpop.permute.xlu1 %1929  ;;  %v1928_v21 = vpop.permute.xlu0 %1927  ;;  %v1742_v32 = vadd.f32 %v1740_v45, %v1708_v56  ;;  %v1723_v53 = vadd.f32 %v1721_v39, %v1695_v10  ;;  %v1729_v40 = vadd.f32 %v1727_v27, %v1699_v57  ;;  %v6590_v56 = vstv %s5436_s26  ;;  %s5891_s26 = sld [smem:[#allocation12 + $0x306]] }
 0x285   :  { %v1934_v24 = vadd.f32 %v1930_v35, %v5441_v26  ;;  %v1933_v46 = vadd.f32 %v1928_v21, %v5446_v3  ;;  %v1850_v62 = vadd.f32 %v1848_v6, %v1846_v4  ;;  %v1884_v17 = vadd.f32 %v1882_v15, %v1880_v48 }
 0x286   :  { %v1849_v5 = vadd.f32 %v1848_v6, %v1845_v16  ;;  %v1883_v36 = vadd.f32 %v1882_v15, %v1879_v37  ;;  %2521 = vrot.lane.b32.xlu1 %v5451_v61, %s6589_s27  ;;  %2519 = vrot.lane.b32.xlu0 %v5467_v58, %s6589_s27  ;;  %v1735_v26 = vadd.f32 %v1733_v20, %v1703_v1  ;;  %v6593_v57 = vstv %s5481_s24  ;;  %s5755_s24 = sld [smem:[#allocation12 + $0x200]] }
 0x287   :  { %v1741_v3 = vadd.f32 %v1739_v33, %v1707_v12  ;;  %v1852_v6 = vmax.f32 %v1850_v62, 0.0  ;;  %v1886_v15 = vmax.f32 %v1884_v17, 0.0  ;;  %v6595_v17 = vmov %v6591_v34 }
 0x288   :  { %v1944_v61 = vpop.permute.xlu1 %1943  ;;  %v1942_v30 = vpop.permute.xlu0 %1941  ;;  %v1851_v41 = vmax.f32 %v1849_v5, 0.0  ;;  %v1885_v45 = vmax.f32 %v1883_v36, 0.0  ;;  %v6596_v36 = vmov %v6592_v11 }
 0x289   :  { %v1948_v8 = vadd.f32 %v1944_v61, %v1934_v24  ;;  %v1947_v43 = vadd.f32 %v1942_v30, %v1933_v46  ;;  %v1856_v42 = vmul.f32 %v1854_v51, %v1852_v6  ;;  %v1862_v58 = vmul.f32 %v1860_v23, %v1852_v6 }
 0x28a   :  { %v1868_v12 = vmul.f32 %v1866_v0, %v1852_v6  ;;  %v1874_v1 = vmul.f32 %v1872_v60, %v1852_v6  ;;  %2815 = vrot.lane.b32.xlu1 %v5472_v19, %s6588_s13  ;;  %v1890_v7 = vmul.f32 %v6590_v56, %v1886_v15  ;;  %v1896_v18 = vmul.f32 %v6591_v34, %v1886_v15 }
 0x28b   :  { %v1902_v10 = vmul.f32 %v6592_v11, %v1886_v15  ;;  %v1908_v39 = vmul.f32 %v6593_v57, %v1886_v15  ;;  %2813 = vrot.lane.b32.xlu0 %v5477_v38, %s6588_s13  ;;  %v1858_v27 = vadd.f32 %v1856_v42, %v1724_v47  ;;  %v1864_v20 = vadd.f32 %v1862_v58, %v1730_v52 }
 0x28c   :  { %v1870_v33 = vadd.f32 %v1868_v12, %v1736_v49  ;;  %v1876_v4 = vadd.f32 %v1874_v1, %v1742_v32  ;;  %v1964_v48 = vpop.permute.xlu1 %1963  ;;  %v1962_v16 = vpop.permute.xlu0 %1961  ;;  %v1855_v19 = vmul.f32 %v1854_v51, %v1851_v41  ;;  %v1861_v37 = vmul.f32 %v1860_v23, %v1851_v41 }
 0x28d   :  { %v1867_v35 = vmul.f32 %v1866_v0, %v1851_v41  ;;  %v1873_v38 = vmul.f32 %v1872_v60, %v1851_v41  ;;  %v5615_v21 = vadd.f32 %v1890_v7, %v1858_v27  ;;  %v5617_v47 = vadd.f32 %v1896_v18, %v1864_v20 }
 0x28e   :  { %v5619_v52 = vadd.f32 %v1902_v10, %v1870_v33  ;;  %v5621_v24 = vadd.f32 %v1908_v39, %v1876_v4  ;;  %2681 = vrot.lane.b32.xlu1 %v5499_v22, %s6588_s13  ;;  %v1857_v51 = vadd.f32 %v1855_v19, %v1723_v53  ;;  %v1863_v23 = vadd.f32 %v1861_v37, %v1729_v40 }
 0x28f   :  { %v1869_v46 = vadd.f32 %v1867_v35, %v1735_v26  ;;  %v1875_v0 = vadd.f32 %v1873_v38, %v1741_v3  ;;  %2679 = vrot.lane.b32.xlu0 %v5504_v59, %s6588_s13  ;;  %v6594_v60 = vmov %v6590_v56  ;;  %v1895_v5 = vmul.f32 %v6595_v17, %v1885_v45 }
 0x290   :  { %v1889_v62 = vmul.f32 %v6594_v60, %v1885_v45  ;;  %v1901_v49 = vmul.f32 %v6596_v36, %v1885_v45  ;;  %v6597_v32 = vmov %v6593_v57  ;;  %v1978_v22 = vpop.permute.xlu1 %1977  ;;  %v1976_v15 = vpop.permute.xlu0 %1975  ;;  %v1954_v53 = vadd.f32 %v5486_v9, %v1948_v8 }
 0x291   :  { %v1907_v6 = vmul.f32 %v6597_v32, %v1885_v45  ;;  %v1953_v40 = vadd.f32 %v5494_v50, %v1947_v43  ;;  %v6598_v59 = vstv %s5311_s20  ;;  %v2688_v3 = vstv %s5583_s0  ;;  %s5659_s20 = sld [smem:[#allocation14 + $0x5]]  ;;  %s5900_s0 = sld [smem:[#allocation17 + $0x8]] }
 0x292   :  { %v2823_v26 = vmul.f32 %v6598_v59, %v5383_v25  ;;  %v5647_v61 = vadd.f32 %v1889_v62, %v1857_v51  ;;  %v5649_v30 = vadd.f32 %v1895_v5, %v1863_v23  ;;  %v5651_v41 = vadd.f32 %v1901_v49, %v1869_v46  ;;  %2829 = vrot.lane.b32.xlu1 %v5511_v63, %s6589_s27 }
 0x293   :  { %v5653_v45 = vadd.f32 %v1907_v6, %v1875_v0  ;;  %v1968_v9 = vadd.f32 %v1964_v48, %v1954_v53  ;;  %v1967_v50 = vadd.f32 %v1962_v16, %v1953_v40  ;;  %v6599_v8 = vstv %s5317_s14  ;;  %s5686_s14 = sld [smem:[#allocation17 + $0x5]] }
 0x294   :  { %2827 = vrot.lane.b32.xlu0 %v2823_v26, %s6589_s27  ;;  %v1986_v43 = vmul.f32 %v6599_v8, %v5184_v31  ;;  %v1998_v42 = vpop.permute.xlu1 %1997  ;;  %v1996_v58 = vpop.permute.xlu0 %1995  ;;  %v2690_v12 = vmul.f32 %v2688_v3, %v5453_v54  ;;  %v2842_v63 = vstv %s5605_s10  ;;  %v6600_v7 = vmov %v6599_v8  ;;  %s5902_s10 = sld [smem:[#allocation17 + $0x88]] }
 0x295   :  { %v1982_v1 = vadd.f32 %v1978_v22, %v1968_v9  ;;  %v1981_v56 = vadd.f32 %v1976_v15, %v1967_v50  ;;  %v1985_v34 = vmul.f32 %v6600_v7, %v5186_v29  ;;  %v2689_v18 = vmul.f32 %v2688_v3, %v5455_v2  ;;  %v2954_v3 = vld [vmem:[%s6601_s12 + $0xa] sm:$0xff] }
 0x296   :  { %2695 = vrot.lane.b32.xlu1 %v2690_v12, %s6589_s27  ;;  %v2086_v10 = vstv %s5627_s2  ;;  %v2844_v39 = vmul.f32 %v2842_v63, %v5453_v54  ;;  %v2856_v27 = vstv %s5637_s18  ;;  %v2843_v4 = vmul.f32 %v2842_v63, %v5455_v2  ;;  %s5764_s2 = sld [smem:[#allocation12 + $0x203]]  ;;  %s5766_s18 = sld [smem:[#allocation12 + $0x280]] }
 0x297   :  { %v1988_v31 = vadd.f32 %v1986_v43, %v1982_v1  ;;  %v1987_v11 = vadd.f32 %v1985_v34, %v1981_v56  ;;  %v2118_v48 = vstv %s5645_s15  ;;  %v2018_v16 = vstv %s5657_s16  ;;  %s5768_s15 = sld [smem:[#allocation12 + $0x283]]  ;;  %s5910_s16 = sld [smem:[#allocation15 + $0x9]] }
 0x298   :  { %2693 = vrot.lane.b32.xlu0 %v2689_v18, %s6589_s27  ;;  %v2012_v29 = vpop.permute.xlu1 %2011  ;;  %v2010_v57 = vpop.permute.xlu0 %2009  ;;  %v2052_v19 = vstv %s5659_s20  ;;  %v2088_v37 = vmul.f32 %v2086_v10, %v5160_v14  ;;  %v2087_v35 = vmul.f32 %v2086_v10, %v5162_v28  ;;  %v2858_v23 = vmul.f32 %v2856_v27, %v5453_v54  ;;  %s5913_s20 = sld [smem:[#allocation17 + $0x9]] }
 0x299   :  { %v2002_v20 = vadd.f32 %v1998_v42, %v1988_v31  ;;  %v2001_v33 = vadd.f32 %v1996_v58, %v1987_v11  ;;  %v2857_v46 = vmul.f32 %v2856_v27, %v5455_v2  ;;  %v2022_v0 = vstv %s5662_s8  ;;  %v2953_v58 = vld [vmem:[%s6601_s12 + $0x2] sm:$0xff]  ;;  %s5785_s8 = sld [smem:[#allocation14 + $0x6]] }
 0x29a   :  { %2849 = vrot.lane.b32.xlu1 %v2844_v39, %s6588_s13  ;;  %v2028_v60 = vstv %s5668_s5  ;;  %v2056_v62 = vstv %s5670_s9  ;;  %v5710_v36 = vmul.f32 %v2118_v48, %v5172_v13  ;;  %v2034_v6 = vstv %s5678_s1  ;;  %s5787_s5 = sld [smem:[#allocation14 + $0x7]]  ;;  %s5919_s9 = sld [smem:[#allocation17 + $0x189]] }
 0x29b   :  { %v2016_v38 = vadd.f32 %v2012_v29, %v2002_v20  ;;  %v2015_v51 = vadd.f32 %v2010_v57, %v2001_v33  ;;  %v2040_v22 = vstv %s5680_s4  ;;  %v2046_v9 = vstv %s5683_s25  ;;  %s5792_s4 = sld [smem:[#allocation15 + $0x6]]  ;;  %s5794_s25 = sld [smem:[#allocation15 + $0x7]] }
 0x29c   :  { %2847 = vrot.lane.b32.xlu0 %v2843_v4, %s6588_s13  ;;  %v2098_v17 = vpop.permute.xlu1 %2097  ;;  %v2096_v5 = vpop.permute.xlu0 %2095  ;;  %v2062_v50 = vstv %s5686_s14  ;;  %v2068_v8 = vstv %s5688_s21  ;;  %v2119_v12 = vmul.f32 %v2118_v48, %v5174_v55  ;;  %v2074_v63 = vstv %s5692_s6  ;;  %s5797_s14 = sld [smem:[#allocation17 + $0x6]]  ;;  %s5808_s13 = sld [smem:[#allocation17 + $0x7]] }
 0x29d   :  { %v2020_v14 = vmul.f32 %v2018_v16, %v2016_v38  ;;  %v2054_v28 = vmul.f32 %v2052_v19, %v2016_v38  ;;  %v2019_v49 = vmul.f32 %v2018_v16, %v2015_v51  ;;  %v2053_v32 = vmul.f32 %v2052_v19, %v2015_v51  ;;  %v3396_v55 = vld [vmem:[%s6601_s12 + $0x22] sm:$0xff]  ;;  %v3395_v19 = vld [vmem:[%s6601_s12 + $0x1a] sm:$0xff]  ;;  %s5799_s21 = sld [smem:[#allocation17 + $0x86]]  ;;  %s5927_s1 = sld [smem:[#allocation14 + $0xa]] }
 0x29e   :  { %v2102_v15 = vadd.f32 %v2098_v17, %v2088_v37  ;;  %v2101_v53 = vadd.f32 %v2096_v5, %v2087_v35  ;;  %2863 = vrot.lane.b32.xlu1 %v2858_v23, %s6589_s27  ;;  %v2080_v1 = vstv %s5694_s3  ;;  %s5802_s6 = sld [smem:[#allocation17 + $0x106]] }
 0x29f   :  { %v2024_v40 = vadd.f32 %v2022_v0, %v2020_v14  ;;  %v2058_v59 = vadd.f32 %v2056_v62, %v2054_v28  ;;  %v2023_v26 = vadd.f32 %v2022_v0, %v2019_v49  ;;  %v2057_v13 = vadd.f32 %v2056_v62, %v2053_v32  ;;  %s5804_s3 = sld [smem:[#allocation17 + $0x186]] }
 0x2a0   :  { %2861 = vrot.lane.b32.xlu0 %v2857_v46, %s6589_s27  ;;  %v2112_v43 = vpop.permute.xlu1 %2111  ;;  %v2110_v42 = vpop.permute.xlu0 %2109 }
 0x2a1   :  { %v2026_v56 = vmax.f32 %v2024_v40, 0.0  ;;  %v2060_v7 = vmax.f32 %v2058_v59, 0.0  ;;  %v2025_v34 = vmax.f32 %v2023_v26, 0.0  ;;  %v2059_v18 = vmax.f32 %v2057_v13, 0.0 }
 0x2a2   :  { %v2116_v31 = vadd.f32 %v2112_v43, %v2102_v15  ;;  %v2115_v11 = vadd.f32 %v2110_v42, %v2101_v53  ;;  %2959 = vrot.lane.b32.xlu1 %v2954_v3, %s6589_s27  ;;  %v3400_v3 = vld [vmem:[%s6601_s12 + $0x52] sm:$0xff]  ;;  %v3399_v43 = vld [vmem:[%s6601_s12 + $0x4a] sm:$0xff] }
 0x2a3   :  { %v2030_v10 = vmul.f32 %v2028_v60, %v2026_v56  ;;  %v2036_v29 = vmul.f32 %v2034_v6, %v2026_v56  ;;  %v2042_v57 = vmul.f32 %v2040_v22, %v2026_v56  ;;  %v2048_v39 = vmul.f32 %v2046_v9, %v2026_v56 }
 0x2a4   :  { %2957 = vrot.lane.b32.xlu0 %v2953_v58, %s6589_s27  ;;  %v2064_v27 = vmul.f32 %v2062_v50, %v2060_v7  ;;  %v2070_v20 = vmul.f32 %v2068_v8, %v2060_v7  ;;  %v2076_v33 = vmul.f32 %v2074_v63, %v2060_v7  ;;  %v2082_v4 = vmul.f32 %v2080_v1, %v2060_v7  ;;  %v2132_v48 = vpop.permute.xlu1 %2131  ;;  %v2130_v16 = vpop.permute.xlu0 %2129 }
 0x2a5   :  { %v2032_v37 = vadd.f32 %v2030_v10, %v5615_v21  ;;  %v2038_v35 = vadd.f32 %v2036_v29, %v5617_v47  ;;  %v2044_v38 = vadd.f32 %v2042_v57, %v5619_v52  ;;  %v2050_v51 = vadd.f32 %v2048_v39, %v5621_v24  ;;  %v3398_v21 = vld [vmem:[%s6601_s12 + $0x3a] sm:$0xff] }
 0x2a6   :  { %v2029_v23 = vmul.f32 %v2028_v60, %v2025_v34  ;;  %v2035_v46 = vmul.f32 %v2034_v6, %v2025_v34  ;;  %v2041_v0 = vmul.f32 %v2040_v22, %v2025_v34  ;;  %v2047_v62 = vmul.f32 %v2046_v9, %v2025_v34  ;;  %2976 = vrot.lane.b32.xlu1 %v3396_v55, %s6589_s27  ;;  %v3397_v6 = vld [vmem:[%s6601_s12 + $0x32] sm:$0xff]  ;;  %s5816_s12 = sld [smem:[#allocation17 + $0x187]] }
 0x2a7   :  { %v5743_v17 = vadd.f32 %v2064_v27, %v2032_v37  ;;  %v5745_v5 = vadd.f32 %v2070_v20, %v2038_v35  ;;  %v5747_v14 = vadd.f32 %v2076_v33, %v2044_v38  ;;  %v5749_v28 = vadd.f32 %v2082_v4, %v2050_v51  ;;  %v3433_v27 = vld [vmem:[#allocation2 + $0x38] sm:$0xff]  ;;  %v3434_v33 = vld [vmem:[#allocation2 + $0x30] sm:$0xff] }
 0x2a8   :  { %2974 = vrot.lane.b32.xlu0 %v3395_v19, %s6589_s27  ;;  %v2031_v47 = vadd.f32 %v2029_v23, %v5647_v61  ;;  %v2037_v52 = vadd.f32 %v2035_v46, %v5649_v30  ;;  %v2043_v24 = vadd.f32 %v2041_v0, %v5651_v41  ;;  %v2049_v60 = vadd.f32 %v2047_v62, %v5653_v45  ;;  %v2146_v49 = vpop.permute.xlu1 %2145  ;;  %v2144_v32 = vpop.permute.xlu0 %2143  ;;  %v5820_v19 = vld [vmem:[#allocation2 + $0x39] sm:$0xff]  ;;  %v5823_v35 = vld [vmem:[#allocation2 + $0x31] sm:$0xff] }
 0x2a9   :  { %v2063_v22 = vmul.f32 %v2062_v50, %v2059_v18  ;;  %v2069_v15 = vmul.f32 %v2068_v8, %v2059_v18  ;;  %v2075_v53 = vmul.f32 %v2074_v63, %v2059_v18  ;;  %v2081_v40 = vmul.f32 %v2080_v1, %v2059_v18  ;;  %v3432_v1 = vld [vmem:[#allocation2 + $0x1a] sm:$0xff] }
 0x2aa   :  { %v2122_v61 = vadd.f32 %v5710_v36, %v2116_v31  ;;  %v2121_v30 = vadd.f32 %v2119_v12, %v2115_v11  ;;  %2993 = vrot.lane.b32.xlu1 %v3398_v21, %s6589_s27  ;;  %v2152_v41 = vstv %s5729_s17  ;;  %v3431_v12 = vld [vmem:[#allocation2 + $0x22] sm:$0xff]  ;;  %v2260_v7 = vstv %s5755_s24  ;;  %s3353_s17 = sld [smem:[#allocation12 + $0x303]]  ;;  %s5897_s24 = sld [smem:[#allocation15 + $0x8]] }
 0x2ab   :  { %v5773_v45 = vadd.f32 %v2063_v22, %v2031_v47  ;;  %v5775_v59 = vadd.f32 %v2069_v15, %v2037_v52  ;;  %v5777_v26 = vadd.f32 %v2075_v53, %v2043_v24  ;;  %v5779_v13 = vadd.f32 %v2081_v40, %v2049_v60 }
 0x2ac   :  { %2991 = vrot.lane.b32.xlu0 %v3397_v6, %s6589_s27  ;;  %v2136_v36 = vadd.f32 %v2132_v48, %v2122_v61  ;;  %v2135_v9 = vadd.f32 %v2130_v16, %v2121_v30  ;;  %v2166_v50 = vpop.permute.xlu1 %2165  ;;  %v2164_v8 = vpop.permute.xlu0 %2163  ;;  %v2154_v63 = vmul.f32 %v3431_v12, %v2152_v41  ;;  %v2153_v56 = vmul.f32 %v3432_v1, %v2152_v41 }
 0x2ad   :  { %v2292_v10 = vstv %s5764_s2  ;;  %v2428_v29 = vstv %s5766_s18  ;;  %v2460_v57 = vstv %s5768_s15  ;;  %v2262_v20 = vmul.f32 %v3433_v27, %v2260_v7  ;;  %s5904_s2 = sld [smem:[#allocation17 + $0x108]]  ;;  %s5906_s18 = sld [smem:[#allocation14 + $0x9]] }
 0x2ae   :  { %v2150_v42 = vadd.f32 %v2146_v49, %v2136_v36  ;;  %v2149_v58 = vadd.f32 %v2144_v32, %v2135_v9  ;;  %3010 = vrot.lane.b32.xlu1 %v3400_v3, %s6589_s27  ;;  %v2261_v4 = vmul.f32 %v3434_v33, %v2260_v7  ;;  %v2186_v48 = vstv %s5785_s8  ;;  %s5908_s15 = sld [smem:[#allocation17 + $0x188]]  ;;  %s5915_s8 = sld [smem:[#allocation17 + $0x89]] }
 0x2af   :  { %v2220_v16 = vstv %s5787_s5  ;;  %v2294_v37 = vmul.f32 %v5820_v19, %v2292_v10  ;;  %v2293_v38 = vmul.f32 %v5823_v35, %v2292_v10  ;;  %v5826_v62 = vmul.f32 %v3433_v27, %v2428_v29  ;;  %s5917_s5 = sld [smem:[#allocation17 + $0x109]] }
 0x2b0   :  { %3008 = vrot.lane.b32.xlu0 %v3399_v43, %s6589_s27  ;;  %v2156_v34 = vadd.f32 %v2154_v63, %v2150_v42  ;;  %v2155_v18 = vadd.f32 %v2153_v56, %v2149_v58  ;;  %v2180_v31 = vpop.permute.xlu1 %2179  ;;  %v2178_v11 = vpop.permute.xlu0 %2177  ;;  %s5814_s27 = sld [smem:[#allocation17 + $0x107]]  ;;  %v5828_v21 = vmul.f32 %v3434_v33, %v2428_v29  ;;  %v2190_v47 = vstv %s5792_s4  ;;  %s5929_s4 = sld [smem:[#allocation15 + $0xa]] }
 0x2b1   :  { %v2224_v52 = vstv %s5794_s25  ;;  %v2196_v15 = vstv %s5797_s14  ;;  %v2202_v53 = vstv %s5799_s21  ;;  %v2208_v40 = vstv %s5802_s6  ;;  %s5932_s25 = sld [smem:[#allocation17 + $0xa]] }
 0x2b2   :  { %v2170_v39 = vadd.f32 %v2166_v50, %v2156_v34  ;;  %v2169_v55 = vadd.f32 %v2164_v8, %v2155_v18  ;;  %v2214_v61 = vstv %s5804_s3  ;;  %v2230_v8 = vstv %s5808_s13  ;;  %s5934_s14 = sld [smem:[#allocation17 + $0x8a]]  ;;  %s5952_s3 = sld [smem:[#allocation14 + $0xb]] }
 0x2b3   :  { %v2236_v43 = vstv %s5810_s19  ;;  %v2248_v63 = vstv %s5816_s12  ;;  %s5936_s21 = sld [smem:[#allocation17 + $0x10a]]  ;;  %s5954_s13 = sld [smem:[#allocation15 + $0xb]] }
 0x2b4   :  { %v2184_v51 = vadd.f32 %v2180_v31, %v2170_v39  ;;  %v2183_v23 = vadd.f32 %v2178_v11, %v2169_v55  ;;  %v2272_v46 = vpop.permute.xlu1 %2271  ;;  %v2270_v0 = vpop.permute.xlu0 %2269  ;;  %s5938_s6 = sld [smem:[#allocation17 + $0x18a]]  ;;  %s5992_s19 = sld [smem:[#allocation17 + $0xb]] }
 0x2b5   :  { %v2276_v24 = vadd.f32 %v2272_v46, %v2262_v20  ;;  %v2275_v60 = vadd.f32 %v2270_v0, %v2261_v4  ;;  %s6000_s12 = sld [smem:[#allocation17 + $0x10b]] }
 0x2b6   :  { %v2188_v49 = vmul.f32 %v2186_v48, %v2184_v51  ;;  %v2222_v32 = vmul.f32 %v2220_v16, %v2184_v51  ;;  %v2187_v6 = vmul.f32 %v2186_v48, %v2183_v23  ;;  %v2221_v22 = vmul.f32 %v2220_v16, %v2183_v23 }
 0x2b7   :  { %v2242_v12 = vstv %s5814_s27  ;;  %s5994_s27 = sld [smem:[#allocation17 + $0x8b]] }
 0x2b8   :  { %v2192_v30 = vadd.f32 %v2190_v47, %v2188_v49  ;;  %v2226_v41 = vadd.f32 %v2224_v52, %v2222_v32  ;;  %v2191_v3 = vadd.f32 %v2190_v47, %v2187_v6  ;;  %v2225_v36 = vadd.f32 %v2224_v52, %v2221_v22  ;;  %v2286_v9 = vpop.permute.xlu1 %2285  ;;  %v2284_v50 = vpop.permute.xlu0 %2283 }
 0x2b9   :  { %v2290_v42 = vadd.f32 %v2286_v9, %v2276_v24  ;;  %v2289_v58 = vadd.f32 %v2284_v50, %v2275_v60 }
 0x2ba   :  { %v2194_v1 = vmax.f32 %v2192_v30, 0.0  ;;  %v2228_v56 = vmax.f32 %v2226_v41, 0.0  ;;  %v2193_v7 = vmax.f32 %v2191_v3, 0.0  ;;  %v2227_v34 = vmax.f32 %v2225_v36, 0.0 }
 0x2bb   :  { %v2296_v18 = vadd.f32 %v2294_v37, %v2290_v42  ;;  %v2295_v31 = vadd.f32 %v2293_v38, %v2289_v58 }
 0x2bc   :  { %v2198_v11 = vmul.f32 %v2196_v15, %v2194_v1  ;;  %v2204_v10 = vmul.f32 %v2202_v53, %v2194_v1  ;;  %v2210_v29 = vmul.f32 %v2208_v40, %v2194_v1  ;;  %v2216_v39 = vmul.f32 %v2214_v61, %v2194_v1  ;;  %v2306_v55 = vpop.permute.xlu1 %2305  ;;  %v2304_v27 = vpop.permute.xlu0 %2303 }
 0x2bd   :  { %v2232_v20 = vmul.f32 %v2230_v8, %v2228_v56  ;;  %v2238_v33 = vmul.f32 %v2236_v43, %v2228_v56  ;;  %v2244_v4 = vmul.f32 %v2242_v12, %v2228_v56  ;;  %v2250_v48 = vmul.f32 %v2248_v63, %v2228_v56 }
 0x2be   :  { %v2200_v16 = vadd.f32 %v2198_v11, %v5743_v17  ;;  %v2206_v51 = vadd.f32 %v2204_v10, %v5745_v5  ;;  %v2212_v23 = vadd.f32 %v2210_v29, %v5747_v14  ;;  %v2218_v46 = vadd.f32 %v2216_v39, %v5749_v28 }
 0x2bf   :  { %v2197_v37 = vmul.f32 %v2196_v15, %v2193_v7  ;;  %v2203_v38 = vmul.f32 %v2202_v53, %v2193_v7  ;;  %v2209_v0 = vmul.f32 %v2208_v40, %v2193_v7  ;;  %v2215_v47 = vmul.f32 %v2214_v61, %v2193_v7  ;;  %v3437_v7 = vld [vmem:[#allocation2 + $0x3a] sm:$0xff] }
 0x2c0   :  { %v5846_v52 = vadd.f32 %v2232_v20, %v2200_v16  ;;  %v5848_v24 = vadd.f32 %v2238_v33, %v2206_v51  ;;  %v5850_v60 = vadd.f32 %v2244_v4, %v2212_v23  ;;  %v5852_v49 = vadd.f32 %v2250_v48, %v2218_v46  ;;  %v2440_v17 = vpop.permute.xlu1 %2439  ;;  %v2438_v5 = vpop.permute.xlu0 %2437  ;;  %v3440_v20 = vld [vmem:[#allocation2 + $0x48] sm:$0xff] }
 0x2c1   :  { %v2199_v14 = vadd.f32 %v2197_v37, %v5773_v45  ;;  %v2205_v28 = vadd.f32 %v2203_v38, %v5775_v59  ;;  %v2211_v32 = vadd.f32 %v2209_v0, %v5777_v26  ;;  %v2217_v6 = vadd.f32 %v2215_v47, %v5779_v13 }
 0x2c2   :  { %v2231_v22 = vmul.f32 %v2230_v8, %v2227_v34  ;;  %v2237_v15 = vmul.f32 %v2236_v43, %v2227_v34  ;;  %v2243_v53 = vmul.f32 %v2242_v12, %v2227_v34  ;;  %v2249_v40 = vmul.f32 %v2248_v63, %v2227_v34 }
 0x2c3   :  { %v2310_v61 = vadd.f32 %v2306_v55, %v2296_v18  ;;  %v2309_v30 = vadd.f32 %v2304_v27, %v2295_v31  ;;  %v2444_v41 = vadd.f32 %v2440_v17, %v5826_v62  ;;  %v2443_v3 = vadd.f32 %v2438_v5, %v5828_v21  ;;  %v3438_v18 = vld [vmem:[#allocation2 + $0x32] sm:$0xff] }
 0x2c4   :  { %v5860_v45 = vadd.f32 %v2231_v22, %v2199_v14  ;;  %v5862_v59 = vadd.f32 %v2237_v15, %v2205_v28  ;;  %v5864_v26 = vadd.f32 %v2243_v53, %v2211_v32  ;;  %v5866_v13 = vadd.f32 %v2249_v40, %v2217_v6  ;;  %v2454_v36 = vpop.permute.xlu1 %2453  ;;  %v2452_v9 = vpop.permute.xlu0 %2451  ;;  %v3439_v55 = vld [vmem:[#allocation2 + $0x50] sm:$0xff] }
 0x2c5   :  { %v2458_v50 = vadd.f32 %v2454_v36, %v2444_v41  ;;  %v2457_v8 = vadd.f32 %v2452_v9, %v2443_v3  ;;  %v2462_v43 = vmul.f32 %v5820_v19, %v2460_v57  ;;  %v2461_v62 = vmul.f32 %v5823_v35, %v2460_v57 }
 0x2c6   :  { %v2326_v21 = vstv %s5844_s22  ;;  %v2602_v57 = vstv %s3350_s30  ;;  %v2634_v4 = vstv %s3353_s17  ;;  %v2802_v3 = vstv %s5889_s11  ;;  %s6002_s22 = sld [smem:[#allocation17 + $0x18b]]  ;;  %s6004_s30 = sld [smem:[#allocation14 + $0xc]] }
 0x2c7   :  { %v2464_v42 = vadd.f32 %v2462_v43, %v2458_v50  ;;  %v2463_v58 = vadd.f32 %v2461_v62, %v2457_v8  ;;  %v2328_v34 = vmul.f32 %v3437_v7, %v2326_v21  ;;  %v2327_v31 = vmul.f32 %v3438_v18, %v2326_v21  ;;  %v3441_v21 = vld [vmem:[#allocation2 + $0x51] sm:$0xff]  ;;  %s6006_s17 = sld [smem:[#allocation15 + $0xc]]  ;;  %s6024_s11 = sld [smem:[#allocation14 + $0xe]] }
 0x2c8   :  { %v2320_v12 = vpop.permute.xlu1 %2319  ;;  %v2318_v63 = vpop.permute.xlu0 %2317  ;;  %v2604_v27 = vmul.f32 %v3439_v55, %v2602_v57  ;;  %v2603_v33 = vmul.f32 %v3440_v20, %v2602_v57  ;;  %v2636_v38 = vmul.f32 %v2634_v4, %v5381_v44  ;;  %v2635_v0 = vmul.f32 %v2634_v4, %v5383_v25 }
 0x2c9   :  { %v2324_v1 = vadd.f32 %v2320_v12, %v2310_v61  ;;  %v2323_v56 = vadd.f32 %v2318_v63, %v2309_v30  ;;  %v2494_v44 = vstv %s5879_s7  ;;  %v2770_v61 = vstv %s5883_s28  ;;  %s6016_s7 = sld [smem:[#allocation14 + $0xd]] }
 0x2ca   :  { %v2496_v53 = vmul.f32 %v3437_v7, %v2494_v44  ;;  %v2495_v40 = vmul.f32 %v3438_v18, %v2494_v44  ;;  %v2668_v36 = vstv %s5891_s26  ;;  %v2836_v8 = vstv %s5893_s23  ;;  %s6018_s28 = sld [smem:[#allocation15 + $0xd]]  ;;  %s6026_s26 = sld [smem:[#allocation15 + $0xe]] }
 0x2cb   :  { %v5875_v11 = vadd.f32 %v2328_v34, %v2324_v1  ;;  %v5877_v10 = vadd.f32 %v2327_v31, %v2323_v56  ;;  %v2772_v43 = vmul.f32 %v3439_v55, %v2770_v61  ;;  %v2771_v62 = vmul.f32 %v3440_v20, %v2770_v61  ;;  %s6036_s23 = sld [smem:[#allocation14 + $0xf]] }
 0x2cc   :  { %v2614_v19 = vpop.permute.xlu1 %2613  ;;  %v2612_v29 = vpop.permute.xlu0 %2611  ;;  %v5945_v63 = vmul.f32 %v2668_v36, %v5453_v54  ;;  %v5948_v1 = vmul.f32 %v2668_v36, %v5455_v2  ;;  %v2360_v7 = vstv %s5895_s29  ;;  %v5957_v34 = vmul.f32 %v2836_v8, %v5453_v54  ;;  %s6038_s29 = sld [smem:[#allocation15 + $0xf]] }
 0x2cd   :  { %v2618_v48 = vadd.f32 %v2614_v19, %v2604_v27  ;;  %v2617_v16 = vadd.f32 %v2612_v29, %v2603_v33  ;;  %v5960_v18 = vmul.f32 %v2836_v8, %v5455_v2  ;;  %v2364_v19 = vstv %s5897_s24  ;;  %s6043_s24 = sld [smem:[#allocation17 + $0xc]] }
 0x2ce   :  { %v2394_v29 = vstv %s5906_s18  ;;  %v2388_v55 = vstv %s5908_s15  ;;  %v2398_v54 = vstv %s5910_s16  ;;  %v2404_v33 = vstv %s5913_s20  ;;  %s6061_s18 = sld [smem:[#allocation18]]  ;;  %s6063_s15 = sld [smem:[#allocation17 + $0x8c]] }
 0x2cf   :  { %v2410_v2 = vstv %s5915_s8  ;;  %v2562_v61 = vstv %s5952_s3  ;;  %s6069_s16 = sld [smem:[#allocation17 + $0x8d]]  ;;  %s6071_s20 = sld [smem:[#allocation17 + $0x8e]] }
 0x2d0   :  { %v2474_v35 = vpop.permute.xlu1 %2473  ;;  %v2472_v39 = vpop.permute.xlu0 %2471  ;;  %s6077_s8 = sld [smem:[#allocation17 + $0x8f]]  ;;  %s6168_s3 = sld [smem:[#allocation17 + $0x18e]] }
 0x2d1   :  { %v2478_v25 = vadd.f32 %v2474_v35, %v2464_v42  ;;  %v2477_v28 = vadd.f32 %v2472_v39, %v2463_v58  ;;  %v5940_v42 = vmul.f32 %v3441_v21, %v2802_v3  ;;  %v3442_v58 = vld [vmem:[#allocation2 + $0x49] sm:$0xff]  ;;  %v2376_v35 = vstv %s5902_s10  ;;  %s6055_s10 = sld [smem:[#allocation17 + $0xe]] }
 0x2d2   :  { %v5942_v12 = vmul.f32 %v3442_v58, %v2802_v3  ;;  %v2382_v39 = vstv %s5904_s2  ;;  %v2566_v3 = vstv %s5954_s13  ;;  %s6057_s2 = sld [smem:[#allocation17 + $0xf]] }
 0x2d3   :  { %s6205_s13 = sld [smem:[#allocation17 + $0x18f]] }
 0x2d4   :  { %v2628_v51 = vpop.permute.xlu1 %2627  ;;  %v2626_v23 = vpop.permute.xlu0 %2625 }
 0x2d5   :  { %v2632_v46 = vadd.f32 %v2628_v51, %v2618_v48  ;;  %v2631_v37 = vadd.f32 %v2626_v23, %v2617_v16  ;;  %v2416_v48 = vstv %s5917_s5  ;;  %s6126_s5 = sld [smem:[#allocation18 + $0x1]] }
 0x2d7   :  { %v5885_v47 = vadd.f32 %v2636_v38, %v2632_v46  ;;  %v5887_v17 = vadd.f32 %v2635_v0, %v2631_v37  ;;  %v2528_v38 = vstv %s5927_s1  ;;  %v2532_v0 = vstv %s5929_s4  ;;  %s6146_s1 = sld [smem:[#allocation17 + $0x10d]]  ;;  %s6149_s4 = sld [smem:[#allocation17 + $0x10e]] }
 0x2d8   :  { %v2340_v5 = vpop.permute.xlu1 %2339  ;;  %v2338_v14 = vpop.permute.xlu0 %2337 }
 0x2d9   :  { %v2344_v56 = vadd.f32 %v2340_v5, %v5875_v11  ;;  %v2343_v31 = vadd.f32 %v2338_v14, %v5877_v10  ;;  %v2370_v11 = vstv %s5900_s0  ;;  %v2422_v10 = vstv %s5919_s9  ;;  %s6045_s0 = sld [smem:[#allocation17 + $0xd]]  ;;  %s6136_s9 = sld [smem:[#allocation17 + $0x10c]] }
 0x2dc   :  { %v2488_v32 = vpop.permute.xlu1 %2487  ;;  %v2486_v6 = vpop.permute.xlu0 %2485 }
 0x2dd   :  { %v2492_v22 = vadd.f32 %v2488_v32, %v2478_v25  ;;  %v2491_v15 = vadd.f32 %v2486_v6, %v2477_v28  ;;  %v2538_v25 = vstv %s5932_s25  ;;  %v2544_v28 = vstv %s5934_s14  ;;  %s6151_s25 = sld [smem:[#allocation17 + $0x10f]]  ;;  %s6156_s14 = sld [smem:[#allocation18 + $0x2]] }
 0x2df   :  { %v5921_v30 = vadd.f32 %v2496_v53, %v2492_v22  ;;  %v5923_v41 = vadd.f32 %v2495_v40, %v2491_v15  ;;  %v2550_v22 = vstv %s5936_s21  ;;  %v2556_v15 = vstv %s5938_s6  ;;  %s6158_s21 = sld [smem:[#allocation17 + $0x18c]]  ;;  %s6163_s6 = sld [smem:[#allocation17 + $0x18d]] }
 0x2e0   :  { %v2782_v9 = vpop.permute.xlu1 %2781  ;;  %v2780_v50 = vpop.permute.xlu0 %2779 }
 0x2e1   :  { %v2786_v36 = vadd.f32 %v2782_v9, %v2772_v43  ;;  %v2785_v8 = vadd.f32 %v2780_v50, %v2771_v62 }
 0x2e4   :  { %v2354_v57 = vpop.permute.xlu1 %2353  ;;  %v2352_v20 = vpop.permute.xlu0 %2351 }
 0x2e5   :  { %v2358_v27 = vadd.f32 %v2354_v57, %v2344_v56  ;;  %v2357_v4 = vadd.f32 %v2352_v20, %v2343_v31 }
 0x2e7   :  { %v2362_v16 = vmul.f32 %v2360_v7, %v2358_v27  ;;  %v2396_v51 = vmul.f32 %v2394_v29, %v2358_v27  ;;  %v2361_v23 = vmul.f32 %v2360_v7, %v2357_v4  ;;  %v2395_v46 = vmul.f32 %v2394_v29, %v2357_v4 }
 0x2e8   :  { %v5974_v37 = vpop.permute.xlu1 %2647  ;;  %v2646_v44 = vpop.permute.xlu0 %2645 }
 0x2e9   :  { %v2366_v5 = vadd.f32 %v2364_v19, %v2362_v16  ;;  %v2400_v14 = vadd.f32 %v2398_v54, %v2396_v51  ;;  %v2365_v32 = vadd.f32 %v2364_v19, %v2361_v23  ;;  %v2399_v6 = vadd.f32 %v2398_v54, %v2395_v46 }
 0x2eb   :  { %v2368_v53 = vmax.f32 %v2366_v5, 0.0  ;;  %v2402_v40 = vmax.f32 %v2400_v14, 0.0  ;;  %v2367_v21 = vmax.f32 %v2365_v32, 0.0  ;;  %v2401_v58 = vmax.f32 %v2399_v6, 0.0 }
 0x2ec   :  { %v2796_v56 = vpop.permute.xlu1 %2795  ;;  %v2794_v57 = vpop.permute.xlu0 %2793 }
 0x2ed   :  { %v2372_v7 = vmul.f32 %v2370_v11, %v2368_v53  ;;  %v2378_v31 = vmul.f32 %v2376_v35, %v2368_v53  ;;  %v2384_v29 = vmul.f32 %v2382_v39, %v2368_v53  ;;  %v2390_v19 = vmul.f32 %v2388_v55, %v2368_v53 }
 0x2ee   :  { %v2406_v27 = vmul.f32 %v2404_v33, %v2402_v40  ;;  %v2412_v20 = vmul.f32 %v2410_v2, %v2402_v40  ;;  %v2418_v54 = vmul.f32 %v2416_v48, %v2402_v40  ;;  %v2424_v4 = vmul.f32 %v2422_v10, %v2402_v40 }
 0x2ef   :  { %v2374_v9 = vadd.f32 %v2372_v7, %v5846_v52  ;;  %v2380_v50 = vadd.f32 %v2378_v31, %v5848_v24  ;;  %v2386_v43 = vadd.f32 %v2384_v29, %v5850_v60  ;;  %v2392_v62 = vadd.f32 %v2390_v19, %v5852_v49 }
 0x2f0   :  { %v2371_v16 = vmul.f32 %v2370_v11, %v2367_v21  ;;  %v2377_v51 = vmul.f32 %v2376_v35, %v2367_v21  ;;  %v2383_v23 = vmul.f32 %v2382_v39, %v2367_v21  ;;  %v2389_v46 = vmul.f32 %v2388_v55, %v2367_v21  ;;  %v2508_v5 = vpop.permute.xlu1 %2507  ;;  %v2506_v11 = vpop.permute.xlu0 %2505 }
 0x2f1   :  { %v6008_v52 = vadd.f32 %v2406_v27, %v2374_v9  ;;  %v6010_v24 = vadd.f32 %v2412_v20, %v2380_v50  ;;  %v6012_v60 = vadd.f32 %v2418_v54, %v2386_v43  ;;  %v6014_v49 = vadd.f32 %v2424_v4, %v2392_v62 }
 0x2f2   :  { %v2373_v35 = vadd.f32 %v2371_v16, %v5860_v45  ;;  %v2379_v39 = vadd.f32 %v2377_v51, %v5862_v59  ;;  %v2385_v55 = vadd.f32 %v2383_v23, %v5864_v26  ;;  %v2391_v14 = vadd.f32 %v2389_v46, %v5866_v13 }
 0x2f3   :  { %v2405_v32 = vmul.f32 %v2404_v33, %v2401_v58  ;;  %v2411_v6 = vmul.f32 %v2410_v2, %v2401_v58  ;;  %v2417_v53 = vmul.f32 %v2416_v48, %v2401_v58  ;;  %v2423_v40 = vmul.f32 %v2422_v10, %v2401_v58 }
 0x2f4   :  { %v2652_v45 = vadd.f32 %v5974_v37, %v5885_v47  ;;  %v2651_v59 = vadd.f32 %v2646_v44, %v5887_v17  ;;  %v2800_v26 = vadd.f32 %v2796_v56, %v2786_v36  ;;  %v2799_v13 = vadd.f32 %v2794_v57, %v2785_v8  ;;  %v2662_v21 = vpop.permute.xlu1 %2661  ;;  %v2660_v47 = vpop.permute.xlu0 %2659 }
 0x2f5   :  { %v6047_v33 = vadd.f32 %v2405_v32, %v2373_v35  ;;  %v6049_v2 = vadd.f32 %v2411_v6, %v2379_v39  ;;  %v6051_v48 = vadd.f32 %v2417_v53, %v2385_v55  ;;  %v6053_v10 = vadd.f32 %v2423_v40, %v2391_v14 }
 0x2f6   :  { %v2666_v17 = vadd.f32 %v2662_v21, %v2652_v45  ;;  %v2665_v37 = vadd.f32 %v2660_v47, %v2651_v59  ;;  %v2806_v44 = vadd.f32 %v5940_v42, %v2800_v26  ;;  %v2805_v36 = vadd.f32 %v5942_v12, %v2799_v13 }
 0x2f7   :  { %v2512_v8 = vadd.f32 %v2508_v5, %v5921_v30  ;;  %v2572_v58 = vstv %s5992_s19  ;;  %v2578_v56 = vstv %s5994_s27  ;;  %v2584_v7 = vstv %s6000_s12  ;;  %s6321_s19 = sld [smem:[#allocation18 + $0x3]]  ;;  %s3612_s27 = smov [#allocation20]  }
 0x2f8   :  { %v2511_v42 = vadd.f32 %v2506_v11, %v5923_v41  ;;  %v2590_v12 = vstv %s6002_s22  ;;  %v2522_v31 = vpop.permute.xlu1 %2521  ;;  %v2672_v30 = vadd.f32 %v5945_v63, %v2666_v17  ;;  %v2671_v29 = vadd.f32 %v5948_v1, %v2665_v37  ;;  %v2520_v57 = vpop.permute.xlu0 %2519  ;;  %s3026_s12 = sshll.u32 %s3612_s27, 4  ;;  %s3027_s12 = int_to_ptr.vmem [resolvable:$true] %s3026_s12 }
 0x2f9   :  { %v2526_v19 = vadd.f32 %v2522_v31, %v2512_v8  ;;  %v2702_v27 = vstv %s6004_s30  ;;  %v2706_v41 = vstv %s6006_s17  ;;  %v2736_v20 = vstv %s6016_s7  ;;  %s3563_s22 = scalar_lea.vmem %s3027_s12, 1024  ;;  %p3568_p9 = scmp.lt.s32.totalorder %s3027_s12, %s3027_s12 }
 0x2fa   :  { %v2525_v54 = vadd.f32 %v2520_v57, %v2511_v42  ;;  %v2740_v4 = vstv %s6018_s28  ;;  %v2870_v63 = vstv %s6024_s11  ;;  %v2874_v9 = vstv %s6026_s26  ;;  %p3564_p8 = scmp.ne.s32.totalorder %s3027_s12, %s3563_s22  ;;  %p3569_p10 = scmp.lt.s32.totalorder %s3563_s22, %s3563_s22 }
 0x2fb   :  { %v2530_v1 = vmul.f32 %v2528_v38, %v2526_v19  ;;  %v2564_v50 = vmul.f32 %v2562_v61, %v2526_v19  ;;  %v2904_v43 = vstv %s6036_s23  ;;  %v2908_v62 = vstv %s6038_s29 }
 0x2fc   :  { %v2529_v16 = vmul.f32 %v2528_v38, %v2525_v54  ;;  %v2563_v51 = vmul.f32 %v2562_v61, %v2525_v54  ;;  %v2816_v23 = vpop.permute.xlu1 %2815  ;;  %v2712_v46 = vstv %s6043_s24  ;;  %v2746_v5 = vstv %s6045_s0  ;;  %p3570_p11 = por %p3569_p10, %p3568_p9 }
 0x2fd   :  { %v2534_v11 = vadd.f32 %v2532_v0, %v2530_v1  ;;  %v2568_v35 = vadd.f32 %v2566_v3, %v2564_v50  ;;  %v2814_v39 = vpop.permute.xlu0 %2813  ;;  %v2880_v55 = vstv %s6055_s10  ;;  %v2914_v14 = vstv %s6057_s2 }
 0x2fe   :  { %v2533_v38 = vadd.f32 %v2532_v0, %v2529_v16  ;;  %v2567_v32 = vadd.f32 %v2566_v3, %v2563_v51  ;;  %v2938_v61 = vstv %s6061_s18  ;;  %v2718_v6 = vstv %s6063_s15  ;;  %p3571_p12 = pnand %p3570_p11, %p3564_p8 }
 0x2ff   :  { %v2536_v53 = vmax.f32 %v2534_v11, 0.0  ;;  %v2570_v40 = vmax.f32 %v2568_v35, 0.0  ;;  %v2752_v45 = vstv %s6069_s16  ;;  %v2886_v59 = vstv %s6071_s20 }
 0x300   :  { %v2535_v26 = vmax.f32 %v2533_v38, 0.0  ;;  %v2569_v13 = vmax.f32 %v2567_v32, 0.0  ;;  %v2820_v21 = vadd.f32 %v2816_v23, %v2806_v44  ;;  %v2682_v0 = vpop.permute.xlu1 %2681  ;;  %v2920_v47 = vstv %s6077_s8 }
 0x301   :  { %v2540_v3 = vmul.f32 %v2538_v25, %v2536_v53  ;;  %v2546_v17 = vmul.f32 %v2544_v28, %v2536_v53  ;;  %v2552_v37 = vmul.f32 %v2550_v22, %v2536_v53  ;;  %v2819_v8 = vadd.f32 %v2814_v39, %v2805_v36  ;;  %v2680_v42 = vpop.permute.xlu0 %2679 }
 0x302   :  { %v2558_v31 = vmul.f32 %v2556_v15, %v2536_v53  ;;  %v2574_v19 = vmul.f32 %v2572_v58, %v2570_v40  ;;  %v2580_v44 = vmul.f32 %v2578_v56, %v2570_v40  ;;  %v2586_v57 = vmul.f32 %v2584_v7, %v2570_v40 }
 0x303   :  { %v2592_v54 = vmul.f32 %v2590_v12, %v2570_v40  ;;  %v2539_v1 = vmul.f32 %v2538_v25, %v2535_v26  ;;  %v2545_v50 = vmul.f32 %v2544_v28, %v2535_v26  ;;  %v2551_v16 = vmul.f32 %v2550_v22, %v2535_v26 }
 0x304   :  { %v2557_v36 = vmul.f32 %v2556_v15, %v2535_v26  ;;  %v2573_v51 = vmul.f32 %v2572_v58, %v2569_v13  ;;  %v2579_v23 = vmul.f32 %v2578_v56, %v2569_v13  ;;  %v2585_v11 = vmul.f32 %v2584_v7, %v2569_v13  ;;  %v2830_v35 = vpop.permute.xlu1 %2829 }
 0x305   :  { %v2686_v39 = vadd.f32 %v2682_v0, %v2672_v30  ;;  %v2685_v38 = vadd.f32 %v2680_v42, %v2671_v29  ;;  %v2834_v25 = vadd.f32 %v2830_v35, %v2820_v21  ;;  %v2542_v28 = vadd.f32 %v2540_v3, %v6008_v52 }
 0x306   :  { %v2828_v32 = vpop.permute.xlu0 %2827  ;;  %v2541_v15 = vadd.f32 %v2539_v1, %v6047_v33  ;;  %v2548_v58 = vadd.f32 %v2546_v17, %v6010_v24  ;;  %v2547_v56 = vadd.f32 %v2545_v50, %v6049_v2  ;;  %v2554_v52 = vadd.f32 %v2552_v37, %v6012_v60 }
 0x307   :  { %v2833_v22 = vadd.f32 %v2828_v32, %v2819_v8  ;;  %v2840_v7 = vadd.f32 %v5957_v34, %v2834_v25  ;;  %v2576_v30 = vadd.f32 %v2574_v19, %v2542_v28  ;;  %v2553_v29 = vadd.f32 %v2551_v16, %v6051_v48 }
 0x308   :  { %v2696_v33 = vpop.permute.xlu1 %2695  ;;  %v2575_v2 = vadd.f32 %v2573_v51, %v2541_v15  ;;  %v2582_v53 = vadd.f32 %v2580_v44, %v2548_v58  ;;  %v6166_v40 = vadd.f32 %v2579_v23, %v2547_v56  ;;  %v6170_v48 = vadd.f32 %v2586_v57, %v2554_v52 }
 0x309   :  { %v2839_v24 = vadd.f32 %v5960_v18, %v2833_v22  ;;  %v2700_v34 = vadd.f32 %v2696_v33, %v2686_v39  ;;  %v6172_v26 = vadd.f32 %v2585_v11, %v2553_v29  ;;  %v2560_v18 = vadd.f32 %v2558_v31, %v6014_v49 }
 0x30a   :  { %v2694_v60 = vpop.permute.xlu0 %2693  ;;  %v2591_v21 = vmul.f32 %v2590_v12, %v2569_v13  ;;  %v2942_v3 = vstv %s6126_s5  ;;  %v2559_v17 = vadd.f32 %v2557_v36, %v6053_v10  ;;  %v2724_v42 = vstv %s6136_s9 }
 0x30b   :  { %v2699_v0 = vadd.f32 %v2694_v60, %v2685_v38  ;;  %v2704_v37 = vmul.f32 %v2702_v27, %v2700_v34  ;;  %v2738_v8 = vmul.f32 %v2736_v20, %v2700_v34  ;;  %v6184_v19 = vadd.f32 %v2592_v54, %v2560_v18 }
 0x30c   :  { %v2850_v13 = vpop.permute.xlu1 %2849  ;;  %v2758_v31 = vstv %s6146_s1  ;;  %v6191_v44 = vadd.f32 %v2591_v21, %v2559_v17  ;;  %v2892_v50 = vstv %s6149_s4  ;;  %v2926_v16 = vstv %s6151_s25 }
 0x30d   :  { %v2703_v49 = vmul.f32 %v2702_v27, %v2699_v0  ;;  %v2737_v12 = vmul.f32 %v2736_v20, %v2699_v0  ;;  %v2708_v10 = vadd.f32 %v2706_v41, %v2704_v37  ;;  %v2742_v57 = vadd.f32 %v2740_v4, %v2738_v8 }
 0x30e   :  { %v2848_v1 = vpop.permute.xlu0 %2847  ;;  %v2946_v20 = vstv %s6156_s14  ;;  %v2730_v36 = vstv %s6158_s21  ;;  %v2854_v11 = vadd.f32 %v2850_v13, %v2840_v7  ;;  %v2764_v35 = vstv %s6163_s6 }
 0x30f   :  { %v2707_v54 = vadd.f32 %v2706_v41, %v2703_v49  ;;  %v2741_v27 = vadd.f32 %v2740_v4, %v2737_v12  ;;  %v6207_v51 = vmax.f32 %v2708_v10, 0.0  ;;  %v6209_v23 = vmax.f32 %v2742_v57, 0.0 }
 0x310   :  { %v2853_v39 = vadd.f32 %v2848_v1, %v2839_v24  ;;  %v2864_v38 = vpop.permute.xlu1 %2863  ;;  %v2898_v25 = vstv %s6168_s3 }
 0x311   :  { %v6212_v41 = vmax.f32 %v2707_v54, 0.0  ;;  %v6214_v4 = vmax.f32 %v2741_v27, 0.0  ;;  %v2868_v32 = vadd.f32 %v2864_v38, %v2854_v11  ;;  %v2714_v22 = vmul.f32 %v2712_v46, %v6207_v51 }
 0x312   :  { %v2862_v28 = vpop.permute.xlu0 %2861  ;;  %v2748_v15 = vmul.f32 %v2746_v5, %v6209_v23  ;;  %v2720_v58 = vmul.f32 %v2718_v6, %v6207_v51  ;;  %v2754_v29 = vmul.f32 %v2752_v45, %v6209_v23  ;;  %v2726_v10 = vmul.f32 %v2724_v42, %v6207_v51 }
 0x313   :  { %v2867_v56 = vadd.f32 %v2862_v28, %v2853_v39  ;;  %v2713_v7 = vmul.f32 %v2712_v46, %v6212_v41  ;;  %v2747_v52 = vmul.f32 %v2746_v5, %v6214_v4  ;;  %v2872_v33 = vmul.f32 %v2870_v63, %v2868_v32 }
 0x314   :  { %v2906_v24 = vmul.f32 %v2904_v43, %v2868_v32  ;;  %v2716_v34 = vadd.f32 %v2714_v22, %v2576_v30  ;;  %v2722_v60 = vadd.f32 %v2720_v58, %v2582_v53  ;;  %v2719_v0 = vmul.f32 %v2718_v6, %v6212_v41 }
 0x315   :  { %v2871_v18 = vmul.f32 %v2870_v63, %v2867_v56  ;;  %v2905_v21 = vmul.f32 %v2904_v43, %v2867_v56  ;;  %v2715_v46 = vadd.f32 %v2713_v7, %v2575_v2  ;;  %v2876_v5 = vadd.f32 %v2874_v9, %v2872_v33 }
 0x316   :  { %v2910_v17 = vadd.f32 %v2908_v62, %v2906_v24  ;;  %v2750_v37 = vadd.f32 %v2748_v15, %v2716_v34  ;;  %v2756_v30 = vadd.f32 %v2754_v29, %v2722_v60  ;;  %v2932_v2 = vstv %s6205_s13  ;;  %v2958_v28 = vpop.permute.xlu0 %2957 }
 0x317   :  { %v2875_v53 = vadd.f32 %v2874_v9, %v2871_v18  ;;  %v2909_v63 = vadd.f32 %v2908_v62, %v2905_v21  ;;  %v2749_v43 = vadd.f32 %v2747_v52, %v2715_v46  ;;  %v2878_v6 = vmax.f32 %v2876_v5, 0.0  ;;  %v2960_v62 = vpop.permute.xlu1 %2959 }
 0x318   :  { %v6255_v8 = vmax.f32 %v2910_v17, 0.0  ;;  %v2753_v49 = vmul.f32 %v2752_v45, %v6214_v4  ;;  %v2721_v12 = vadd.f32 %v2719_v0, %v6166_v40  ;;  %v2760_v57 = vmul.f32 %v2758_v31, %v6209_v23 }
 0x319   :  { %v6261_v13 = vmax.f32 %v2875_v53, 0.0  ;;  %v6263_v9 = vmax.f32 %v2909_v63, 0.0  ;;  %v2882_v1 = vmul.f32 %v2880_v55, %v2878_v6  ;;  %v2888_v40 = vmul.f32 %v2886_v59, %v2878_v6 }
 0x31a   :  { %v2916_v45 = vmul.f32 %v2914_v14, %v6255_v8  ;;  %v2725_v54 = vmul.f32 %v2724_v42, %v6212_v41  ;;  %v2922_v39 = vmul.f32 %v2920_v47, %v6255_v8  ;;  %v2928_v58 = vmul.f32 %v2926_v16, %v6255_v8 }
 0x31b   :  { %v2881_v27 = vmul.f32 %v2880_v55, %v6261_v13  ;;  %v2915_v11 = vmul.f32 %v2914_v14, %v6263_v9  ;;  %v2887_v38 = vmul.f32 %v2886_v59, %v6261_v13  ;;  %v2884_v32 = vadd.f32 %v2882_v1, %v2750_v37  ;;  %v2977_v33 = vpop.permute.xlu1 %2976  ;;  %v2975_v37 = vpop.permute.xlu0 %2974 }
 0x31c   :  { %v2890_v22 = vadd.f32 %v2888_v40, %v2756_v30  ;;  %v2921_v42 = vmul.f32 %v2920_v47, %v6263_v9  ;;  %v2755_v55 = vadd.f32 %v2753_v49, %v2721_v12  ;;  %v2894_v14 = vmul.f32 %v2892_v50, %v2878_v6 }
 0x31d   :  { %v2883_v15 = vadd.f32 %v2881_v27, %v2749_v43  ;;  %v2728_v59 = vadd.f32 %v2726_v10, %v6170_v48  ;;  %v2918_v56 = vadd.f32 %v2916_v45, %v2884_v32  ;;  %v2759_v29 = vmul.f32 %v2758_v31, %v6214_v4 }
 0x31e   :  { %v2924_v7 = vadd.f32 %v2922_v39, %v2890_v22  ;;  %v2889_v52 = vadd.f32 %v2887_v38, %v2755_v55  ;;  %v2893_v34 = vmul.f32 %v2892_v50, %v6261_v13  ;;  %v2727_v60 = vadd.f32 %v2725_v54, %v6172_v26 }
 0x31f   :  { %v2917_v47 = vadd.f32 %v2915_v11, %v2883_v15  ;;  %v2762_v24 = vadd.f32 %v2760_v57, %v2728_v59  ;;  %v2940_v18 = vadd.f32 %v2938_v61, %v2918_v56  ;;  %v2732_v46 = vmul.f32 %v2730_v36, %v6207_v51  ;;  %v2994_v57 = vpop.permute.xlu1 %2993 }
 0x320   :  { %v2944_v48 = vadd.f32 %v2942_v3, %v2924_v7  ;;  %v2923_v21 = vadd.f32 %v2921_v42, %v2889_v52  ;;  %v2927_v5 = vmul.f32 %v2926_v16, %v6263_v9  ;;  %v2761_v17 = vadd.f32 %v2759_v29, %v2727_v60 }
 0x321   :  { %v2939_v31 = vadd.f32 %v2938_v61, %v2917_v47  ;;  %v2896_v0 = vadd.f32 %v2894_v14, %v2762_v24  ;;  %v2964_v26 = vadd.f32 %v2960_v62, %v2940_v18  ;;  %v2766_v53 = vmul.f32 %v2764_v35, %v6209_v23 }
 0x322   :  { %v2981_v50 = vadd.f32 %v2977_v33, %v2944_v48  ;;  %v2943_v30 = vadd.f32 %v2942_v3, %v2923_v21  ;;  %v2895_v61 = vadd.f32 %v2893_v34, %v2761_v17  ;;  %v2900_v43 = vmul.f32 %v2898_v25, %v2878_v6 }
 0x323   :  { %v2963_v51 = vadd.f32 %v2958_v28, %v2939_v31  ;;  %v2930_v63 = vadd.f32 %v2928_v58, %v2896_v0  ;;  %v2966_v16 = vmax.f32 %v2964_v26, 0.0  ;;  %v2734_v62 = vadd.f32 %v2732_v46, %v6184_v19  ;;  %v3011_v22 = vpop.permute.xlu1 %3010 }
 0x324   :  { %v2983_v49 = vmax.f32 %v2981_v50, 0.0  ;;  %v2980_v12 = vadd.f32 %v2975_v37, %v2943_v30  ;;  %v2929_v1 = vadd.f32 %v2927_v5, %v2895_v61  ;;  %v2731_v23 = vmul.f32 %v2730_v36, %v6212_v41  ;;  %v2992_v41 = vpop.permute.xlu0 %2991 }
 0x325   :  { %v2965_v10 = vmax.f32 %v2963_v51, 0.0  ;;  %v2948_v3 = vadd.f32 %v2946_v20, %v2930_v63  ;;  %2969 = vst.msk [vmem:[#allocation20 + $0x8] sm:$0xff] %vm2967_vm2, %v2966_v16  ;;  %v2768_v45 = vadd.f32 %v2766_v53, %v2734_v62  ;;  %v2765_v40 = vmul.f32 %v2764_v35, %v6214_v4 }
 0x326   :  { %2986 = vst.msk [vmem:[#allocation20 + $0x18] sm:$0xff] %vm2967_vm2, %v2983_v49  ;;  %v2982_v6 = vmax.f32 %v2980_v12, 0.0  ;;  %v2947_v54 = vadd.f32 %v2946_v20, %v2929_v1  ;;  %v2899_v27 = vmul.f32 %v2898_v25, %v6261_v13  ;;  %v2733_v36 = vadd.f32 %v2731_v23, %v6191_v44 }
 0x327   :  { %2968 = vst.msk [vmem:[#allocation20] sm:$0xff] %vm2967_vm2, %v2965_v10  ;;  %v2998_v19 = vadd.f32 %v2994_v57, %v2948_v3  ;;  %v2934_v11 = vmul.f32 %v2932_v2, %v6255_v8  ;;  %v2902_v39 = vadd.f32 %v2900_v43, %v2768_v45  ;;  %v2950_v4 = vstv %s6321_s19 }
 0x328   :  { %2985 = vst.msk [vmem:[#allocation20 + $0x10] sm:$0xff] %vm2967_vm2, %v2982_v6  ;;  %v2997_v35 = vadd.f32 %v2992_v41, %v2947_v54  ;;  %v2767_v32 = vadd.f32 %v2765_v40, %v2733_v36  ;;  %v2933_v25 = vmul.f32 %v2932_v2, %v6263_v9  ;;  %v3009_v8 = vpop.permute.xlu0 %3008 }
 0x329   :  { %v3000_v38 = vmax.f32 %v2998_v19, 0.0  ;;  %v2936_v28 = vadd.f32 %v2934_v11, %v2902_v39 }
 0x32a   :  { %v2999_v20 = vmax.f32 %v2997_v35, 0.0  ;;  %v2901_v44 = vadd.f32 %v2899_v27, %v2767_v32 }
 0x32b   :  { %3003 = vst.msk [vmem:[#allocation20 + $0x28] sm:$0xff] %vm2967_vm2, %v3000_v38  ;;  %v2952_v13 = vadd.f32 %v2950_v4, %v2936_v28 }
 0x32c   :  { %3002 = vst.msk [vmem:[#allocation20 + $0x20] sm:$0xff] %vm2967_vm2, %v2999_v20  ;;  %v2935_v42 = vadd.f32 %v2933_v25, %v2901_v44 }
 0x32d   :  { %v3015_v55 = vadd.f32 %v3011_v22, %v2952_v13 }
 0x32e   :  { %v2951_v15 = vadd.f32 %v2950_v4, %v2935_v42 }
 0x32f   :  { %v3017_v14 = vmax.f32 %v3015_v55, 0.0 }
 0x330   :  { %v3014_v58 = vadd.f32 %v3009_v8, %v2951_v15 }
 0x331   :  { %3020 = vst.msk [vmem:[#allocation20 + $0x38] sm:$0xff] %vm2967_vm2, %v3017_v14 }
 0x332   :  { %v3016_v59 = vmax.f32 %v3014_v58, 0.0 }
 0x334   :  { %3019 = vst.msk [vmem:[#allocation20 + $0x30] sm:$0xff] %vm2967_vm2, %v3016_v59 }
 0x335   :  { %3574 = shalt.err (!%p3571_p12)
}
 0x336   :  { %s6602_s7 = sld [smem:[#allocation56_spill]] }
 0x33c   :  { %s3575_s28 = scalar_lea.hbm %s6602_s7, 1024 }
 0x33d   :  { %p3576_p13 = scmp.ne.s32.totalorder %s6602_s7, %s3575_s28  ;;  %p3579_p0 = scmp.lt.u32.totalorder %s3575_s28, %s6602_s7 }
 0x33f   :  { %p3581_p1 = pnand %p3579_p0, %p3576_p13 }
 0x341   :  { %3584 = shalt.err (!%p3581_p1)
}
 0x342   :  { %s3613_s24 = smov 128   ;;  %s3614_s0 = smov 8  }
 0x343   :  { %3032 = dma.vmem_to_hbm [thread:$0]  %s3027_s12, 1024, %s6602_s7, [#allocation4], %s3613_s24, %s3613_s24, %s3614_s0  }
 0x344   :  { %3597 = dma.done.wait [#allocation4], 1024  }
 0x345   :  { %3598 = vsyncadd [#allocation4], 4294966272 }
 0x346   :  { %3036 = vsyncpa [#allocation4], 1 }
 0x347   :  { %3037 = vsyncpa [#allocation5], 1 }
 0x348   :  { %3038 = vsyncpa [#allocation7], 1 }
 0x349   :  { %3039 = vsyncpa [#allocation10], 1 }
 0x34a   :  { %3040 = vsyncpa [#allocation13], 1 }
 0x34b   :  { %3041 = vsyncpa [#allocation16], 1 }
 0x34c   :  { %3042 = vsyncpa [#allocation19], 1 }

</bundles_post_ra>
